<compile_context>
chip_gen: v7x
topology: tpu7x:2x2x1
jax: 0.10.0
libtpu: 0.0.40
codegen_flags: <defaults>
</compile_context>

<pallas_src>
import functools

import jax
import jax.numpy as jnp
from jax.experimental import pallas as pl
from jax.experimental.pallas import tpu as pltpu

LN_EPS = 1e-5  # nn.LayerNorm default


# ---------------------------------------------------------------------------
# Pallas kernel: processes a [block_rows, M] tile of the flattened [rows, M] tensor.
# Weights are pre-transposed [in, out]; wqkv is [M, 3M] with the attention scale and
# the LayerNorm affine already folded in; wproj/bproj are out_proj o temporal_fc.
# ---------------------------------------------------------------------------
def _attn_time_kernel(x_ref, wqkv_ref, bqkv_ref, wproj_ref, bproj_ref, o_ref,
                      *, T, num_heads, head_dim):
    rows, m = x_ref.shape
    tb = rows // T

    # --- LayerNorm normalization (affine folded into wqkv/bqkv host-side) ---
    x = x_ref[...].astype(jnp.float32)
    mu = jnp.mean(x, axis=-1, keepdims=True)
    xc = x - mu
    var = jnp.mean(xc * xc, axis=-1, keepdims=True)
    h = (xc * jax.lax.rsqrt(var + LN_EPS)).astype(jnp.bfloat16)       # [rows, M]

    # --- Fused QKV: one [rows, M] @ [M, 3M] GEMM, bf16 operands, f32 accum.
    #     Cast to bf16 immediately so the f32 [rows, 3M] intermediate dies fast. ---
    qkv = (jnp.dot(h, wqkv_ref[...], preferred_element_type=jnp.float32)
           + bqkv_ref[...]).astype(jnp.bfloat16)                      # [rows, 3M]

    # --- Multi-head attention over the (small) time axis; softmax in f32.
    #     Per-head contexts stay as values and are concatenated into one lane-dense
    #     [rows, M] context (no VMEM scratch, no masked partial stores). ---
    ctx_heads = []
    for hd in range(num_heads):
        lo = hd * head_dim
        qh = qkv[:, lo:lo + head_dim].reshape(tb, T, head_dim)
        kh = qkv[:, m + lo:m + lo + head_dim].reshape(tb, T, head_dim)
        vh = qkv[:, 2 * m + lo:2 * m + lo + head_dim].reshape(tb, T, head_dim)
        s = jnp.einsum('btd,bsd->bts', qh, kh,
                       preferred_element_type=jnp.float32)            # scale pre-folded
        s = s - jnp.max(s, axis=-1, keepdims=True)
        pw = jnp.exp(s)
        pw = pw * pl.reciprocal(jnp.sum(pw, axis=-1, keepdims=True), approx=True)
        oh = jnp.einsum('bts,bsd->btd', pw.astype(jnp.bfloat16), vh,
                        preferred_element_type=jnp.float32)           # [tb, T, D]
        ctx_heads.append(oh.reshape(rows, head_dim).astype(jnp.bfloat16))
    ctx = jnp.concatenate(ctx_heads, axis=-1)                         # [rows, M] bf16

    # --- Fused out_proj o temporal_fc: single [rows, M] @ [M, M] GEMM ---
    res = jnp.dot(ctx, wproj_ref[...],
                  preferred_element_type=jnp.float32) + bproj_ref[...]

    # --- residual add (re-read x so its f32 copy need not stay live mid-kernel) ---
    o_ref[...] = (x_ref[...].astype(jnp.float32) + res).astype(o_ref.dtype)


# ---------------------------------------------------------------------------
# Host-side chip / sizing helpers.
# ---------------------------------------------------------------------------
def _chip_info():
    """Returns (per-TensorCore VMEM bytes, TensorCores per chip)."""
    kind = ""
    try:
        kind = jax.devices()[0].device_kind.lower()
    except Exception:
        pass
    if "7" in kind:                      # v7x: 64 MiB per TC, 2 TCs per chip
        return 64 * 1024 * 1024, 2
    return 128 * 1024 * 1024, 1          # v5e / v6e: 128 MiB, single TensorCore


def _choose_block_bp(BP, T, M, vmem_limit_bytes, num_tc, x_bytes=4, max_rows=2048):
    """Largest divisor of BP whose [d*T, M] tile fits the per-TC VMEM budget.

    On dual-TC chips (v7x) prefer an even grid so both TensorCores stay busy; on
    single-TC chips allow the full-BP tile (grid of 1).
    """
    # Honest per-row peak-liveness estimate (bytes): double-buffered f32 in/out tiles
    # (16M) + f32 x (4M) + bf16 h (2M) + transient f32 qkv (12M) + bf16 qkv (6M)
    # + per-head q/k/v copies, bf16 ctx, f32 res (~8M)  ->  ~48*M.
    per_row = (4 * x_bytes + 32) * M
    weight_bytes = 2 * (3 * M * M + M * M) * 2          # double-buffered bf16 wqkv+wproj
    budget = max(int(vmem_limit_bytes * 0.85) - weight_bytes, per_row * T)

    def feasible(d):
        rows = d * T
        if rows > max_rows or rows * per_row > budget:
            return False
        if d != BP and rows % 8 != 0:                   # (8, 128) sublane rule
            return False
        return True

    best = 0
    for d in range(1, BP + 1):
        if BP % d or not feasible(d):
            continue
        if num_tc > 1 and (BP // d) % num_tc != 0:      # balanced grid across TCs
            continue
        best = d
    if best == 0:                                       # fallback: ignore TC parity
        best = 1
        for d in range(1, BP + 1):
            if BP % d == 0 and feasible(d):
                best = d
    return best


def pack_params(params, num_heads):
    """Fuse QKV (+ attention scale + LayerNorm affine) and out_proj o temporal_fc."""
    ln_g, ln_b, wq, bq, wk, bk, wv, bv, wo, bo, wt, bt = params
    M = wq.shape[0]
    head_dim = M // num_heads
    scale = head_dim ** -0.5
    hi = jax.lax.Precision.HIGHEST

    # Fused QKV with the attention scale folded into Q.
    wqkv = jnp.concatenate([wq * scale, wk, wv], axis=1)              # [M, 3M]
    bqkv = jnp.concatenate([bq * scale, bk, bv], axis=1)              # [1, 3M]
    # Fold LayerNorm affine:  (xn*g + b) @ W + c  ==  xn @ (g[:,None]*W) + (b@W + c)
    bqkv = bqkv + jnp.dot(ln_b.reshape(1, M), wqkv, precision=hi)
    wqkv = wqkv * ln_g.reshape(M, 1)

    # Fuse out_proj with temporal_fc (no nonlinearity between them -> exact).
    wproj = jnp.dot(wo, wt, precision=hi)                             # [M, M]
    bproj = jnp.dot(bo, wt, precision=hi) + bt                        # [1, M]

    return (wqkv.astype(jnp.bfloat16), bqkv.astype(jnp.float32),
            wproj.astype(jnp.bfloat16), bproj.astype(jnp.float32))


def siglip_attn_time_pallas(x2d, packed, *, T, num_heads, block_bp, vmem_limit_bytes):
    """x2d: [rows, M] (rows = BP*T); returns x + temporal_fc(out_proj(attn(LN(x))))."""
    rows_total, M = x2d.shape
    BP = rows_total // T
    assert M % num_heads == 0 and BP % block_bp == 0
    block_rows = block_bp * T
    wqkv, bqkv, wproj, bproj = packed

    kernel = functools.partial(_attn_time_kernel, T=T, num_heads=num_heads,
                               head_dim=M // num_heads)
    row_spec = pl.BlockSpec((block_rows, M), lambda i: (i, 0))

    return pl.pallas_call(
        kernel,
        out_shape=jax.ShapeDtypeStruct((rows_total, M), x2d.dtype),
        grid=(BP // block_bp,),
        in_specs=[row_spec,
                  pl.BlockSpec((M, 3 * M), lambda i: (0, 0)),   # fused qkv weight
                  pl.BlockSpec((1, 3 * M), lambda i: (0, 0)),   # fused qkv bias
                  pl.BlockSpec((M, M), lambda i: (0, 0)),       # fused proj weight
                  pl.BlockSpec((1, M), lambda i: (0, 0))],      # fused proj bias
        out_specs=row_spec,
        compiler_params=pltpu.CompilerParams(
            dimension_semantics=("parallel",),
            vmem_limit_bytes=int(vmem_limit_bytes)),
    )(x2d, wqkv, bqkv, wproj, bproj)


# ---------------------------------------------------------------------------
# Module-level wrapper (glue: split cls token, flatten patch*time tokens).
# ---------------------------------------------------------------------------
@functools.partial(jax.jit, static_argnames=("T", "num_heads"))
def siglip_layer_attn_time(hidden_states, params, *, T, num_heads):
    b, n, m = hidden_states.shape
    p = (n - 1) // T
    cls_tok = hidden_states[:, :1, :]
    # [b, p*T, m] -> lane-dense 2-D [rows, m]; each consecutive T rows is one group.
    x2d = hidden_states[:, 1:, :].reshape(b * p * T, m)
    packed = pack_params(params, num_heads)
    vmem_per_tc, num_tc = _chip_info()
    vmem_limit = vmem_per_tc * 3 // 4
    block_bp = _choose_block_bp(b * p, T, m, vmem_limit, num_tc)
    y = siglip_attn_time_pallas(x2d, packed, T=T, num_heads=num_heads,
                                block_bp=block_bp, vmem_limit_bytes=vmem_limit)
    y = y.reshape(b, p * T, m)                             # residual already added
    return jnp.concatenate([cls_tok, y], axis=1)


# ---------------------------------------------------------------------------
# Pure-JAX f32 reference (for self-test), mirrors the PyTorch forward.
# ---------------------------------------------------------------------------
def reference_forward(hidden_states, T, params, *, num_heads):
    ln_g, ln_b, wq, bq, wk, bk, wv, bv, wo, bo, wt, bt = params
    b, n, m = hidden_states.shape
    p = (n - 1) // T
    head_dim = m // num_heads
    cls_tok = hidden_states[:, :1, :]
    x = hidden_states[:, 1:, :].reshape(b * p, T, m)
    mu = x.mean(-1, keepdims=True)
    var = ((x - mu) ** 2).mean(-1, keepdims=True)
    h = (x - mu) / jnp.sqrt(var + LN_EPS) * ln_g + ln_b
    q, k, v = h @ wq + bq, h @ wk + bk, h @ wv + bv
    sh = lambda z: z.reshape(b * p, T, num_heads, head_dim).transpose(0, 2, 1, 3)
    qh, kh, vh = sh(q), sh(k), sh(v)
    s = jnp.einsum('bhtd,bhsd->bhts', qh, kh) * head_dim ** -0.5
    pw = jax.nn.softmax(s, axis=-1)
    o = jnp.einsum('bhts,bhsd->bhtd', pw, vh)
    o = o.transpose(0, 2, 1, 3).reshape(b * p, T, m)
    o = o @ wo + bo
    rt = o @ wt + bt
    y = (x + rt).reshape(b, p * T, m)
    return jnp.concatenate([cls_tok, y], axis=1)


# ---------------------------------------------------------------------------
# Deterministic parameter init (matches module __init__ shapes; temporal_fc is
# constant_init(val=0, bias=0) exactly as in the module).  Weights are [in, out].
# ---------------------------------------------------------------------------
def init_params(key, m):
    ks = jax.random.split(key, 8)
    s = 0.02
    ln_g = jnp.ones((1, m), jnp.float32)
    ln_b = jnp.zeros((1, m), jnp.float32)
    wq = jax.random.normal(ks[0], (m, m), jnp.float32) * s
    bq = jax.random.normal(ks[1], (1, m), jnp.float32) * s
    wk = jax.random.normal(ks[2], (m, m), jnp.float32) * s
    bk = jax.random.normal(ks[3], (1, m), jnp.float32) * s
    wv = jax.random.normal(ks[4], (m, m), jnp.float32) * s
    bv = jax.random.normal(ks[5], (1, m), jnp.float32) * s
    wo = jax.random.normal(ks[6], (m, m), jnp.float32) * s
    bo = jax.random.normal(ks[7], (1, m), jnp.float32) * s
    wt = jnp.zeros((m, m), jnp.float32)   # constant_init(temporal_fc, val=0, bias=0)
    bt = jnp.zeros((1, m), jnp.float32)
    return (ln_g, ln_b, wq, bq, wk, bk, wv, bv, wo, bo, wt, bt)


if __name__ == "__main__":
    key = jax.random.PRNGKey(0)
    b, T, p, m, num_heads = 2, 8, 16, 128, 4     # BP=32 -> 256-row GEMM tiles
    n_tokens = 1 + p * T                         # cls + patch*time
    kx, kp, kt = jax.random.split(key, 3)

    hidden = jax.random.normal(kx, (b, n_tokens, m), jnp.float32)
    params = init_params(kp, m)

    # Faithful module run: temporal_fc is zero-initialized, so the layer is an identity.
    out = jax.block_until_ready(
        siglip_layer_attn_time(hidden, params, T=T, num_heads=num_heads))
    assert out.shape == hidden.shape
    assert bool(jnp.allclose(out, hidden, atol=1e-6)), "zero-init temporal_fc must be identity"

    # Self-test: nonzero temporal_fc so the attention path reaches the output; compare
    # the bf16-MXU kernel against the f32 reference.
    test_params = list(params)
    test_params[10] = jax.random.normal(kt, (m, m), jnp.float32) * 0.02
    test_params = tuple(test_params)
    out_k = jax.block_until_ready(
        siglip_layer_attn_time(hidden, test_params, T=T, num_heads=num_heads))
    with jax.default_matmul_precision("highest"):
        out_r = reference_forward(hidden, T, test_params, num_heads=num_heads)
    err = float(jnp.max(jnp.abs(out_k - out_r)))
    assert err < 1e-2, f"max abs err {err}"

    print("KERNEL_OK")
</pallas_src>

<mosaic_0001>
module attributes {stable_mosaic.version = 11 : i64} {
  func.func @_attn_time_kernel(%arg0: i32, %arg1: memref<256x128xf32, #tpu.memory_space<vmem>>, %arg2: memref<128x384xbf16, #tpu.memory_space<vmem>>, %arg3: memref<1x384xf32, #tpu.memory_space<vmem>>, %arg4: memref<128x128xbf16, #tpu.memory_space<vmem>>, %arg5: memref<1x128xf32, #tpu.memory_space<vmem>>, %arg6: memref<256x128xf32, #tpu.memory_space<vmem>>) attributes {dimension_semantics = [#tpu.dimension_semantics<parallel>], iteration_bounds = array<i64: 1>, scalar_prefetch = 0 : i64, scratch_operands = 0 : i64, tpu.core_type = #tpu.core_type<tc>, window_params = [{transform_indices = @transform_0, window_bounds = array<i64: 256, 128>}, {pipeline_mode = #tpu.pipeline_mode<synchronous>, transform_indices = @transform_1, window_bounds = array<i64: 128, 384>}, {pipeline_mode = #tpu.pipeline_mode<synchronous>, transform_indices = @transform_2, window_bounds = array<i64: 1, 384>}, {pipeline_mode = #tpu.pipeline_mode<synchronous>, transform_indices = @transform_3, window_bounds = array<i64: 128, 128>}, {pipeline_mode = #tpu.pipeline_mode<synchronous>, transform_indices = @transform_4, window_bounds = array<i64: 1, 128>}, {transform_indices = @transform_5, window_bounds = array<i64: 256, 128>}]} {
    %c0 = arith.constant 0 : index
    %c0_0 = arith.constant 0 : index
    %0 = vector.load %arg1[%c0, %c0_0] : memref<256x128xf32, #tpu.memory_space<vmem>>, vector<256x128xf32>
    %cst = arith.constant dense<0.000000e+00> : vector<256xf32>
    %1 = vector.multi_reduction <add>, %0, %cst [1] : vector<256x128xf32> to vector<256xf32>
    %2 = vector.shape_cast %1 : vector<256xf32> to vector<256x1xf32>
    %cst_1 = arith.constant 1.280000e+02 : f32
    %3 = vector.broadcast %cst_1 : f32 to vector<256x1xf32>
    %4 = arith.divf %2, %3 : vector<256x1xf32>
    %5 = vector.broadcast %4 : vector<256x1xf32> to vector<256x128xf32>
    %6 = arith.subf %0, %5 : vector<256x128xf32>
    %7 = arith.mulf %6, %6 : vector<256x128xf32>
    %cst_2 = arith.constant dense<0.000000e+00> : vector<256xf32>
    %8 = vector.multi_reduction <add>, %7, %cst_2 [1] : vector<256x128xf32> to vector<256xf32>
    %9 = vector.shape_cast %8 : vector<256xf32> to vector<256x1xf32>
    %cst_3 = arith.constant 1.280000e+02 : f32
    %10 = vector.broadcast %cst_3 : f32 to vector<256x1xf32>
    %11 = arith.divf %9, %10 : vector<256x1xf32>
    %cst_4 = arith.constant 9.99999974E-6 : f32
    %12 = vector.broadcast %cst_4 : f32 to vector<256x1xf32>
    %13 = arith.addf %11, %12 : vector<256x1xf32>
    %14 = math.rsqrt %13 : vector<256x1xf32>
    %15 = vector.broadcast %14 : vector<256x1xf32> to vector<256x128xf32>
    %16 = arith.mulf %6, %15 : vector<256x128xf32>
    %17 = arith.truncf %16 : vector<256x128xf32> to vector<256x128xbf16>
    %c0_5 = arith.constant 0 : index
    %c0_6 = arith.constant 0 : index
    %18 = vector.load %arg2[%c0_5, %c0_6] : memref<128x384xbf16, #tpu.memory_space<vmem>>, vector<128x384xbf16>
    %cst_7 = arith.constant dense<0.000000e+00> : vector<256x384xf32>
    %19 = tpu.matmul %17, %18, %cst_7 {dimension_numbers = #tpu.dot_dimension_numbers<[1], [0], [0], [1], [0, 0, 1, 1], [], []>} : vector<256x128xbf16>, vector<128x384xbf16>, vector<256x384xf32> -> vector<256x384xf32>
    %c0_8 = arith.constant 0 : index
    %c0_9 = arith.constant 0 : index
    %20 = vector.load %arg3[%c0_8, %c0_9] : memref<1x384xf32, #tpu.memory_space<vmem>>, vector<1x384xf32>
    %21 = vector.broadcast %20 : vector<1x384xf32> to vector<256x384xf32>
    %22 = arith.addf %19, %21 : vector<256x384xf32>
    %23 = arith.truncf %22 : vector<256x384xf32> to vector<256x384xbf16>
    %24 = vector.extract_strided_slice %23 {offsets = [0, 0], sizes = [256, 32], strides = [1, 1]} : vector<256x384xbf16> to vector<256x32xbf16>
    %25 = vector.shape_cast %24 : vector<256x32xbf16> to vector<32x8x32xbf16>
    %26 = vector.extract_strided_slice %23 {offsets = [0, 128], sizes = [256, 32], strides = [1, 1]} : vector<256x384xbf16> to vector<256x32xbf16>
    %27 = vector.shape_cast %26 : vector<256x32xbf16> to vector<32x8x32xbf16>
    %28 = vector.extract_strided_slice %23 {offsets = [0, 256], sizes = [256, 32], strides = [1, 1]} : vector<256x384xbf16> to vector<256x32xbf16>
    %29 = vector.shape_cast %28 : vector<256x32xbf16> to vector<32x8x32xbf16>
    "tpu.trace_start"() <{level = 10 : i32, message = "btd,bsd->bts"}> : () -> ()
    %cst_10 = arith.constant dense<0.000000e+00> : vector<32x8x8xf32>
    %30 = tpu.matmul %25, %27, %cst_10 {dimension_numbers = #tpu.dot_dimension_numbers<[2], [2], [1], [1], [0, 0, 0, 1, 1, 1], [0], [0]>} : vector<32x8x32xbf16>, vector<32x8x32xbf16>, vector<32x8x8xf32> -> vector<32x8x8xf32>
    "tpu.trace_stop"() : () -> ()
    %cst_11 = arith.constant dense<0xFF800000> : vector<32x8xf32>
    %31 = vector.multi_reduction <maximumf>, %30, %cst_11 [2] : vector<32x8x8xf32> to vector<32x8xf32>
    %32 = vector.shape_cast %31 : vector<32x8xf32> to vector<32x8x1xf32>
    %33 = vector.broadcast %32 : vector<32x8x1xf32> to vector<32x8x8xf32>
    %34 = arith.subf %30, %33 : vector<32x8x8xf32>
    %35 = math.exp %34 : vector<32x8x8xf32>
    %cst_12 = arith.constant dense<0.000000e+00> : vector<32x8xf32>
    %36 = vector.multi_reduction <add>, %35, %cst_12 [2] : vector<32x8x8xf32> to vector<32x8xf32>
    %37 = vector.shape_cast %36 : vector<32x8xf32> to vector<32x8x1xf32>
    %38 = tpu.reciprocal %37 {approx = true} : vector<32x8x1xf32> -> vector<32x8x1xf32>
    %39 = vector.broadcast %38 : vector<32x8x1xf32> to vector<32x8x8xf32>
    %40 = arith.mulf %35, %39 : vector<32x8x8xf32>
    %41 = arith.truncf %40 : vector<32x8x8xf32> to vector<32x8x8xbf16>
    "tpu.trace_start"() <{level = 10 : i32, message = "bts,bsd->btd"}> : () -> ()
    %cst_13 = arith.constant dense<0.000000e+00> : vector<32x8x32xf32>
    %42 = tpu.matmul %41, %29, %cst_13 {dimension_numbers = #tpu.dot_dimension_numbers<[2], [1], [1], [2], [0, 0, 0, 1, 1, 2], [0], [0]>} : vector<32x8x8xbf16>, vector<32x8x32xbf16>, vector<32x8x32xf32> -> vector<32x8x32xf32>
    "tpu.trace_stop"() : () -> ()
    %43 = vector.shape_cast %42 : vector<32x8x32xf32> to vector<256x32xf32>
    %44 = arith.truncf %43 : vector<256x32xf32> to vector<256x32xbf16>
    %45 = vector.extract_strided_slice %23 {offsets = [0, 32], sizes = [256, 32], strides = [1, 1]} : vector<256x384xbf16> to vector<256x32xbf16>
    %46 = vector.shape_cast %45 : vector<256x32xbf16> to vector<32x8x32xbf16>
    %47 = vector.extract_strided_slice %23 {offsets = [0, 160], sizes = [256, 32], strides = [1, 1]} : vector<256x384xbf16> to vector<256x32xbf16>
    %48 = vector.shape_cast %47 : vector<256x32xbf16> to vector<32x8x32xbf16>
    %49 = vector.extract_strided_slice %23 {offsets = [0, 288], sizes = [256, 32], strides = [1, 1]} : vector<256x384xbf16> to vector<256x32xbf16>
    %50 = vector.shape_cast %49 : vector<256x32xbf16> to vector<32x8x32xbf16>
    "tpu.trace_start"() <{level = 10 : i32, message = "btd,bsd->bts"}> : () -> ()
    %cst_14 = arith.constant dense<0.000000e+00> : vector<32x8x8xf32>
    %51 = tpu.matmul %46, %48, %cst_14 {dimension_numbers = #tpu.dot_dimension_numbers<[2], [2], [1], [1], [0, 0, 0, 1, 1, 1], [0], [0]>} : vector<32x8x32xbf16>, vector<32x8x32xbf16>, vector<32x8x8xf32> -> vector<32x8x8xf32>
    "tpu.trace_stop"() : () -> ()
    %cst_15 = arith.constant dense<0xFF800000> : vector<32x8xf32>
    %52 = vector.multi_reduction <maximumf>, %51, %cst_15 [2] : vector<32x8x8xf32> to vector<32x8xf32>
    %53 = vector.shape_cast %52 : vector<32x8xf32> to vector<32x8x1xf32>
    %54 = vector.broadcast %53 : vector<32x8x1xf32> to vector<32x8x8xf32>
    %55 = arith.subf %51, %54 : vector<32x8x8xf32>
    %56 = math.exp %55 : vector<32x8x8xf32>
    %cst_16 = arith.constant dense<0.000000e+00> : vector<32x8xf32>
    %57 = vector.multi_reduction <add>, %56, %cst_16 [2] : vector<32x8x8xf32> to vector<32x8xf32>
    %58 = vector.shape_cast %57 : vector<32x8xf32> to vector<32x8x1xf32>
    %59 = tpu.reciprocal %58 {approx = true} : vector<32x8x1xf32> -> vector<32x8x1xf32>
    %60 = vector.broadcast %59 : vector<32x8x1xf32> to vector<32x8x8xf32>
    %61 = arith.mulf %56, %60 : vector<32x8x8xf32>
    %62 = arith.truncf %61 : vector<32x8x8xf32> to vector<32x8x8xbf16>
    "tpu.trace_start"() <{level = 10 : i32, message = "bts,bsd->btd"}> : () -> ()
    %cst_17 = arith.constant dense<0.000000e+00> : vector<32x8x32xf32>
    %63 = tpu.matmul %62, %50, %cst_17 {dimension_numbers = #tpu.dot_dimension_numbers<[2], [1], [1], [2], [0, 0, 0, 1, 1, 2], [0], [0]>} : vector<32x8x8xbf16>, vector<32x8x32xbf16>, vector<32x8x32xf32> -> vector<32x8x32xf32>
    "tpu.trace_stop"() : () -> ()
    %64 = vector.shape_cast %63 : vector<32x8x32xf32> to vector<256x32xf32>
    %65 = arith.truncf %64 : vector<256x32xf32> to vector<256x32xbf16>
    %66 = vector.extract_strided_slice %23 {offsets = [0, 64], sizes = [256, 32], strides = [1, 1]} : vector<256x384xbf16> to vector<256x32xbf16>
    %67 = vector.shape_cast %66 : vector<256x32xbf16> to vector<32x8x32xbf16>
    %68 = vector.extract_strided_slice %23 {offsets = [0, 192], sizes = [256, 32], strides = [1, 1]} : vector<256x384xbf16> to vector<256x32xbf16>
    %69 = vector.shape_cast %68 : vector<256x32xbf16> to vector<32x8x32xbf16>
    %70 = vector.extract_strided_slice %23 {offsets = [0, 320], sizes = [256, 32], strides = [1, 1]} : vector<256x384xbf16> to vector<256x32xbf16>
    %71 = vector.shape_cast %70 : vector<256x32xbf16> to vector<32x8x32xbf16>
    "tpu.trace_start"() <{level = 10 : i32, message = "btd,bsd->bts"}> : () -> ()
    %cst_18 = arith.constant dense<0.000000e+00> : vector<32x8x8xf32>
    %72 = tpu.matmul %67, %69, %cst_18 {dimension_numbers = #tpu.dot_dimension_numbers<[2], [2], [1], [1], [0, 0, 0, 1, 1, 1], [0], [0]>} : vector<32x8x32xbf16>, vector<32x8x32xbf16>, vector<32x8x8xf32> -> vector<32x8x8xf32>
    "tpu.trace_stop"() : () -> ()
    %cst_19 = arith.constant dense<0xFF800000> : vector<32x8xf32>
    %73 = vector.multi_reduction <maximumf>, %72, %cst_19 [2] : vector<32x8x8xf32> to vector<32x8xf32>
    %74 = vector.shape_cast %73 : vector<32x8xf32> to vector<32x8x1xf32>
    %75 = vector.broadcast %74 : vector<32x8x1xf32> to vector<32x8x8xf32>
    %76 = arith.subf %72, %75 : vector<32x8x8xf32>
    %77 = math.exp %76 : vector<32x8x8xf32>
    %cst_20 = arith.constant dense<0.000000e+00> : vector<32x8xf32>
    %78 = vector.multi_reduction <add>, %77, %cst_20 [2] : vector<32x8x8xf32> to vector<32x8xf32>
    %79 = vector.shape_cast %78 : vector<32x8xf32> to vector<32x8x1xf32>
    %80 = tpu.reciprocal %79 {approx = true} : vector<32x8x1xf32> -> vector<32x8x1xf32>
    %81 = vector.broadcast %80 : vector<32x8x1xf32> to vector<32x8x8xf32>
    %82 = arith.mulf %77, %81 : vector<32x8x8xf32>
    %83 = arith.truncf %82 : vector<32x8x8xf32> to vector<32x8x8xbf16>
    "tpu.trace_start"() <{level = 10 : i32, message = "bts,bsd->btd"}> : () -> ()
    %cst_21 = arith.constant dense<0.000000e+00> : vector<32x8x32xf32>
    %84 = tpu.matmul %83, %71, %cst_21 {dimension_numbers = #tpu.dot_dimension_numbers<[2], [1], [1], [2], [0, 0, 0, 1, 1, 2], [0], [0]>} : vector<32x8x8xbf16>, vector<32x8x32xbf16>, vector<32x8x32xf32> -> vector<32x8x32xf32>
    "tpu.trace_stop"() : () -> ()
    %85 = vector.shape_cast %84 : vector<32x8x32xf32> to vector<256x32xf32>
    %86 = arith.truncf %85 : vector<256x32xf32> to vector<256x32xbf16>
    %87 = vector.extract_strided_slice %23 {offsets = [0, 96], sizes = [256, 32], strides = [1, 1]} : vector<256x384xbf16> to vector<256x32xbf16>
    %88 = vector.shape_cast %87 : vector<256x32xbf16> to vector<32x8x32xbf16>
    %89 = vector.extract_strided_slice %23 {offsets = [0, 224], sizes = [256, 32], strides = [1, 1]} : vector<256x384xbf16> to vector<256x32xbf16>
    %90 = vector.shape_cast %89 : vector<256x32xbf16> to vector<32x8x32xbf16>
    %91 = vector.extract_strided_slice %23 {offsets = [0, 352], sizes = [256, 32], strides = [1, 1]} : vector<256x384xbf16> to vector<256x32xbf16>
    %92 = vector.shape_cast %91 : vector<256x32xbf16> to vector<32x8x32xbf16>
    "tpu.trace_start"() <{level = 10 : i32, message = "btd,bsd->bts"}> : () -> ()
    %cst_22 = arith.constant dense<0.000000e+00> : vector<32x8x8xf32>
    %93 = tpu.matmul %88, %90, %cst_22 {dimension_numbers = #tpu.dot_dimension_numbers<[2], [2], [1], [1], [0, 0, 0, 1, 1, 1], [0], [0]>} : vector<32x8x32xbf16>, vector<32x8x32xbf16>, vector<32x8x8xf32> -> vector<32x8x8xf32>
    "tpu.trace_stop"() : () -> ()
    %cst_23 = arith.constant dense<0xFF800000> : vector<32x8xf32>
    %94 = vector.multi_reduction <maximumf>, %93, %cst_23 [2] : vector<32x8x8xf32> to vector<32x8xf32>
    %95 = vector.shape_cast %94 : vector<32x8xf32> to vector<32x8x1xf32>
    %96 = vector.broadcast %95 : vector<32x8x1xf32> to vector<32x8x8xf32>
    %97 = arith.subf %93, %96 : vector<32x8x8xf32>
    %98 = math.exp %97 : vector<32x8x8xf32>
    %cst_24 = arith.constant dense<0.000000e+00> : vector<32x8xf32>
    %99 = vector.multi_reduction <add>, %98, %cst_24 [2] : vector<32x8x8xf32> to vector<32x8xf32>
    %100 = vector.shape_cast %99 : vector<32x8xf32> to vector<32x8x1xf32>
    %101 = tpu.reciprocal %100 {approx = true} : vector<32x8x1xf32> -> vector<32x8x1xf32>
    %102 = vector.broadcast %101 : vector<32x8x1xf32> to vector<32x8x8xf32>
    %103 = arith.mulf %98, %102 : vector<32x8x8xf32>
    %104 = arith.truncf %103 : vector<32x8x8xf32> to vector<32x8x8xbf16>
    "tpu.trace_start"() <{level = 10 : i32, message = "bts,bsd->btd"}> : () -> ()
    %cst_25 = arith.constant dense<0.000000e+00> : vector<32x8x32xf32>
    %105 = tpu.matmul %104, %92, %cst_25 {dimension_numbers = #tpu.dot_dimension_numbers<[2], [1], [1], [2], [0, 0, 0, 1, 1, 2], [0], [0]>} : vector<32x8x8xbf16>, vector<32x8x32xbf16>, vector<32x8x32xf32> -> vector<32x8x32xf32>
    "tpu.trace_stop"() : () -> ()
    %106 = vector.shape_cast %105 : vector<32x8x32xf32> to vector<256x32xf32>
    %107 = arith.truncf %106 : vector<256x32xf32> to vector<256x32xbf16>
    %108 = tpu.concatenate %44, %65, %86, %107 in 1 : vector<256x32xbf16>, vector<256x32xbf16>, vector<256x32xbf16>, vector<256x32xbf16> -> vector<256x128xbf16>
    %c0_26 = arith.constant 0 : index
    %c0_27 = arith.constant 0 : index
    %109 = vector.load %arg4[%c0_26, %c0_27] : memref<128x128xbf16, #tpu.memory_space<vmem>>, vector<128x128xbf16>
    %cst_28 = arith.constant dense<0.000000e+00> : vector<256x128xf32>
    %110 = tpu.matmul %108, %109, %cst_28 {dimension_numbers = #tpu.dot_dimension_numbers<[1], [0], [0], [1], [0, 0, 1, 1], [], []>} : vector<256x128xbf16>, vector<128x128xbf16>, vector<256x128xf32> -> vector<256x128xf32>
    %c0_29 = arith.constant 0 : index
    %c0_30 = arith.constant 0 : index
    %111 = vector.load %arg5[%c0_29, %c0_30] : memref<1x128xf32, #tpu.memory_space<vmem>>, vector<1x128xf32>
    %112 = vector.broadcast %111 : vector<1x128xf32> to vector<256x128xf32>
    %113 = arith.addf %110, %112 : vector<256x128xf32>
    %c0_31 = arith.constant 0 : index
    %c0_32 = arith.constant 0 : index
    %114 = vector.load %arg1[%c0_31, %c0_32] : memref<256x128xf32, #tpu.memory_space<vmem>>, vector<256x128xf32>
    %115 = arith.addf %114, %113 : vector<256x128xf32>
    %c0_33 = arith.constant 0 : index
    %c0_34 = arith.constant 0 : index
    %116 = vector.load %arg6[%c0_33, %c0_34] : memref<256x128xf32, #tpu.memory_space<vmem>>, vector<256x128xf32>
    tpu.vector_store %arg6[%c0_33, %c0_34], %115 {strides = array<i32>} : memref<256x128xf32, #tpu.memory_space<vmem>>, vector<256x128xf32>,
    return
  }
  func.func @transform_0(%arg0: i32) -> (i32, i32) {
    %c0_i32 = arith.constant 0 : i32
    %c0_i32_0 = arith.constant 0 : i32
    return %arg0, %c0_i32 : i32, i32
  }
  func.func @transform_1(%arg0: i32) -> (i32, i32) {
    %c0_i32 = arith.constant 0 : i32
    %c0_i32_0 = arith.constant 0 : i32
    %c0_i32_1 = arith.constant 0 : i32
    return %c0_i32, %c0_i32_0 : i32, i32
  }
  func.func @transform_2(%arg0: i32) -> (i32, i32) {
    %c0_i32 = arith.constant 0 : i32
    %c0_i32_0 = arith.constant 0 : i32
    %c0_i32_1 = arith.constant 0 : i32
    return %c0_i32, %c0_i32_0 : i32, i32
  }
  func.func @transform_3(%arg0: i32) -> (i32, i32) {
    %c0_i32 = arith.constant 0 : i32
    %c0_i32_0 = arith.constant 0 : i32
    %c0_i32_1 = arith.constant 0 : i32
    return %c0_i32, %c0_i32_0 : i32, i32
  }
  func.func @transform_4(%arg0: i32) -> (i32, i32) {
    %c0_i32 = arith.constant 0 : i32
    %c0_i32_0 = arith.constant 0 : i32
    %c0_i32_1 = arith.constant 0 : i32
    return %c0_i32, %c0_i32_0 : i32, i32
  }
  func.func @transform_5(%arg0: i32) -> (i32, i32) {
    %c0_i32 = arith.constant 0 : i32
    %c0_i32_0 = arith.constant 0 : i32
    return %arg0, %c0_i32 : i32, i32
  }
}

</mosaic_0001>

<bundles_post_ra>
// kernel: siglip_layer_attn_time.1
= control target key start
LH: loop header
LB: loop body
LE: loop exit
PB: predicated region body
PF: predicated region fallthrough
CT: control target
= control target key end

     0   :  { %10 = vsyncpa [#allocation3], 0  ;;  %s24405_s0 = inlined_call_operand.hbm [shape: f32[256,128], index: 0, kind: input, shape index: {}]   ;;  %s24406_s1 = inlined_call_operand.hbm [shape: bf16[128,384], index: 1, kind: input, shape index: {}]   ;;  %s24407_s2 = inlined_call_operand.hbm [shape: f32[1,384], index: 2, kind: input, shape index: {}]   ;;  %s24408_s3 = inlined_call_operand.hbm [shape: bf16[128,128], index: 3, kind: input, shape index: {}]   ;;  %s24409_s4 = inlined_call_operand.hbm [shape: f32[1,128], index: 4, kind: input, shape index: {}]   ;;  %s24410_s5 = inlined_call_operand.hbm [shape: f32[256,128], index: 5, kind: output, shape index: {}]  }
   0x1   :  { %11 = vsyncpa [#allocation6], 0 }
   0x2   :  { %12 = vsyncpa [#allocation9], 0 }
   0x3   :  { %13 = vsyncpa [#allocation4], 0  ;;  %s19344_s18 = smov [#allocation5]   ;;  %s19204_s22 = scalar_lea.hbm %s24406_s1, 3072 }
   0x4   :  { %s31_s19 = sshll.u32 %s19344_s18, 4  ;;  %p19205_p0 = scmp.ne.s32.totalorder %s24406_s1, %s19204_s22  ;;  %s32_s19 = int_to_ptr.vmem [resolvable:$true] %s31_s19 }
   0x5   :  { %p19208_p1 = scmp.lt.u32.totalorder %s19204_s22, %s24406_s1 }
   0x7   :  { %p19210_p2 = pnand %p19208_p1, %p19205_p0 }
   0x9   :  { %19213 = shalt.err (!%p19210_p2)
}
   0xa   :  { %s19214_s27 = scalar_lea.vmem %s32_s19, 3072  ;;  %p19219_p4 = scmp.lt.s32.totalorder %s32_s19, %s32_s19 }
   0xb   :  { %p19215_p3 = scmp.ne.s32.totalorder %s32_s19, %s19214_s27  ;;  %p19220_p5 = scmp.lt.s32.totalorder %s19214_s27, %s19214_s27 }
   0xd   :  { %p19221_p6 = por %p19220_p5, %p19219_p4 }
   0xf   :  { %p19222_p7 = pnand %p19221_p6, %p19215_p3 }
  0x11   :  { %19225 = shalt.err (!%p19222_p7)
}
  0x12   :  { %s19345_s28 = smov 192   ;;  %s19346_s29 = smov 12  }
  0x13   :  { %37 = dma.hbm_to_vmem [thread:$0]  %s24406_s1, 3072, %s32_s19, [#allocation6], %s19345_s28, %s19345_s28, %s19346_s29  }
  0x14   :  { %s19347_s7 = smov [#allocation8]   ;;  %s19226_s11 = scalar_lea.hbm %s24408_s3, 1024 }
  0x15   :  { %s53_s8 = sshll.u32 %s19347_s7, 4  ;;  %p19227_p8 = scmp.ne.s32.totalorder %s24408_s3, %s19226_s11  ;;  %s54_s8 = int_to_ptr.vmem [resolvable:$true] %s53_s8 }
  0x16   :  { %p19230_p9 = scmp.lt.u32.totalorder %s19226_s11, %s24408_s3 }
  0x18   :  { %p19232_p10 = pnand %p19230_p9, %p19227_p8 }
  0x1a   :  { %19235 = shalt.err (!%p19232_p10)
}
  0x1b   :  { %s19236_s16 = scalar_lea.vmem %s54_s8, 1024  ;;  %p19241_p12 = scmp.lt.s32.totalorder %s54_s8, %s54_s8 }
  0x1c   :  { %p19237_p11 = scmp.ne.s32.totalorder %s54_s8, %s19236_s16  ;;  %p19242_p13 = scmp.lt.s32.totalorder %s19236_s16, %s19236_s16 }
  0x1e   :  { %p19243_p0 = por %p19242_p13, %p19241_p12 }
  0x20   :  { %p19244_p1 = pnand %p19243_p0, %p19237_p11 }
  0x22   :  { %19247 = shalt.err (!%p19244_p1)
}
  0x23   :  { %s19348_s1 = smov 64   ;;  %s19349_s17 = smov 4  }
  0x24   :  { %59 = dma.hbm_to_vmem [thread:$0]  %s24408_s3, 1024, %s54_s8, [#allocation9], %s19348_s1, %s19348_s1, %s19349_s17  }
  0x25   :  { %s19350_s20 = smov [#allocation2]   ;;  %s19248_s24 = scalar_lea.hbm %s24405_s0, 4096 }
  0x26   :  { %s19_s21 = sshll.u32 %s19350_s20, 4  ;;  %p19249_p2 = scmp.ne.s32.totalorder %s24405_s0, %s19248_s24  ;;  %s20_s21 = int_to_ptr.vmem [resolvable:$true] %s19_s21 }
  0x27   :  { %p19252_p3 = scmp.lt.u32.totalorder %s19248_s24, %s24405_s0 }
  0x29   :  { %p19254_p4 = pnand %p19252_p3, %p19249_p2 }
  0x2b   :  { %19257 = shalt.err (!%p19254_p4)
}
  0x2c   :  { %s19258_s29 = scalar_lea.vmem %s20_s21, 4096  ;;  %p19263_p6 = scmp.lt.s32.totalorder %s20_s21, %s20_s21 }
  0x2d   :  { %p19259_p5 = scmp.ne.s32.totalorder %s20_s21, %s19258_s29  ;;  %p19264_p7 = scmp.lt.s32.totalorder %s19258_s29, %s19258_s29 }
  0x2f   :  { %p19265_p8 = por %p19264_p7, %p19263_p6 }
  0x31   :  { %p19266_p9 = pnand %p19265_p8, %p19259_p5 }
  0x33   :  { %19269 = shalt.err (!%p19266_p9)
}
  0x34   :  { %s19351_s3 = smov 128   ;;  %s19352_s30 = smov 8  }
  0x35   :  { %25 = dma.hbm_to_vmem [thread:$0]  %s24405_s0, 4096, %s20_s21, [#allocation3], %s19351_s3, %s19351_s3, %s19352_s30  }
  0x36   :  { %s19353_s8 = smov [#allocation7]   ;;  %s19354_s10 = smov [#allocation10]  }
  0x37   :  { %s44_s9 = sshll.u32 %s19353_s8, 4  ;;  %s66_s11 = sshll.u32 %s19354_s10, 4  ;;  %s45_s9 = int_to_ptr.vmem [resolvable:$true] %s44_s9  ;;  %s67_s11 = int_to_ptr.vmem [resolvable:$true] %s66_s11 }
  0x38   :  { %s19270_s14 = scalar_lea.hbm %s24407_s2, 48 }
  0x39   :  { %p19271_p10 = scmp.ne.s32.totalorder %s24407_s2, %s19270_s14  ;;  %p19274_p11 = scmp.lt.u32.totalorder %s19270_s14, %s24407_s2 }
  0x3b   :  { %p19276_p12 = pnand %p19274_p11, %p19271_p10 }
  0x3d   :  { %19279 = shalt.err (!%p19276_p12)
}
  0x3e   :  { %s19280_s0 = scalar_lea.vmem %s45_s9, 48  ;;  %s19284_s19 = scalar_lea.vmem %s45_s9, 64 }
  0x3f   :  { %p19281_p13 = scmp.ne.s32.totalorder %s45_s9, %s19280_s0  ;;  %p19285_p0 = scmp.lt.s32.totalorder %s45_s9, %s45_s9 }
  0x40   :  { %p19286_p1 = scmp.lt.s32.totalorder %s19284_s19, %s19280_s0 }
  0x42   :  { %p19287_p2 = por %p19286_p1, %p19285_p0 }
  0x44   :  { %p19288_p3 = pnand %p19287_p2, %p19281_p13 }
  0x46   :  { %19291 = shalt.err (!%p19288_p3)
}
  0x47   :  { %47 = dma.hbm_to_vmem [thread:$0]  %s24407_s2, 48, %s45_s9, [#allocation6]  }
  0x48   :  { %s19292_s24 = scalar_lea.hbm %s24409_s4, 16 }
  0x49   :  { %p19293_p4 = scmp.ne.s32.totalorder %s24409_s4, %s19292_s24  ;;  %p19296_p5 = scmp.lt.u32.totalorder %s19292_s24, %s24409_s4 }
  0x4b   :  { %p19298_p6 = pnand %p19296_p5, %p19293_p4 }
  0x4d   :  { %19301 = shalt.err (!%p19298_p6)
}
  0x4e   :  { %s19302_s29 = scalar_lea.vmem %s67_s11, 16  ;;  %s19306_s6 = scalar_lea.vmem %s67_s11, 32 }
  0x4f   :  { %p19303_p7 = scmp.ne.s32.totalorder %s67_s11, %s19302_s29  ;;  %p19307_p8 = scmp.lt.s32.totalorder %s67_s11, %s67_s11 }
  0x50   :  { %p19308_p9 = scmp.lt.s32.totalorder %s19306_s6, %s19302_s29 }
  0x52   :  { %p19309_p10 = por %p19308_p9, %p19307_p8 }
  0x54   :  { %p19310_p11 = pnand %p19309_p10, %p19303_p7 }
  0x56   :  { %19313 = shalt.err (!%p19310_p11)
}
  0x57   :  { %69 = dma.hbm_to_vmem [thread:$0]  %s24409_s4, 16, %s67_s11, [#allocation9]  }
  0x58   :  { %19336 = dma.done.wait [#allocation3], 4096  }
  0x59   :  { %19337 = vsyncadd [#allocation3], 4294963200 }
  0x5a   :  { %19338 = dma.done.wait [#allocation6], 3120  }
  0x5b   :  { %19339 = vsyncadd [#allocation6], 4294964176 }
  0x5c   :  { %19340 = dma.done.wait [#allocation9], 1040  }
  0x5d   :  { %19341 = vsyncadd [#allocation9], 4294966256  ;;  %v86_v0 = vld [vmem:[#allocation2] sm:$0xff]  ;;  %v88_v1 = vld [vmem:[#allocation2 + $0x10] sm:$0xff]  ;;  %vm19357_vm0 = vmmov 0   ;;  %vm1306_vm1 = vcmask 261120  }
  0x5e   :  { %118 = vadd.xlane.f32.xlu0 %v86_v0  ;;  %122 = vadd.xlane.f32.xlu1 %v88_v1  ;;  %v87_v2 = vld [vmem:[#allocation2 + $0x8] sm:$0xff]  ;;  %v89_v3 = vld [vmem:[#allocation2 + $0x18] sm:$0xff]  ;;  %v19456_v4 = vld [vmem:[#allocation2 + $0x20] sm:$0xff]  ;;  %vm3167_vm2 = vcmask 1043456   ;;  %vm2779_vm3 = vcmask 64512   ;;  %s19358_s4 = smov 96  }
  0x5f   :  { %v19458_v5 = vld [vmem:[#allocation2 + $0x28] sm:$0xff]  ;;  %v19460_v6 = vld [vmem:[#allocation2 + $0x30] sm:$0xff]  ;;  %v19462_v7 = vld [vmem:[#allocation2 + $0x38] sm:$0xff]  ;;  %s19359_s8 = smov 32   ;;  %vm15453_vm4 = vcmask 523264   ;;  %vm15486_vm5 = vcmask 785408  }
  0x60   :  { %v19466_v8 = vld [vmem:[#allocation2 + $0x40] sm:$0xff]  ;;  %v19468_v9 = vld [vmem:[#allocation2 + $0x48] sm:$0xff]  ;;  %v19472_v10 = vld [vmem:[#allocation2 + $0x50] sm:$0xff] }
  0x61   :  { %v19474_v11 = vld [vmem:[#allocation2 + $0x58] sm:$0xff]  ;;  %v19480_v12 = vld [vmem:[#allocation2 + $0x60] sm:$0xff]  ;;  %v19482_v13 = vld [vmem:[#allocation2 + $0x68] sm:$0xff] }
  0x62   :  { %120 = vadd.xlane.f32.xlu0 %v87_v2  ;;  %124 = vadd.xlane.f32.xlu1 %v89_v3  ;;  %v18588_v14 = vld [vmem:[#allocation5 + $0x4] ss:$12 sps:$4 sm:$0xff]   ;;  %v18590_v15 = vld [vmem:[#allocation5] ss:$12 sps:$4 sm:$0xff]   ;;  %v18591_v16 = vld [vmem:[#allocation5 + $0x1c] ss:$12 sps:$4 sm:$0xff]  }
  0x63   :  { %664 = vmatprep.subr.bf16.mxu0 %v18588_v14  ;;  %18555 = vmatprep.subr.bf16.mxu1 %v18588_v14  ;;  %v18593_v17 = vld [vmem:[#allocation5 + $0x18] ss:$12 sps:$4 sm:$0xff]   ;;  %v18594_v18 = vld [vmem:[#allocation5 + $0x34] ss:$12 sps:$4 sm:$0xff]   ;;  %v19509_v37 = vld [vmem:[#allocation2 + $0x88] sm:$0xff] }
  0x64   :  { %665 = vmatpush1.bf16.msra.mxu0 %v18590_v15  ;;  %18563 = vmatpush1.bf16.msra.mxu1 %v18590_v15  ;;  %v19492_v28 = vld [vmem:[#allocation2 + $0x70] sm:$0xff]  ;;  %v19499_v33 = vld [vmem:[#allocation2 + $0x80] sm:$0xff]  ;;  %v19501_v34 = vld [vmem:[#allocation2 + $0x78] sm:$0xff] }
  0x65   :  { %666 = vmatprep.subr.bf16.mxu0 %v18591_v16  ;;  %18556 = vmatprep.subr.bf16.mxu1 %v18591_v16  ;;  %v18596_v41 = vld [vmem:[#allocation5 + $0x30] ss:$12 sps:$4 sm:$0xff]   ;;  %v18597_v44 = vld [vmem:[#allocation5 + $0x4c] ss:$12 sps:$4 sm:$0xff]   ;;  %v18599_v47 = vld [vmem:[#allocation5 + $0x48] ss:$12 sps:$4 sm:$0xff]  }
  0x66   :  { %126 = vadd.xlane.f32.xlu0 %v19456_v4  ;;  %128 = vadd.xlane.f32.xlu1 %v19458_v5  ;;  %v19514_v42 = vld [vmem:[#allocation2 + $0x90] sm:$0xff]  ;;  %v19520_v48 = vld [vmem:[#allocation2 + $0xa0] sm:$0xff]  ;;  %v19522_v49 = vld [vmem:[#allocation2 + $0x98] sm:$0xff] }
  0x67   :  { %v18600_v50 = vld [vmem:[#allocation5 + $0x64] ss:$12 sps:$4 sm:$0xff]   ;;  %v18602_v53 = vld [vmem:[#allocation5 + $0x60] ss:$12 sps:$4 sm:$0xff]   ;;  %v18603_v56 = vld [vmem:[#allocation5 + $0x7c] ss:$12 sps:$4 sm:$0xff]  }
  0x68   :  { %667 = vmatpush1.bf16.msra.mxu0 %v18593_v17  ;;  %18564 = vmatpush1.bf16.msra.mxu1 %v18593_v17  ;;  %v19531_v54 = vld [vmem:[#allocation2 + $0xa8] sm:$0xff]  ;;  %v18605_v59 = vld [vmem:[#allocation5 + $0x78] ss:$12 sps:$4 sm:$0xff]   ;;  %v19536_v60 = vld [vmem:[#allocation2 + $0xb0] sm:$0xff] }
  0x69   :  { %668 = vmatprep.subr.bf16.mxu0 %v18594_v18  ;;  %18557 = vmatprep.subr.bf16.mxu1 %v18594_v18  ;;  %v18606_v62 = vld [vmem:[#allocation5 + $0x94] ss:$12 sps:$4 sm:$0xff]   ;;  %v19553_v17 = vld [vmem:[#allocation2 + $0xc8] sm:$0xff] }
  0x6a   :  { %130 = vadd.xlane.f32.xlu0 %v19460_v6  ;;  %132 = vadd.xlane.f32.xlu1 %v19462_v7  ;;  %v18611_v16 = vld [vmem:[#allocation5 + $0xa8] ss:$12 sps:$4 sm:$0xff]  }
  0x6c   :  { %669 = vmatpush1.bf16.msra.mxu0 %v18596_v41  ;;  %18565 = vmatpush1.bf16.msra.mxu1 %v18596_v41 }
  0x6d   :  { %670 = vmatprep.subr.bf16.mxu0 %v18597_v44  ;;  %18558 = vmatprep.subr.bf16.mxu1 %v18597_v44  ;;  %v19587_v44 = vld [vmem:[#allocation2 + $0xe8] sm:$0xff] }
  0x6e   :  { %134 = vadd.xlane.f32.xlu0 %v19466_v8  ;;  %136 = vadd.xlane.f32.xlu1 %v19468_v9 }
  0x70   :  { %671 = vmatpush1.bf16.msra.mxu0 %v18599_v47  ;;  %18566 = vmatpush1.bf16.msra.mxu1 %v18599_v47 }
  0x71   :  { %672 = vmatprep.subr.bf16.mxu0 %v18600_v50  ;;  %18559 = vmatprep.subr.bf16.mxu1 %v18600_v50 }
  0x72   :  { %138 = vadd.xlane.f32.xlu0 %v19472_v10  ;;  %140 = vadd.xlane.f32.xlu1 %v19474_v11 }
  0x74   :  { %673 = vmatpush1.bf16.msra.mxu0 %v18602_v53  ;;  %18567 = vmatpush1.bf16.msra.mxu1 %v18602_v53 }
  0x75   :  { %674 = vmatprep.subr.bf16.mxu0 %v18603_v56  ;;  %18560 = vmatprep.subr.bf16.mxu1 %v18603_v56 }
  0x76   :  { %142 = vadd.xlane.f32.xlu0 %v19480_v12  ;;  %144 = vadd.xlane.f32.xlu1 %v19482_v13 }
  0x78   :  { %675 = vmatpush1.bf16.msra.mxu0 %v18605_v59  ;;  %18568 = vmatpush1.bf16.msra.mxu1 %v18605_v59 }
  0x79   :  { %676 = vmatprep.subr.bf16.mxu0 %v18606_v62  ;;  %18561 = vmatprep.subr.bf16.mxu1 %v18606_v62 }
  0xeb   :  { %v119_v19 = vpop.xlane.xlu0 %118  ;;  %v123_v21 = vpop.xlane.xlu1 %122 }
  0xec   :  { %v183_v20 = vmul.f32 0.0078125, %v119_v19  ;;  %v185_v27 = vmul.f32 0.0078125, %v123_v21  ;;  %v19355_v19 = vmov 0  }
  0xed   :  { %696 = vmatprep.mubr.bf16.mxu0 %v19355_v19  ;;  %806 = vmatprep.mubr.bf16.mxu1 %v19355_v19 }
  0xee   :  { %v19486_v22 = vsub.f32 %v86_v0, %v183_v20  ;;  %v19497_v32 = vsub.f32 %v88_v1, %v185_v27  ;;  %v18608_v1 = vld [vmem:[#allocation5 + $0x90] ss:$12 sps:$4 sm:$0xff]  }
  0xef   :  { %v121_v23 = vpop.xlane.xlu0 %120  ;;  %v125_v29 = vpop.xlane.xlu1 %124  ;;  %677 = vmatpush1.bf16.msra.mxu0 %v18608_v1  ;;  %18569 = vmatpush1.bf16.msra.mxu1 %v18608_v1 }
  0xf0   :  { %v184_v24 = vmul.f32 0.0078125, %v121_v23  ;;  %v247_v25 = vmul.f32 %v19486_v22, %v19486_v22  ;;  %v186_v31 = vmul.f32 0.0078125, %v125_v29  ;;  %v249_v35 = vmul.f32 %v19497_v32, %v19497_v32  ;;  %v19563_v23 = vld [vmem:[#allocation2 + $0xd0] sm:$0xff] }
  0xf2   :  { %279 = vadd.xlane.f32.xlu0 %v247_v25  ;;  %v19490_v26 = vsub.f32 %v87_v2, %v184_v24  ;;  %v19507_v36 = vsub.f32 %v89_v3, %v186_v31  ;;  %v19542_v2 = vld [vmem:[#allocation2 + $0xb8] sm:$0xff]  ;;  %v19544_v3 = vld [vmem:[#allocation2 + $0xc0] sm:$0xff] }
  0xf3   :  { %v127_v38 = vpop.xlane.xlu0 %126  ;;  %v129_v43 = vpop.xlane.xlu1 %128 }
  0xf4   :  { %v248_v30 = vmul.f32 %v19490_v26, %v19490_v26  ;;  %v250_v39 = vmul.f32 %v19507_v36, %v19507_v36  ;;  %v187_v40 = vmul.f32 0.0078125, %v127_v38  ;;  %v188_v45 = vmul.f32 0.0078125, %v129_v43 }
  0xf6   :  { %146 = vadd.xlane.f32.xlu0 %v19492_v28  ;;  %281 = vadd.xlane.f32.xlu1 %v248_v30  ;;  %v19518_v46 = vsub.f32 %v19456_v4, %v187_v40  ;;  %v19529_v52 = vsub.f32 %v19458_v5, %v188_v45  ;;  %v18609_v5 = vld [vmem:[#allocation5 + $0xac] ss:$12 sps:$4 sm:$0xff]  }
  0xf7   :  { %v131_v55 = vpop.xlane.xlu0 %130  ;;  %v133_v61 = vpop.xlane.xlu1 %132  ;;  %678 = vmatprep.subr.bf16.mxu0 %v18609_v5  ;;  %18562 = vmatprep.subr.bf16.mxu1 %v18609_v5  ;;  %v19571_v30 = vld [vmem:[#allocation2 + $0xd8] sm:$0xff] }
  0xf8   :  { %v251_v51 = vmul.f32 %v19518_v46, %v19518_v46  ;;  %v252_v57 = vmul.f32 %v19529_v52, %v19529_v52  ;;  %v189_v58 = vmul.f32 0.0078125, %v131_v55  ;;  %v190_v63 = vmul.f32 0.0078125, %v133_v61  ;;  %679 = vmatpush1.bf16.msra.mxu0 %v18611_v16  ;;  %18570 = vmatpush1.bf16.msra.mxu1 %v18611_v16  ;;  %v19603_v55 = vld [vmem:[#allocation2 + $0xf8] sm:$0xff] }
  0xfa   :  { %150 = vadd.xlane.f32.xlu0 %v19499_v33  ;;  %148 = vadd.xlane.f32.xlu1 %v19501_v34  ;;  %v19540_v0 = vsub.f32 %v19460_v6, %v189_v58  ;;  %v19551_v15 = vsub.f32 %v19462_v7, %v190_v63 }
  0xfb   :  { %v135_v4 = vpop.xlane.xlu0 %134  ;;  %v137_v18 = vpop.xlane.xlu1 %136 }
  0xfc   :  { %v253_v14 = vmul.f32 %v19540_v0, %v19540_v0  ;;  %v191_v6 = vmul.f32 0.0078125, %v135_v4  ;;  %v254_v7 = vmul.f32 %v19551_v15, %v19551_v15  ;;  %v192_v20 = vmul.f32 0.0078125, %v137_v18 }
  0xfe   :  { %283 = vadd.xlane.f32.xlu0 %v249_v35  ;;  %152 = vadd.xlane.f32.xlu1 %v19509_v37  ;;  %v19561_v21 = vsub.f32 %v19466_v8, %v191_v6  ;;  %v19569_v29 = vsub.f32 %v19468_v9, %v192_v20 }
  0xff   :  { %v139_v24 = vpop.xlane.xlu0 %138  ;;  %v141_v31 = vpop.xlane.xlu1 %140 }
 0x100   :  { %v255_v25 = vmul.f32 %v19561_v21, %v19561_v21  ;;  %v193_v27 = vmul.f32 0.0078125, %v139_v24  ;;  %v256_v8 = vmul.f32 %v19569_v29, %v19569_v29  ;;  %v194_v35 = vmul.f32 0.0078125, %v141_v31 }
 0x102   :  { %154 = vadd.xlane.f32.xlu0 %v19514_v42  ;;  %285 = vadd.xlane.f32.xlu1 %v250_v39  ;;  %v19577_v38 = vsub.f32 %v19472_v10, %v193_v27  ;;  %v19579_v39 = vld [vmem:[#allocation2 + $0xe0] sm:$0xff]  ;;  %v19585_v43 = vsub.f32 %v19474_v11, %v194_v35 }
 0x103   :  { %v143_v40 = vpop.xlane.xlu0 %142  ;;  %v145_v45 = vpop.xlane.xlu1 %144 }
 0x104   :  { %v257_v9 = vmul.f32 %v19577_v38, %v19577_v38  ;;  %v195_v41 = vmul.f32 0.0078125, %v143_v40  ;;  %v258_v10 = vmul.f32 %v19585_v43, %v19585_v43  ;;  %v196_v47 = vmul.f32 0.0078125, %v145_v45 }
 0x106   :  { %158 = vadd.xlane.f32.xlu0 %v19520_v48  ;;  %156 = vadd.xlane.f32.xlu1 %v19522_v49  ;;  %v19593_v50 = vsub.f32 %v19480_v12, %v195_v41  ;;  %v19601_v53 = vsub.f32 %v19482_v13, %v196_v47 }
 0x108   :  { %v259_v11 = vmul.f32 %v19593_v50, %v19593_v50  ;;  %v260_v12 = vmul.f32 %v19601_v53, %v19601_v53 }
 0x10a   :  { %160 = vadd.xlane.f32.xlu1 %v19531_v54  ;;  %287 = vadd.xlane.f32.xlu0 %v251_v51  ;;  %v19595_v51 = vld [vmem:[#allocation2 + $0xf0] sm:$0xff] }
 0x10e   :  { %289 = vadd.xlane.f32.xlu1 %v252_v57  ;;  %162 = vadd.xlane.f32.xlu0 %v19536_v60 }
 0x112   :  { %164 = vadd.xlane.f32.xlu1 %v19542_v2  ;;  %166 = vadd.xlane.f32.xlu0 %v19544_v3 }
 0x116   :  { %168 = vadd.xlane.f32.xlu1 %v19553_v17  ;;  %291 = vadd.xlane.f32.xlu0 %v253_v14 }
 0x11a   :  { %293 = vadd.xlane.f32.xlu1 %v254_v7  ;;  %170 = vadd.xlane.f32.xlu0 %v19563_v23 }
 0x11e   :  { %172 = vadd.xlane.f32.xlu1 %v19571_v30  ;;  %295 = vadd.xlane.f32.xlu0 %v255_v25 }
 0x122   :  { %297 = vadd.xlane.f32.xlu1 %v256_v8  ;;  %174 = vadd.xlane.f32.xlu0 %v19579_v39 }
 0x126   :  { %176 = vadd.xlane.f32.xlu1 %v19587_v44  ;;  %299 = vadd.xlane.f32.xlu0 %v257_v9 }
 0x12a   :  { %301 = vadd.xlane.f32.xlu1 %v258_v10  ;;  %178 = vadd.xlane.f32.xlu0 %v19595_v51 }
 0x12e   :  { %180 = vadd.xlane.f32.xlu1 %v19603_v55  ;;  %303 = vadd.xlane.f32.xlu0 %v259_v11 }
 0x132   :  { %305 = vadd.xlane.f32.xlu1 %v260_v12 }
 0x17f   :  { %v280_v56 = vpop.xlane.xlu0 %279 }
 0x180   :  { %v343_v57 = vmul.f32 0.0078125, %v280_v56 }
 0x182   :  { %v375_v58 = vadd.f32 1e-05, %v343_v57 }
 0x183   :  { %v282_v59 = vpop.xlane.xlu1 %281  ;;  %v147_v61 = vpop.xlane.xlu0 %146 }
 0x184   :  { %v344_v62 = vmul.f32 0.0078125, %v282_v59  ;;  %v197_v63 = vmul.f32 0.0078125, %v147_v61  ;;  %18628 = vrsqrt.f32 %v375_v58 }
 0x186   :  { %v376_v1 = vadd.f32 1e-05, %v344_v62  ;;  %v19609_v13 = vsub.f32 %v19492_v28, %v197_v63 }
 0x187   :  { %v149_v4 = vpop.xlane.xlu1 %148  ;;  %v151_v5 = vpop.xlane.xlu0 %150 }
 0x188   :  { %18630 = vrsqrt.f32 %v376_v1  ;;  %v198_v14 = vmul.f32 0.0078125, %v149_v4  ;;  %v199_v6 = vmul.f32 0.0078125, %v151_v5  ;;  %v261_v16 = vmul.f32 %v19609_v13, %v19609_v13 }
 0x18a   :  { %307 = vadd.xlane.f32.xlu0 %v261_v16  ;;  %v19614_v18 = vsub.f32 %v19501_v34, %v198_v14  ;;  %v19617_v7 = vsub.f32 %v19499_v33, %v199_v6 }
 0x18b   :  { %v153_v20 = vpop.xlane.xlu1 %152  ;;  %v284_v24 = vpop.xlane.xlu0 %283 }
 0x18c   :  { %v200_v25 = vmul.f32 0.0078125, %v153_v20  ;;  %v345_v28 = vmul.f32 0.0078125, %v284_v24  ;;  %v262_v27 = vmul.f32 %v19614_v18, %v19614_v18  ;;  %v263_v31 = vmul.f32 %v19617_v7, %v19617_v7 }
 0x18e   :  { %v377_v8 = vadd.f32 1e-05, %v345_v28  ;;  %309 = vadd.xlane.f32.xlu1 %v262_v27  ;;  %311 = vadd.xlane.f32.xlu0 %v263_v31  ;;  %v19624_v35 = vsub.f32 %v19509_v37, %v200_v25  ;;  %v18629_v33 = vpop.eup %18628 }
 0x18f   :  { %v286_v34 = vpop.xlane.xlu1 %285  ;;  %v155_v40 = vpop.xlane.xlu0 %154  ;;  %v439_v37 = vmul.f32 %v18629_v33, %v19486_v22 }
 0x190   :  { %v346_v9 = vmul.f32 0.0078125, %v286_v34  ;;  %v201_v41 = vmul.f32 0.0078125, %v155_v40  ;;  %v264_v45 = vmul.f32 %v19624_v35, %v19624_v35  ;;  %18632 = vrsqrt.f32 %v377_v8 }
 0x192   :  { %v18631_v10 = vpop.eup %18630  ;;  %v378_v47 = vadd.f32 1e-05, %v346_v9  ;;  %313 = vadd.xlane.f32.xlu1 %v264_v45  ;;  %v19629_v11 = vsub.f32 %v19514_v42, %v201_v41 }
 0x193   :  { %v157_v12 = vpop.xlane.xlu1 %156  ;;  %v159_v56 = vpop.xlane.xlu0 %158  ;;  %v440_v57 = vmul.f32 %v18631_v10, %v19490_v26 }
 0x194   :  { %18634 = vrsqrt.f32 %v378_v47  ;;  %v202_v58 = vmul.f32 0.0078125, %v157_v12  ;;  %v203_v59 = vmul.f32 0.0078125, %v159_v56  ;;  %v265_v61 = vmul.f32 %v19629_v11, %v19629_v11 }
 0x195   :  { %v19635_v62 = vpack.c.bf16 %v440_v57, %v439_v37 }
 0x196   :  { %315 = vadd.xlane.f32.xlu0 %v265_v61  ;;  %v19638_v63 = vsub.f32 %v19522_v49, %v202_v58  ;;  %v19641_v42 = vsub.f32 %v19520_v48, %v203_v59 }
 0x197   :  { %v161_v1 = vpop.xlane.xlu1 %160  ;;  %697 = vmatmul.mubr.bf16.vlgmr.msra.gmra.mrb[0].mxu0 %v19635_v62  ;;  %v288_v22 = vpop.xlane.xlu0 %287 }
 0x198   :  { %v204_v26 = vmul.f32 0.0078125, %v161_v1  ;;  %v347_v4 = vmul.f32 0.0078125, %v288_v22  ;;  %v266_v5 = vmul.f32 %v19638_v63, %v19638_v63  ;;  %v267_v14 = vmul.f32 %v19641_v42, %v19641_v42  ;;  %706 = vmatprep.mubr.bf16.mxu0 %v19355_v19 }
 0x19a   :  { %v379_v6 = vadd.f32 1e-05, %v347_v4  ;;  %317 = vadd.xlane.f32.xlu1 %v266_v5  ;;  %319 = vadd.xlane.f32.xlu0 %v267_v14  ;;  %v19650_v48 = vsub.f32 %v19531_v54, %v204_v26  ;;  %v18633_v20 = vpop.eup %18632 }
 0x19b   :  { %v290_v49 = vpop.xlane.xlu1 %289  ;;  %v163_v16 = vpop.xlane.xlu0 %162  ;;  %v441_v54 = vmul.f32 %v18633_v20, %v19497_v32 }
 0x19c   :  { %v348_v24 = vmul.f32 0.0078125, %v290_v49  ;;  %v205_v25 = vmul.f32 0.0078125, %v163_v16  ;;  %v268_v28 = vmul.f32 %v19650_v48, %v19650_v48  ;;  %18636 = vrsqrt.f32 %v379_v6 }
 0x19e   :  { %v18635_v27 = vpop.eup %18634  ;;  %v380_v31 = vadd.f32 1e-05, %v348_v24  ;;  %321 = vadd.xlane.f32.xlu1 %v268_v28  ;;  %v19655_v8 = vsub.f32 %v19536_v60, %v205_v25 }
 0x19f   :  { %v165_v34 = vpop.xlane.xlu1 %164  ;;  %v167_v40 = vpop.xlane.xlu0 %166  ;;  %v442_v33 = vmul.f32 %v18635_v27, %v19507_v36 }
 0x1a0   :  { %18638 = vrsqrt.f32 %v380_v31  ;;  %v206_v9 = vmul.f32 0.0078125, %v165_v34  ;;  %v207_v41 = vmul.f32 0.0078125, %v167_v40  ;;  %v269_v45 = vmul.f32 %v19655_v8, %v19655_v8 }
 0x1a1   :  { %v19661_v10 = vpack.c.bf16 %v442_v33, %v441_v54 }
 0x1a2   :  { %323 = vadd.xlane.f32.xlu0 %v269_v45  ;;  %v19664_v47 = vsub.f32 %v19542_v2, %v206_v9  ;;  %v19667_v60 = vsub.f32 %v19544_v3, %v207_v41 }
 0x1a3   :  { %v169_v12 = vpop.xlane.xlu1 %168  ;;  %707 = vmatmul.mubr.bf16.gmra.mrb[4].mxu0 %v19661_v10  ;;  %v292_v32 = vpop.xlane.xlu0 %291 }
 0x1a4   :  { %v208_v36 = vmul.f32 0.0078125, %v169_v12  ;;  %v349_v56 = vmul.f32 0.0078125, %v292_v32  ;;  %v270_v37 = vmul.f32 %v19664_v47, %v19664_v47  ;;  %v271_v57 = vmul.f32 %v19667_v60, %v19667_v60  ;;  %716 = vmatprep.mubr.bf16.mxu0 %v19355_v19 }
 0x1a6   :  { %v381_v58 = vadd.f32 1e-05, %v349_v56  ;;  %325 = vadd.xlane.f32.xlu1 %v270_v37  ;;  %327 = vadd.xlane.f32.xlu0 %v271_v57  ;;  %v19676_v2 = vsub.f32 %v19553_v17, %v208_v36  ;;  %v18637_v61 = vpop.eup %18636 }
 0x1a7   :  { %v294_v3 = vpop.xlane.xlu1 %293  ;;  %v171_v59 = vpop.xlane.xlu0 %170  ;;  %v443_v17 = vmul.f32 %v18637_v61, %v19518_v46 }
 0x1a8   :  { %v350_v1 = vmul.f32 0.0078125, %v294_v3  ;;  %v209_v22 = vmul.f32 0.0078125, %v171_v59  ;;  %v272_v26 = vmul.f32 %v19676_v2, %v19676_v2  ;;  %18640 = vrsqrt.f32 %v381_v58 }
 0x1aa   :  { %v18639_v4 = vpop.eup %18638  ;;  %v382_v5 = vadd.f32 1e-05, %v350_v1  ;;  %329 = vadd.xlane.f32.xlu1 %v272_v26  ;;  %v19681_v14 = vsub.f32 %v19563_v23, %v209_v22 }
 0x1ab   :  { %v173_v6 = vpop.xlane.xlu1 %172  ;;  %v296_v49 = vpop.xlane.xlu0 %295  ;;  %v444_v16 = vmul.f32 %v18639_v4, %v19529_v52 }
 0x1ac   :  { %18642 = vrsqrt.f32 %v382_v5  ;;  %v210_v20 = vmul.f32 0.0078125, %v173_v6  ;;  %v351_v24 = vmul.f32 0.0078125, %v296_v49  ;;  %v273_v25 = vmul.f32 %v19681_v14, %v19681_v14 }
 0x1ad   :  { %v19687_v28 = vpack.c.bf16 %v444_v16, %v443_v17 }
 0x1ae   :  { %v383_v27 = vadd.f32 1e-05, %v351_v24  ;;  %331 = vadd.xlane.f32.xlu0 %v273_v25  ;;  %v19690_v31 = vsub.f32 %v19571_v30, %v210_v20 }
 0x1af   :  { %v298_v23 = vpop.xlane.xlu1 %297  ;;  %717 = vmatmul.mubr.bf16.gmra.mrb[8].mxu0 %v19687_v28  ;;  %v175_v34 = vpop.xlane.xlu0 %174 }
 0x1b0   :  { %v352_v46 = vmul.f32 0.0078125, %v298_v23  ;;  %v211_v40 = vmul.f32 0.0078125, %v175_v34  ;;  %v274_v52 = vmul.f32 %v19690_v31, %v19690_v31  ;;  %726 = vmatprep.mubr.bf16.mxu0 %v19355_v19  ;;  %18644 = vrsqrt.f32 %v383_v27 }
 0x1b2   :  { %v384_v54 = vadd.f32 1e-05, %v352_v46  ;;  %333 = vadd.xlane.f32.xlu1 %v274_v52  ;;  %v19697_v33 = vsub.f32 %v19579_v39, %v211_v40  ;;  %v18641_v41 = vpop.eup %18640 }
 0x1b3   :  { %v177_v9 = vpop.xlane.xlu1 %176  ;;  %v300_v30 = vpop.xlane.xlu0 %299  ;;  %v445_v39 = vmul.f32 %v18641_v41, %v19540_v0 }
 0x1b4   :  { %18646 = vrsqrt.f32 %v384_v54  ;;  %v212_v45 = vmul.f32 0.0078125, %v177_v9  ;;  %v353_v12 = vmul.f32 0.0078125, %v300_v30  ;;  %v275_v32 = vmul.f32 %v19697_v33, %v19697_v33  ;;  %v19732_v54 = vld [vmem:[#allocation5 + $0x8] ss:$12 sps:$4 sm:$0xff]  }
 0x1b5   :  { %16923 = vmatprep.subr.bf16.mxu1 %v19732_v54 }
 0x1b6   :  { %v18643_v36 = vpop.eup %18642  ;;  %v385_v56 = vadd.f32 1e-05, %v353_v12  ;;  %335 = vadd.xlane.f32.xlu0 %v275_v32  ;;  %v19702_v37 = vsub.f32 %v19587_v44, %v212_v45 }
 0x1b7   :  { %v302_v57 = vpop.xlane.xlu1 %301  ;;  %v179_v58 = vpop.xlane.xlu0 %178  ;;  %v446_v3 = vmul.f32 %v18643_v36, %v19551_v15 }
 0x1b8   :  { %v354_v59 = vmul.f32 0.0078125, %v302_v57  ;;  %v213_v61 = vmul.f32 0.0078125, %v179_v58  ;;  %v276_v1 = vmul.f32 %v19702_v37, %v19702_v37  ;;  %18648 = vrsqrt.f32 %v385_v56 }
 0x1b9   :  { %v19708_v22 = vpack.c.bf16 %v446_v3, %v445_v39 }
 0x1ba   :  { %v386_v26 = vadd.f32 1e-05, %v354_v59  ;;  %337 = vadd.xlane.f32.xlu1 %v276_v1  ;;  %v19711_v4 = vsub.f32 %v19595_v51, %v213_v61  ;;  %v18645_v0 = vpop.eup %18644 }
 0x1bb   :  { %v181_v44 = vpop.xlane.xlu1 %180  ;;  %727 = vmatmul.mubr.bf16.gmra.mrb[12].mxu0 %v19708_v22  ;;  %v304_v5 = vpop.xlane.xlu0 %303  ;;  %v447_v24 = vmul.f32 %v18645_v0, %v19561_v21 }
 0x1bc   :  { %18650 = vrsqrt.f32 %v386_v26  ;;  %v214_v15 = vmul.f32 0.0078125, %v181_v44  ;;  %v355_v6 = vmul.f32 0.0078125, %v304_v5  ;;  %v277_v49 = vmul.f32 %v19711_v4, %v19711_v4  ;;  %736 = vmatprep.mubr.bf16.mxu0 %v19355_v19 }
 0x1be   :  { %v18647_v17 = vpop.eup %18646  ;;  %v387_v16 = vadd.f32 1e-05, %v355_v6  ;;  %339 = vadd.xlane.f32.xlu0 %v277_v49  ;;  %v19718_v20 = vsub.f32 %v19603_v55, %v214_v15 }
 0x1bf   :  { %v306_v51 = vpop.xlane.xlu1 %305  ;;  %v448_v25 = vmul.f32 %v18647_v17, %v19569_v29 }
 0x1c0   :  { %v356_v27 = vmul.f32 0.0078125, %v306_v51  ;;  %v278_v23 = vmul.f32 %v19718_v20, %v19718_v20  ;;  %18652 = vrsqrt.f32 %v387_v16 }
 0x1c1   :  { %v19724_v34 = vpack.c.bf16 %v448_v25, %v447_v24 }
 0x1c2   :  { %v388_v46 = vadd.f32 1e-05, %v356_v27  ;;  %341 = vadd.xlane.f32.xlu1 %v278_v23  ;;  %v18649_v40 = vpop.eup %18648 }
 0x1c3   :  { %737 = vmatmul.mubr.bf16.gmra.mrb[16].mxu0 %v19724_v34  ;;  %v449_v21 = vmul.f32 %v18649_v40, %v19577_v38  ;;  %v24455_v38 = vmov 0.0  }
 0x1c4   :  { %18654 = vrsqrt.f32 %v388_v46  ;;  %746 = vmatprep.mubr.bf16.mxu0 %v19355_v19  ;;  %17019 = vmatprep.subr.bf16.mxu0 %v24455_v38 }
 0x1c6   :  { %v18651_v55 = vpop.eup %18650 }
 0x1c7   :  { %v450_v29 = vmul.f32 %v18651_v55, %v19585_v43 }
 0x1c9   :  { %v19730_v52 = vpack.c.bf16 %v450_v29, %v449_v21 }
 0x1ca   :  { %v18653_v9 = vpop.eup %18652 }
 0x1cb   :  { %747 = vmatmul.mubr.bf16.gmra.mrb[20].mxu0 %v19730_v52  ;;  %v451_v41 = vmul.f32 %v18653_v9, %v19593_v50 }
 0x1cc   :  { %756 = vmatprep.mubr.bf16.mxu0 %v19355_v19 }
 0x1ce   :  { %v18655_v30 = vpop.eup %18654 }
 0x1cf   :  { %v452_v45 = vmul.f32 %v18655_v30, %v19601_v53 }
 0x1d1   :  { %v19739_v12 = vpack.c.bf16 %v452_v45, %v451_v41 }
 0x1d3   :  { %757 = vmatmul.mubr.bf16.gmra.mrb[24].mxu0 %v19739_v12 }
 0x1d4   :  { %766 = vmatprep.mubr.bf16.mxu0 %v19355_v19 }
 0x217   :  { %v308_v43 = vpop.xlane.xlu0 %307 }
 0x218   :  { %v357_v32 = vmul.f32 0.0078125, %v308_v43 }
 0x21a   :  { %v389_v36 = vadd.f32 1e-05, %v357_v32 }
 0x21b   :  { %v310_v56 = vpop.xlane.xlu1 %309  ;;  %v312_v57 = vpop.xlane.xlu0 %311 }
 0x21c   :  { %v358_v58 = vmul.f32 0.0078125, %v310_v56  ;;  %18656 = vrsqrt.f32 %v389_v36  ;;  %v359_v50 = vmul.f32 0.0078125, %v312_v57 }
 0x21e   :  { %v390_v39 = vadd.f32 1e-05, %v358_v58  ;;  %v391_v59 = vadd.f32 1e-05, %v359_v50 }
 0x21f   :  { %v314_v3 = vpop.xlane.xlu1 %313 }
 0x220   :  { %18658 = vrsqrt.f32 %v390_v39  ;;  %v360_v53 = vmul.f32 0.0078125, %v314_v3 }
 0x222   :  { %v392_v61 = vadd.f32 1e-05, %v360_v53 }
 0x223   :  { %v316_v1 = vpop.xlane.xlu0 %315 }
 0x224   :  { %18660 = vrsqrt.f32 %v392_v61  ;;  %v361_v26 = vmul.f32 0.0078125, %v316_v1 }
 0x225   :  { %18662 = vrsqrt.f32 %v391_v59 }
 0x226   :  { %v18657_v5 = vpop.eup %18656  ;;  %v393_v6 = vadd.f32 1e-05, %v361_v26 }
 0x227   :  { %v318_v44 = vpop.xlane.xlu1 %317  ;;  %v320_v17 = vpop.xlane.xlu0 %319  ;;  %v453_v51 = vmul.f32 %v18657_v5, %v19609_v13 }
 0x228   :  { %v362_v0 = vmul.f32 0.0078125, %v318_v44  ;;  %v363_v27 = vmul.f32 0.0078125, %v320_v17 }
 0x22a   :  { %v18659_v15 = vpop.eup %18658  ;;  %v394_v49 = vadd.f32 1e-05, %v362_v0  ;;  %v395_v9 = vadd.f32 1e-05, %v363_v27 }
 0x22b   :  { %v322_v16 = vpop.xlane.xlu1 %321  ;;  %v454_v24 = vmul.f32 %v18659_v15, %v19614_v18 }
 0x22c   :  { %18664 = vrsqrt.f32 %v394_v49  ;;  %v364_v25 = vmul.f32 0.0078125, %v322_v16 }
 0x22d   :  { %v19746_v23 = vpack.c.bf16 %v454_v24, %v453_v51  ;;  %18666 = vrsqrt.f32 %v393_v6 }
 0x22e   :  { %v18661_v46 = vpop.eup %18660  ;;  %v396_v21 = vadd.f32 1e-05, %v364_v25 }
 0x22f   :  { %767 = vmatmul.mubr.bf16.gmra.mrb[28].mxu0 %v19746_v23  ;;  %v324_v40 = vpop.xlane.xlu0 %323  ;;  %v18663_v55 = vpop.eup %18662  ;;  %v456_v13 = vmul.f32 %v18661_v46, %v19624_v35  ;;  %v18613_v46 = vld [vmem:[#allocation5 + $0x20] ss:$12 sps:$4 sm:$0xff]  }
 0x230   :  { %v365_v29 = vmul.f32 0.0078125, %v324_v40  ;;  %776 = vmatprep.mubr.bf16.mxu0 %v19355_v19  ;;  %v455_v45 = vmul.f32 %v18663_v55, %v19617_v7  ;;  %18668 = vrsqrt.f32 %v396_v21 }
 0x231   :  { %18670 = vrsqrt.f32 %v395_v9 }
 0x232   :  { %v397_v30 = vadd.f32 1e-05, %v365_v29  ;;  %v19752_v32 = vpack.c.bf16 %v456_v13, %v455_v45 }
 0x233   :  { %v326_v18 = vpop.xlane.xlu1 %325  ;;  %v328_v41 = vpop.xlane.xlu0 %327 }
 0x234   :  { %v366_v43 = vmul.f32 0.0078125, %v326_v18  ;;  %18672 = vrsqrt.f32 %v397_v30  ;;  %v367_v57 = vmul.f32 0.0078125, %v328_v41 }
 0x236   :  { %v18665_v36 = vpop.eup %18664  ;;  %v398_v56 = vadd.f32 1e-05, %v366_v43  ;;  %v399_v7 = vadd.f32 1e-05, %v367_v57 }
 0x237   :  { %v330_v58 = vpop.xlane.xlu1 %329  ;;  %777 = vmatmul.mubr.bf16.gmra.mrb[32].mxu0 %v19752_v32  ;;  %v18667_v39 = vpop.eup %18666  ;;  %v458_v50 = vmul.f32 %v18665_v36, %v19638_v63 }
 0x238   :  { %18674 = vrsqrt.f32 %v398_v56  ;;  %v368_v35 = vmul.f32 0.0078125, %v330_v58  ;;  %786 = vmatprep.mubr.bf16.mxu0 %v19355_v19  ;;  %v457_v59 = vmul.f32 %v18667_v39, %v19629_v11 }
 0x23a   :  { %v400_v3 = vadd.f32 1e-05, %v368_v35  ;;  %v19758_v61 = vpack.c.bf16 %v458_v50, %v457_v59  ;;  %v18669_v1 = vpop.eup %18668  ;;  %v18617_v50 = vld [vmem:[#allocation5 + $0x80] ss:$12 sps:$4 sm:$0xff]   ;;  %v521_v59 = vlaneseq }
 0x23b   :  { %v332_v53 = vpop.xlane.xlu0 %331  ;;  %v18671_v44 = vpop.eup %18670  ;;  %v460_v63 = vmul.f32 %v18669_v1, %v19650_v48 }
 0x23c   :  { %18676 = vrsqrt.f32 %v400_v3  ;;  %v369_v26 = vmul.f32 0.0078125, %v332_v53  ;;  %v459_v16 = vmul.f32 %v18671_v44, %v19641_v42  ;;  %v18618_v53 = vld [vmem:[#allocation5 + $0x98] ss:$12 sps:$4 sm:$0xff]  }
 0x23d   :  { %18678 = vrsqrt.f32 %v399_v7 }
 0x23e   :  { %v18673_v0 = vpop.eup %18672  ;;  %v401_v49 = vadd.f32 1e-05, %v369_v26  ;;  %v19766_v25 = vpack.c.bf16 %v460_v63, %v459_v16  ;;  %v18619_v26 = vld [vmem:[#allocation5 + $0xb0] ss:$12 sps:$4 sm:$0xff]  }
 0x23f   :  { %v334_v5 = vpop.xlane.xlu1 %333  ;;  %787 = vmatmul.mubr.bf16.gmra.mrb[36].mxu0 %v19758_v61  ;;  %v461_v51 = vmul.f32 %v18673_v0, %v19655_v8  ;;  %v19794_v0 = vshrl.u32 %v521_v59, 7 }
 0x240   :  { %v370_v15 = vmul.f32 0.0078125, %v334_v5  ;;  %796 = vmatprep.mubr.bf16.mxu0 %v19355_v19 }
 0x242   :  { %v18675_v6 = vpop.eup %18674  ;;  %v402_v17 = vadd.f32 1e-05, %v370_v15  ;;  %v527_v15 = vsub.s32 1, %v19794_v0 }
 0x243   :  { %v336_v11 = vpop.xlane.xlu0 %335  ;;  %v462_v24 = vmul.f32 %v18675_v6, %v19664_v47  ;;  %v18614_v47 = vld [vmem:[#allocation5 + $0x38] ss:$12 sps:$4 sm:$0xff]   ;;  %v19801_v6 = vld [vmem:[#allocation7] sm:$0x7] }
 0x244   :  { %18680 = vrsqrt.f32 %v402_v17  ;;  %v371_v55 = vmul.f32 0.0078125, %v336_v11 }
 0x245   :  { %v19768_v27 = vpack.c.bf16 %v462_v24, %v461_v51  ;;  %18682 = vrsqrt.f32 %v401_v49 }
 0x246   :  { %v18677_v40 = vpop.eup %18676  ;;  %v403_v29 = vadd.f32 1e-05, %v371_v55 }
 0x247   :  { %v338_v48 = vpop.xlane.xlu1 %337  ;;  %797 = vmatmul.mubr.bf16.gmra.mrb[40].mxu0 %v19766_v25  ;;  %807 = vmatmul.mubr.bf16.vlgmr.msra.gmra.mrb[0].mxu1 %v19768_v27  ;;  %v18679_v21 = vpop.eup %18678  ;;  %v464_v8 = vmul.f32 %v18677_v40, %v19676_v2 }
 0x248   :  { %v372_v42 = vmul.f32 0.0078125, %v338_v48  ;;  %16924 = vmatpush3.bf16.msra.mxu1 %v19732_v54  ;;  %816 = vmatprep.mubr.bf16.mxu1 %v19355_v19  ;;  %v463_v30 = vmul.f32 %v18679_v21, %v19667_v60  ;;  %v18615_v54 = vld [vmem:[#allocation5 + $0x50] ss:$12 sps:$4 sm:$0xff]   ;;  %v18616_v60 = vld [vmem:[#allocation5 + $0x68] ss:$12 sps:$4 sm:$0xff]  }
 0x249   :  { %16925 = vmatprep.subr.bf16.mxu1 %v18613_v46  ;;  %17021 = vmatprep.mubr.msk.bf16.mxu0 %vm19357_vm0, %v24455_v38 }
 0x24a   :  { %v404_v9 = vadd.f32 1e-05, %v372_v42  ;;  %v19778_v18 = vpack.c.bf16 %v464_v8, %v463_v30 }
 0x24b   :  { %v340_v13 = vpop.xlane.xlu0 %339 }
 0x24c   :  { %18684 = vrsqrt.f32 %v404_v9  ;;  %16926 = vmatpush3.bf16.msra.mxu1 %v18613_v46  ;;  %v373_v2 = vmul.f32 0.0078125, %v340_v13 }
 0x24d   :  { %16927 = vmatprep.subr.bf16.mxu1 %v18614_v47  ;;  %18686 = vrsqrt.f32 %v403_v29 }
 0x24e   :  { %v18681_v41 = vpop.eup %18680  ;;  %v405_v57 = vadd.f32 1e-05, %v373_v2 }
 0x24f   :  { %v342_v45 = vpop.xlane.xlu1 %341  ;;  %817 = vmatmul.mubr.bf16.gmra.mrb[4].mxu1 %v19778_v18  ;;  %v18683_v43 = vpop.eup %18682  ;;  %v466_v56 = vmul.f32 %v18681_v41, %v19690_v31 }
 0x250   :  { %v374_v36 = vmul.f32 0.0078125, %v342_v45  ;;  %16928 = vmatpush3.bf16.msra.mxu1 %v18614_v47  ;;  %826 = vmatprep.mubr.bf16.mxu1 %v19355_v19  ;;  %v465_v39 = vmul.f32 %v18683_v43, %v19681_v14 }
 0x251   :  { %16929 = vmatprep.subr.bf16.mxu1 %v18615_v54 }
 0x252   :  { %v406_v58 = vadd.f32 1e-05, %v374_v36  ;;  %v19784_v35 = vpack.c.bf16 %v466_v56, %v465_v39 }
 0x254   :  { %18688 = vrsqrt.f32 %v406_v58  ;;  %16930 = vmatpush3.bf16.msra.mxu1 %v18615_v54 }
 0x255   :  { %16931 = vmatprep.subr.bf16.mxu1 %v18616_v60  ;;  %18690 = vrsqrt.f32 %v405_v57 }
 0x256   :  { %v18685_v7 = vpop.eup %18684 }
 0x257   :  { %827 = vmatmul.mubr.bf16.gmra.mrb[8].mxu1 %v19784_v35  ;;  %v18687_v3 = vpop.eup %18686  ;;  %v468_v31 = vmul.f32 %v18685_v7, %v19702_v37 }
 0x258   :  { %16932 = vmatpush3.bf16.msra.mxu1 %v18616_v60  ;;  %836 = vmatprep.mubr.bf16.mxu1 %v19355_v19  ;;  %v467_v14 = vmul.f32 %v18687_v3, %v19697_v33 }
 0x259   :  { %16933 = vmatprep.subr.bf16.mxu1 %v18617_v50 }
 0x25a   :  { %v19790_v1 = vpack.c.bf16 %v468_v31, %v467_v14 }
 0x25c   :  { %16934 = vmatpush3.bf16.msra.mxu1 %v18617_v50 }
 0x25d   :  { %16935 = vmatprep.subr.bf16.mxu1 %v18618_v53 }
 0x25e   :  { %v18689_v44 = vpop.eup %18688 }
 0x25f   :  { %837 = vmatmul.mubr.bf16.gmra.mrb[12].mxu1 %v19790_v1  ;;  %v18691_v5 = vpop.eup %18690  ;;  %v470_v37 = vmul.f32 %v18689_v44, %v19718_v20 }
 0x260   :  { %16936 = vmatpush3.bf16.msra.mxu1 %v18618_v53  ;;  %846 = vmatprep.mubr.bf16.mxu1 %v19355_v19  ;;  %v469_v33 = vmul.f32 %v18691_v5, %v19711_v4  ;;  %v19807_v19 = vrot.slane %v19801_v6, %v527_v15 }
 0x261   :  { %16937 = vmatprep.subr.bf16.mxu1 %v18619_v26 }
 0x262   :  { %v19799_v63 = vpack.c.bf16 %v470_v37, %v469_v33 }
 0x264   :  { %16938 = vmatpush3.bf16.msra.mxu1 %v18619_v26 }
 0x265   :  { %16971 = vmatprep.subr.bf16.mxu1 %v24455_v38 }
 0x267   :  { %847 = vmatmul.mubr.bf16.gmra.mrb[16].mxu1 %v19799_v63 }
 0x268   :  { %16939 = vmatprep.mubr.bf16.mxu1 %v19635_v62 }
 0x26a   :  { %v19809_v20 = vpop.f32.mrb[0].mxu0 }
 0x26b   :  { %v700_v49 = vpop.f32.mrb[1].mxu0 }
 0x26c   :  { %v701_v4 = vadd.f32 %v700_v49, %v19807_v19  ;;  %v19812_v17 = vpop.f32.mrb[2].mxu0 }
 0x26d   :  { %v704_v11 = vpop.f32.mrb[3].mxu0 }
 0x26e   :  { %v19814_v16 = vpack.c.bf16 %v701_v4, %v701_v4  ;;  %v705_v56 = vadd.f32 %v704_v11, %v19807_v19 }
 0x26f   :  { %16940 = vmatmul.mubr.bf16.vlgmr.msra.gmra.mrb[20].mxu1 %v19661_v10 }
 0x270   :  { %16943 = vmatprep.mubr.bf16.mxu1 %v19687_v28  ;;  %v1311_v62 = vsel %vm1306_vm1, %v19814_v16, 0  ;;  %v19904_v3 = vpack.c.bf16 %v705_v56, %v705_v56 }
 0x271   :  { %16972 = vmatpush3.bf16.xpose.msra.mxu1 %v1311_v62 }
 0x272   :  { %16977 = vmatprep.subr.bf16.mxu1 %v24455_v38 }
 0x276   :  { %v19821_v51 = vpop.f32.mrb[4].mxu0 }
 0x277   :  { %v19823_v24 = vpop.f32.mrb[5].mxu0  ;;  %16944 = vmatmul.mubr.bf16.gmra.mrb[24].mxu1 %v19708_v22 }
 0x278   :  { %v19826_v46 = vpop.f32.mrb[6].mxu0  ;;  %16947 = vmatprep.mubr.bf16.mxu1 %v19724_v34  ;;  %v711_v59 = vadd.f32 %v19823_v24, %v19807_v19 }
 0x279   :  { %v19829_v40 = vpop.f32.mrb[7].mxu0 }
 0x27a   :  { %v19929_v5 = vpack.c.bf16 %v711_v59, %v711_v59  ;;  %v715_v33 = vadd.f32 %v19829_v40, %v19807_v19 }
 0x27c   :  { %24688 = vst [vmem:[#allocation22_spill] sm:$0xff] %v19929_v5  ;;  %v1403_v15 = vsel %vm1306_vm1, %v19929_v5, 0 }
 0x27f   :  { %16948 = vmatmul.mubr.bf16.gmra.mrb[28].mxu1 %v19730_v52 }
 0x280   :  { %16951 = vmatprep.mubr.bf16.mxu1 %v19739_v12 }
 0x282   :  { %v19833_v10 = vpop.f32.mrb[8].mxu0 }
 0x283   :  { %v19835_v28 = vpop.f32.mrb[9].mxu0 }
 0x284   :  { %v19837_v55 = vpop.f32.mrb[10].mxu0  ;;  %v721_v4 = vadd.f32 %v19835_v28, %v19807_v19 }
 0x285   :  { %v19839_v48 = vpop.f32.mrb[11].mxu0 }
 0x286   :  { %v19963_v62 = vpack.c.bf16 %v721_v4, %v721_v4  ;;  %v725_v24 = vadd.f32 %v19839_v48, %v19807_v19 }
 0x287   :  { %16952 = vmatmul.mubr.bf16.gmra.mrb[32].mxu1 %v19746_v23  ;;  %v523_v23 = vsub.s32 0, %v19794_v0 }
 0x288   :  { %16955 = vmatprep.mubr.bf16.mxu1 %v19752_v32  ;;  %24692 = vst [vmem:[#allocation26_spill] sm:$0xff] %v19963_v62  ;;  %v1495_v40 = vsel %vm1306_vm1, %v19963_v62, 0  ;;  %v19978_v28 = vpack.c.bf16 %v725_v24, %v725_v24 }
 0x28a   :  { %24694 = vst [vmem:[#allocation28_spill] sm:$0xff] %v19978_v28 }
 0x28e   :  { %v19843_v22 = vpop.f32.mrb[12].mxu0 }
 0x28f   :  { %v19845_v34 = vpop.f32.mrb[13].mxu0  ;;  %16956 = vmatmul.mubr.bf16.gmra.mrb[36].mxu1 %v19758_v61 }
 0x290   :  { %v19848_v52 = vpop.f32.mrb[14].mxu0  ;;  %16959 = vmatprep.mubr.bf16.mxu1 %v19766_v25  ;;  %v19864_v25 = vrot.slane %v19801_v6, %v523_v23  ;;  %v731_v48 = vadd.f32 %v19845_v34, %v19807_v19 }
 0x291   :  { %v19851_v12 = vpop.f32.mrb[15].mxu0 }
 0x292   :  { %v699_v39 = vadd.f32 %v19809_v20, %v19864_v25  ;;  %v703_v26 = vadd.f32 %v19812_v17, %v19864_v25  ;;  %v19948_v20 = vpack.c.bf16 %v715_v33, %v715_v33  ;;  %v713_v11 = vadd.f32 %v19826_v46, %v19864_v25 }
 0x293   :  { %v719_v46 = vadd.f32 %v19833_v10, %v19864_v25  ;;  %v723_v10 = vadd.f32 %v19837_v55, %v19864_v25  ;;  %v19993_v23 = vpack.c.bf16 %v731_v48, %v731_v48  ;;  %v735_v34 = vadd.f32 %v19851_v12, %v19807_v19 }
 0x294   :  { %v19910_v53 = vpack.c.bf16 %v699_v39, %v699_v39  ;;  %v19933_v37 = vpack.c.bf16 %v703_v26, %v703_v26  ;;  %24690 = vst [vmem:[#allocation24_spill] sm:$0xff] %v19948_v20  ;;  %v1449_v17 = vsel %vm1306_vm1, %v19948_v20, 0  ;;  %v729_v55 = vadd.f32 %v19843_v22, %v19864_v25 }
 0x295   :  { %24696 = vst [vmem:[#allocation30_spill] sm:$0xff] %v19993_v23  ;;  %v733_v22 = vadd.f32 %v19848_v52, %v19864_v25 }
 0x296   :  { %v738_v21 = vpop.f32.mrb[16].mxu0  ;;  %24689 = vst [vmem:[#allocation23_spill] sm:$0xff] %v19933_v37 }
 0x297   :  { %v740_v42 = vpop.f32.mrb[17].mxu0  ;;  %16960 = vmatmul.mubr.bf16.gmra.mrb[40].mxu1 %v19768_v27  ;;  %v739_v27 = vadd.f32 %v738_v21, %v19864_v25  ;;  %v19980_v21 = vpack.c.bf16 %v719_v46, %v719_v46 }
 0x298   :  { %v741_v32 = vadd.f32 %v740_v42, %v19807_v19  ;;  %v19856_v8 = vpop.f32.mrb[18].mxu0  ;;  %16963 = vmatprep.mubr.bf16.mxu1 %v19778_v18  ;;  %v1541_v42 = vsel %vm1306_vm1, %v19978_v28, 0 }
 0x299   :  { %v19859_v47 = vpop.f32.mrb[19].mxu0  ;;  %v19877_v41 = vpack.c.bf16 %v739_v27, %v739_v27  ;;  %24695 = vst [vmem:[#allocation29_spill] sm:$0xff] %v19980_v21  ;;  %v20008_v27 = vpack.c.bf16 %v735_v34, %v735_v34  ;;  %v743_v52 = vadd.f32 %v19856_v8, %v19864_v25 }
 0x29a   :  { %v19861_v61 = vpack.c.bf16 %v741_v32, %v741_v32  ;;  %v19995_v32 = vpack.c.bf16 %v723_v10, %v723_v10  ;;  %v745_v12 = vadd.f32 %v19859_v47, %v19807_v19 }
 0x29b   :  { %24683 = vst [vmem:[#allocation17_spill] sm:$0xff] %v19877_v41  ;;  %24698 = vst [vmem:[#allocation32_spill] sm:$0xff] %v20008_v27  ;;  %v20040_v56 = vpack.c.bf16 %v743_v52, %v743_v52 }
 0x29c   :  { %24682 = vst [vmem:[#allocation16_spill] sm:$0xff] %v19861_v61  ;;  %v1679_v29 = vsel %vm1306_vm1, %v19861_v61, 0  ;;  %24697 = vst [vmem:[#allocation31_spill] sm:$0xff] %v19995_v32 }
 0x29d   :  { %17020 = vmatpush3.bf16.xpose.msra.mxu0 %v1679_v29  ;;  %v1587_v29 = vsel %vm1306_vm1, %v19993_v23, 0  ;;  %24703 = vst [vmem:[#allocation37_spill] sm:$0xff] %v20040_v56 }
 0x29e   :  { %v748_v9 = vpop.f32.mrb[20].mxu0  ;;  %17031 = vmatprep.subr.bf16.mxu0 %v24455_v38 }
 0x29f   :  { %v750_v13 = vpop.f32.mrb[21].mxu0  ;;  %16964 = vmatmul.mubr.bf16.gmra.mrb[44].mxu1 %v19784_v35  ;;  %v749_v43 = vadd.f32 %v748_v9, %v19864_v25  ;;  %v20010_v9 = vpack.c.bf16 %v729_v55, %v729_v55 }
 0x2a0   :  { %v751_v30 = vadd.f32 %v750_v13, %v19807_v19  ;;  %v19872_v18 = vpop.f32.mrb[22].mxu0  ;;  %16967 = vmatprep.mubr.bf16.mxu1 %v19790_v1  ;;  %v1357_v1 = vsel %vm1306_vm1, %v19904_v3, 0  ;;  %v1633_v13 = vsel %vm1306_vm1, %v20008_v27, 0 }
 0x2a1   :  { %v19875_v54 = vpop.f32.mrb[23].mxu0  ;;  %v19900_v50 = vpack.c.bf16 %v749_v43, %v749_v43  ;;  %24699 = vst [vmem:[#allocation33_spill] sm:$0xff] %v20010_v9  ;;  %v753_v8 = vadd.f32 %v19872_v18, %v19864_v25 }
 0x2a2   :  { %v19879_v2 = vpack.c.bf16 %v751_v30, %v751_v30  ;;  %v20023_v30 = vpack.c.bf16 %v745_v12, %v745_v12  ;;  %v755_v47 = vadd.f32 %v19875_v54, %v19807_v19 }
 0x2a3   :  { %24685 = vst [vmem:[#allocation19_spill] sm:$0xff] %v19900_v50  ;;  %v20055_v39 = vpack.c.bf16 %v753_v8, %v753_v8 }
 0x2a4   :  { %24684 = vst [vmem:[#allocation18_spill] sm:$0xff] %v19879_v2  ;;  %17022 = vmatmul.mubr.msk.bf16.vlgmr.msra.gmra.mrb[44].mxu0 %vm1306_vm1, %v19877_v41  ;;  %v1771_v45 = vsel %vm1306_vm1, %v19879_v2, 0  ;;  %24700 = vst [vmem:[#allocation34_spill] sm:$0xff] %v20023_v30  ;;  %v1725_v43 = vsel %vm1306_vm1, %v20023_v30, 0 }
 0x2a5   :  { %17032 = vmatpush3.bf16.xpose.msra.mxu0 %v1771_v45  ;;  %17033 = vmatprep.mubr.msk.bf16.mxu0 %vm19357_vm0, %v24455_v38  ;;  %v20025_v45 = vpack.c.bf16 %v733_v22, %v733_v22  ;;  %24705 = vst [vmem:[#allocation39_spill] sm:$0xff] %v20055_v39 }
 0x2a6   :  { %v758_v36 = vpop.f32.mrb[24].mxu0  ;;  %17043 = vmatprep.subr.bf16.mxu0 %v24455_v38 }
 0x2a7   :  { %v760_v60 = vpop.f32.mrb[25].mxu0  ;;  %16968 = vmatmul.mubr.bf16.gmra.mrb[48].mxu1 %v19799_v63  ;;  %v759_v14 = vadd.f32 %v758_v36, %v19864_v25  ;;  %v709_v63 = vadd.f32 %v19821_v51, %v19864_v25  ;;  %v19965_v51 = vpack.c.bf16 %v713_v11, %v713_v11  ;;  %24701 = vst [vmem:[#allocation35_spill] sm:$0xff] %v20025_v45 }
 0x2a8   :  { %v761_v57 = vadd.f32 %v760_v60, %v19807_v19  ;;  %v19892_v58 = vpop.f32.mrb[26].mxu0  ;;  %16973 = vmatprep.mubr.msk.bf16.mxu1 %vm19357_vm0, %v24455_v38  ;;  %v20038_v36 = vpack.c.bf16 %v755_v47, %v755_v47 }
 0x2a9   :  { %v19898_v35 = vpop.f32.mrb[27].mxu0  ;;  %v19927_v44 = vpack.c.bf16 %v759_v14, %v759_v14  ;;  %v19950_v49 = vpack.c.bf16 %v709_v63, %v709_v63  ;;  %24693 = vst [vmem:[#allocation27_spill] sm:$0xff] %v19965_v51 }
 0x2aa   :  { %v19902_v7 = vpack.c.bf16 %v761_v57, %v761_v57  ;;  %24702 = vst [vmem:[#allocation36_spill] sm:$0xff] %v20038_v36  ;;  %v765_v54 = vadd.f32 %v19898_v35, %v19807_v19  ;;  %v1817_v60 = vsel %vm1306_vm1, %v20038_v36, 0 }
 0x2ab   :  { %24687 = vst [vmem:[#allocation21_spill] sm:$0xff] %v19927_v44  ;;  %24691 = vst [vmem:[#allocation25_spill] sm:$0xff] %v19950_v49 }
 0x2ac   :  { %24686 = vst [vmem:[#allocation20_spill] sm:$0xff] %v19902_v7  ;;  %17034 = vmatmul.mubr.msk.bf16.vlgmr.msra.gmra.mrb[48].mxu0 %vm1306_vm1, %v19900_v50  ;;  %v1863_v31 = vsel %vm1306_vm1, %v19902_v7, 0  ;;  %v20053_v57 = vpack.c.bf16 %v765_v54, %v765_v54 }
 0x2ad   :  { %17044 = vmatpush3.bf16.xpose.msra.mxu0 %v1863_v31  ;;  %17045 = vmatprep.mubr.msk.bf16.mxu0 %vm19357_vm0, %v24455_v38  ;;  %v763_v31 = vadd.f32 %v19892_v58, %v19864_v25 }
 0x2ae   :  { %17055 = vmatprep.subr.bf16.mxu0 %v24455_v38  ;;  %24704 = vst [vmem:[#allocation38_spill] sm:$0xff] %v20053_v57  ;;  %v1909_v35 = vsel %vm1306_vm1, %v20053_v57, 0 }
 0x2af   :  { %16974 = vmatmul.mubr.msk.bf16.vlgmr.msra.gmra.mrb[52].mxu1 %vm1306_vm1, %v19910_v53  ;;  %v20066_v18 = vpack.c.bf16 %v763_v31, %v763_v31 }
 0x2b0   :  { %16978 = vmatpush3.bf16.xpose.msra.mxu1 %v1357_v1  ;;  %16979 = vmatprep.mubr.msk.bf16.mxu1 %vm19357_vm0, %v24455_v38 }
 0x2b1   :  { %16983 = vmatprep.subr.bf16.mxu1 %v24455_v38  ;;  %24706 = vst [vmem:[#allocation40_spill] sm:$0xff] %v20066_v18 }
 0x2b4   :  { %17046 = vmatmul.mubr.msk.bf16.vlgmr.msra.gmra.mrb[52].mxu0 %vm1306_vm1, %v19927_v44 }
 0x2b5   :  { %17057 = vmatprep.mubr.msk.bf16.mxu0 %vm19357_vm0, %v24455_v38 }
 0x2b7   :  { %16980 = vmatmul.mubr.msk.bf16.vlgmr.msra.gmra.mrb[56].mxu1 %vm1306_vm1, %v19933_v37 }
 0x2b8   :  { %16984 = vmatpush3.bf16.xpose.msra.mxu1 %v1403_v15  ;;  %16985 = vmatprep.mubr.msk.bf16.mxu1 %vm19357_vm0, %v24455_v38 }
 0x2b9   :  { %16989 = vmatprep.subr.bf16.mxu1 %v24455_v38 }
 0x2bf   :  { %16986 = vmatmul.mubr.msk.bf16.vlgmr.msra.gmra.mrb[60].mxu1 %vm1306_vm1, %v19950_v49 }
 0x2c0   :  { %16990 = vmatpush3.bf16.xpose.msra.mxu1 %v1449_v17  ;;  %16991 = vmatprep.mubr.msk.bf16.mxu1 %vm19357_vm0, %v24455_v38 }
 0x2c1   :  { %16995 = vmatprep.subr.bf16.mxu1 %v24455_v38 }
 0x2c7   :  { %16992 = vmatmul.mubr.msk.bf16.vlgmr.msra.gmra.mrb[64].mxu1 %vm1306_vm1, %v19965_v51 }
 0x2c8   :  { %16996 = vmatpush3.bf16.xpose.msra.mxu1 %v1495_v40  ;;  %16997 = vmatprep.mubr.msk.bf16.mxu1 %vm19357_vm0, %v24455_v38 }
 0x2c9   :  { %17001 = vmatprep.subr.bf16.mxu1 %v24455_v38 }
 0x2cf   :  { %16998 = vmatmul.mubr.msk.bf16.vlgmr.msra.gmra.mrb[68].mxu1 %vm1306_vm1, %v19980_v21 }
 0x2d0   :  { %17002 = vmatpush3.bf16.xpose.msra.mxu1 %v1541_v42  ;;  %17003 = vmatprep.mubr.msk.bf16.mxu1 %vm19357_vm0, %v24455_v38 }
 0x2d1   :  { %17007 = vmatprep.subr.bf16.mxu1 %v24455_v38 }
 0x2d7   :  { %17004 = vmatmul.mubr.msk.bf16.vlgmr.msra.gmra.mrb[72].mxu1 %vm1306_vm1, %v19995_v32 }
 0x2d8   :  { %17008 = vmatpush3.bf16.xpose.msra.mxu1 %v1587_v29  ;;  %17009 = vmatprep.mubr.msk.bf16.mxu1 %vm19357_vm0, %v24455_v38 }
 0x2d9   :  { %17013 = vmatprep.subr.bf16.mxu1 %v24455_v38 }
 0x2df   :  { %17010 = vmatmul.mubr.msk.bf16.vlgmr.msra.gmra.mrb[76].mxu1 %vm1306_vm1, %v20010_v9 }
 0x2e0   :  { %17014 = vmatpush3.bf16.xpose.msra.mxu1 %v1633_v13  ;;  %17015 = vmatprep.mubr.msk.bf16.mxu1 %vm19357_vm0, %v24455_v38 }
 0x2e1   :  { %17025 = vmatprep.subr.bf16.mxu1 %v24455_v38 }
 0x2e7   :  { %17016 = vmatmul.mubr.msk.bf16.vlgmr.msra.gmra.mrb[80].mxu1 %vm1306_vm1, %v20025_v45 }
 0x2e8   :  { %17026 = vmatpush3.bf16.xpose.msra.mxu1 %v1725_v43  ;;  %17027 = vmatprep.mubr.msk.bf16.mxu1 %vm19357_vm0, %v24455_v38 }
 0x2e9   :  { %17037 = vmatprep.subr.bf16.mxu1 %v24455_v38 }
 0x2ef   :  { %17028 = vmatmul.mubr.msk.bf16.vlgmr.msra.gmra.mrb[84].mxu1 %vm1306_vm1, %v20040_v56 }
 0x2f0   :  { %17038 = vmatpush3.bf16.xpose.msra.mxu1 %v1817_v60  ;;  %17039 = vmatprep.mubr.msk.bf16.mxu1 %vm19357_vm0, %v24455_v38 }
 0x2f1   :  { %17049 = vmatprep.subr.bf16.mxu1 %v24455_v38 }
 0x2f7   :  { %17040 = vmatmul.mubr.msk.bf16.vlgmr.msra.gmra.mrb[88].mxu1 %vm1306_vm1, %v20055_v39 }
 0x2f8   :  { %17050 = vmatpush3.bf16.xpose.msra.mxu1 %v1909_v35  ;;  %17051 = vmatprep.mubr.msk.bf16.mxu1 %vm19357_vm0, %v24455_v38 }
 0x2f9   :  { %17061 = vmatprep.subr.bf16.mxu1 %v24455_v38 }
 0x2ff   :  { %17052 = vmatmul.mubr.msk.bf16.vlgmr.msra.gmra.mrb[92].mxu1 %vm1306_vm1, %v20066_v18 }
 0x300   :  { %17063 = vmatprep.mubr.msk.bf16.mxu1 %vm19357_vm0, %v24455_v38 }
 0x302   :  { %v768_v14 = vpop.f32.mrb[28].mxu0 }
 0x303   :  { %v770_v59 = vpop.f32.mrb[29].mxu0  ;;  %v769_v17 = vadd.f32 %v768_v14, %v19864_v25 }
 0x304   :  { %v771_v1 = vadd.f32 %v770_v59, %v19807_v19  ;;  %v772_v26 = vpop.f32.mrb[30].mxu0 }
 0x305   :  { %v774_v33 = vpop.f32.mrb[31].mxu0  ;;  %v773_v46 = vadd.f32 %v772_v26, %v19864_v25  ;;  %v20087_v34 = vpack.c.bf16 %v769_v17, %v769_v17 }
 0x306   :  { %v20073_v15 = vpack.c.bf16 %v771_v1, %v771_v1  ;;  %v775_v58 = vadd.f32 %v774_v33, %v19807_v19 }
 0x307   :  { %24709 = vst [vmem:[#allocation43_spill] sm:$0xff] %v20087_v34  ;;  %v20092_v12 = vpack.c.bf16 %v773_v46, %v773_v46 }
 0x308   :  { %24707 = vst [vmem:[#allocation41_spill] sm:$0xff] %v20073_v15  ;;  %v20076_v63 = vpack.c.bf16 %v775_v58, %v775_v58  ;;  %v1955_v4 = vsel %vm1306_vm1, %v20073_v15, 0 }
 0x309   :  { %17056 = vmatpush3.bf16.xpose.msra.mxu0 %v1955_v4  ;;  %24711 = vst [vmem:[#allocation45_spill] sm:$0xff] %v20092_v12 }
 0x30a   :  { %24708 = vst [vmem:[#allocation42_spill] sm:$0xff] %v20076_v63  ;;  %v778_v11 = vpop.f32.mrb[32].mxu0  ;;  %v2001_v24 = vsel %vm1306_vm1, %v20076_v63, 0  ;;  %17067 = vmatprep.subr.bf16.mxu0 %v24455_v38 }
 0x30b   :  { %v780_v40 = vpop.f32.mrb[33].mxu0  ;;  %17062 = vmatpush3.bf16.xpose.msra.mxu1 %v2001_v24  ;;  %v779_v47 = vadd.f32 %v778_v11, %v19864_v25 }
 0x30c   :  { %v781_v48 = vadd.f32 %v780_v40, %v19807_v19  ;;  %v782_v42 = vpop.f32.mrb[34].mxu0  ;;  %17073 = vmatprep.subr.bf16.mxu1 %v24455_v38 }
 0x30d   :  { %v784_v10 = vpop.f32.mrb[35].mxu0  ;;  %v783_v60 = vadd.f32 %v782_v42, %v19864_v25  ;;  %v20113_v14 = vpack.c.bf16 %v779_v47, %v779_v47 }
 0x30e   :  { %v20089_v29 = vpack.c.bf16 %v781_v48, %v781_v48  ;;  %v785_v55 = vadd.f32 %v784_v10, %v19807_v19 }
 0x30f   :  { %24713 = vst [vmem:[#allocation47_spill] sm:$0xff] %v20113_v14  ;;  %v20118_v26 = vpack.c.bf16 %v783_v60, %v783_v60 }
 0x310   :  { %24710 = vst [vmem:[#allocation44_spill] sm:$0xff] %v20089_v29  ;;  %v20094_v13 = vpack.c.bf16 %v785_v55, %v785_v55  ;;  %17058 = vmatmul.mubr.msk.bf16.vlgmr.msra.gmra.mrb[56].mxu0 %vm1306_vm1, %v20087_v34  ;;  %v2047_v22 = vsel %vm1306_vm1, %v20089_v29, 0 }
 0x311   :  { %17068 = vmatpush3.bf16.xpose.msra.mxu0 %v2047_v22  ;;  %17069 = vmatprep.mubr.msk.bf16.mxu0 %vm19357_vm0, %v24455_v38  ;;  %24715 = vst [vmem:[#allocation49_spill] sm:$0xff] %v20118_v26 }
 0x312   :  { %24712 = vst [vmem:[#allocation46_spill] sm:$0xff] %v20094_v13  ;;  %v788_v43 = vpop.f32.mrb[36].mxu0  ;;  %17064 = vmatmul.mubr.msk.bf16.vlgmr.msra.gmra.mrb[96].mxu1 %vm1306_vm1, %v20092_v12  ;;  %v2093_v52 = vsel %vm1306_vm1, %v20094_v13, 0  ;;  %17079 = vmatprep.subr.bf16.mxu0 %v24455_v38 }
 0x313   :  { %v790_v54 = vpop.f32.mrb[37].mxu0  ;;  %17074 = vmatpush3.bf16.xpose.msra.mxu1 %v2093_v52  ;;  %17075 = vmatprep.mubr.msk.bf16.mxu1 %vm19357_vm0, %v24455_v38  ;;  %v789_v4 = vadd.f32 %v788_v43, %v19864_v25 }
 0x314   :  { %v791_v8 = vadd.f32 %v790_v54, %v19807_v19  ;;  %v792_v35 = vpop.f32.mrb[38].mxu0  ;;  %17085 = vmatprep.subr.bf16.mxu1 %v24455_v38 }
 0x315   :  { %v794_v31 = vpop.f32.mrb[39].mxu0  ;;  %v793_v48 = vadd.f32 %v792_v35, %v19864_v25  ;;  %v20139_v43 = vpack.c.bf16 %v789_v4, %v789_v4 }
 0x316   :  { %v20115_v59 = vpack.c.bf16 %v791_v8, %v791_v8  ;;  %v795_v1 = vadd.f32 %v794_v31, %v19807_v19 }
 0x317   :  { %24717 = vst [vmem:[#allocation51_spill] sm:$0xff] %v20139_v43  ;;  %v20144_v60 = vpack.c.bf16 %v793_v48, %v793_v48 }
 0x318   :  { %24714 = vst [vmem:[#allocation48_spill] sm:$0xff] %v20115_v59  ;;  %v20120_v33 = vpack.c.bf16 %v795_v1, %v795_v1  ;;  %17070 = vmatmul.mubr.msk.bf16.vlgmr.msra.gmra.mrb[60].mxu0 %vm1306_vm1, %v20113_v14  ;;  %v2139_v58 = vsel %vm1306_vm1, %v20115_v59, 0 }
 0x319   :  { %17080 = vmatpush3.bf16.xpose.msra.mxu0 %v2139_v58  ;;  %17081 = vmatprep.mubr.msk.bf16.mxu0 %vm19357_vm0, %v24455_v38  ;;  %24719 = vst [vmem:[#allocation53_spill] sm:$0xff] %v20144_v60 }
 0x31a   :  { %24716 = vst [vmem:[#allocation50_spill] sm:$0xff] %v20120_v33  ;;  %v798_v17 = vpop.f32.mrb[40].mxu0  ;;  %v808_v11 = vpop.f32.mrb[0].mxu1  ;;  %17076 = vmatmul.mubr.msk.bf16.vlgmr.msra.gmra.mrb[100].mxu1 %vm1306_vm1, %v20118_v26  ;;  %v2185_v24 = vsel %vm1306_vm1, %v20120_v33, 0  ;;  %17091 = vmatprep.subr.bf16.mxu0 %v24455_v38 }
 0x31b   :  { %v800_v40 = vpop.f32.mrb[41].mxu0  ;;  %v810_v46 = vpop.f32.mrb[1].mxu1  ;;  %17086 = vmatpush3.bf16.xpose.msra.mxu1 %v2185_v24  ;;  %17087 = vmatprep.mubr.msk.bf16.mxu1 %vm19357_vm0, %v24455_v38  ;;  %v799_v1 = vadd.f32 %v798_v17, %v19864_v25 }
 0x31c   :  { %v801_v42 = vadd.f32 %v800_v40, %v19807_v19  ;;  %v802_v10 = vpop.f32.mrb[42].mxu0  ;;  %v812_v55 = vpop.f32.mrb[2].mxu1  ;;  %17097 = vmatprep.subr.bf16.mxu1 %v24455_v38  ;;  %v811_v8 = vadd.f32 %v810_v46, %v19807_v19 }
 0x31d   :  { %v804_v22 = vpop.f32.mrb[43].mxu0  ;;  %v814_v47 = vpop.f32.mrb[3].mxu1  ;;  %v803_v17 = vadd.f32 %v802_v10, %v19864_v25  ;;  %v809_v10 = vadd.f32 %v808_v11, %v19864_v25 }
 0x31e   :  { %v20141_v52 = vpack.c.bf16 %v801_v42, %v801_v42  ;;  %v805_v54 = vadd.f32 %v804_v22, %v19807_v19  ;;  %v815_v58 = vadd.f32 %v814_v47, %v19807_v19  ;;  %v20164_v46 = vpack.c.bf16 %v811_v8, %v811_v8 }
 0x31f   :  { %v20168_v22 = vpack.c.bf16 %v799_v1, %v799_v1 }
 0x320   :  { %24718 = vst [vmem:[#allocation52_spill] sm:$0xff] %v20141_v52  ;;  %v20147_v31 = vpack.c.bf16 %v805_v54, %v805_v54  ;;  %17082 = vmatmul.mubr.msk.bf16.vlgmr.msra.gmra.mrb[64].mxu0 %vm1306_vm1, %v20139_v43  ;;  %v2231_v35 = vsel %vm1306_vm1, %v20141_v52, 0  ;;  %24721 = vst [vmem:[#allocation55_spill] sm:$0xff] %v20164_v46  ;;  %v20170_v47 = vpack.c.bf16 %v815_v58, %v815_v58  ;;  %v2323_v8 = vsel %vm1306_vm1, %v20164_v46, 0 }
 0x321   :  { %17092 = vmatpush3.bf16.xpose.msra.mxu0 %v2231_v35  ;;  %17093 = vmatprep.mubr.msk.bf16.mxu0 %vm19357_vm0, %v24455_v38  ;;  %24722 = vst [vmem:[#allocation56_spill] sm:$0xff] %v20168_v22  ;;  %v20172_v54 = vpack.c.bf16 %v803_v17, %v803_v17  ;;  %v813_v17 = vadd.f32 %v812_v55, %v19864_v25 }
 0x322   :  { %24720 = vst [vmem:[#allocation54_spill] sm:$0xff] %v20147_v31  ;;  %v818_v4 = vpop.f32.mrb[4].mxu1  ;;  %17088 = vmatmul.mubr.msk.bf16.vlgmr.msra.gmra.mrb[104].mxu1 %vm1306_vm1, %v20144_v60  ;;  %v2277_v24 = vsel %vm1306_vm1, %v20147_v31, 0  ;;  %17103 = vmatprep.subr.bf16.mxu0 %v24455_v38  ;;  %24723 = vst [vmem:[#allocation57_spill] sm:$0xff] %v20170_v47  ;;  %v20194_v31 = vpack.c.bf16 %v809_v10, %v809_v10 }
 0x323   :  { %v820_v40 = vpop.f32.mrb[5].mxu1  ;;  %17098 = vmatpush3.bf16.xpose.msra.mxu1 %v2277_v24  ;;  %17099 = vmatprep.mubr.msk.bf16.mxu1 %vm19357_vm0, %v24455_v38  ;;  %24724 = vst [vmem:[#allocation58_spill] sm:$0xff] %v20172_v54  ;;  %v2369_v24 = vsel %vm1306_vm1, %v20170_v47, 0  ;;  %v20198_v47 = vpack.c.bf16 %v813_v17, %v813_v17 }
 0x324   :  { %v822_v48 = vpop.f32.mrb[6].mxu1  ;;  %17109 = vmatprep.subr.bf16.mxu1 %v24455_v38  ;;  %v821_v35 = vadd.f32 %v820_v40, %v19807_v19  ;;  %24726 = vst [vmem:[#allocation60_spill] sm:$0xff] %v20194_v31 }
 0x325   :  { %v824_v42 = vpop.f32.mrb[7].mxu1  ;;  %24728 = vst [vmem:[#allocation62_spill] sm:$0xff] %v20198_v47  ;;  %v823_v17 = vadd.f32 %v822_v48, %v19864_v25 }
 0x326   :  { %v825_v1 = vadd.f32 %v824_v42, %v19807_v19 }
 0x328   :  { %17094 = vmatmul.mubr.msk.bf16.vlgmr.msra.gmra.mrb[68].mxu0 %vm1306_vm1, %v20168_v22 }
 0x329   :  { %17104 = vmatpush3.bf16.xpose.msra.mxu0 %v2323_v8  ;;  %17105 = vmatprep.mubr.msk.bf16.mxu0 %vm19357_vm0, %v24455_v38  ;;  %v20191_v8 = vpack.c.bf16 %v821_v35, %v821_v35  ;;  %v819_v35 = vadd.f32 %v818_v4, %v19864_v25 }
 0x32a   :  { %v828_v58 = vpop.f32.mrb[8].mxu1  ;;  %17100 = vmatmul.mubr.msk.bf16.vlgmr.msra.gmra.mrb[108].mxu1 %vm1306_vm1, %v20172_v54  ;;  %17115 = vmatprep.subr.bf16.mxu0 %v24455_v38  ;;  %v20196_v54 = vpack.c.bf16 %v825_v1, %v825_v1 }
 0x32b   :  { %v830_v40 = vpop.f32.mrb[9].mxu1  ;;  %17110 = vmatpush3.bf16.xpose.msra.mxu1 %v2369_v24  ;;  %17111 = vmatprep.mubr.msk.bf16.mxu1 %vm19357_vm0, %v24455_v38  ;;  %24725 = vst [vmem:[#allocation59_spill] sm:$0xff] %v20191_v8  ;;  %v2415_v55 = vsel %vm1306_vm1, %v20191_v8, 0  ;;  %v20220_v33 = vpack.c.bf16 %v819_v35, %v819_v35 }
 0x32c   :  { %v832_v11 = vpop.f32.mrb[10].mxu1  ;;  %17121 = vmatprep.subr.bf16.mxu1 %v24455_v38  ;;  %24727 = vst [vmem:[#allocation61_spill] sm:$0xff] %v20196_v54  ;;  %v831_v60 = vadd.f32 %v830_v40, %v19807_v19  ;;  %v2461_v24 = vsel %vm1306_vm1, %v20196_v54, 0  ;;  %v20224_v54 = vpack.c.bf16 %v823_v17, %v823_v17  ;;  %v531_v17 = vsub.s32 2, %v19794_v0 }
 0x32d   :  { %v834_v42 = vpop.f32.mrb[11].mxu1  ;;  %24730 = vst [vmem:[#allocation64_spill] sm:$0xff] %v20220_v33 }
 0x32e   :  { %v835_v10 = vadd.f32 %v834_v42, %v19807_v19  ;;  %24732 = vst [vmem:[#allocation66_spill] sm:$0xff] %v20224_v54 }
 0x330   :  { %17106 = vmatmul.mubr.msk.bf16.vlgmr.msra.gmra.mrb[72].mxu0 %vm1306_vm1, %v20194_v31 }
 0x331   :  { %17116 = vmatpush3.bf16.xpose.msra.mxu0 %v2415_v55  ;;  %17117 = vmatprep.mubr.msk.bf16.mxu0 %vm19357_vm0, %v24455_v38  ;;  %v20217_v55 = vpack.c.bf16 %v831_v60, %v831_v60  ;;  %v829_v60 = vadd.f32 %v828_v58, %v19864_v25  ;;  %v833_v58 = vadd.f32 %v832_v11, %v19864_v25 }
 0x332   :  { %v838_v1 = vpop.f32.mrb[12].mxu1  ;;  %17112 = vmatmul.mubr.msk.bf16.vlgmr.msra.gmra.mrb[112].mxu1 %vm1306_vm1, %v20198_v47  ;;  %17127 = vmatprep.subr.bf16.mxu0 %v24455_v38  ;;  %v20222_v47 = vpack.c.bf16 %v835_v10, %v835_v10 }
 0x333   :  { %v840_v40 = vpop.f32.mrb[13].mxu1  ;;  %17122 = vmatpush3.bf16.xpose.msra.mxu1 %v2461_v24  ;;  %17123 = vmatprep.mubr.msk.bf16.mxu1 %vm19357_vm0, %v24455_v38  ;;  %24729 = vst [vmem:[#allocation63_spill] sm:$0xff] %v20217_v55  ;;  %v2507_v48 = vsel %vm1306_vm1, %v20217_v55, 0  ;;  %v20247_v55 = vpack.c.bf16 %v829_v60, %v829_v60 }
 0x334   :  { %v842_v4 = vpop.f32.mrb[14].mxu1  ;;  %17133 = vmatprep.subr.bf16.mxu1 %v24455_v38  ;;  %24731 = vst [vmem:[#allocation65_spill] sm:$0xff] %v20222_v47  ;;  %v841_v26 = vadd.f32 %v840_v40, %v19807_v19  ;;  %v2553_v24 = vsel %vm1306_vm1, %v20222_v47, 0 }
 0x335   :  { %v844_v42 = vpop.f32.mrb[15].mxu1  ;;  %24734 = vst [vmem:[#allocation68_spill] sm:$0xff] %v20247_v55 }
 0x336   :  { %v845_v35 = vadd.f32 %v844_v42, %v19807_v19 }
 0x338   :  { %17118 = vmatmul.mubr.msk.bf16.vlgmr.msra.gmra.mrb[76].mxu0 %vm1306_vm1, %v20220_v33  ;;  %v20249_v47 = vpack.c.bf16 %v845_v35, %v845_v35  ;;  %v20252_v33 = vrot.slane %v19801_v6, %v531_v17 }
 0x339   :  { %17128 = vmatpush3.bf16.xpose.msra.mxu0 %v2507_v48  ;;  %17129 = vmatprep.mubr.msk.bf16.mxu0 %vm19357_vm0, %v24455_v38  ;;  %v20244_v48 = vpack.c.bf16 %v841_v26, %v841_v26  ;;  %v839_v26 = vadd.f32 %v838_v1, %v19864_v25  ;;  %v843_v1 = vadd.f32 %v842_v4, %v19864_v25 }
 0x33a   :  { %v848_v10 = vpop.f32.mrb[16].mxu1  ;;  %17124 = vmatmul.mubr.msk.bf16.vlgmr.msra.gmra.mrb[116].mxu1 %vm1306_vm1, %v20224_v54  ;;  %17139 = vmatprep.subr.bf16.mxu0 %v24455_v38  ;;  %24735 = vst [vmem:[#allocation69_spill] sm:$0xff] %v20249_v47  ;;  %v2645_v60 = vsel %vm1306_vm1, %v20249_v47, 0 }
 0x33b   :  { %v850_v40 = vpop.f32.mrb[17].mxu1  ;;  %17134 = vmatpush3.bf16.xpose.msra.mxu1 %v2553_v24  ;;  %17135 = vmatprep.mubr.msk.bf16.mxu1 %vm19357_vm0, %v24455_v38  ;;  %24733 = vst [vmem:[#allocation67_spill] sm:$0xff] %v20244_v48  ;;  %v20254_v24 = vpack.c.bf16 %v833_v58, %v833_v58  ;;  %v2599_v0 = vsel %vm1306_vm1, %v20244_v48, 0  ;;  %v20286_v47 = vpack.c.bf16 %v843_v1, %v843_v1 }
 0x33c   :  { %v852_v42 = vpop.f32.mrb[18].mxu1  ;;  %17145 = vmatprep.subr.bf16.mxu1 %v24455_v38  ;;  %v851_v8 = vadd.f32 %v850_v40, %v19807_v19  ;;  %v849_v4 = vadd.f32 %v848_v10, %v19864_v25 }
 0x33d   :  { %v854_v54 = vpop.f32.mrb[19].mxu1  ;;  %24736 = vst [vmem:[#allocation70_spill] sm:$0xff] %v20254_v24  ;;  %24740 = vst [vmem:[#allocation74_spill] sm:$0xff] %v20286_v47  ;;  %v853_v10 = vadd.f32 %v852_v42, %v19864_v25 }
 0x33e   :  { %v855_v11 = vadd.f32 %v854_v54, %v19807_v19  ;;  %v20276_v19 = vpack.c.bf16 %v851_v8, %v851_v8 }
 0x33f   :  { %v20324_v25 = vpack.c.bf16 %v853_v10, %v853_v10 }
 0x340   :  { %17130 = vmatmul.mubr.msk.bf16.vlgmr.msra.gmra.mrb[80].mxu0 %vm1306_vm1, %v20247_v55  ;;  %24737 = vst [vmem:[#allocation71_spill] sm:$0xff] %v20276_v19  ;;  %v2691_v8 = vsel %vm1306_vm1, %v20276_v19, 0 }
 0x341   :  { %17140 = vmatpush3.bf16.xpose.msra.mxu0 %v2599_v0  ;;  %17141 = vmatprep.mubr.msk.bf16.mxu0 %vm19357_vm0, %v24455_v38  ;;  %v20282_v0 = vpack.c.bf16 %v839_v26, %v839_v26  ;;  %24744 = vst [vmem:[#allocation78_spill] sm:$0xff] %v20324_v25 }
 0x342   :  { %v16941_v6 = vpop.f32.mrb[20].mxu1  ;;  %17136 = vmatmul.mubr.msk.bf16.vlgmr.msra.gmra.mrb[120].mxu1 %vm1306_vm1, %v20254_v24  ;;  %17151 = vmatprep.subr.bf16.mxu0 %v24455_v38  ;;  %v20317_v24 = vpack.c.bf16 %v849_v4, %v849_v4 }
 0x343   :  { %v20271_v35 = vadd.f32 %v16941_v6, %v20252_v33  ;;  %v891_v40 = vpop.f32.mrb[21].mxu1  ;;  %17146 = vmatpush3.bf16.xpose.msra.mxu1 %v2645_v60  ;;  %17147 = vmatprep.mubr.msk.bf16.mxu1 %vm19357_vm0, %v24455_v38  ;;  %24738 = vst [vmem:[#allocation72_spill] sm:$0xff] %v20282_v0  ;;  %v20284_v6 = vpack.c.bf16 %v855_v11, %v855_v11 }
 0x344   :  { %v16942_v54 = vpop.f32.mrb[22].mxu1  ;;  %17157 = vmatprep.subr.bf16.mxu1 %v24455_v38  ;;  %v892_v60 = vadd.f32 %v891_v40, %v20252_v33  ;;  %24742 = vst [vmem:[#allocation76_spill] sm:$0xff] %v20317_v24 }
 0x345   :  { %v20280_v17 = vadd.f32 %v16942_v54, %v20252_v33  ;;  %v894_v58 = vpop.f32.mrb[23].mxu1  ;;  %24739 = vst [vmem:[#allocation73_spill] sm:$0xff] %v20284_v6  ;;  %v2737_v40 = vsel %vm1306_vm1, %v20284_v6, 0 }
 0x346   :  { %v895_v26 = vadd.f32 %v894_v58, %v20252_v33  ;;  %v20308_v58 = vpack.c.bf16 %v892_v60, %v892_v60 }
 0x348   :  { %17142 = vmatmul.mubr.msk.bf16.vlgmr.msra.gmra.mrb[84].mxu0 %vm1306_vm1, %v20282_v0  ;;  %24741 = vst [vmem:[#allocation75_spill] sm:$0xff] %v20308_v58  ;;  %v3169_v42 = vsel %vm3167_vm2, %v20308_v58, 0 }
 0x349   :  { %17152 = vmatpush3.bf16.xpose.msra.mxu0 %v2691_v8  ;;  %17153 = vmatprep.mubr.msk.bf16.mxu0 %vm19357_vm0, %v24455_v38 }
 0x34a   :  { %v16945_v11 = vpop.f32.mrb[24].mxu1  ;;  %17148 = vmatmul.mubr.msk.bf16.vlgmr.msra.gmra.mrb[124].mxu1 %vm1306_vm1, %v20286_v47  ;;  %17163 = vmatprep.subr.bf16.mxu0 %v24455_v38 }
 0x34b   :  { %v20303_v1 = vadd.f32 %v16945_v11, %v20252_v33  ;;  %v907_v54 = vpop.f32.mrb[25].mxu1  ;;  %17158 = vmatpush3.bf16.xpose.msra.mxu1 %v2737_v40  ;;  %17159 = vmatprep.mubr.msk.bf16.mxu1 %vm19357_vm0, %v24455_v38  ;;  %v20319_v40 = vpack.c.bf16 %v895_v26, %v895_v26 }
 0x34c   :  { %v20311_v8 = vadd.f32 %v907_v54, %v20252_v33  ;;  %v16946_v47 = vpop.f32.mrb[26].mxu1  ;;  %17169 = vmatprep.subr.bf16.mxu1 %v24455_v38 }
 0x34d   :  { %v20315_v6 = vadd.f32 %v16946_v47, %v20252_v33  ;;  %v910_v11 = vpop.f32.mrb[27].mxu1  ;;  %24743 = vst [vmem:[#allocation77_spill] sm:$0xff] %v20319_v40  ;;  %v3215_v60 = vsel %vm3167_vm2, %v20319_v40, 0 }
 0x34e   :  { %v20322_v19 = vadd.f32 %v910_v11, %v20252_v33 }
 0x350   :  { %17154 = vmatmul.mubr.msk.bf16.vlgmr.msra.gmra.mrb[88].mxu0 %vm1306_vm1, %v20317_v24 }
 0x351   :  { %17164 = vmatpush3.bf16.msra.mxu0 %v3169_v42  ;;  %17165 = vmatprep.mubr.msk.bf16.mxu0 %vm19357_vm0, %v24455_v38 }
 0x352   :  { %v16949_v47 = vpop.f32.mrb[28].mxu1  ;;  %17160 = vmatmul.mubr.msk.bf16.vlgmr.msra.gmra.mrb[128].mxu1 %vm1306_vm1, %v20324_v25  ;;  %17175 = vmatprep.subr.bf16.mxu0 %v24455_v38 }
 0x353   :  { %v20338_v4 = vadd.f32 %v16949_v47, %v20252_v33  ;;  %v923_v26 = vpop.f32.mrb[29].mxu1  ;;  %17170 = vmatpush3.bf16.msra.mxu1 %v3215_v60  ;;  %17171 = vmatprep.mubr.msk.bf16.mxu1 %vm19357_vm0, %v24455_v38 }
 0x354   :  { %v20343_v54 = vadd.f32 %v923_v26, %v20252_v33  ;;  %v16950_v10 = vpop.f32.mrb[30].mxu1  ;;  %17181 = vmatprep.subr.bf16.mxu1 %v24455_v38 }
 0x355   :  { %v20347_v11 = vadd.f32 %v16950_v10, %v20252_v33  ;;  %v926_v42 = vpop.f32.mrb[31].mxu1 }
 0x356   :  { %v20350_v40 = vadd.f32 %v926_v42, %v20252_v33 }
 0x35a   :  { %v16953_v47 = vpop.f32.mrb[32].mxu1 }
 0x35b   :  { %v20353_v25 = vadd.f32 %v16953_v47, %v20252_v33  ;;  %v939_v60 = vpop.f32.mrb[33].mxu1 }
 0x35c   :  { %v20356_v58 = vadd.f32 %v939_v60, %v20252_v33  ;;  %v16954_v26 = vpop.f32.mrb[34].mxu1 }
 0x35d   :  { %v20359_v24 = vadd.f32 %v16954_v26, %v20252_v33  ;;  %v942_v38 = vpop.f32.mrb[35].mxu1 }
 0x35e   :  { %v20362_v10 = vadd.f32 %v942_v38, %v20252_v33 }
 0x362   :  { %v16957_v0 = vpop.f32.mrb[36].mxu1 }
 0x363   :  { %v20365_v42 = vadd.f32 %v16957_v0, %v20252_v33  ;;  %v955_v48 = vpop.f32.mrb[37].mxu1 }
 0x364   :  { %v20368_v47 = vadd.f32 %v955_v48, %v20252_v33  ;;  %v16958_v55 = vpop.f32.mrb[38].mxu1 }
 0x365   :  { %24745 = vst [vmem:[#allocation79_spill] sm:$0xff] %v20365_v42  ;;  %v20371_v60 = vadd.f32 %v16958_v55, %v20252_v33  ;;  %v958_v13 = vpop.f32.mrb[39].mxu1 }
 0x366   :  { %24746 = vst [vmem:[#allocation80_spill] sm:$0xff] %v20368_v47  ;;  %v20374_v26 = vadd.f32 %v958_v13, %v20252_v33 }
 0x367   :  { %24747 = vst [vmem:[#allocation81_spill] sm:$0xff] %v20371_v60 }
 0x368   :  { %24748 = vst [vmem:[#allocation82_spill] sm:$0xff] %v20374_v26 }
 0x36a   :  { %v16961_v31 = vpop.f32.mrb[40].mxu1 }
 0x36b   :  { %v20377_v38 = vadd.f32 %v16961_v31, %v20252_v33  ;;  %v971_v12 = vpop.f32.mrb[41].mxu1 }
 0x36c   :  { %v20380_v0 = vadd.f32 %v971_v12, %v20252_v33  ;;  %v16962_v46 = vpop.f32.mrb[42].mxu1 }
 0x36d   :  { %24749 = vst [vmem:[#allocation83_spill] sm:$0xff] %v20377_v38  ;;  %v20383_v48 = vadd.f32 %v16962_v46, %v20252_v33  ;;  %v974_v63 = vpop.f32.mrb[43].mxu1 }
 0x36e   :  { %24750 = vst [vmem:[#allocation84_spill] sm:$0xff] %v20380_v0  ;;  %v20386_v55 = vadd.f32 %v974_v63, %v20252_v33 }
 0x36f   :  { %24751 = vst [vmem:[#allocation85_spill] sm:$0xff] %v20383_v48 }
 0x370   :  { %24752 = vst [vmem:[#allocation86_spill] sm:$0xff] %v20386_v55 }
 0x372   :  { %v16965_v22 = vpop.f32.mrb[44].mxu1 }
 0x373   :  { %v20389_v13 = vadd.f32 %v16965_v22, %v20252_v33  ;;  %v987_v18 = vpop.f32.mrb[45].mxu1 }
 0x374   :  { %v20392_v31 = vadd.f32 %v987_v18, %v20252_v33  ;;  %v16966_v52 = vpop.f32.mrb[46].mxu1 }
 0x375   :  { %24753 = vst [vmem:[#allocation87_spill] sm:$0xff] %v20389_v13  ;;  %v20395_v12 = vadd.f32 %v16966_v52, %v20252_v33  ;;  %v990_v57 = vpop.f32.mrb[47].mxu1 }
 0x376   :  { %24754 = vst [vmem:[#allocation88_spill] sm:$0xff] %v20392_v31  ;;  %v20398_v46 = vadd.f32 %v990_v57, %v20252_v33 }
 0x377   :  { %24755 = vst [vmem:[#allocation89_spill] sm:$0xff] %v20395_v12  ;;  %v20400_v43 = vpop.f32.mrb[44].mxu0 }
 0x378   :  { %24756 = vst [vmem:[#allocation90_spill] sm:$0xff] %v20398_v46  ;;  %v17023_v63 = vpop.f32.mrb[45].mxu0 }
 0x379   :  { %v1718_v39 = vpop.f32.mrb[46].mxu0 }
 0x37a   :  { %v16969_v59 = vpop.f32.mrb[48].mxu1  ;;  %v17024_v36 = vpop.f32.mrb[47].mxu0 }
 0x37b   :  { %v20403_v22 = vadd.f32 %v16969_v59, %v20252_v33  ;;  %v1003_v13 = vpop.f32.mrb[49].mxu1 }
 0x37c   :  { %v20406_v18 = vadd.f32 %v1003_v13, %v20252_v33  ;;  %v16970_v14 = vpop.f32.mrb[50].mxu1 }
 0x37d   :  { %24757 = vst [vmem:[#allocation91_spill] sm:$0xff] %v20403_v22  ;;  %v20409_v52 = vadd.f32 %v16970_v14, %v20252_v33  ;;  %v1006_v12 = vpop.f32.mrb[51].mxu1 }
 0x37e   :  { %24758 = vst [vmem:[#allocation92_spill] sm:$0xff] %v20406_v18  ;;  %v20412_v57 = vadd.f32 %v1006_v12, %v20252_v33 }
 0x37f   :  { %24759 = vst [vmem:[#allocation93_spill] sm:$0xff] %v20409_v52  ;;  %v20414_v56 = vpop.f32.mrb[48].mxu0 }
 0x380   :  { %24760 = vst [vmem:[#allocation94_spill] sm:$0xff] %v20412_v57  ;;  %v17035_v39 = vpop.f32.mrb[49].mxu0 }
 0x381   :  { %v1810_v63 = vpop.f32.mrb[50].mxu0 }
 0x382   :  { %v20416_v36 = vpop.f32.mrb[52].mxu1  ;;  %v17036_v59 = vpop.f32.mrb[51].mxu0 }
 0x383   :  { %v16975_v22 = vpop.f32.mrb[53].mxu1  ;;  %v2780_v13 = vsel %vm2779_vm3, %v20416_v36, -inf }
 0x384   :  { %2781 = vmax.xlane.f32.xlu0 %v2780_v13  ;;  %v1350_v18 = vpop.f32.mrb[54].mxu1 }
 0x385   :  { %v16976_v14 = vpop.f32.mrb[55].mxu1 }
 0x387   :  { %v20420_v52 = vpop.f32.mrb[52].mxu0 }
 0x388   :  { %v17047_v29 = vpop.f32.mrb[53].mxu0 }
 0x389   :  { %v1902_v33 = vpop.f32.mrb[54].mxu0 }
 0x38a   :  { %v20422_v12 = vpop.f32.mrb[56].mxu1  ;;  %v17048_v57 = vpop.f32.mrb[55].mxu0 }
 0x38b   :  { %v16981_v39 = vpop.f32.mrb[57].mxu1  ;;  %v2783_v63 = vsel %vm2779_vm3, %v20422_v12, -inf }
 0x38c   :  { %2784 = vmax.xlane.f32.xlu1 %v2783_v63  ;;  %v1396_v59 = vpop.f32.mrb[58].mxu1 }
 0x38d   :  { %v16982_v22 = vpop.f32.mrb[59].mxu1 }
 0x392   :  { %v20426_v30 = vpop.f32.mrb[60].mxu1 }
 0x393   :  { %v16987_v34 = vpop.f32.mrb[61].mxu1  ;;  %v2786_v18 = vsel %vm2779_vm3, %v20426_v30, -inf }
 0x394   :  { %2787 = vmax.xlane.f32.xlu0 %v2786_v18  ;;  %v1442_v13 = vpop.f32.mrb[62].mxu1 }
 0x395   :  { %v16988_v29 = vpop.f32.mrb[63].mxu1 }
 0x39a   :  { %v20430_v14 = vpop.f32.mrb[64].mxu1 }
 0x39b   :  { %v16993_v33 = vpop.f32.mrb[65].mxu1  ;;  %v2789_v57 = vsel %vm2779_vm3, %v20430_v14, -inf }
 0x39c   :  { %2790 = vmax.xlane.f32.xlu1 %v2789_v57  ;;  %v1488_v39 = vpop.f32.mrb[66].mxu1 }
 0x39d   :  { %v16994_v63 = vpop.f32.mrb[67].mxu1 }
 0x3a2   :  { %v20434_v59 = vpop.f32.mrb[68].mxu1 }
 0x3a3   :  { %v16999_v22 = vpop.f32.mrb[69].mxu1  ;;  %v2792_v34 = vsel %vm2779_vm3, %v20434_v59, -inf }
 0x3a4   :  { %2793 = vmax.xlane.f32.xlu0 %v2792_v34  ;;  %v1534_v45 = vpop.f32.mrb[70].mxu1 }
 0x3a5   :  { %v17000_v18 = vpop.f32.mrb[71].mxu1  ;;  %v2804_v45 = vsel %vm2779_vm3, %v20400_v43, -inf }
 0x3aa   :  { %v20438_v13 = vpop.f32.mrb[72].mxu1 }
 0x3ab   :  { %v17005_v29 = vpop.f32.mrb[73].mxu1  ;;  %v2795_v33 = vsel %vm2779_vm3, %v20438_v13, -inf }
 0x3ac   :  { %2796 = vmax.xlane.f32.xlu1 %v2795_v33  ;;  %v1580_v15 = vpop.f32.mrb[74].mxu1 }
 0x3ad   :  { %v17006_v57 = vpop.f32.mrb[75].mxu1  ;;  %v2810_v15 = vsel %vm2779_vm3, %v20414_v56, -inf }
 0x3b2   :  { %v20442_v39 = vpop.f32.mrb[76].mxu1 }
 0x3b3   :  { %v17011_v63 = vpop.f32.mrb[77].mxu1  ;;  %v2798_v22 = vsel %vm2779_vm3, %v20442_v39, -inf }
 0x3b4   :  { %2799 = vmax.xlane.f32.xlu0 %v2798_v22  ;;  %v1626_v46 = vpop.f32.mrb[78].mxu1 }
 0x3b5   :  { %v17012_v34 = vpop.f32.mrb[79].mxu1  ;;  %v2816_v46 = vsel %vm2779_vm3, %v20420_v52, -inf }
 0x3b8   :  { %2805 = vmax.xlane.f32.xlu0 %v2804_v45 }
 0x3ba   :  { %v20448_v18 = vpop.f32.mrb[80].mxu1 }
 0x3bb   :  { %v17017_v29 = vpop.f32.mrb[81].mxu1  ;;  %v2801_v33 = vsel %vm2779_vm3, %v20448_v18, -inf }
 0x3bc   :  { %2811 = vmax.xlane.f32.xlu0 %v2810_v15  ;;  %2802 = vmax.xlane.f32.xlu1 %v2801_v33  ;;  %v1672_v57 = vpop.f32.mrb[82].mxu1 }
 0x3bd   :  { %v17018_v63 = vpop.f32.mrb[83].mxu1 }
 0x3c0   :  { %2817 = vmax.xlane.f32.xlu0 %v2816_v46 }
 0x3c2   :  { %v20456_v22 = vpop.f32.mrb[84].mxu1 }
 0x3c3   :  { %v17029_v34 = vpop.f32.mrb[85].mxu1  ;;  %v2807_v45 = vsel %vm2779_vm3, %v20456_v22, -inf }
 0x3c4   :  { %2808 = vmax.xlane.f32.xlu1 %v2807_v45  ;;  %v1764_v29 = vpop.f32.mrb[86].mxu1 }
 0x3c5   :  { %v17030_v27 = vpop.f32.mrb[87].mxu1 }
 0x3ca   :  { %v20460_v31 = vpop.f32.mrb[88].mxu1 }
 0x3cb   :  { %v17041_v44 = vpop.f32.mrb[89].mxu1  ;;  %v2813_v15 = vsel %vm2779_vm3, %v20460_v31, -inf }
 0x3cc   :  { %2814 = vmax.xlane.f32.xlu1 %v2813_v15  ;;  %v1856_v33 = vpop.f32.mrb[90].mxu1 }
 0x3cd   :  { %v17042_v57 = vpop.f32.mrb[91].mxu1 }
 0x3d2   :  { %v20464_v63 = vpop.f32.mrb[92].mxu1 }
 0x3d3   :  { %v17053_v46 = vpop.f32.mrb[93].mxu1  ;;  %v2819_v34 = vsel %vm2779_vm3, %v20464_v63, -inf }
 0x3d4   :  { %2820 = vmax.xlane.f32.xlu1 %v2819_v34  ;;  %v1948_v32 = vpop.f32.mrb[94].mxu1 }
 0x3d5   :  { %v17054_v45 = vpop.f32.mrb[95].mxu1 }
 0x3e3   :  { %v20468_v29 = vpop.f32.mrb[56].mxu0 }
 0x3e4   :  { %v17059_v27 = vpop.f32.mrb[57].mxu0  ;;  %v2822_v44 = vsel %vm2779_vm3, %v20468_v29, -inf }
 0x3e5   :  { %v1994_v7 = vpop.f32.mrb[58].mxu0  ;;  %2823 = vmax.xlane.f32.xlu0 %v2822_v44  ;;  %v20472_v15 = vpop.f32.mrb[96].mxu1 }
 0x3e6   :  { %v17060_v33 = vpop.f32.mrb[59].mxu0  ;;  %v17065_v57 = vpop.f32.mrb[97].mxu1  ;;  %v2825_v46 = vsel %vm2779_vm3, %v20472_v15, -inf }
 0x3e7   :  { %2826 = vmax.xlane.f32.xlu1 %v2825_v46  ;;  %v2040_v48 = vpop.f32.mrb[98].mxu1 }
 0x3e8   :  { %v17066_v34 = vpop.f32.mrb[99].mxu1 }
 0x3eb   :  { %v20476_v32 = vpop.f32.mrb[60].mxu0 }
 0x3ec   :  { %v17071_v45 = vpop.f32.mrb[61].mxu0  ;;  %v2828_v27 = vsel %vm2779_vm3, %v20476_v32, -inf }
 0x3ed   :  { %v2086_v28 = vpop.f32.mrb[62].mxu0  ;;  %2829 = vmax.xlane.f32.xlu0 %v2828_v27  ;;  %v20480_v7 = vpop.f32.mrb[100].mxu1 }
 0x3ee   :  { %v17072_v44 = vpop.f32.mrb[63].mxu0  ;;  %v17077_v38 = vpop.f32.mrb[101].mxu1  ;;  %v2831_v33 = vsel %vm2779_vm3, %v20480_v7, -inf }
 0x3ef   :  { %2832 = vmax.xlane.f32.xlu1 %v2831_v33  ;;  %v2132_v57 = vpop.f32.mrb[102].mxu1 }
 0x3f0   :  { %v17078_v46 = vpop.f32.mrb[103].mxu1 }
 0x3f3   :  { %v20484_v48 = vpop.f32.mrb[64].mxu0 }
 0x3f4   :  { %v17083_v34 = vpop.f32.mrb[65].mxu0  ;;  %v2834_v45 = vsel %vm2779_vm3, %v20484_v48, -inf }
 0x3f5   :  { %v2178_v50 = vpop.f32.mrb[66].mxu0  ;;  %2835 = vmax.xlane.f32.xlu0 %v2834_v45  ;;  %v20488_v28 = vpop.f32.mrb[104].mxu1 }
 0x3f6   :  { %v17084_v27 = vpop.f32.mrb[67].mxu0  ;;  %v17089_v51 = vpop.f32.mrb[105].mxu1  ;;  %v2837_v38 = vsel %vm2779_vm3, %v20488_v28, -inf }
 0x3f7   :  { %2838 = vmax.xlane.f32.xlu1 %v2837_v38  ;;  %v2224_v44 = vpop.f32.mrb[106].mxu1 }
 0x3f8   :  { %v17090_v33 = vpop.f32.mrb[107].mxu1 }
 0x3fb   :  { %v20492_v57 = vpop.f32.mrb[68].mxu0 }
 0x3fc   :  { %v17095_v46 = vpop.f32.mrb[69].mxu0  ;;  %v2840_v34 = vsel %vm2779_vm3, %v20492_v57, -inf }
 0x3fd   :  { %v2270_v2 = vpop.f32.mrb[70].mxu0  ;;  %2841 = vmax.xlane.f32.xlu0 %v2840_v34  ;;  %v20496_v50 = vpop.f32.mrb[108].mxu1 }
 0x3fe   :  { %v17096_v45 = vpop.f32.mrb[71].mxu0  ;;  %v17101_v55 = vpop.f32.mrb[109].mxu1  ;;  %v2843_v51 = vsel %vm2779_vm3, %v20496_v50, -inf }
 0x3ff   :  { %2844 = vmax.xlane.f32.xlu1 %v2843_v51  ;;  %v2316_v27 = vpop.f32.mrb[110].mxu1 }
 0x400   :  { %v17102_v38 = vpop.f32.mrb[111].mxu1 }
 0x403   :  { %v20500_v44 = vpop.f32.mrb[72].mxu0 }
 0x404   :  { %v17107_v33 = vpop.f32.mrb[73].mxu0  ;;  %v2846_v46 = vsel %vm2779_vm3, %v20500_v44, -inf }
 0x405   :  { %v2362_v20 = vpop.f32.mrb[74].mxu0  ;;  %2847 = vmax.xlane.f32.xlu0 %v2846_v46  ;;  %v20504_v2 = vpop.f32.mrb[112].mxu1 }
 0x406   :  { %v17108_v34 = vpop.f32.mrb[75].mxu0  ;;  %v17113_v0 = vpop.f32.mrb[113].mxu1  ;;  %v2849_v55 = vsel %vm2779_vm3, %v20504_v2, -inf }
 0x407   :  { %2850 = vmax.xlane.f32.xlu1 %v2849_v55  ;;  %v2408_v45 = vpop.f32.mrb[114].mxu1 }
 0x408   :  { %v17114_v51 = vpop.f32.mrb[115].mxu1 }
 0x40b   :  { %v20508_v27 = vpop.f32.mrb[76].mxu0 }
 0x40c   :  { %v17119_v38 = vpop.f32.mrb[77].mxu0 }
 0x40d   :  { %v2454_v41 = vpop.f32.mrb[78].mxu0  ;;  %v20510_v33 = vpop.f32.mrb[116].mxu1 }
 0x40e   :  { %v17120_v37 = vpop.f32.mrb[79].mxu0  ;;  %v17125_v61 = vpop.f32.mrb[117].mxu1  ;;  %v2855_v20 = vsel %vm2779_vm3, %v20510_v33, -inf }
 0x40f   :  { %2856 = vmax.xlane.f32.xlu1 %v2855_v20  ;;  %v2500_v46 = vpop.f32.mrb[118].mxu1 }
 0x410   :  { %v17126_v0 = vpop.f32.mrb[119].mxu1 }
 0x411   :  { %v2782_v34 = vpop.xlane.xlu0 %2781 }
 0x412   :  { %v2876_v60 = vsub.f32 %v20416_v36, %v2782_v34 }
 0x413   :  { %v20515_v55 = vpop.f32.mrb[80].mxu0 }
 0x414   :  { %v2908_v45 = vmul.f32 1.442695, %v2876_v60  ;;  %v17131_v51 = vpop.f32.mrb[81].mxu0 }
 0x415   :  { %v2546_v42 = vpop.f32.mrb[82].mxu0  ;;  %v20517_v38 = vpop.f32.mrb[120].mxu1 }
 0x416   :  { %18692 = vpow2.f32 %v2908_v45  ;;  %v17132_v41 = vpop.f32.mrb[83].mxu0  ;;  %v17137_v37 = vpop.f32.mrb[121].mxu1 }
 0x417   :  { %v2592_v61 = vpop.f32.mrb[122].mxu1 }
 0x418   :  { %v17138_v9 = vpop.f32.mrb[123].mxu1 }
 0x419   :  { %v2785_v23 = vpop.xlane.xlu1 %2784 }
 0x41a   :  { %v2877_v20 = vsub.f32 %v20422_v12, %v2785_v23 }
 0x41b   :  { %v20520_v46 = vpop.f32.mrb[84].mxu0 }
 0x41c   :  { %v2910_v0 = vmul.f32 1.442695, %v2877_v20  ;;  %v17143_v26 = vpop.f32.mrb[85].mxu0 }
 0x41d   :  { %v2638_v36 = vpop.f32.mrb[86].mxu0  ;;  %v20522_v34 = vpop.f32.mrb[124].mxu1 }
 0x41e   :  { %18694 = vpow2.f32 %v2910_v0  ;;  %v17144_v60 = vpop.f32.mrb[87].mxu0  ;;  %v17149_v42 = vpop.f32.mrb[125].mxu1  ;;  %v2852_v0 = vsel %vm2779_vm3, %v20508_v27, -inf }
 0x41f   :  { %v2684_v51 = vpop.f32.mrb[126].mxu1 }
 0x420   :  { %v20524_v47 = vpop.eup %18692  ;;  %v17150_v45 = vpop.f32.mrb[127].mxu1 }
 0x421   :  { %v2788_v41 = vpop.xlane.xlu0 %2787  ;;  %v2972_v9 = vsel %vm2779_vm3, %v20524_v47, 0.0 }
 0x422   :  { %v2878_v23 = vsub.f32 %v20426_v30, %v2788_v41  ;;  %2973 = vadd.xlane.f32.xlu0 %v2972_v9 }
 0x423   :  { %v20529_v12 = vpop.f32.mrb[88].mxu0 }
 0x424   :  { %v2912_v26 = vmul.f32 1.442695, %v2878_v23  ;;  %v17155_v37 = vpop.f32.mrb[89].mxu0 }
 0x425   :  { %v2730_v61 = vpop.f32.mrb[90].mxu0  ;;  %v20531_v20 = vpop.f32.mrb[128].mxu1  ;;  %v2861_v37 = vsel %vm2779_vm3, %v20517_v38, -inf }
 0x426   :  { %18696 = vpow2.f32 %v2912_v26  ;;  %2853 = vmax.xlane.f32.xlu0 %v2852_v0  ;;  %v17156_v36 = vpop.f32.mrb[91].mxu0  ;;  %v17161_v60 = vpop.f32.mrb[129].mxu1 }
 0x427   :  { %v2776_v42 = vpop.f32.mrb[130].mxu1 }
 0x428   :  { %v20535_v51 = vpop.eup %18694  ;;  %v17162_v45 = vpop.f32.mrb[131].mxu1 }
 0x429   :  { %v2791_v30 = vpop.xlane.xlu1 %2790  ;;  %v2975_v41 = vsel %vm2779_vm3, %v20535_v51, 0.0 }
 0x42a   :  { %v2879_v9 = vsub.f32 %v20430_v14, %v2791_v30  ;;  %2976 = vadd.xlane.f32.xlu1 %v2975_v41  ;;  %v2858_v14 = vsel %vm2779_vm3, %v20515_v55, -inf }
 0x42c   :  { %v2914_v23 = vmul.f32 1.442695, %v2879_v9 }
 0x42e   :  { %18698 = vpow2.f32 %v2914_v23  ;;  %2862 = vmax.xlane.f32.xlu1 %v2861_v37 }
 0x430   :  { %v20542_v26 = vpop.eup %18696 }
 0x431   :  { %v2794_v61 = vpop.xlane.xlu0 %2793  ;;  %v2978_v0 = vsel %vm2779_vm3, %v20542_v26, 0.0 }
 0x432   :  { %v2880_v36 = vsub.f32 %v20434_v59, %v2794_v61  ;;  %2979 = vadd.xlane.f32.xlu0 %v2978_v0  ;;  %v2867_v59 = vsel %vm2779_vm3, %v20522_v34, -inf }
 0x434   :  { %v2916_v60 = vmul.f32 1.442695, %v2880_v36 }
 0x436   :  { %18700 = vpow2.f32 %v2916_v60  ;;  %2859 = vmax.xlane.f32.xlu0 %v2858_v14 }
 0x438   :  { %v20549_v42 = vpop.eup %18698 }
 0x439   :  { %v2797_v45 = vpop.xlane.xlu1 %2796  ;;  %v2981_v30 = vsel %vm2779_vm3, %v20549_v42, 0.0 }
 0x43a   :  { %v2881_v41 = vsub.f32 %v20438_v13, %v2797_v45  ;;  %2982 = vadd.xlane.f32.xlu1 %v2981_v30  ;;  %v2864_v13 = vsel %vm2779_vm3, %v20520_v46, -inf }
 0x43c   :  { %v2918_v9 = vmul.f32 1.442695, %v2881_v41 }
 0x43e   :  { %18702 = vpow2.f32 %v2918_v9  ;;  %2868 = vmax.xlane.f32.xlu1 %v2867_v59 }
 0x440   :  { %v20556_v23 = vpop.eup %18700 }
 0x441   :  { %v2800_v37 = vpop.xlane.xlu0 %2799  ;;  %v2984_v61 = vsel %vm2779_vm3, %v20556_v23, 0.0 }
 0x442   :  { %v2882_v0 = vsub.f32 %v20442_v39, %v2800_v37  ;;  %2985 = vadd.xlane.f32.xlu0 %v2984_v61 }
 0x444   :  { %v2920_v36 = vmul.f32 1.442695, %v2882_v0 }
 0x445   :  { %v2806_v60 = vpop.xlane.xlu0 %2805 }
 0x446   :  { %18704 = vpow2.f32 %v2920_v36  ;;  %v2884_v14 = vsub.f32 %v20400_v43, %v2806_v60  ;;  %2865 = vmax.xlane.f32.xlu0 %v2864_v13  ;;  %v2873_v43 = vsel %vm2779_vm3, %v20531_v20, -inf }
 0x448   :  { %v20564_v45 = vpop.eup %18702  ;;  %v2924_v30 = vmul.f32 1.442695, %v2884_v14 }
 0x449   :  { %v2812_v41 = vpop.xlane.xlu0 %2811  ;;  %v2803_v9 = vpop.xlane.xlu1 %2802  ;;  %v2987_v59 = vsel %vm2779_vm3, %v20564_v45, 0.0 }
 0x44a   :  { %v2886_v39 = vsub.f32 %v20414_v56, %v2812_v41  ;;  %v2883_v37 = vsub.f32 %v20448_v18, %v2803_v9  ;;  %2988 = vadd.xlane.f32.xlu1 %v2987_v59  ;;  %18706 = vpow2.f32 %v2924_v30  ;;  %v2870_v41 = vsel %vm2779_vm3, %v20529_v12, -inf }
 0x44c   :  { %v2928_v61 = vmul.f32 1.442695, %v2886_v39  ;;  %v2922_v0 = vmul.f32 1.442695, %v2883_v37 }
 0x44d   :  { %v2818_v36 = vpop.xlane.xlu0 %2817 }
 0x44e   :  { %v2888_v60 = vsub.f32 %v20420_v52, %v2818_v36  ;;  %2874 = vmax.xlane.f32.xlu1 %v2873_v43  ;;  %18708 = vpow2.f32 %v2922_v0 }
 0x44f   :  { %18710 = vpow2.f32 %v2928_v61 }
 0x450   :  { %v20573_v13 = vpop.eup %18704  ;;  %v2932_v14 = vmul.f32 1.442695, %v2888_v60 }
 0x451   :  { %v2809_v21 = vpop.xlane.xlu1 %2808  ;;  %v2990_v56 = vsel %vm2779_vm3, %v20573_v13, 0.0 }
 0x452   :  { %v2885_v18 = vsub.f32 %v20456_v22, %v2809_v21  ;;  %2991 = vadd.xlane.f32.xlu0 %v2990_v56  ;;  %18712 = vpow2.f32 %v2932_v14 }
 0x454   :  { %v2926_v30 = vmul.f32 1.442695, %v2885_v18  ;;  %v20580_v9 = vpop.eup %18706 }
 0x455   :  { %v2996_v39 = vsel %vm2779_vm3, %v20580_v9, 0.0 }
 0x456   :  { %18714 = vpow2.f32 %v2926_v30  ;;  %2871 = vmax.xlane.f32.xlu0 %v2870_v41 }
 0x458   :  { %v20582_v52 = vpop.eup %18708 }
 0x459   :  { %v2815_v59 = vpop.xlane.xlu1 %2814  ;;  %v20586_v37 = vpop.eup %18710  ;;  %v2993_v22 = vsel %vm2779_vm3, %v20582_v52, 0.0 }
 0x45a   :  { %v2887_v21 = vsub.f32 %v20460_v31, %v2815_v59  ;;  %2997 = vadd.xlane.f32.xlu0 %v2996_v39  ;;  %2994 = vadd.xlane.f32.xlu1 %v2993_v22  ;;  %v3002_v0 = vsel %vm2779_vm3, %v20586_v37, 0.0 }
 0x45c   :  { %v2930_v61 = vmul.f32 1.442695, %v2887_v21  ;;  %v20593_v36 = vpop.eup %18712 }
 0x45d   :  { %v3008_v31 = vsel %vm2779_vm3, %v20593_v36, 0.0 }
 0x45e   :  { %18716 = vpow2.f32 %v2930_v61  ;;  %3003 = vadd.xlane.f32.xlu0 %v3002_v0 }
 0x460   :  { %v20595_v43 = vpop.eup %18714 }
 0x461   :  { %v2821_v60 = vpop.xlane.xlu1 %2820  ;;  %v2999_v14 = vsel %vm2779_vm3, %v20595_v43, 0.0 }
 0x462   :  { %v2889_v56 = vsub.f32 %v20464_v63, %v2821_v60  ;;  %3000 = vadd.xlane.f32.xlu1 %v2999_v14  ;;  %3009 = vadd.xlane.f32.xlu0 %v3008_v31 }
 0x464   :  { %v2934_v18 = vmul.f32 1.442695, %v2889_v56 }
 0x466   :  { %18718 = vpow2.f32 %v2934_v18 }
 0x468   :  { %v20602_v30 = vpop.eup %18716 }
 0x469   :  { %v3005_v41 = vsel %vm2779_vm3, %v20602_v30, 0.0 }
 0x46a   :  { %3006 = vadd.xlane.f32.xlu1 %v3005_v41 }
 0x470   :  { %v20606_v59 = vpop.eup %18718 }
 0x471   :  { %v3011_v39 = vsel %vm2779_vm3, %v20606_v59, 0.0 }
 0x472   :  { %v2824_v21 = vpop.xlane.xlu0 %2823  ;;  %3012 = vadd.xlane.f32.xlu1 %v3011_v39 }
 0x473   :  { %v2890_v22 = vsub.f32 %v20468_v29, %v2824_v21 }
 0x474   :  { %v2827_v63 = vpop.xlane.xlu1 %2826 }
 0x475   :  { %v2936_v61 = vmul.f32 1.442695, %v2890_v22  ;;  %v2891_v0 = vsub.f32 %v20472_v15, %v2827_v63 }
 0x477   :  { %18720 = vpow2.f32 %v2936_v61  ;;  %v2938_v60 = vmul.f32 1.442695, %v2891_v0 }
 0x479   :  { %18722 = vpow2.f32 %v2938_v60 }
 0x47a   :  { %v2830_v14 = vpop.xlane.xlu0 %2829 }
 0x47b   :  { %v2892_v31 = vsub.f32 %v20476_v32, %v2830_v14 }
 0x47c   :  { %v2833_v56 = vpop.xlane.xlu1 %2832 }
 0x47d   :  { %v2940_v18 = vmul.f32 1.442695, %v2892_v31  ;;  %v2893_v41 = vsub.f32 %v20480_v7, %v2833_v56 }
 0x47f   :  { %18724 = vpow2.f32 %v2940_v18  ;;  %v2942_v62 = vmul.f32 1.442695, %v2893_v41 }
 0x481   :  { %v20614_v49 = vpop.eup %18720  ;;  %18726 = vpow2.f32 %v2942_v62 }
 0x482   :  { %v2836_v29 = vpop.xlane.xlu0 %2835  ;;  %v3014_v39 = vsel %vm2779_vm3, %v20614_v49, 0.0 }
 0x483   :  { %v20618_v15 = vpop.eup %18722  ;;  %v2894_v21 = vsub.f32 %v20484_v48, %v2836_v29  ;;  %3015 = vadd.xlane.f32.xlu0 %v3014_v39 }
 0x484   :  { %v2839_v22 = vpop.xlane.xlu1 %2838  ;;  %v3017_v32 = vsel %vm2779_vm3, %v20618_v15, 0.0 }
 0x485   :  { %v2944_v63 = vmul.f32 1.442695, %v2894_v21  ;;  %v2895_v7 = vsub.f32 %v20488_v28, %v2839_v22  ;;  %3018 = vadd.xlane.f32.xlu1 %v3017_v32 }
 0x487   :  { %18728 = vpow2.f32 %v2944_v63  ;;  %v2946_v61 = vmul.f32 1.442695, %v2895_v7 }
 0x489   :  { %v20624_v62 = vpop.eup %18724  ;;  %18730 = vpow2.f32 %v2946_v61 }
 0x48a   :  { %v2842_v0 = vpop.xlane.xlu0 %2841  ;;  %v3020_v60 = vsel %vm2779_vm3, %v20624_v62, 0.0 }
 0x48b   :  { %v20628_v14 = vpop.eup %18726  ;;  %v2896_v48 = vsub.f32 %v20492_v57, %v2842_v0  ;;  %3021 = vadd.xlane.f32.xlu0 %v3020_v60 }
 0x48c   :  { %v2845_v31 = vpop.xlane.xlu1 %2844  ;;  %v3023_v56 = vsel %vm2779_vm3, %v20628_v14, 0.0 }
 0x48d   :  { %v2948_v28 = vmul.f32 1.442695, %v2896_v48  ;;  %v2897_v18 = vsub.f32 %v20496_v50, %v2845_v31  ;;  %3024 = vadd.xlane.f32.xlu1 %v3023_v56 }
 0x48f   :  { %18732 = vpow2.f32 %v2948_v28  ;;  %v2950_v41 = vmul.f32 1.442695, %v2897_v18 }
 0x491   :  { %v20634_v29 = vpop.eup %18728  ;;  %18734 = vpow2.f32 %v2950_v41 }
 0x492   :  { %v2848_v39 = vpop.xlane.xlu0 %2847  ;;  %v3026_v21 = vsel %vm2779_vm3, %v20634_v29, 0.0 }
 0x493   :  { %v20638_v22 = vpop.eup %18730  ;;  %v2898_v57 = vsub.f32 %v20500_v44, %v2848_v39  ;;  %3027 = vadd.xlane.f32.xlu0 %v3026_v21 }
 0x494   :  { %v2851_v32 = vpop.xlane.xlu1 %2850  ;;  %v3029_v63 = vsel %vm2779_vm3, %v20638_v22, 0.0 }
 0x495   :  { %v2952_v50 = vmul.f32 1.442695, %v2898_v57  ;;  %v2899_v7 = vsub.f32 %v20504_v2, %v2851_v32  ;;  %3030 = vadd.xlane.f32.xlu1 %v3029_v63 }
 0x497   :  { %18736 = vpow2.f32 %v2952_v50  ;;  %v2954_v61 = vmul.f32 1.442695, %v2899_v7  ;;  %v20665_v50 = vpack.c.bf16 %v20271_v35, %v20271_v35 }
 0x499   :  { %v20644_v0 = vpop.eup %18732  ;;  %18738 = vpow2.f32 %v2954_v61  ;;  %24761 = vst [vmem:[#allocation95_spill] sm:$0xff] %v20665_v50 }
 0x49a   :  { %v3032_v60 = vsel %vm2779_vm3, %v20644_v0, 0.0 }
 0x49b   :  { %v20648_v48 = vpop.eup %18734  ;;  %3033 = vadd.xlane.f32.xlu0 %v3032_v60 }
 0x49c   :  { %v3035_v44 = vsel %vm2779_vm3, %v20648_v48, 0.0  ;;  %v2857_v41 = vpop.xlane.xlu1 %2856 }
 0x49d   :  { %3036 = vadd.xlane.f32.xlu1 %v3035_v44  ;;  %v24762_v44 = vmov 0.0  }
 0x4a1   :  { %v20652_v31 = vpop.eup %18736 }
 0x4a2   :  { %v3038_v2 = vsel %vm2779_vm3, %v20652_v31, 0.0 }
 0x4a3   :  { %v20656_v56 = vpop.eup %18738  ;;  %3039 = vadd.xlane.f32.xlu0 %v3038_v2 }
 0x4a4   :  { %v3041_v28 = vsel %vm2779_vm3, %v20656_v56, 0.0 }
 0x4a5   :  { %3042 = vadd.xlane.f32.xlu1 %v3041_v28 }
 0x4af   :  { %v2974_v18 = vpop.xlane.xlu0 %2973 }
 0x4b0   :  { %18740 = vrcp.f32 %v2974_v18 }
 0x4b3   :  { %v2854_v39 = vpop.xlane.xlu0 %2853 }
 0x4b4   :  { %v2900_v21 = vsub.f32 %v20508_v27, %v2854_v39  ;;  %v3261_v27 = vsel %vm3167_vm2, %v20665_v50, 0  ;;  %v20680_v39 = vpack.c.bf16 %v20280_v17, %v20280_v17 }
 0x4b6   :  { %v2956_v57 = vmul.f32 1.442695, %v2900_v21  ;;  %4705 = vrot.lane.b32.xlu1 %v19904_v3, %s19358_s4  ;;  %24763 = vst [vmem:[#allocation96_spill] sm:$0xff] %v20680_v39  ;;  %v2901_v21 = vsub.f32 %v20510_v33, %v2857_v41  ;;  %v3307_v17 = vsel %vm3167_vm2, %v20680_v39, 0 }
 0x4b7   :  { %v2977_v32 = vpop.xlane.xlu1 %2976 }
 0x4b8   :  { %18742 = vpow2.f32 %v2956_v57 }
 0x4b9   :  { %18744 = vrcp.f32 %v2977_v32 }
 0x4ba   :  { %v18741_v63 = vpop.eup %18740 }
 0x4bb   :  { %v3100_v7 = vmul.f32 %v18741_v63, %v20524_v47  ;;  %v2863_v28 = vpop.xlane.xlu1 %2862 }
 0x4bd   :  { %v3132_v61 = vpack.c.bf16 %v3100_v7, %v3100_v7 }
 0x4bf   :  { %v2980_v60 = vpop.xlane.xlu0 %2979  ;;  %17166 = vmatmul.mubr.msk.bf16.vlgmr.msra.gmra.mrb[92].mxu0 %vm2779_vm3, %v3132_v61 }
 0x4c0   :  { %17176 = vmatpush3.bf16.msra.mxu0 %v3261_v27  ;;  %17177 = vmatprep.mubr.msk.bf16.mxu0 %vm19357_vm0, %v24762_v44  ;;  %18746 = vrcp.f32 %v2980_v60  ;;  %v2958_v60 = vmul.f32 1.442695, %v2901_v21  ;;  %v2903_v27 = vsub.f32 %v20517_v38, %v2863_v28 }
 0x4c1   :  { %17187 = vmatprep.subr.bf16.mxu0 %v24762_v44 }
 0x4c2   :  { %v20674_v2 = vpop.eup %18742  ;;  %v2962_v38 = vmul.f32 1.442695, %v2903_v27 }
 0x4c3   :  { %v18745_v35 = vpop.eup %18744  ;;  %v2860_v18 = vpop.xlane.xlu0 %2859  ;;  %v3044_v47 = vsel %vm2779_vm3, %v20674_v2, 0.0 }
 0x4c4   :  { %v2902_v57 = vsub.f32 %v20515_v55, %v2860_v18  ;;  %3045 = vadd.xlane.f32.xlu0 %v3044_v47  ;;  %v3101_v32 = vmul.f32 %v18745_v35, %v20535_v51  ;;  %v20694_v55 = vpack.c.bf16 %v20311_v8, %v20311_v8 }
 0x4c6   :  { %v2960_v63 = vmul.f32 1.442695, %v2902_v57  ;;  %v3133_v7 = vpack.c.bf16 %v3101_v32, %v3101_v32  ;;  %24764 = vst [vmem:[#allocation97_spill] sm:$0xff] %v20694_v55  ;;  %v3353_v21 = vsel %vm3167_vm2, %v20694_v55, 0  ;;  %v20710_v32 = vpack.c.bf16 %v20322_v19, %v20322_v19 }
 0x4c7   :  { %v2983_v61 = vpop.xlane.xlu1 %2982 }
 0x4c8   :  { %18748 = vpow2.f32 %v2960_v63  ;;  %17172 = vmatmul.mubr.msk.bf16.vlgmr.msra.gmra.mrb[132].mxu1 %vm2779_vm3, %v3133_v7  ;;  %24765 = vst [vmem:[#allocation98_spill] sm:$0xff] %v20710_v32 }
 0x4c9   :  { %18750 = vrcp.f32 %v2983_v61  ;;  %17182 = vmatpush3.bf16.msra.mxu1 %v3307_v17  ;;  %17183 = vmatprep.mubr.msk.bf16.mxu1 %vm19357_vm0, %v24762_v44 }
 0x4ca   :  { %17193 = vmatprep.subr.bf16.mxu1 %v24762_v44  ;;  %v18747_v33 = vpop.eup %18746  ;;  %18752 = vpow2.f32 %v2958_v60 }
 0x4cb   :  { %v2869_v51 = vpop.xlane.xlu1 %2868  ;;  %v3102_v35 = vmul.f32 %v18747_v33, %v20542_v26  ;;  %18754 = vpow2.f32 %v2962_v38  ;;  %v3399_v33 = vsel %vm3167_vm2, %v20710_v32, 0 }
 0x4cc   :  { %v2905_v41 = vsub.f32 %v20522_v34, %v2869_v51  ;;  %v20728_v51 = vpack.c.bf16 %v20303_v1, %v20303_v1 }
 0x4cd   :  { %v3134_v28 = vpack.c.bf16 %v3102_v35, %v3102_v35 }
 0x4ce   :  { %v2966_v47 = vmul.f32 1.442695, %v2905_v41  ;;  %24766 = vst [vmem:[#allocation99_spill] sm:$0xff] %v20728_v51 }
 0x4cf   :  { %v2986_v18 = vpop.xlane.xlu0 %2985  ;;  %17178 = vmatmul.mubr.msk.bf16.vlgmr.msra.gmra.mrb[96].mxu0 %vm2779_vm3, %v3134_v28 }
 0x4d0   :  { %18756 = vrcp.f32 %v2986_v18  ;;  %17188 = vmatpush3.bf16.msra.mxu0 %v3353_v21  ;;  %17189 = vmatprep.mubr.msk.bf16.mxu0 %vm19357_vm0, %v24762_v44 }
 0x4d1   :  { %17199 = vmatprep.subr.bf16.mxu0 %v24762_v44  ;;  %18758 = vpow2.f32 %v2966_v47  ;;  %v3445_v47 = vsel %vm3167_vm2, %v20728_v51, 0 }
 0x4d2   :  { %v20703_v8 = vpop.eup %18748 }
 0x4d3   :  { %v18751_v34 = vpop.eup %18750  ;;  %v2866_v26 = vpop.xlane.xlu0 %2865  ;;  %v3050_v57 = vsel %vm2779_vm3, %v20703_v8, 0.0 }
 0x4d4   :  { %v2904_v63 = vsub.f32 %v20520_v46, %v2866_v26  ;;  %3051 = vadd.xlane.f32.xlu0 %v3050_v57  ;;  %v3103_v7 = vmul.f32 %v18751_v34, %v20549_v42  ;;  %v20714_v61 = vpop.eup %18752  ;;  %v20749_v57 = vpack.c.bf16 %v20315_v6, %v20315_v6 }
 0x4d5   :  { %v3047_v19 = vsel %vm2779_vm3, %v20714_v61, 0.0  ;;  %v20723_v46 = vpop.eup %18754 }
 0x4d6   :  { %v2964_v60 = vmul.f32 1.442695, %v2904_v63  ;;  %v3135_v27 = vpack.c.bf16 %v3103_v7, %v3103_v7  ;;  %v3053_v41 = vsel %vm2779_vm3, %v20723_v46, 0.0  ;;  %24767 = vst [vmem:[#allocation100_spill] sm:$0xff] %v20749_v57 }
 0x4d7   :  { %v2989_v17 = vpop.xlane.xlu1 %2988 }
 0x4d8   :  { %18760 = vpow2.f32 %v2964_v60  ;;  %17184 = vmatmul.mubr.msk.bf16.vlgmr.msra.gmra.mrb[136].mxu1 %vm2779_vm3, %v3135_v27 }
 0x4d9   :  { %18762 = vrcp.f32 %v2989_v17  ;;  %17194 = vmatpush3.bf16.msra.mxu1 %v3399_v33  ;;  %17195 = vmatprep.mubr.msk.bf16.mxu1 %vm19357_vm0, %v24762_v44 }
 0x4da   :  { %3048 = vadd.xlane.f32.xlu1 %v3047_v19  ;;  %17205 = vmatprep.subr.bf16.mxu1 %v24762_v44  ;;  %v18757_v42 = vpop.eup %18756  ;;  %v3491_v19 = vsel %vm3167_vm2, %v20749_v57, 0 }
 0x4db   :  { %v3104_v38 = vmul.f32 %v18757_v42, %v20556_v23  ;;  %v20733_v35 = vpop.eup %18758  ;;  %v20751_v63 = vpop.xlane.xlu1 %2874 }
 0x4dc   :  { %v3059_v1 = vsel %vm2779_vm3, %v20733_v35, 0.0 }
 0x4dd   :  { %v3136_v28 = vpack.c.bf16 %v3104_v38, %v3104_v38 }
 0x4de   :  { %3054 = vadd.xlane.f32.xlu1 %v3053_v41 }
 0x4df   :  { %v2992_v18 = vpop.xlane.xlu0 %2991  ;;  %17190 = vmatmul.mubr.msk.bf16.vlgmr.msra.gmra.mrb[100].mxu0 %vm2779_vm3, %v3136_v28 }
 0x4e0   :  { %18764 = vrcp.f32 %v2992_v18  ;;  %17200 = vmatpush3.bf16.msra.mxu0 %v3445_v47  ;;  %17201 = vmatprep.mubr.msk.bf16.mxu0 %vm19357_vm0, %v24762_v44 }
 0x4e1   :  { %17211 = vmatprep.subr.bf16.mxu0 %v24762_v44 }
 0x4e2   :  { %v20742_v23 = vpop.eup %18760  ;;  %3060 = vadd.xlane.f32.xlu1 %v3059_v1 }
 0x4e3   :  { %v18763_v21 = vpop.eup %18762  ;;  %v2872_v34 = vpop.xlane.xlu0 %2871  ;;  %v3056_v26 = vsel %vm2779_vm3, %v20742_v23, 0.0 }
 0x4e4   :  { %v2906_v7 = vsub.f32 %v20529_v12, %v2872_v34  ;;  %3057 = vadd.xlane.f32.xlu0 %v3056_v26  ;;  %v3105_v60 = vmul.f32 %v18763_v21, %v20564_v45  ;;  %v20763_v45 = vpack.c.bf16 %v20343_v54, %v20343_v54  ;;  %v20780_v34 = vpack.c.bf16 %v20350_v40, %v20350_v40 }
 0x4e6   :  { %v2968_v27 = vmul.f32 1.442695, %v2906_v7  ;;  %v3137_v17 = vpack.c.bf16 %v3105_v60, %v3105_v60  ;;  %24768 = vst [vmem:[#allocation101_spill] sm:$0xff] %v20763_v45  ;;  %v3537_v18 = vsel %vm3167_vm2, %v20763_v45, 0  ;;  %24769 = vst [vmem:[#allocation102_spill] sm:$0xff] %v20780_v34  ;;  %v20785_v7 = vpack.c.bf16 %v20338_v4, %v20338_v4 }
 0x4e7   :  { %v2998_v33 = vpop.xlane.xlu0 %2997  ;;  %v2995_v42 = vpop.xlane.xlu1 %2994  ;;  %v3583_v40 = vsel %vm3167_vm2, %v20780_v34, 0 }
 0x4e8   :  { %18766 = vpow2.f32 %v2968_v27  ;;  %17196 = vmatmul.mubr.msk.bf16.vlgmr.msra.gmra.mrb[140].mxu1 %vm2779_vm3, %v3137_v17  ;;  %24770 = vst [vmem:[#allocation103_spill] sm:$0xff] %v20785_v7  ;;  %v3629_v4 = vsel %vm3167_vm2, %v20785_v7, 0 }
 0x4e9   :  { %17206 = vmatpush3.bf16.msra.mxu1 %v3491_v19  ;;  %18768 = vrcp.f32 %v2995_v42  ;;  %17207 = vmatprep.mubr.msk.bf16.mxu1 %vm19357_vm0, %v24762_v44 }
 0x4ea   :  { %18770 = vrcp.f32 %v2998_v33  ;;  %17217 = vmatprep.subr.bf16.mxu1 %v24762_v44  ;;  %v18765_v6 = vpop.eup %18764 }
 0x4eb   :  { %v3004_v12 = vpop.xlane.xlu0 %3003  ;;  %v3106_v38 = vmul.f32 %v18765_v6, %v20573_v13  ;;  %v20803_v6 = vpack.c.bf16 %v20347_v11, %v20347_v11  ;;  %v2907_v11 = vsub.f32 %v20531_v20, %v20751_v63  ;;  %v20827_v63 = vpack.c.bf16 %v20362_v10, %v20362_v10 }
 0x4ec   :  { %18772 = vrcp.f32 %v3004_v12  ;;  %v20808_v12 = vpack.c.bf16 %v20356_v58, %v20356_v58 }
 0x4ed   :  { %v3138_v41 = vpack.c.bf16 %v3106_v38, %v3106_v38  ;;  %24771 = vst [vmem:[#allocation104_spill] sm:$0xff] %v20803_v6  ;;  %24773 = vst [vmem:[#allocation106_spill] sm:$0xff] %v20827_v63 }
 0x4ee   :  { %24772 = vst [vmem:[#allocation105_spill] sm:$0xff] %v20808_v12  ;;  %v3721_v58 = vsel %vm3167_vm2, %v20808_v12, 0 }
 0x4ef   :  { %v3001_v28 = vpop.xlane.xlu1 %3000  ;;  %17202 = vmatmul.mubr.msk.bf16.vlgmr.msra.gmra.mrb[104].mxu0 %vm2779_vm3, %v3138_v41  ;;  %v3010_v1 = vpop.xlane.xlu0 %3009 }
 0x4f0   :  { %18774 = vrcp.f32 %v3001_v28  ;;  %17212 = vmatpush3.bf16.msra.mxu0 %v3537_v18  ;;  %17213 = vmatprep.mubr.msk.bf16.mxu0 %vm19357_vm0, %v24762_v44 }
 0x4f1   :  { %17223 = vmatprep.subr.bf16.mxu0 %v24762_v44  ;;  %18776 = vrcp.f32 %v3010_v1  ;;  %v20832_v1 = vpack.c.bf16 %v20353_v25, %v20353_v25 }
 0x4f2   :  { %v20771_v47 = vpop.eup %18766 }
 0x4f3   :  { %v18769_v54 = vpop.eup %18768  ;;  %4653 = vrot.lane.b32.xlu1 %v19910_v53, %s19358_s4  ;;  %v3062_v13 = vsel %vm2779_vm3, %v20771_v47, 0.0  ;;  %24774 = vst [vmem:[#allocation107_spill] sm:$0xff] %v20832_v1  ;;  %v3813_v10 = vsel %vm3167_vm2, %v20832_v1, 0 }
 0x4f4   :  { %v18771_v21 = vpop.eup %18770  ;;  %3063 = vadd.xlane.f32.xlu0 %v3062_v13  ;;  %v3107_v26 = vmul.f32 %v18769_v54, %v20582_v52  ;;  %v2970_v13 = vmul.f32 1.442695, %v2907_v11  ;;  %v24781_v11 = vld [vmem:[#allocation82_spill] sm:$0xff] }
 0x4f5   :  { %v3108_v60 = vmul.f32 %v18771_v21, %v20580_v9 }
 0x4f6   :  { %v3139_v27 = vpack.c.bf16 %v3107_v26, %v3107_v26  ;;  %v18773_v19 = vpop.eup %18772 }
 0x4f7   :  { %v3007_v17 = vpop.xlane.xlu1 %3006  ;;  %v3140_v33 = vpack.c.bf16 %v3108_v60, %v3108_v60  ;;  %v3110_v42 = vmul.f32 %v18773_v19, %v20586_v37  ;;  %v20848_v60 = vpack.c.bf16 %v20359_v24, %v20359_v24 }
 0x4f8   :  { %17208 = vmatmul.mubr.msk.bf16.vlgmr.msra.gmra.mrb[144].mxu1 %vm2779_vm3, %v3139_v27  ;;  %18778 = vrcp.f32 %v3007_v17 }
 0x4f9   :  { %17218 = vmatpush3.bf16.msra.mxu1 %v3583_v40  ;;  %17214 = vmatmul.mubr.msk.bf16.vlgmr.msra.gmra.mrb[108].mxu0 %vm2779_vm3, %v3140_v33  ;;  %v3142_v28 = vpack.c.bf16 %v3110_v42, %v3110_v42  ;;  %24775 = vst [vmem:[#allocation108_spill] sm:$0xff] %v20848_v60  ;;  %v3859_v17 = vsel %vm3167_vm2, %v20848_v60, 0  ;;  %v24777_v40 = vld [vmem:[#allocation26_spill] sm:$0xff]  ;;  %v24778_v42 = vld [vmem:[#allocation29_spill] sm:$0xff] }
 0x4fa   :  { %v18775_v52 = vpop.eup %18774  ;;  %17224 = vmatpush3.bf16.msra.mxu0 %v3629_v4  ;;  %17219 = vmatprep.mubr.msk.bf16.mxu1 %vm19357_vm0, %v24762_v44 }
 0x4fb   :  { %17225 = vmatprep.mubr.msk.bf16.mxu0 %vm19357_vm0, %v24762_v44  ;;  %17229 = vmatprep.subr.bf16.mxu1 %v24762_v44  ;;  %v3109_v9 = vmul.f32 %v18775_v52, %v20595_v43  ;;  %v18777_v18 = vpop.eup %18776  ;;  %v3675_v43 = vsel %vm3167_vm2, %v20803_v6, 0 }
 0x4fc   :  { %17235 = vmatprep.subr.bf16.mxu0 %v24762_v44  ;;  %v3112_v20 = vmul.f32 %v18777_v18, %v20593_v36 }
 0x4fd   :  { %v3141_v38 = vpack.c.bf16 %v3109_v9, %v3109_v9 }
 0x4fe   :  { %v3144_v26 = vpack.c.bf16 %v3112_v20, %v3112_v20 }
 0x4ff   :  { %v3013_v41 = vpop.xlane.xlu1 %3012 }
 0x500   :  { %17220 = vmatmul.mubr.msk.bf16.vlgmr.msra.gmra.mrb[148].mxu1 %vm2779_vm3, %v3141_v38  ;;  %18780 = vrcp.f32 %v3013_v41  ;;  %v24779_v41 = vld [vmem:[#allocation80_spill] sm:$0xff] }
 0x501   :  { %17230 = vmatpush3.bf16.msra.mxu1 %v3675_v43  ;;  %17226 = vmatmul.mubr.msk.bf16.vlgmr.msra.gmra.mrb[112].mxu0 %vm2779_vm3, %v3142_v28  ;;  %18782 = vpow2.f32 %v2970_v13  ;;  %v20873_v28 = vpack.c.bf16 %v24779_v41, %v24779_v41 }
 0x502   :  { %v18779_v37 = vpop.eup %18778  ;;  %17236 = vmatpush3.bf16.msra.mxu0 %v3721_v58  ;;  %17231 = vmatprep.mubr.msk.bf16.mxu1 %vm19357_vm0, %v24762_v44  ;;  %v20878_v58 = vpack.c.bf16 %v24781_v11, %v24781_v11  ;;  %v24791_v11 = vld [vmem:[#allocation17_spill] sm:$0xff] }
 0x503   :  { %17237 = vmatprep.mubr.msk.bf16.mxu0 %vm19357_vm0, %v24762_v44  ;;  %17241 = vmatprep.subr.bf16.mxu1 %v24762_v44  ;;  %v3111_v54 = vmul.f32 %v18779_v37, %v20602_v30  ;;  %v3767_v30 = vsel %vm3167_vm2, %v20827_v63, 0  ;;  %24780 = vst [vmem:[#allocation80_spill] sm:$0xff] %v20873_v28  ;;  %v24783_v37 = vld [vmem:[#allocation30_spill] sm:$0xff]  ;;  %v3905_v13 = vsel %vm3167_vm2, %v20873_v28, 0 }
 0x504   :  { %17247 = vmatprep.subr.bf16.mxu0 %v24762_v44  ;;  %24782 = vst [vmem:[#allocation82_spill] sm:$0xff] %v20878_v58 }
 0x505   :  { %v3143_v21 = vpack.c.bf16 %v3111_v54, %v3111_v54 }
 0x508   :  { %17232 = vmatmul.mubr.msk.bf16.vlgmr.msra.gmra.mrb[152].mxu1 %vm2779_vm3, %v3143_v21 }
 0x509   :  { %17238 = vmatmul.mubr.msk.bf16.vlgmr.msra.gmra.mrb[116].mxu0 %vm2779_vm3, %v3144_v26  ;;  %17242 = vmatpush3.bf16.msra.mxu1 %v3767_v30 }
 0x50a   :  { %v18781_v36 = vpop.eup %18780  ;;  %17248 = vmatpush3.bf16.msra.mxu0 %v3813_v10  ;;  %4655 = vrot.lane.b32.xlu0 %v19814_v16, %s19358_s4 }
 0x50b   :  { %17243 = vmatprep.mubr.msk.bf16.mxu1 %vm19357_vm0, %v24762_v44  ;;  %17253 = vmatprep.subr.bf16.mxu1 %v24762_v44  ;;  %v3113_v25 = vmul.f32 %v18781_v36, %v20606_v59  ;;  %v24776_v59 = vld [vmem:[#allocation25_spill] sm:$0xff]  ;;  %v20863_v19 = vpop.eup %18782  ;;  %v24785_v36 = vld [vmem:[#allocation79_spill] sm:$0xff] }
 0x50c   :  { %17249 = vmatprep.mubr.msk.bf16.mxu0 %vm19357_vm0, %v24762_v44  ;;  %17259 = vmatprep.subr.bf16.mxu0 %v24762_v44  ;;  %v3065_v4 = vsel %vm2779_vm3, %v20863_v19, 0.0 }
 0x50d   :  { %v3145_v27 = vpack.c.bf16 %v3113_v25, %v3113_v25  ;;  %v20896_v25 = vpack.c.bf16 %v24785_v36, %v24785_v36  ;;  %v24797_v36 = vld [vmem:[#allocation18_spill] sm:$0xff] }
 0x50e   :  { %4755 = vrot.lane.b32.xlu0 %v19929_v5, %s19358_s4 }
 0x50f   :  { %24786 = vst [vmem:[#allocation79_spill] sm:$0xff] %v20896_v25 }
 0x510   :  { %17244 = vmatmul.mubr.msk.bf16.vlgmr.msra.gmra.mrb[156].mxu1 %vm2779_vm3, %v3145_v27  ;;  %v3016_v33 = vpop.xlane.xlu0 %3015 }
 0x511   :  { %17254 = vmatpush3.bf16.msra.mxu1 %v3859_v17  ;;  %18784 = vrcp.f32 %v3016_v33  ;;  %17255 = vmatprep.mubr.msk.bf16.mxu1 %vm19357_vm0, %v24762_v44  ;;  %v24787_v33 = vld [vmem:[#allocation81_spill] sm:$0xff] }
 0x512   :  { %v3019_v24 = vpop.xlane.xlu1 %3018  ;;  %4753 = vrot.lane.b32.xlu0 %v24776_v59, %s19358_s4  ;;  %17265 = vmatprep.subr.bf16.mxu1 %v24762_v44 }
 0x513   :  { %18786 = vrcp.f32 %v3019_v24  ;;  %v20904_v24 = vpack.c.bf16 %v24787_v33, %v24787_v33  ;;  %v24798_v33 = vld [vmem:[#allocation27_spill] sm:$0xff] }
 0x515   :  { %24788 = vst [vmem:[#allocation81_spill] sm:$0xff] %v20904_v24 }
 0x516   :  { %4855 = vrot.lane.b32.xlu0 %v24777_v40, %s19358_s4 }
 0x517   :  { %3066 = vadd.xlane.f32.xlu1 %v3065_v4  ;;  %v24789_v4 = vld [vmem:[#allocation16_spill] sm:$0xff] }
 0x518   :  { %v3022_v52 = vpop.xlane.xlu0 %3021 }
 0x519   :  { %18788 = vrcp.f32 %v3022_v52 }
 0x51a   :  { %v3025_v9 = vpop.xlane.xlu1 %3024  ;;  %4853 = vrot.lane.b32.xlu0 %v24778_v42, %s19358_s4 }
 0x51b   :  { %v18785_v38 = vpop.eup %18784  ;;  %18790 = vrcp.f32 %v3025_v9 }
 0x51c   :  { %v3114_v18 = vmul.f32 %v18785_v38, %v20614_v49  ;;  %v3951_v49 = vsel %vm3167_vm2, %v20878_v58, 0  ;;  %v24790_v38 = vld [vmem:[#allocation23_spill] sm:$0xff] }
 0x51d   :  { %v18787_v43 = vpop.eup %18786 }
 0x51e   :  { %4955 = vrot.lane.b32.xlu0 %v24783_v37, %s19358_s4  ;;  %v3146_v54 = vpack.c.bf16 %v3114_v18, %v3114_v18  ;;  %v3115_v20 = vmul.f32 %v18787_v43, %v20618_v15  ;;  %v24784_v15 = vld [vmem:[#allocation33_spill] sm:$0xff] }
 0x520   :  { %17250 = vmatmul.mubr.msk.bf16.vlgmr.msra.gmra.mrb[120].mxu0 %vm2779_vm3, %v3146_v54  ;;  %v3028_v21 = vpop.xlane.xlu0 %3027  ;;  %v3147_v26 = vpack.c.bf16 %v3115_v20, %v3115_v20  ;;  %v24792_v20 = vld [vmem:[#allocation84_spill] sm:$0xff] }
 0x521   :  { %17260 = vmatpush3.bf16.msra.mxu0 %v3905_v13  ;;  %18792 = vrcp.f32 %v3028_v21  ;;  %17261 = vmatprep.mubr.msk.bf16.mxu0 %vm19357_vm0, %v24762_v44  ;;  %v20924_v13 = vpack.c.bf16 %v24792_v20, %v24792_v20  ;;  %v24794_v21 = vld [vmem:[#allocation24_spill] sm:$0xff] }
 0x522   :  { %17256 = vmatmul.mubr.msk.bf16.vlgmr.msra.gmra.mrb[160].mxu1 %vm2779_vm3, %v3147_v26  ;;  %v3031_v30 = vpop.xlane.xlu1 %3030  ;;  %4953 = vrot.lane.b32.xlu0 %v24784_v15, %s19358_s4 }
 0x523   :  { %v18789_v10 = vpop.eup %18788  ;;  %17266 = vmatpush3.bf16.msra.mxu1 %v3951_v49  ;;  %18794 = vrcp.f32 %v3031_v30  ;;  %17271 = vmatprep.subr.bf16.mxu0 %v24762_v44  ;;  %24793 = vst [vmem:[#allocation23_spill] sm:$0xff] %v20924_v13  ;;  %v24795_v30 = vld [vmem:[#allocation86_spill] sm:$0xff] }
 0x524   :  { %v3116_v27 = vmul.f32 %v18789_v10, %v20624_v62  ;;  %17267 = vmatprep.mubr.msk.bf16.mxu1 %vm19357_vm0, %v24762_v44  ;;  %17277 = vmatprep.subr.bf16.mxu1 %v24762_v44  ;;  %v3997_v62 = vsel %vm3167_vm2, %v20896_v25, 0  ;;  %v20934_v10 = vpack.c.bf16 %v24795_v30, %v24795_v30 }
 0x525   :  { %v18791_v17 = vpop.eup %18790 }
 0x526   :  { %5055 = vrot.lane.b32.xlu0 %v24789_v4, %s19358_s4  ;;  %v3148_v52 = vpack.c.bf16 %v3116_v27, %v3116_v27  ;;  %v3117_v9 = vmul.f32 %v18791_v17, %v20628_v14  ;;  %v4043_v14 = vsel %vm3167_vm2, %v20904_v24, 0  ;;  %24796 = vst [vmem:[#allocation84_spill] sm:$0xff] %v20934_v10 }
 0x528   :  { %4703 = vrot.lane.b32.xlu1 %v24790_v38, %s19358_s4  ;;  %17262 = vmatmul.mubr.msk.bf16.vlgmr.msra.gmra.mrb[124].mxu0 %vm2779_vm3, %v3148_v52  ;;  %v3034_v41 = vpop.xlane.xlu0 %3033  ;;  %v3149_v18 = vpack.c.bf16 %v3117_v9, %v3117_v9 }
 0x529   :  { %17272 = vmatpush3.bf16.msra.mxu0 %v3997_v62  ;;  %18796 = vrcp.f32 %v3034_v41  ;;  %17273 = vmatprep.mubr.msk.bf16.mxu0 %vm19357_vm0, %v24762_v44  ;;  %v24799_v41 = vld [vmem:[#allocation19_spill] sm:$0xff] }
 0x52a   :  { %17268 = vmatmul.mubr.msk.bf16.vlgmr.msra.gmra.mrb[164].mxu1 %vm2779_vm3, %v3149_v18  ;;  %v3037_v43 = vpop.xlane.xlu1 %3036  ;;  %5053 = vrot.lane.b32.xlu0 %v24791_v11, %s19358_s4 }
 0x52b   :  { %v18793_v54 = vpop.eup %18792  ;;  %17278 = vmatpush3.bf16.msra.mxu1 %v4043_v14  ;;  %18798 = vrcp.f32 %v3037_v43  ;;  %17283 = vmatprep.subr.bf16.mxu0 %v24762_v44  ;;  %v24800_v14 = vld [vmem:[#allocation83_spill] sm:$0xff] }
 0x52c   :  { %4805 = vrot.lane.b32.xlu1 %v24794_v21, %s19358_s4  ;;  %v3118_v26 = vmul.f32 %v18793_v54, %v20634_v29  ;;  %17279 = vmatprep.mubr.msk.bf16.mxu1 %vm19357_vm0, %v24762_v44  ;;  %v4089_v29 = vsel %vm3167_vm2, %v20924_v13, 0  ;;  %v20954_v43 = vpack.c.bf16 %v24800_v14, %v24800_v14  ;;  %v24802_v54 = vld [vmem:[#allocation28_spill] sm:$0xff] }
 0x52d   :  { %v18795_v49 = vpop.eup %18794  ;;  %17289 = vmatprep.subr.bf16.mxu1 %v24762_v44 }
 0x52e   :  { %5155 = vrot.lane.b32.xlu0 %v24797_v36, %s19358_s4  ;;  %v3150_v27 = vpack.c.bf16 %v3118_v26, %v3118_v26  ;;  %v3119_v17 = vmul.f32 %v18795_v49, %v20638_v22  ;;  %v4135_v22 = vsel %vm3167_vm2, %v20934_v10, 0  ;;  %24801 = vst [vmem:[#allocation24_spill] sm:$0xff] %v20954_v43  ;;  %v24803_v49 = vld [vmem:[#allocation85_spill] sm:$0xff] }
 0x52f   :  { %v20964_v30 = vpack.c.bf16 %v24803_v49, %v24803_v49 }
 0x530   :  { %4803 = vrot.lane.b32.xlu1 %v24798_v33, %s19358_s4  ;;  %17274 = vmatmul.mubr.msk.bf16.vlgmr.msra.gmra.mrb[128].mxu0 %vm2779_vm3, %v3150_v27  ;;  %v3040_v52 = vpop.xlane.xlu0 %3039  ;;  %v3151_v9 = vpack.c.bf16 %v3119_v17, %v3119_v17  ;;  %v24805_v27 = vld [vmem:[#allocation20_spill] sm:$0xff] }
 0x531   :  { %17284 = vmatpush3.bf16.msra.mxu0 %v4089_v29  ;;  %18800 = vrcp.f32 %v3040_v52  ;;  %17285 = vmatprep.mubr.msk.bf16.mxu0 %vm19357_vm0, %v24762_v44  ;;  %24804 = vst [vmem:[#allocation86_spill] sm:$0xff] %v20964_v30  ;;  %v24806_v52 = vld [vmem:[#allocation31_spill] sm:$0xff] }
 0x532   :  { %17280 = vmatmul.mubr.msk.bf16.vlgmr.msra.gmra.mrb[168].mxu1 %vm2779_vm3, %v3151_v9  ;;  %v3043_v62 = vpop.xlane.xlu1 %3042  ;;  %5153 = vrot.lane.b32.xlu0 %v24799_v41, %s19358_s4  ;;  %v24828_v41 = vld [vmem:[#allocation42_spill] sm:$0xff] }
 0x533   :  { %v18797_v18 = vpop.eup %18796  ;;  %17290 = vmatpush3.bf16.msra.mxu1 %v4135_v22  ;;  %18802 = vrcp.f32 %v3043_v62  ;;  %17295 = vmatprep.subr.bf16.mxu0 %v24762_v44  ;;  %v4227_v22 = vsel %vm3167_vm2, %v20964_v30, 0 }
 0x534   :  { %4905 = vrot.lane.b32.xlu1 %v24802_v54, %s19358_s4  ;;  %v3120_v20 = vmul.f32 %v18797_v18, %v20644_v0  ;;  %17291 = vmatprep.mubr.msk.bf16.mxu1 %vm19357_vm0, %v24762_v44  ;;  %v4181_v0 = vsel %vm3167_vm2, %v20954_v43, 0  ;;  %v24808_v18 = vld [vmem:[#allocation88_spill] sm:$0xff] }
 0x535   :  { %v18799_v26 = vpop.eup %18798  ;;  %17301 = vmatprep.subr.bf16.mxu1 %v24762_v44  ;;  %v20984_v14 = vpack.c.bf16 %v24808_v18, %v24808_v18  ;;  %v24814_v18 = vld [vmem:[#allocation35_spill] sm:$0xff] }
 0x536   :  { %5255 = vrot.lane.b32.xlu0 %v24805_v27, %s19358_s4  ;;  %v3152_v17 = vpack.c.bf16 %v3120_v20, %v3120_v20  ;;  %v3121_v29 = vmul.f32 %v18799_v26, %v20648_v48  ;;  %v24807_v48 = vld [vmem:[#allocation21_spill] sm:$0xff]  ;;  %v24810_v20 = vld [vmem:[#allocation32_spill] sm:$0xff] }
 0x537   :  { %24809 = vst [vmem:[#allocation27_spill] sm:$0xff] %v20984_v14  ;;  %v24827_v27 = vld [vmem:[#allocation56_spill] sm:$0xff] }
 0x538   :  { %4903 = vrot.lane.b32.xlu1 %v24806_v52, %s19358_s4  ;;  %17286 = vmatmul.mubr.msk.bf16.vlgmr.msra.gmra.mrb[132].mxu0 %vm2779_vm3, %v3152_v17  ;;  %v3153_v9 = vpack.c.bf16 %v3121_v29, %v3121_v29  ;;  %v24811_v17 = vld [vmem:[#allocation90_spill] sm:$0xff] }
 0x539   :  { %17296 = vmatpush3.bf16.msra.mxu0 %v4181_v0  ;;  %17297 = vmatprep.mubr.msk.bf16.mxu0 %vm19357_vm0, %v24762_v44  ;;  %v20994_v29 = vpack.c.bf16 %v24811_v17, %v24811_v17  ;;  %v24813_v0 = vld [vmem:[#allocation41_spill] sm:$0xff]  ;;  %v24817_v17 = vld [vmem:[#allocation44_spill] sm:$0xff] }
 0x53a   :  { %17292 = vmatmul.mubr.msk.bf16.vlgmr.msra.gmra.mrb[172].mxu1 %vm2779_vm3, %v3153_v9  ;;  %5253 = vrot.lane.b32.xlu0 %v24807_v48, %s19358_s4  ;;  %v24825_v48 = vld [vmem:[#allocation52_spill] sm:$0xff] }
 0x53b   :  { %v18801_v62 = vpop.eup %18800  ;;  %17302 = vmatpush3.bf16.msra.mxu1 %v4227_v22  ;;  %17307 = vmatprep.subr.bf16.mxu0 %v24762_v44  ;;  %24812 = vst [vmem:[#allocation83_spill] sm:$0xff] %v20994_v29 }
 0x53c   :  { %5005 = vrot.lane.b32.xlu1 %v24810_v20, %s19358_s4  ;;  %v3122_v26 = vmul.f32 %v18801_v62, %v20652_v31  ;;  %17303 = vmatprep.mubr.msk.bf16.mxu1 %vm19357_vm0, %v24762_v44  ;;  %v4273_v31 = vsel %vm3167_vm2, %v20984_v14, 0 }
 0x53d   :  { %v18803_v49 = vpop.eup %18802  ;;  %17313 = vmatprep.subr.bf16.mxu1 %v24762_v44 }
 0x53e   :  { %5355 = vrot.lane.b32.xlu0 %v24813_v0, %s19358_s4  ;;  %v3154_v9 = vpack.c.bf16 %v3122_v26, %v3122_v26  ;;  %v3123_v22 = vmul.f32 %v18803_v49, %v20656_v56  ;;  %v4319_v26 = vsel %vm3167_vm2, %v20994_v29, 0  ;;  %v24815_v56 = vld [vmem:[#allocation43_spill] sm:$0xff]  ;;  %v24816_v49 = vld [vmem:[#allocation34_spill] sm:$0xff] }
 0x53f   :  { %v24823_v0 = vld [vmem:[#allocation51_spill] sm:$0xff] }
 0x540   :  { %5003 = vrot.lane.b32.xlu1 %v24814_v18, %s19358_s4  ;;  %17298 = vmatmul.mubr.msk.bf16.vlgmr.msra.gmra.mrb[136].mxu0 %vm2779_vm3, %v3154_v9  ;;  %v3155_v62 = vpack.c.bf16 %v3123_v22, %v3123_v22  ;;  %v24818_v9 = vld [vmem:[#allocation37_spill] sm:$0xff]  ;;  %v24819_v22 = vld [vmem:[#allocation47_spill] sm:$0xff] }
 0x541   :  { %17308 = vmatpush3.bf16.msra.mxu0 %v4273_v31  ;;  %17309 = vmatprep.mubr.msk.bf16.mxu0 %vm19357_vm0, %v24762_v44  ;;  %v24820_v31 = vld [vmem:[#allocation36_spill] sm:$0xff] }
 0x542   :  { %17304 = vmatmul.mubr.msk.bf16.vlgmr.msra.gmra.mrb[176].mxu1 %vm2779_vm3, %v3155_v62  ;;  %5353 = vrot.lane.b32.xlu0 %v24815_v56, %s19358_s4  ;;  %v24821_v62 = vld [vmem:[#allocation48_spill] sm:$0xff] }
 0x543   :  { %17314 = vmatpush3.bf16.msra.mxu1 %v4319_v26  ;;  %17319 = vmatprep.subr.bf16.mxu0 %v24762_v44  ;;  %v24822_v26 = vld [vmem:[#allocation39_spill] sm:$0xff] }
 0x544   :  { %5105 = vrot.lane.b32.xlu1 %v24816_v49, %s19358_s4  ;;  %17315 = vmatprep.mubr.msk.bf16.mxu1 %vm19357_vm0, %v24762_v44 }
 0x545   :  { %17325 = vmatprep.subr.bf16.mxu1 %v24762_v44 }
 0x546   :  { %5455 = vrot.lane.b32.xlu0 %v24817_v17, %s19358_s4  ;;  %v24824_v17 = vld [vmem:[#allocation38_spill] sm:$0xff] }
 0x548   :  { %5103 = vrot.lane.b32.xlu1 %v24818_v9, %s19358_s4 }
 0x54a   :  { %5453 = vrot.lane.b32.xlu0 %v24819_v22, %s19358_s4  ;;  %v24826_v22 = vld [vmem:[#allocation40_spill] sm:$0xff] }
 0x54c   :  { %5205 = vrot.lane.b32.xlu1 %v24820_v31, %s19358_s4 }
 0x54e   :  { %5555 = vrot.lane.b32.xlu0 %v24821_v62, %s19358_s4 }
 0x550   :  { %5203 = vrot.lane.b32.xlu1 %v24822_v26, %s19358_s4  ;;  %v24832_v26 = vld [vmem:[#allocation45_spill] sm:$0xff] }
 0x551   :  { %v3046_v56 = vpop.xlane.xlu0 %3045 }
 0x552   :  { %18804 = vrcp.f32 %v3046_v56  ;;  %5553 = vrot.lane.b32.xlu0 %v24823_v0, %s19358_s4  ;;  %v24829_v56 = vld [vmem:[#allocation87_spill] sm:$0xff] }
 0x553   :  { %v21043_v36 = vpack.c.bf16 %v24829_v56, %v24829_v56  ;;  %v24833_v56 = vld [vmem:[#allocation60_spill] sm:$0xff] }
 0x554   :  { %5305 = vrot.lane.b32.xlu1 %v24824_v17, %s19358_s4  ;;  %v24831_v17 = vld [vmem:[#allocation55_spill] sm:$0xff] }
 0x555   :  { %24830 = vst [vmem:[#allocation85_spill] sm:$0xff] %v21043_v36 }
 0x556   :  { %5655 = vrot.lane.b32.xlu0 %v24825_v48, %s19358_s4 }
 0x558   :  { %5303 = vrot.lane.b32.xlu1 %v24826_v22, %s19358_s4 }
 0x55a   :  { %5653 = vrot.lane.b32.xlu0 %v24827_v27, %s19358_s4  ;;  %v4365_v27 = vsel %vm3167_vm2, %v21043_v36, 0 }
 0x55c   :  { %v18805_v62 = vpop.eup %18804  ;;  %5405 = vrot.lane.b32.xlu1 %v24828_v41, %s19358_s4  ;;  %v21055_v41 = vpop.permute.xlu1 %4705 }
 0x55d   :  { %v3124_v0 = vmul.f32 %v18805_v62, %v20674_v2  ;;  %v24834_v2 = vld [vmem:[#allocation46_spill] sm:$0xff] }
 0x55e   :  { %5755 = vrot.lane.b32.xlu0 %v24831_v17, %s19358_s4  ;;  %v24838_v17 = vld [vmem:[#allocation50_spill] sm:$0xff] }
 0x55f   :  { %v3156_v48 = vpack.c.bf16 %v3124_v0, %v3124_v0 }
 0x560   :  { %5403 = vrot.lane.b32.xlu1 %v24832_v26, %s19358_s4  ;;  %v24839_v26 = vld [vmem:[#allocation92_spill] sm:$0xff] }
 0x561   :  { %17310 = vmatmul.mubr.msk.bf16.vlgmr.msra.gmra.mrb[140].mxu0 %vm2779_vm3, %v3156_v48  ;;  %v3052_v22 = vpop.xlane.xlu0 %3051  ;;  %v24835_v48 = vld [vmem:[#allocation59_spill] sm:$0xff] }
 0x562   :  { %17320 = vmatpush3.bf16.msra.mxu0 %v4365_v27  ;;  %18806 = vrcp.f32 %v3052_v22  ;;  %5753 = vrot.lane.b32.xlu0 %v24833_v56, %s19358_s4  ;;  %v24836_v27 = vld [vmem:[#allocation49_spill] sm:$0xff]  ;;  %v24837_v22 = vld [vmem:[#allocation64_spill] sm:$0xff] }
 0x563   :  { %17321 = vmatprep.mubr.msk.bf16.mxu0 %vm19357_vm0, %v24762_v44  ;;  %17331 = vmatprep.subr.bf16.mxu0 %v24762_v44 }
 0x564   :  { %5505 = vrot.lane.b32.xlu1 %v24834_v2, %s19358_s4  ;;  %v21072_v2 = vpack.c.bf16 %v24839_v26, %v24839_v26  ;;  %v24843_v26 = vld [vmem:[#allocation68_spill] sm:$0xff] }
 0x566   :  { %5855 = vrot.lane.b32.xlu0 %v24835_v48, %s19358_s4  ;;  %24840 = vst [vmem:[#allocation88_spill] sm:$0xff] %v21072_v2 }
 0x567   :  { %v3049_v0 = vpop.xlane.xlu1 %3048 }
 0x568   :  { %18808 = vrcp.f32 %v3049_v0  ;;  %5503 = vrot.lane.b32.xlu1 %v24836_v27, %s19358_s4  ;;  %v24841_v0 = vld [vmem:[#allocation63_spill] sm:$0xff]  ;;  %v24842_v27 = vld [vmem:[#allocation53_spill] sm:$0xff] }
 0x56a   :  { %5853 = vrot.lane.b32.xlu0 %v24837_v22, %s19358_s4 }
 0x56b   :  { %v3055_v62 = vpop.xlane.xlu1 %3054 }
 0x56c   :  { %v18807_v56 = vpop.eup %18806  ;;  %18810 = vrcp.f32 %v3055_v62  ;;  %5605 = vrot.lane.b32.xlu1 %v24838_v17, %s19358_s4  ;;  %v4457_v62 = vsel %vm3167_vm2, %v21072_v2, 0 }
 0x56d   :  { %v3126_v48 = vmul.f32 %v18807_v56, %v20703_v8  ;;  %v24844_v8 = vld [vmem:[#allocation89_spill] sm:$0xff] }
 0x56e   :  { %5955 = vrot.lane.b32.xlu0 %v24841_v0, %s19358_s4  ;;  %v21086_v56 = vpack.c.bf16 %v24844_v8, %v24844_v8  ;;  %v24847_v0 = vld [vmem:[#allocation67_spill] sm:$0xff] }
 0x56f   :  { %v3158_v11 = vpack.c.bf16 %v3126_v48, %v3126_v48  ;;  %v3061_v22 = vpop.xlane.xlu1 %3060 }
 0x570   :  { %5603 = vrot.lane.b32.xlu1 %v24842_v27, %s19358_s4  ;;  %24845 = vst [vmem:[#allocation90_spill] sm:$0xff] %v21086_v56  ;;  %v4411_v8 = vsel %vm3167_vm2, %v21086_v56, 0 }
 0x571   :  { %17322 = vmatmul.mubr.msk.bf16.vlgmr.msra.gmra.mrb[144].mxu0 %vm2779_vm3, %v3158_v11  ;;  %v3058_v17 = vpop.xlane.xlu0 %3057  ;;  %v24846_v11 = vld [vmem:[#allocation54_spill] sm:$0xff] }
 0x572   :  { %v18809_v31 = vpop.eup %18808  ;;  %17332 = vmatpush3.bf16.msra.mxu0 %v4457_v62  ;;  %18812 = vrcp.f32 %v3058_v17  ;;  %5953 = vrot.lane.b32.xlu0 %v24843_v26, %s19358_s4  ;;  %v24853_v26 = vld [vmem:[#allocation91_spill] sm:$0xff] }
 0x573   :  { %v3125_v48 = vmul.f32 %v18809_v31, %v20714_v61  ;;  %17333 = vmatprep.mubr.msk.bf16.mxu0 %vm19357_vm0, %v24762_v44  ;;  %17343 = vmatprep.subr.bf16.mxu0 %v24762_v44  ;;  %18814 = vrcp.f32 %v3061_v22  ;;  %v24848_v61 = vld [vmem:[#allocation58_spill] sm:$0xff]  ;;  %v24849_v22 = vld [vmem:[#allocation72_spill] sm:$0xff] }
 0x574   :  { %5705 = vrot.lane.b32.xlu1 %v24846_v11, %s19358_s4 }
 0x575   :  { %v3157_v62 = vpack.c.bf16 %v3125_v48, %v3125_v48  ;;  %v24850_v48 = vld [vmem:[#allocation94_spill] sm:$0xff] }
 0x576   :  { %v18811_v17 = vpop.eup %18810  ;;  %6055 = vrot.lane.b32.xlu0 %v24847_v0, %s19358_s4 }
 0x577   :  { %17316 = vmatmul.mubr.msk.bf16.vlgmr.msra.gmra.mrb[180].mxu1 %vm2779_vm3, %v3157_v62  ;;  %v3127_v31 = vmul.f32 %v18811_v17, %v20723_v46  ;;  %v21109_v62 = vpack.c.bf16 %v24850_v48, %v24850_v48  ;;  %v24854_v46 = vld [vmem:[#allocation71_spill] sm:$0xff] }
 0x578   :  { %17326 = vmatpush3.bf16.msra.mxu1 %v4411_v8  ;;  %5703 = vrot.lane.b32.xlu1 %v24848_v61, %s19358_s4  ;;  %v24852_v8 = vld [vmem:[#allocation57_spill] sm:$0xff]  ;;  %v21115_v61 = vpack.c.bf16 %v24853_v26, %v24853_v26 }
 0x579   :  { %17327 = vmatprep.mubr.msk.bf16.mxu1 %vm19357_vm0, %v24762_v44  ;;  %17337 = vmatprep.subr.bf16.mxu1 %v24762_v44  ;;  %24851 = vst [vmem:[#allocation87_spill] sm:$0xff] %v21109_v62  ;;  %v3159_v11 = vpack.c.bf16 %v3127_v31, %v3127_v31  ;;  %v4503_v17 = vsel %vm3167_vm2, %v21109_v62, 0 }
 0x57a   :  { %6053 = vrot.lane.b32.xlu0 %v24849_v22, %s19358_s4  ;;  %v24855_v22 = vld [vmem:[#allocation62_spill] sm:$0xff]  ;;  %v4549_v26 = vsel %vm3167_vm2, %v21115_v61, 0 }
 0x57c   :  { %v18813_v0 = vpop.eup %18812  ;;  %5805 = vrot.lane.b32.xlu1 %v24852_v8, %s19358_s4 }
 0x57d   :  { %v3128_v27 = vmul.f32 %v18813_v0, %v20742_v23  ;;  %v18815_v4 = vpop.eup %18814 }
 0x57e   :  { %6155 = vrot.lane.b32.xlu0 %v24854_v46, %s19358_s4  ;;  %v3129_v0 = vmul.f32 %v18815_v4, %v20733_v35  ;;  %v24862_v46 = vld [vmem:[#allocation70_spill] sm:$0xff] }
 0x57f   :  { %17328 = vmatmul.mubr.msk.bf16.vlgmr.msra.gmra.mrb[184].mxu1 %vm2779_vm3, %v3159_v11  ;;  %v3160_v48 = vpack.c.bf16 %v3128_v27, %v3128_v27  ;;  %v24856_v11 = vld [vmem:[#allocation76_spill] sm:$0xff]  ;;  %v24857_v27 = vld [vmem:[#allocation93_spill] sm:$0xff] }
 0x580   :  { %17338 = vmatpush3.bf16.msra.mxu1 %v4503_v17  ;;  %5803 = vrot.lane.b32.xlu1 %v24855_v22, %s19358_s4  ;;  %v21135_v31 = vpack.c.bf16 %v24857_v27, %v24857_v27  ;;  %v24858_v17 = vld [vmem:[#allocation61_spill] sm:$0xff]  ;;  %v3161_v4 = vpack.c.bf16 %v3129_v0, %v3129_v0 }
 0x581   :  { %17334 = vmatmul.mubr.msk.bf16.vlgmr.msra.gmra.mrb[148].mxu0 %vm2779_vm3, %v3160_v48  ;;  %v3064_v23 = vpop.xlane.xlu0 %3063  ;;  %17339 = vmatprep.mubr.msk.bf16.mxu1 %vm19357_vm0, %v24762_v44  ;;  %v24859_v48 = vld [vmem:[#allocation75_spill] sm:$0xff] }
 0x582   :  { %17344 = vmatpush3.bf16.msra.mxu0 %v4549_v26  ;;  %18816 = vrcp.f32 %v3064_v23  ;;  %6153 = vrot.lane.b32.xlu0 %v24856_v11, %s19358_s4  ;;  %v4595_v26 = vsel %vm3167_vm2, %v21135_v31, 0  ;;  %v24860_v23 = vld [vmem:[#allocation66_spill] sm:$0xff] }
 0x583   :  { %17349 = vmatprep.subr.bf16.mxu1 %v24762_v44  ;;  %17345 = vmatprep.mubr.msk.bf16.mxu0 %vm19357_vm0, %v24762_v44 }
 0x584   :  { %5905 = vrot.lane.b32.xlu1 %v24858_v17, %s19358_s4  ;;  %17355 = vmatprep.subr.bf16.mxu0 %v24762_v44 }
 0x585   :  { %v4656_v35 = vpop.permute.xlu0 %4655 }
 0x586   :  { %6637 = vrot.lane.b32.xlu0 %v24859_v48, %s19358_s4  ;;  %v24861_v48 = vld [vmem:[#allocation65_spill] sm:$0xff] }
 0x587   :  { %17340 = vmatmul.mubr.msk.bf16.vlgmr.msra.gmra.mrb[188].mxu1 %vm2779_vm3, %v3161_v4 }
 0x588   :  { %17350 = vmatpush3.bf16.msra.mxu1 %v4595_v26  ;;  %5903 = vrot.lane.b32.xlu1 %v24860_v23, %s19358_s4  ;;  %v4661_v23 = vsel %vm1306_vm1, %v4656_v35, 0 }
 0x589   :  { %v4756_v27 = vpop.permute.xlu0 %4755  ;;  %17351 = vmatprep.mubr.msk.bf16.mxu1 %vm19357_vm0, %v24762_v44  ;;  %17361 = vmatprep.subr.bf16.mxu1 %v24762_v44 }
 0x58a   :  { %6733 = vrot.lane.b32.xlu0 %v20665_v50, %s19358_s4 }
 0x58c   :  { %v18817_v0 = vpop.eup %18816  ;;  %6005 = vrot.lane.b32.xlu1 %v24861_v48, %s19358_s4 }
 0x58d   :  { %v4754_v4 = vpop.permute.xlu0 %4753  ;;  %v3130_v11 = vmul.f32 %v18817_v0, %v20771_v47  ;;  %v24864_v47 = vld [vmem:[#allocation69_spill] sm:$0xff] }
 0x58e   :  { %6829 = vrot.lane.b32.xlu0 %v20694_v55, %s19358_s4 }
 0x58f   :  { %v3162_v26 = vpack.c.bf16 %v3130_v11, %v3130_v11 }
 0x590   :  { %6003 = vrot.lane.b32.xlu1 %v24862_v46, %s19358_s4 }
 0x591   :  { %17346 = vmatmul.mubr.msk.bf16.vlgmr.msra.gmra.mrb[152].mxu0 %vm2779_vm3, %v3162_v26  ;;  %v4856_v17 = vpop.permute.xlu0 %4855  ;;  %v24865_v26 = vld [vmem:[#allocation74_spill] sm:$0xff] }
 0x592   :  { %17356 = vmatpush3.bf16.xpose.msra.mxu0 %v4661_v23  ;;  %6925 = vrot.lane.b32.xlu0 %v20728_v51, %s19358_s4  ;;  %v21166_v50 = vpop.f32.mrb[92].mxu0  ;;  %v4654_v23 = vpop.permute.xlu1 %4653 }
 0x593   :  { %24863 = vst [vmem:[#allocation92_spill] sm:$0xff] %v21166_v50  ;;  %v17167_v48 = vpop.f32.mrb[93].mxu0  ;;  %17357 = vmatprep.mubr.msk.bf16.mxu0 %vm19357_vm0, %v24762_v44  ;;  %17367 = vmatprep.subr.bf16.mxu0 %v24762_v44 }
 0x594   :  { %6105 = vrot.lane.b32.xlu1 %v24864_v47, %s19358_s4  ;;  %v3208_v11 = vpop.f32.mrb[94].mxu0  ;;  %v4761_v48 = vsel %vm1306_vm1, %v4756_v27, 0  ;;  %v24867_v27 = vld [vmem:[#allocation73_spill] sm:$0xff] }
 0x595   :  { %v4854_v35 = vpop.permute.xlu0 %4853  ;;  %v17168_v0 = vpop.f32.mrb[95].mxu0 }
 0x596   :  { %7021 = vrot.lane.b32.xlu0 %v20763_v45, %s19358_s4 }
 0x598   :  { %6103 = vrot.lane.b32.xlu1 %v24865_v26, %s19358_s4  ;;  %v4861_v26 = vsel %vm1306_vm1, %v4856_v17, 0 }
 0x599   :  { %17358 = vmatmul.mubr.msk.bf16.vlgmr.msra.gmra.mrb[156].mxu0 %vm1306_vm1, %v4654_v23  ;;  %v4956_v51 = vpop.permute.xlu0 %4955 }
 0x59a   :  { %17368 = vmatpush3.bf16.xpose.msra.mxu0 %v4761_v48  ;;  %7117 = vrot.lane.b32.xlu0 %v20785_v7, %s19358_s4  ;;  %v24868_v7 = vld [vmem:[#allocation78_spill] sm:$0xff] }
 0x59b   :  { %v21181_v55 = vpop.f32.mrb[132].mxu1  ;;  %17369 = vmatprep.mubr.msk.bf16.mxu0 %vm19357_vm0, %v24762_v44  ;;  %17379 = vmatprep.subr.bf16.mxu0 %v24762_v44 }
 0x59c   :  { %24866 = vst [vmem:[#allocation89_spill] sm:$0xff] %v21181_v55  ;;  %v17173_v0 = vpop.f32.mrb[133].mxu1  ;;  %6205 = vrot.lane.b32.xlu1 %v24867_v27, %s19358_s4  ;;  %v4961_v55 = vsel %vm1306_vm1, %v4956_v51, 0 }
 0x59d   :  { %v3254_v23 = vpop.f32.mrb[134].mxu1  ;;  %v4954_v45 = vpop.permute.xlu0 %4953 }
 0x59e   :  { %v17174_v48 = vpop.f32.mrb[135].mxu1  ;;  %7213 = vrot.lane.b32.xlu0 %v20808_v12, %s19358_s4 }
 0x59f   :  { %v24870_v48 = vld [vmem:[#allocation77_spill] sm:$0xff] }
 0x5a0   :  { %6203 = vrot.lane.b32.xlu1 %v24868_v7, %s19358_s4 }
 0x5a1   :  { %17370 = vmatmul.mubr.msk.bf16.vlgmr.msra.gmra.mrb[160].mxu0 %vm1306_vm1, %v4754_v4  ;;  %v5056_v47 = vpop.permute.xlu0 %5055 }
 0x5a2   :  { %17380 = vmatpush3.bf16.xpose.msra.mxu0 %v4861_v26  ;;  %7309 = vrot.lane.b32.xlu0 %v20832_v1, %s19358_s4  ;;  %v21198_v0 = vpop.f32.mrb[96].mxu0 }
 0x5a3   :  { %24869 = vst [vmem:[#allocation94_spill] sm:$0xff] %v21198_v0  ;;  %17381 = vmatprep.mubr.msk.bf16.mxu0 %vm19357_vm0, %v24762_v44  ;;  %17391 = vmatprep.subr.bf16.mxu0 %v24762_v44  ;;  %v17179_v23 = vpop.f32.mrb[97].mxu0 }
 0x5a4   :  { %6685 = vrot.lane.b32.xlu1 %v24870_v48, %s19358_s4  ;;  %v3067_v11 = vpop.xlane.xlu1 %3066  ;;  %v3300_v17 = vpop.f32.mrb[98].mxu0 }
 0x5a5   :  { %18818 = vrcp.f32 %v3067_v11  ;;  %v5054_v4 = vpop.permute.xlu0 %5053  ;;  %v17180_v50 = vpop.f32.mrb[99].mxu0 }
 0x5a6   :  { %7405 = vrot.lane.b32.xlu0 %v20873_v28, %s19358_s4  ;;  %v5061_v50 = vsel %vm1306_vm1, %v5056_v47, 0 }
 0x5a8   :  { %6781 = vrot.lane.b32.xlu1 %v20680_v39, %s19358_s4  ;;  %v4704_v26 = vpop.permute.xlu1 %4703 }
 0x5a9   :  { %17382 = vmatmul.mubr.msk.bf16.vlgmr.msra.gmra.mrb[164].mxu0 %vm1306_vm1, %v4854_v35  ;;  %v5156_v23 = vpop.permute.xlu0 %5155 }
 0x5aa   :  { %17392 = vmatpush3.bf16.xpose.msra.mxu0 %v4961_v55  ;;  %7501 = vrot.lane.b32.xlu0 %v20896_v25, %s19358_s4 }
 0x5ab   :  { %v21213_v11 = vpop.f32.mrb[136].mxu1  ;;  %17393 = vmatprep.mubr.msk.bf16.mxu0 %vm19357_vm0, %v24762_v44  ;;  %17403 = vmatprep.subr.bf16.mxu0 %v24762_v44 }
 0x5ac   :  { %24871 = vst [vmem:[#allocation91_spill] sm:$0xff] %v21213_v11  ;;  %v17185_v17 = vpop.f32.mrb[137].mxu1  ;;  %6877 = vrot.lane.b32.xlu1 %v20710_v32, %s19358_s4  ;;  %v4806_v51 = vpop.permute.xlu1 %4805 }
 0x5ad   :  { %v3346_v35 = vpop.f32.mrb[138].mxu1  ;;  %v5154_v55 = vpop.permute.xlu0 %5153 }
 0x5ae   :  { %v17186_v28 = vpop.f32.mrb[139].mxu1  ;;  %7597 = vrot.lane.b32.xlu0 %v20924_v13, %s19358_s4 }
 0x5af   :  { %v18819_v25 = vpop.eup %18818 }
 0x5b0   :  { %6973 = vrot.lane.b32.xlu1 %v20749_v57, %s19358_s4  ;;  %v4804_v1 = vpop.permute.xlu1 %4803  ;;  %v3131_v12 = vmul.f32 %v18819_v25, %v20863_v19  ;;  %v4711_v19 = vsel %vm1306_vm1, %v21055_v41, 0 }
 0x5b1   :  { %17394 = vmatmul.mubr.msk.bf16.vlgmr.msra.gmra.mrb[168].mxu0 %vm1306_vm1, %v4954_v45  ;;  %v5256_v17 = vpop.permute.xlu0 %5255 }
 0x5b2   :  { %17404 = vmatpush3.bf16.xpose.msra.mxu0 %v5061_v50  ;;  %7693 = vrot.lane.b32.xlu0 %v20954_v43, %s19358_s4  ;;  %v3163_v28 = vpack.c.bf16 %v3131_v12, %v3131_v12  ;;  %v21231_v35 = vpop.f32.mrb[100].mxu0 }
 0x5b3   :  { %24872 = vst [vmem:[#allocation93_spill] sm:$0xff] %v21231_v35  ;;  %17405 = vmatprep.mubr.msk.bf16.mxu0 %vm19357_vm0, %v24762_v44  ;;  %17415 = vmatprep.subr.bf16.mxu0 %v24762_v44  ;;  %v17191_v25 = vpop.f32.mrb[101].mxu0 }
 0x5b4   :  { %7069 = vrot.lane.b32.xlu1 %v20780_v34, %s19358_s4  ;;  %17352 = vmatmul.mubr.msk.bf16.vlgmr.msra.gmra.mrb[192].mxu1 %vm2779_vm3, %v3163_v28  ;;  %v4906_v45 = vpop.permute.xlu1 %4905  ;;  %v3392_v47 = vpop.f32.mrb[102].mxu0  ;;  %v5161_v25 = vsel %vm1306_vm1, %v5156_v23, 0 }
 0x5b5   :  { %17362 = vmatpush3.bf16.xpose.msra.mxu1 %v4711_v19  ;;  %v5254_v12 = vpop.permute.xlu0 %5253  ;;  %17363 = vmatprep.mubr.msk.bf16.mxu1 %vm19357_vm0, %v24762_v44  ;;  %v17192_v50 = vpop.f32.mrb[103].mxu0  ;;  %v4811_v47 = vsel %vm1306_vm1, %v4806_v51, 0 }
 0x5b6   :  { %7789 = vrot.lane.b32.xlu0 %v20984_v14, %s19358_s4  ;;  %17373 = vmatprep.subr.bf16.mxu1 %v24762_v44 }
 0x5b8   :  { %7165 = vrot.lane.b32.xlu1 %v20803_v6, %s19358_s4  ;;  %v4904_v41 = vpop.permute.xlu1 %4903 }
 0x5b9   :  { %17406 = vmatmul.mubr.msk.bf16.vlgmr.msra.gmra.mrb[172].mxu0 %vm1306_vm1, %v5054_v4  ;;  %v5356_v28 = vpop.permute.xlu0 %5355 }
 0x5ba   :  { %17416 = vmatpush3.bf16.xpose.msra.mxu0 %v5161_v25  ;;  %17417 = vmatprep.mubr.msk.bf16.mxu0 %vm19357_vm0, %v24762_v44 }
 0x5bb   :  { %v21252_v19 = vpop.f32.mrb[140].mxu1  ;;  %17427 = vmatprep.subr.bf16.mxu0 %v24762_v44 }
 0x5bc   :  { %24873 = vst [vmem:[#allocation109_spill] sm:$0xff] %v21252_v19  ;;  %v17197_v0 = vpop.f32.mrb[141].mxu1  ;;  %7261 = vrot.lane.b32.xlu1 %v20827_v63, %s19358_s4  ;;  %17364 = vmatmul.mubr.msk.bf16.vlgmr.msra.gmra.mrb[196].mxu1 %vm1306_vm1, %v4704_v26  ;;  %v5006_v4 = vpop.permute.xlu1 %5005 }
 0x5bd   :  { %17374 = vmatpush3.bf16.xpose.msra.mxu1 %v4811_v47  ;;  %v3438_v23 = vpop.f32.mrb[142].mxu1  ;;  %v5354_v25 = vpop.permute.xlu0 %5353  ;;  %17375 = vmatprep.mubr.msk.bf16.mxu1 %vm19357_vm0, %v24762_v44  ;;  %v5261_v0 = vsel %vm1306_vm1, %v5256_v17, 0 }
 0x5be   :  { %v17198_v11 = vpop.f32.mrb[143].mxu1  ;;  %17385 = vmatprep.subr.bf16.mxu1 %v24762_v44 }
 0x5bf   :  { %v4911_v11 = vsel %vm1306_vm1, %v4906_v45, 0 }
 0x5c0   :  { %7357 = vrot.lane.b32.xlu1 %v20848_v60, %s19358_s4  ;;  %v5004_v51 = vpop.permute.xlu1 %5003 }
 0x5c1   :  { %17418 = vmatmul.mubr.msk.bf16.vlgmr.msra.gmra.mrb[176].mxu0 %vm1306_vm1, %v5154_v55  ;;  %v5456_v50 = vpop.permute.xlu0 %5455 }
 0x5c2   :  { %17428 = vmatpush3.bf16.xpose.msra.mxu0 %v5261_v0  ;;  %17429 = vmatprep.mubr.msk.bf16.mxu0 %vm19357_vm0, %v24762_v44  ;;  %v21270_v26 = vpop.f32.mrb[104].mxu0 }
 0x5c3   :  { %24874 = vst [vmem:[#allocation110_spill] sm:$0xff] %v21270_v26  ;;  %17439 = vmatprep.subr.bf16.mxu0 %v24762_v44  ;;  %v17203_v47 = vpop.f32.mrb[105].mxu0 }
 0x5c4   :  { %7453 = vrot.lane.b32.xlu1 %v20878_v58, %s19358_s4  ;;  %17376 = vmatmul.mubr.msk.bf16.vlgmr.msra.gmra.mrb[200].mxu1 %vm1306_vm1, %v4804_v1  ;;  %v5106_v17 = vpop.permute.xlu1 %5105  ;;  %v3484_v55 = vpop.f32.mrb[106].mxu0  ;;  %v5361_v47 = vsel %vm1306_vm1, %v5356_v28, 0 }
 0x5c5   :  { %17386 = vmatpush3.bf16.xpose.msra.mxu1 %v4911_v11  ;;  %v5454_v23 = vpop.permute.xlu0 %5453  ;;  %17387 = vmatprep.mubr.msk.bf16.mxu1 %vm19357_vm0, %v24762_v44  ;;  %v17204_v0 = vpop.f32.mrb[107].mxu0  ;;  %v5011_v55 = vsel %vm1306_vm1, %v5006_v4, 0 }
 0x5c6   :  { %17397 = vmatprep.subr.bf16.mxu1 %v24762_v44 }
 0x5c8   :  { %7549 = vrot.lane.b32.xlu1 %v20904_v24, %s19358_s4  ;;  %v21282_v45 = vpop.permute.xlu1 %5103 }
 0x5c9   :  { %17430 = vmatmul.mubr.msk.bf16.vlgmr.msra.gmra.mrb[180].mxu0 %vm1306_vm1, %v5254_v12  ;;  %v5556_v1 = vpop.permute.xlu0 %5555 }
 0x5ca   :  { %17440 = vmatpush3.bf16.xpose.msra.mxu0 %v5361_v47  ;;  %17441 = vmatprep.mubr.msk.bf16.mxu0 %vm19357_vm0, %v24762_v44 }
 0x5cb   :  { %v21288_v11 = vpop.f32.mrb[144].mxu1  ;;  %17451 = vmatprep.subr.bf16.mxu0 %v24762_v44 }
 0x5cc   :  { %24875 = vst [vmem:[#allocation111_spill] sm:$0xff] %v21288_v11  ;;  %v21294_v35 = vpop.f32.mrb[108].mxu0  ;;  %v17209_v19 = vpop.f32.mrb[145].mxu1  ;;  %7645 = vrot.lane.b32.xlu1 %v20934_v10, %s19358_s4  ;;  %17388 = vmatmul.mubr.msk.bf16.vlgmr.msra.gmra.mrb[204].mxu1 %vm1306_vm1, %v4904_v41 }
 0x5cd   :  { %24876 = vst [vmem:[#allocation112_spill] sm:$0xff] %v21294_v35  ;;  %v17215_v12 = vpop.f32.mrb[109].mxu0  ;;  %17398 = vmatpush3.bf16.xpose.msra.mxu1 %v5011_v55  ;;  %v5206_v28 = vpop.permute.xlu1 %5205  ;;  %17399 = vmatprep.mubr.msk.bf16.mxu1 %vm19357_vm0, %v24762_v44  ;;  %v5461_v19 = vsel %vm1306_vm1, %v5456_v50, 0 }
 0x5ce   :  { %v3530_v47 = vpop.f32.mrb[146].mxu1  ;;  %v3576_v14 = vpop.f32.mrb[110].mxu0  ;;  %17409 = vmatprep.subr.bf16.mxu1 %v24762_v44 }
 0x5cf   :  { %v17210_v4 = vpop.f32.mrb[147].mxu1  ;;  %v5554_v0 = vpop.permute.xlu0 %5553  ;;  %v5111_v14 = vsel %vm1306_vm1, %v5106_v17, 0 }
 0x5d0   :  { %v17216_v26 = vpop.f32.mrb[111].mxu0  ;;  %7741 = vrot.lane.b32.xlu1 %v20964_v30, %s19358_s4 }
 0x5d1   :  { %v5204_v11 = vpop.permute.xlu1 %5203  ;;  %17442 = vmatmul.mubr.msk.bf16.vlgmr.msra.gmra.mrb[184].mxu0 %vm1306_vm1, %v5354_v25 }
 0x5d2   :  { %17452 = vmatpush3.bf16.xpose.msra.mxu0 %v5461_v19  ;;  %17453 = vmatprep.mubr.msk.bf16.mxu0 %vm19357_vm0, %v24762_v44 }
 0x5d3   :  { %v5656_v41 = vpop.permute.xlu0 %5655  ;;  %v21308_v55 = vpop.f32.mrb[148].mxu1  ;;  %17463 = vmatprep.subr.bf16.mxu0 %v24762_v44 }
 0x5d4   :  { %24877 = vst [vmem:[#allocation113_spill] sm:$0xff] %v21308_v55  ;;  %v21314_v12 = vpop.f32.mrb[112].mxu0  ;;  %v17221_v50 = vpop.f32.mrb[149].mxu1  ;;  %7837 = vrot.lane.b32.xlu1 %v20994_v29, %s19358_s4  ;;  %17400 = vmatmul.mubr.msk.bf16.vlgmr.msra.gmra.mrb[208].mxu1 %vm1306_vm1, %v5004_v51 }
 0x5d5   :  { %24878 = vst [vmem:[#allocation114_spill] sm:$0xff] %v21314_v12  ;;  %v17227_v25 = vpop.f32.mrb[113].mxu0  ;;  %17410 = vmatpush3.bf16.xpose.msra.mxu1 %v5111_v14  ;;  %v5306_v47 = vpop.permute.xlu1 %5305  ;;  %17411 = vmatprep.mubr.msk.bf16.mxu1 %vm19357_vm0, %v24762_v44  ;;  %v5561_v50 = vsel %vm1306_vm1, %v5556_v1, 0 }
 0x5d6   :  { %v3622_v4 = vpop.f32.mrb[150].mxu1  ;;  %v3668_v19 = vpop.f32.mrb[114].mxu0  ;;  %17421 = vmatprep.subr.bf16.mxu1 %v24762_v44  ;;  %v5211_v25 = vsel %vm1306_vm1, %v5206_v28, 0 }
 0x5d7   :  { %v17222_v17 = vpop.f32.mrb[151].mxu1  ;;  %v5654_v26 = vpop.permute.xlu0 %5653 }
 0x5d8   :  { %v17228_v35 = vpop.f32.mrb[115].mxu0  ;;  %7885 = vrot.lane.b32.xlu1 %v21043_v36, %s19358_s4 }
 0x5d9   :  { %v5304_v55 = vpop.permute.xlu1 %5303  ;;  %17454 = vmatmul.mubr.msk.bf16.vlgmr.msra.gmra.mrb[188].mxu0 %vm1306_vm1, %v5454_v23 }
 0x5da   :  { %17464 = vmatpush3.bf16.xpose.msra.mxu0 %v5561_v50  ;;  %17465 = vmatprep.mubr.msk.bf16.mxu0 %vm19357_vm0, %v24762_v44 }
 0x5db   :  { %v5756_v51 = vpop.permute.xlu0 %5755  ;;  %v21328_v14 = vpop.f32.mrb[152].mxu1  ;;  %17475 = vmatprep.subr.bf16.mxu0 %v24762_v44 }
 0x5dc   :  { %24879 = vst [vmem:[#allocation115_spill] sm:$0xff] %v21328_v14  ;;  %v21334_v4 = vpop.f32.mrb[116].mxu0  ;;  %v17233_v1 = vpop.f32.mrb[153].mxu1  ;;  %7933 = vrot.lane.b32.xlu1 %v21086_v56, %s19358_s4  ;;  %17412 = vmatmul.mubr.msk.bf16.vlgmr.msra.gmra.mrb[212].mxu1 %vm1306_vm1, %v21282_v45 }
 0x5dd   :  { %24880 = vst [vmem:[#allocation116_spill] sm:$0xff] %v21334_v4  ;;  %v17239_v23 = vpop.f32.mrb[117].mxu0  ;;  %17422 = vmatpush3.bf16.xpose.msra.mxu1 %v5211_v25  ;;  %v5406_v19 = vpop.permute.xlu1 %5405  ;;  %17423 = vmatprep.mubr.msk.bf16.mxu1 %vm19357_vm0, %v24762_v44  ;;  %v5661_v1 = vsel %vm1306_vm1, %v5656_v41, 0 }
 0x5de   :  { %v3714_v17 = vpop.f32.mrb[154].mxu1  ;;  %v3760_v28 = vpop.f32.mrb[118].mxu0  ;;  %17433 = vmatprep.subr.bf16.mxu1 %v24762_v44  ;;  %v5311_v23 = vsel %vm1306_vm1, %v5306_v47, 0  ;;  %v5411_v47 = vsel %vm1306_vm1, %v5406_v19, 0 }
 0x5df   :  { %v17234_v50 = vpop.f32.mrb[155].mxu1  ;;  %v5754_v35 = vpop.permute.xlu0 %5753 }
 0x5e0   :  { %v17240_v12 = vpop.f32.mrb[119].mxu0 }
 0x5e1   :  { %v5404_v14 = vpop.permute.xlu1 %5403  ;;  %17466 = vmatmul.mubr.msk.bf16.vlgmr.msra.gmra.mrb[192].mxu0 %vm1306_vm1, %v5554_v0 }
 0x5e2   :  { %17476 = vmatpush3.bf16.xpose.msra.mxu0 %v5661_v1  ;;  %17477 = vmatprep.mubr.msk.bf16.mxu0 %vm19357_vm0, %v24762_v44  ;;  %v5761_v1 = vsel %vm1306_vm1, %v5756_v51, 0 }
 0x5e3   :  { %v5856_v45 = vpop.permute.xlu0 %5855  ;;  %v21347_v25 = vpop.f32.mrb[156].mxu1  ;;  %17487 = vmatprep.subr.bf16.mxu0 %v24762_v44 }
 0x5e4   :  { %24881 = vst [vmem:[#allocation117_spill] sm:$0xff] %v21347_v25  ;;  %v17245_v12 = vpop.f32.mrb[157].mxu1  ;;  %17424 = vmatmul.mubr.msk.bf16.vlgmr.msra.gmra.mrb[216].mxu1 %vm1306_vm1, %v5204_v11 }
 0x5e5   :  { %17434 = vmatpush3.bf16.xpose.msra.mxu1 %v5311_v23  ;;  %v5506_v41 = vpop.permute.xlu1 %5505  ;;  %v3806_v0 = vpop.f32.mrb[158].mxu1  ;;  %17435 = vmatprep.mubr.msk.bf16.mxu1 %vm19357_vm0, %v24762_v44 }
 0x5e6   :  { %v17246_v28 = vpop.f32.mrb[159].mxu1  ;;  %17445 = vmatprep.subr.bf16.mxu1 %v24762_v44 }
 0x5e7   :  { %v5854_v50 = vpop.permute.xlu0 %5853 }
 0x5e9   :  { %v5504_v56 = vpop.permute.xlu1 %5503  ;;  %17478 = vmatmul.mubr.msk.bf16.vlgmr.msra.gmra.mrb[196].mxu0 %vm1306_vm1, %v5654_v26  ;;  %v5861_v26 = vsel %vm1306_vm1, %v5856_v45, 0 }
 0x5ea   :  { %17488 = vmatpush3.bf16.xpose.msra.mxu0 %v5761_v1  ;;  %17489 = vmatprep.mubr.msk.bf16.mxu0 %vm19357_vm0, %v24762_v44 }
 0x5eb   :  { %v5956_v11 = vpop.permute.xlu0 %5955  ;;  %17499 = vmatprep.subr.bf16.mxu0 %v24762_v44 }
 0x5ec   :  { %17436 = vmatmul.mubr.msk.bf16.vlgmr.msra.gmra.mrb[220].mxu1 %vm1306_vm1, %v5304_v55  ;;  %v5511_v55 = vsel %vm1306_vm1, %v5506_v41, 0 }
 0x5ed   :  { %17446 = vmatpush3.bf16.xpose.msra.mxu1 %v5411_v47  ;;  %v5606_v23 = vpop.permute.xlu1 %5605  ;;  %17447 = vmatprep.mubr.msk.bf16.mxu1 %vm19357_vm0, %v24762_v44 }
 0x5ee   :  { %17457 = vmatprep.subr.bf16.mxu1 %v24762_v44 }
 0x5ef   :  { %v5954_v51 = vpop.permute.xlu0 %5953 }
 0x5f1   :  { %v5604_v12 = vpop.permute.xlu1 %5603  ;;  %17490 = vmatmul.mubr.msk.bf16.vlgmr.msra.gmra.mrb[200].mxu0 %vm1306_vm1, %v5754_v35 }
 0x5f2   :  { %17500 = vmatpush3.bf16.xpose.msra.mxu0 %v5861_v26  ;;  %17501 = vmatprep.mubr.msk.bf16.mxu0 %vm19357_vm0, %v24762_v44 }
 0x5f3   :  { %v6056_v19 = vpop.permute.xlu0 %6055  ;;  %v21371_v0 = vpop.f32.mrb[120].mxu0  ;;  %17511 = vmatprep.subr.bf16.mxu0 %v24762_v44 }
 0x5f4   :  { %24882 = vst [vmem:[#allocation118_spill] sm:$0xff] %v21371_v0  ;;  %17448 = vmatmul.mubr.msk.bf16.vlgmr.msra.gmra.mrb[224].mxu1 %vm1306_vm1, %v5404_v14  ;;  %v17251_v28 = vpop.f32.mrb[121].mxu0  ;;  %v5961_v14 = vsel %vm1306_vm1, %v5956_v11, 0  ;;  %v6061_v0 = vsel %vm1306_vm1, %v6056_v19, 0 }
 0x5f5   :  { %17458 = vmatpush3.bf16.xpose.msra.mxu1 %v5511_v55  ;;  %v5706_v1 = vpop.permute.xlu1 %5705  ;;  %v21376_v45 = vpop.f32.mrb[160].mxu1  ;;  %17459 = vmatprep.mubr.msk.bf16.mxu1 %vm19357_vm0, %v24762_v44 }
 0x5f6   :  { %24883 = vst [vmem:[#allocation119_spill] sm:$0xff] %v21376_v45  ;;  %v3852_v47 = vpop.f32.mrb[122].mxu0  ;;  %v17257_v26 = vpop.f32.mrb[161].mxu1  ;;  %17469 = vmatprep.subr.bf16.mxu1 %v24762_v44 }
 0x5f7   :  { %v6054_v17 = vpop.permute.xlu0 %6053  ;;  %v17252_v4 = vpop.f32.mrb[123].mxu0  ;;  %v5611_v47 = vsel %vm1306_vm1, %v5606_v23, 0 }
 0x5f8   :  { %v3898_v41 = vpop.f32.mrb[162].mxu1 }
 0x5f9   :  { %v5704_v28 = vpop.permute.xlu1 %5703  ;;  %v17258_v55 = vpop.f32.mrb[163].mxu1  ;;  %17502 = vmatmul.mubr.msk.bf16.vlgmr.msra.gmra.mrb[204].mxu0 %vm1306_vm1, %v5854_v50 }
 0x5fa   :  { %17512 = vmatpush3.bf16.xpose.msra.mxu0 %v5961_v14  ;;  %17513 = vmatprep.mubr.msk.bf16.mxu0 %vm19357_vm0, %v24762_v44 }
 0x5fb   :  { %v21387_v25 = vpop.f32.mrb[124].mxu0  ;;  %17523 = vmatprep.subr.bf16.mxu0 %v24762_v44  ;;  %v6156_v26 = vpop.permute.xlu0 %6155 }
 0x5fc   :  { %24884 = vst [vmem:[#allocation120_spill] sm:$0xff] %v21387_v25  ;;  %17460 = vmatmul.mubr.msk.bf16.vlgmr.msra.gmra.mrb[228].mxu1 %vm1306_vm1, %v5504_v56  ;;  %v17263_v4 = vpop.f32.mrb[125].mxu0  ;;  %v6161_v25 = vsel %vm1306_vm1, %v6156_v26, 0 }
 0x5fd   :  { %17470 = vmatpush3.bf16.xpose.msra.mxu1 %v5611_v47  ;;  %v5806_v11 = vpop.permute.xlu1 %5805  ;;  %v21392_v41 = vpop.f32.mrb[164].mxu1  ;;  %17471 = vmatprep.mubr.msk.bf16.mxu1 %vm19357_vm0, %v24762_v44 }
 0x5fe   :  { %24885 = vst [vmem:[#allocation121_spill] sm:$0xff] %v21392_v41  ;;  %v3944_v14 = vpop.f32.mrb[126].mxu0  ;;  %v17269_v55 = vpop.f32.mrb[165].mxu1  ;;  %17481 = vmatprep.subr.bf16.mxu1 %v24762_v44 }
 0x5ff   :  { %v17264_v35 = vpop.f32.mrb[127].mxu0  ;;  %v3990_v23 = vpop.f32.mrb[166].mxu1  ;;  %v5711_v14 = vsel %vm1306_vm1, %v5706_v1, 0 }
 0x600   :  { %v17270_v4 = vpop.f32.mrb[167].mxu1  ;;  %v6154_v55 = vpop.permute.xlu0 %6153 }
 0x601   :  { %v5804_v56 = vpop.permute.xlu1 %5803  ;;  %17514 = vmatmul.mubr.msk.bf16.vlgmr.msra.gmra.mrb[208].mxu0 %vm1306_vm1, %v5954_v51 }
 0x602   :  { %17524 = vmatpush3.bf16.xpose.msra.mxu0 %v6061_v0  ;;  %17525 = vmatprep.mubr.msk.bf16.mxu0 %vm19357_vm0, %v24762_v44 }
 0x603   :  { %v21403_v47 = vpop.f32.mrb[128].mxu0  ;;  %17535 = vmatprep.subr.bf16.mxu0 %v24762_v44 }
 0x604   :  { %24886 = vst [vmem:[#allocation122_spill] sm:$0xff] %v21403_v47  ;;  %17472 = vmatmul.mubr.msk.bf16.vlgmr.msra.gmra.mrb[232].mxu1 %vm1306_vm1, %v5604_v12  ;;  %v17275_v35 = vpop.f32.mrb[129].mxu0 }
 0x605   :  { %17482 = vmatpush3.bf16.xpose.msra.mxu1 %v5711_v14  ;;  %v5906_v19 = vpop.permute.xlu1 %5905  ;;  %v21408_v23 = vpop.f32.mrb[168].mxu1  ;;  %17483 = vmatprep.mubr.msk.bf16.mxu1 %vm19357_vm0, %v24762_v44 }
 0x606   :  { %24887 = vst [vmem:[#allocation123_spill] sm:$0xff] %v21408_v23  ;;  %v4036_v0 = vpop.f32.mrb[130].mxu0  ;;  %v17281_v4 = vpop.f32.mrb[169].mxu1  ;;  %17493 = vmatprep.subr.bf16.mxu1 %v24762_v44 }
 0x607   :  { %v17276_v50 = vpop.f32.mrb[131].mxu0  ;;  %v4082_v1 = vpop.f32.mrb[170].mxu1  ;;  %v5811_v0 = vsel %vm1306_vm1, %v5806_v11, 0 }
 0x608   :  { %v17282_v35 = vpop.f32.mrb[171].mxu1  ;;  %v6638_v4 = vpop.permute.xlu0 %6637 }
 0x609   :  { %v5904_v12 = vpop.permute.xlu1 %5903  ;;  %17526 = vmatmul.mubr.msk.bf16.vlgmr.msra.gmra.mrb[212].mxu0 %vm1306_vm1, %v6054_v17  ;;  %v6643_v41 = vsel %vm3167_vm2, %v6638_v4, 0 }
 0x60a   :  { %17536 = vmatpush3.bf16.xpose.msra.mxu0 %v6161_v25  ;;  %17537 = vmatprep.mubr.msk.bf16.mxu0 %vm19357_vm0, %v24762_v44 }
 0x60b   :  { %v21419_v14 = vpop.f32.mrb[132].mxu0  ;;  %17547 = vmatprep.subr.bf16.mxu0 %v24762_v44 }
 0x60c   :  { %24888 = vst [vmem:[#allocation124_spill] sm:$0xff] %v21419_v14  ;;  %17484 = vmatmul.mubr.msk.bf16.vlgmr.msra.gmra.mrb[236].mxu1 %vm1306_vm1, %v5704_v28  ;;  %v17287_v50 = vpop.f32.mrb[133].mxu0 }
 0x60d   :  { %17494 = vmatpush3.bf16.xpose.msra.mxu1 %v5811_v0  ;;  %v6006_v26 = vpop.permute.xlu1 %6005  ;;  %v21424_v1 = vpop.f32.mrb[172].mxu1  ;;  %17495 = vmatprep.mubr.msk.bf16.mxu1 %vm19357_vm0, %v24762_v44 }
 0x60e   :  { %24889 = vst [vmem:[#allocation125_spill] sm:$0xff] %v21424_v1  ;;  %v4128_v17 = vpop.f32.mrb[134].mxu0  ;;  %v17293_v35 = vpop.f32.mrb[173].mxu1  ;;  %17505 = vmatprep.subr.bf16.mxu1 %v24762_v44 }
 0x60f   :  { %v17288_v51 = vpop.f32.mrb[135].mxu0  ;;  %v4174_v11 = vpop.f32.mrb[174].mxu1  ;;  %v5911_v17 = vsel %vm1306_vm1, %v5906_v19, 0 }
 0x610   :  { %v17294_v28 = vpop.f32.mrb[175].mxu1 }
 0x611   :  { %17538 = vmatmul.mubr.msk.bf16.vlgmr.msra.gmra.mrb[216].mxu0 %vm1306_vm1, %v6154_v55  ;;  %v6004_v0 = vpop.permute.xlu1 %6003 }
 0x612   :  { %17548 = vmatpush3.bf16.msra.mxu0 %v6643_v41  ;;  %17549 = vmatprep.mubr.msk.bf16.mxu0 %vm19357_vm0, %v24762_v44 }
 0x613   :  { %v21435_v50 = vpop.f32.mrb[136].mxu0  ;;  %17559 = vmatprep.subr.bf16.mxu0 %v24762_v44 }
 0x614   :  { %24890 = vst [vmem:[#allocation126_spill] sm:$0xff] %v21435_v50  ;;  %17496 = vmatmul.mubr.msk.bf16.vlgmr.msra.gmra.mrb[240].mxu1 %vm1306_vm1, %v5804_v56  ;;  %v17299_v51 = vpop.f32.mrb[137].mxu0  ;;  %v6011_v56 = vsel %vm1306_vm1, %v6006_v26, 0 }
 0x615   :  { %17506 = vmatpush3.bf16.xpose.msra.mxu1 %v5911_v17  ;;  %v21440_v35 = vpop.f32.mrb[176].mxu1  ;;  %17507 = vmatprep.mubr.msk.bf16.mxu1 %vm19357_vm0, %v24762_v44  ;;  %v4220_v55 = vpop.f32.mrb[138].mxu0 }
 0x616   :  { %24891 = vst [vmem:[#allocation127_spill] sm:$0xff] %v21440_v35  ;;  %v17305_v4 = vpop.f32.mrb[177].mxu1  ;;  %17517 = vmatprep.subr.bf16.mxu1 %v24762_v44  ;;  %v17300_v11 = vpop.f32.mrb[139].mxu0 }
 0x617   :  { %v4266_v28 = vpop.f32.mrb[178].mxu1  ;;  %v6106_v25 = vpop.permute.xlu1 %6105 }
 0x618   :  { %v17306_v19 = vpop.f32.mrb[179].mxu1  ;;  %v6111_v51 = vsel %vm1306_vm1, %v6106_v25, 0 }
 0x61b   :  { %v6104_v17 = vpop.permute.xlu1 %6103 }
 0x61c   :  { %17508 = vmatmul.mubr.msk.bf16.vlgmr.msra.gmra.mrb[244].mxu1 %vm1306_vm1, %v5904_v12 }
 0x61d   :  { %17518 = vmatpush3.bf16.xpose.msra.mxu1 %v6011_v56  ;;  %17519 = vmatprep.mubr.msk.bf16.mxu1 %vm19357_vm0, %v24762_v44 }
 0x61e   :  { %17529 = vmatprep.subr.bf16.mxu1 %v24762_v44 }
 0x61f   :  { %v6206_v55 = vpop.permute.xlu1 %6205 }
 0x620   :  { %v6211_v12 = vsel %vm1306_vm1, %v6206_v55, 0 }
 0x623   :  { %v6204_v26 = vpop.permute.xlu1 %6203 }
 0x624   :  { %17520 = vmatmul.mubr.msk.bf16.vlgmr.msra.gmra.mrb[248].mxu1 %vm1306_vm1, %v6004_v0 }
 0x625   :  { %17530 = vmatpush3.bf16.xpose.msra.mxu1 %v6111_v51  ;;  %17531 = vmatprep.mubr.msk.bf16.mxu1 %vm19357_vm0, %v24762_v44 }
 0x626   :  { %17541 = vmatprep.subr.bf16.mxu1 %v24762_v44 }
 0x627   :  { %v6686_v25 = vpop.permute.xlu1 %6685 }
 0x628   :  { %v6691_v0 = vsel %vm3167_vm2, %v6686_v25, 0 }
 0x62b   :  { %v21581_v32 = vpop.permute.xlu1 %6781 }
 0x62c   :  { %17532 = vmatmul.mubr.msk.bf16.vlgmr.msra.gmra.mrb[252].mxu1 %vm1306_vm1, %v6104_v17 }
 0x62d   :  { %17542 = vmatpush3.bf16.xpose.msra.mxu1 %v6211_v12  ;;  %17543 = vmatprep.mubr.msk.bf16.mxu1 %vm19357_vm0, %v24762_v44 }
 0x62e   :  { %17553 = vmatprep.subr.bf16.mxu1 %v24762_v44 }
 0x62f   :  { %v21593_v7 = vpop.permute.xlu1 %6877 }
 0x633   :  { %v21603_v8 = vpop.permute.xlu1 %6973 }
 0x634   :  { %17544 = vmatmul.mubr.msk.bf16.vlgmr.msra.gmra.mrb[0].mxu1 %vm1306_vm1, %v6204_v26  ;;  %v21464_v4 = vpop.f32.mrb[140].mxu0  ;;  %24904 = vst [vmem:[#allocation140_spill] sm:$0xff] %v21603_v8 }
 0x635   :  { %24892 = vst [vmem:[#allocation128_spill] sm:$0xff] %v21464_v4  ;;  %17554 = vmatpush3.bf16.msra.mxu1 %v6691_v0  ;;  %v17311_v11 = vpop.f32.mrb[141].mxu0  ;;  %17555 = vmatprep.mubr.msk.bf16.mxu1 %vm19357_vm0, %v24762_v44 }
 0x636   :  { %v4312_v28 = vpop.f32.mrb[142].mxu0  ;;  %17565 = vmatprep.subr.bf16.mxu1 %v24762_v44 }
 0x637   :  { %v17312_v19 = vpop.f32.mrb[143].mxu0 }
 0x644   :  { %v21469_v56 = vpop.f32.mrb[144].mxu0 }
 0x645   :  { %24893 = vst [vmem:[#allocation129_spill] sm:$0xff] %v21469_v56  ;;  %v17323_v17 = vpop.f32.mrb[145].mxu0 }
 0x646   :  { %v4404_v51 = vpop.f32.mrb[146].mxu0 }
 0x647   :  { %v17324_v55 = vpop.f32.mrb[147].mxu0 }
 0x64a   :  { %v21471_v12 = vpop.f32.mrb[180].mxu1 }
 0x64b   :  { %24894 = vst [vmem:[#allocation130_spill] sm:$0xff] %v21471_v12  ;;  %v17317_v25 = vpop.f32.mrb[181].mxu1 }
 0x64c   :  { %v4358_v0 = vpop.f32.mrb[182].mxu1 }
 0x64d   :  { %v17318_v11 = vpop.f32.mrb[183].mxu1 }
 0x652   :  { %v21475_v41 = vpop.f32.mrb[184].mxu1 }
 0x653   :  { %24895 = vst [vmem:[#allocation131_spill] sm:$0xff] %v21475_v41  ;;  %v17329_v50 = vpop.f32.mrb[185].mxu1 }
 0x654   :  { %v4450_v19 = vpop.f32.mrb[186].mxu1  ;;  %v21479_v35 = vpop.f32.mrb[148].mxu0 }
 0x655   :  { %24896 = vst [vmem:[#allocation132_spill] sm:$0xff] %v21479_v35  ;;  %v17330_v17 = vpop.f32.mrb[187].mxu1  ;;  %v17335_v51 = vpop.f32.mrb[149].mxu0 }
 0x656   :  { %v4496_v55 = vpop.f32.mrb[150].mxu0 }
 0x657   :  { %v17336_v14 = vpop.f32.mrb[151].mxu0 }
 0x65a   :  { %v21481_v1 = vpop.f32.mrb[188].mxu1 }
 0x65b   :  { %24897 = vst [vmem:[#allocation133_spill] sm:$0xff] %v21481_v1  ;;  %v17341_v0 = vpop.f32.mrb[189].mxu1 }
 0x65c   :  { %v4542_v11 = vpop.f32.mrb[190].mxu1 }
 0x65d   :  { %v17342_v26 = vpop.f32.mrb[191].mxu1 }
 0x664   :  { %v21485_v4 = vpop.f32.mrb[152].mxu0 }
 0x665   :  { %24898 = vst [vmem:[#allocation134_spill] sm:$0xff] %v21485_v4  ;;  %v17347_v12 = vpop.f32.mrb[153].mxu0 }
 0x666   :  { %v4588_v28 = vpop.f32.mrb[154].mxu0 }
 0x667   :  { %v17348_v50 = vpop.f32.mrb[155].mxu0 }
 0x66c   :  { %v21487_v19 = vpop.f32.mrb[156].mxu0 }
 0x66d   :  { %v17359_v56 = vpop.f32.mrb[157].mxu0  ;;  %v6253_v17 = vsel %vm2779_vm3, %v21487_v19, -inf }
 0x66e   :  { %6254 = vmax.xlane.f32.xlu0 %v6253_v17  ;;  %v4700_v14 = vpop.f32.mrb[158].mxu0 }
 0x66f   :  { %v17360_v51 = vpop.f32.mrb[159].mxu0 }
 0x674   :  { %v21491_v55 = vpop.f32.mrb[160].mxu0 }
 0x675   :  { %v17371_v25 = vpop.f32.mrb[161].mxu0  ;;  %v6259_v26 = vsel %vm2779_vm3, %v21491_v55, -inf }
 0x676   :  { %6260 = vmax.xlane.f32.xlu0 %v6259_v26  ;;  %v4800_v0 = vpop.f32.mrb[162].mxu0 }
 0x677   :  { %v17372_v12 = vpop.f32.mrb[163].mxu0 }
 0x67c   :  { %v21495_v28 = vpop.f32.mrb[164].mxu0 }
 0x67d   :  { %v17383_v11 = vpop.f32.mrb[165].mxu0 }
 0x67e   :  { %v4900_v50 = vpop.f32.mrb[166].mxu0 }
 0x67f   :  { %v17384_v56 = vpop.f32.mrb[167].mxu0 }
 0x684   :  { %v21497_v35 = vpop.f32.mrb[168].mxu0 }
 0x685   :  { %v17395_v1 = vpop.f32.mrb[169].mxu0 }
 0x686   :  { %v5000_v17 = vpop.f32.mrb[170].mxu0 }
 0x687   :  { %v21499_v14 = vpop.f32.mrb[192].mxu1  ;;  %v17396_v51 = vpop.f32.mrb[171].mxu0 }
 0x688   :  { %24899 = vst [vmem:[#allocation135_spill] sm:$0xff] %v21499_v14  ;;  %v17353_v41 = vpop.f32.mrb[193].mxu1 }
 0x689   :  { %v4634_v45 = vpop.f32.mrb[194].mxu1 }
 0x68a   :  { %v17354_v26 = vpop.f32.mrb[195].mxu1 }
 0x68c   :  { %v21503_v0 = vpop.f32.mrb[172].mxu0 }
 0x68d   :  { %v17407_v12 = vpop.f32.mrb[173].mxu0 }
 0x68e   :  { %v5100_v47 = vpop.f32.mrb[174].mxu0 }
 0x68f   :  { %v21505_v11 = vpop.f32.mrb[196].mxu1  ;;  %v17408_v50 = vpop.f32.mrb[175].mxu0 }
 0x690   :  { %v17365_v56 = vpop.f32.mrb[197].mxu1  ;;  %v6256_v1 = vsel %vm2779_vm3, %v21505_v11, -inf }
 0x691   :  { %6257 = vmax.xlane.f32.xlu1 %v6256_v1  ;;  %v4750_v17 = vpop.f32.mrb[198].mxu1  ;;  %v6265_v1 = vsel %vm2779_vm3, %v21495_v28, -inf }
 0x692   :  { %v17366_v51 = vpop.f32.mrb[199].mxu1 }
 0x694   :  { %v21509_v23 = vpop.f32.mrb[176].mxu0 }
 0x695   :  { %v17419_v25 = vpop.f32.mrb[177].mxu0 }
 0x696   :  { %v5200_v41 = vpop.f32.mrb[178].mxu0 }
 0x697   :  { %v21511_v45 = vpop.f32.mrb[200].mxu1  ;;  %v17420_v26 = vpop.f32.mrb[179].mxu0 }
 0x698   :  { %v17377_v4 = vpop.f32.mrb[201].mxu1  ;;  %v6262_v47 = vsel %vm2779_vm3, %v21511_v45, -inf  ;;  %v6271_v26 = vsel %vm2779_vm3, %v21497_v35, -inf }
 0x699   :  { %v4850_v12 = vpop.f32.mrb[202].mxu1  ;;  %6263 = vmax.xlane.f32.xlu0 %v6262_v47 }
 0x69a   :  { %v17378_v50 = vpop.f32.mrb[203].mxu1 }
 0x69c   :  { %v21515_v56 = vpop.f32.mrb[180].mxu0 }
 0x69d   :  { %6266 = vmax.xlane.f32.xlu0 %v6265_v1  ;;  %v17431_v17 = vpop.f32.mrb[181].mxu0  ;;  %v6277_v1 = vsel %vm2779_vm3, %v21503_v0, -inf }
 0x69e   :  { %v5300_v51 = vpop.f32.mrb[182].mxu0 }
 0x69f   :  { %v21519_v25 = vpop.f32.mrb[204].mxu1  ;;  %v17432_v41 = vpop.f32.mrb[183].mxu0 }
 0x6a0   :  { %v17389_v14 = vpop.f32.mrb[205].mxu1  ;;  %v6268_v4 = vsel %vm2779_vm3, %v21519_v25, -inf }
 0x6a1   :  { %6269 = vmax.xlane.f32.xlu1 %v6268_v4  ;;  %v4950_v47 = vpop.f32.mrb[206].mxu1  ;;  %6272 = vmax.xlane.f32.xlu0 %v6271_v26  ;;  %v6283_v4 = vsel %vm2779_vm3, %v21509_v23, -inf }
 0x6a2   :  { %v17390_v12 = vpop.f32.mrb[207].mxu1 }
 0x6a4   :  { %v21525_v50 = vpop.f32.mrb[184].mxu0 }
 0x6a5   :  { %6278 = vmax.xlane.f32.xlu0 %v6277_v1  ;;  %v17443_v17 = vpop.f32.mrb[185].mxu0  ;;  %v6289_v1 = vsel %vm2779_vm3, %v21515_v56, -inf }
 0x6a6   :  { %v5400_v51 = vpop.f32.mrb[186].mxu0 }
 0x6a7   :  { %v21529_v41 = vpop.f32.mrb[208].mxu1  ;;  %v17444_v14 = vpop.f32.mrb[187].mxu0 }
 0x6a8   :  { %v17401_v36 = vpop.f32.mrb[209].mxu1  ;;  %v6274_v43 = vsel %vm2779_vm3, %v21529_v41, -inf }
 0x6a9   :  { %6275 = vmax.xlane.f32.xlu1 %v6274_v43  ;;  %v5050_v26 = vpop.f32.mrb[210].mxu1  ;;  %6284 = vmax.xlane.f32.xlu0 %v6283_v4  ;;  %v6295_v43 = vsel %vm2779_vm3, %v21525_v50, -inf }
 0x6aa   :  { %v17402_v47 = vpop.f32.mrb[211].mxu1  ;;  %v21545_v26 = vpop.permute.xlu0 %6733 }
 0x6ac   :  { %v21535_v12 = vpop.f32.mrb[188].mxu0 }
 0x6ad   :  { %6290 = vmax.xlane.f32.xlu0 %v6289_v1  ;;  %v17455_v17 = vpop.f32.mrb[189].mxu0  ;;  %v6301_v1 = vsel %vm2779_vm3, %v21535_v12, -inf }
 0x6ae   :  { %v5500_v51 = vpop.f32.mrb[190].mxu0  ;;  %v21553_v10 = vpop.permute.xlu0 %6829 }
 0x6af   :  { %v21539_v14 = vpop.f32.mrb[212].mxu1  ;;  %v17456_v36 = vpop.f32.mrb[191].mxu0 }
 0x6b0   :  { %v17413_v29 = vpop.f32.mrb[213].mxu1  ;;  %v6280_v13 = vsel %vm2779_vm3, %v21539_v14, -inf }
 0x6b1   :  { %6281 = vmax.xlane.f32.xlu1 %v6280_v13  ;;  %v5150_v4 = vpop.f32.mrb[214].mxu1  ;;  %6296 = vmax.xlane.f32.xlu0 %v6295_v43 }
 0x6b2   :  { %v17414_v47 = vpop.f32.mrb[215].mxu1 }
 0x6b4   :  { %v21547_v30 = vpop.f32.mrb[192].mxu0 }
 0x6b5   :  { %6302 = vmax.xlane.f32.xlu0 %v6301_v1  ;;  %v17467_v17 = vpop.f32.mrb[193].mxu0  ;;  %v6307_v43 = vsel %vm2779_vm3, %v21547_v30, -inf }
 0x6b6   :  { %v5600_v29 = vpop.f32.mrb[194].mxu0 }
 0x6b7   :  { %v21551_v51 = vpop.f32.mrb[216].mxu1  ;;  %v17468_v36 = vpop.f32.mrb[195].mxu0 }
 0x6b8   :  { %v17425_v24 = vpop.f32.mrb[217].mxu1  ;;  %v6286_v13 = vsel %vm2779_vm3, %v21551_v51, -inf  ;;  %v21563_v29 = vpop.permute.xlu0 %6925 }
 0x6b9   :  { %6287 = vmax.xlane.f32.xlu1 %v6286_v13  ;;  %v5250_v4 = vpop.f32.mrb[218].mxu1  ;;  %6308 = vmax.xlane.f32.xlu0 %v6307_v43 }
 0x6ba   :  { %v17426_v47 = vpop.f32.mrb[219].mxu1 }
 0x6bc   :  { %v21559_v58 = vpop.f32.mrb[196].mxu0  ;;  %v21569_v47 = vpop.permute.xlu0 %7021 }
 0x6bd   :  { %v17479_v1 = vpop.f32.mrb[197].mxu0  ;;  %v6313_v17 = vsel %vm2779_vm3, %v21559_v58, -inf  ;;  %24900 = vst [vmem:[#allocation136_spill] sm:$0xff] %v21569_v47 }
 0x6be   :  { %6314 = vmax.xlane.f32.xlu0 %v6313_v17  ;;  %v5700_v24 = vpop.f32.mrb[198].mxu0 }
 0x6bf   :  { %v21565_v36 = vpop.f32.mrb[220].mxu1  ;;  %v17480_v60 = vpop.f32.mrb[199].mxu0 }
 0x6c0   :  { %v17437_v63 = vpop.f32.mrb[221].mxu1  ;;  %v6292_v13 = vsel %vm2779_vm3, %v21565_v36, -inf }
 0x6c1   :  { %6293 = vmax.xlane.f32.xlu1 %v6292_v13  ;;  %v5350_v43 = vpop.f32.mrb[222].mxu1 }
 0x6c2   :  { %v17438_v4 = vpop.f32.mrb[223].mxu1  ;;  %v21579_v43 = vpop.permute.xlu0 %7117 }
 0x6c3   :  { %24901 = vst [vmem:[#allocation137_spill] sm:$0xff] %v21579_v43 }
 0x6c4   :  { %v21571_v1 = vpop.f32.mrb[200].mxu0 }
 0x6c5   :  { %v17491_v6 = vpop.f32.mrb[201].mxu0  ;;  %v6319_v34 = vsel %vm2779_vm3, %v21571_v1, -inf }
 0x6c6   :  { %6320 = vmax.xlane.f32.xlu0 %v6319_v34  ;;  %v5800_v17 = vpop.f32.mrb[202].mxu0  ;;  %v21589_v48 = vpop.permute.xlu0 %7213 }
 0x6c7   :  { %v21575_v24 = vpop.f32.mrb[224].mxu1  ;;  %v17492_v60 = vpop.f32.mrb[203].mxu0  ;;  %24902 = vst [vmem:[#allocation138_spill] sm:$0xff] %v21589_v48 }
 0x6c8   :  { %v17449_v63 = vpop.f32.mrb[225].mxu1  ;;  %v6298_v57 = vsel %vm2779_vm3, %v21575_v24, -inf }
 0x6c9   :  { %6299 = vmax.xlane.f32.xlu1 %v6298_v57  ;;  %v5450_v13 = vpop.f32.mrb[226].mxu1 }
 0x6ca   :  { %v17450_v4 = vpop.f32.mrb[227].mxu1 }
 0x6cc   :  { %v21583_v6 = vpop.f32.mrb[204].mxu0 }
 0x6cd   :  { %v17503_v39 = vpop.f32.mrb[205].mxu0  ;;  %v6325_v34 = vsel %vm2779_vm3, %v21583_v6, -inf }
 0x6ce   :  { %6326 = vmax.xlane.f32.xlu0 %v6325_v34  ;;  %v5900_v17 = vpop.f32.mrb[206].mxu0 }
 0x6cf   :  { %v21587_v60 = vpop.f32.mrb[228].mxu1  ;;  %v17504_v63 = vpop.f32.mrb[207].mxu0 }
 0x6d0   :  { %v17461_v57 = vpop.f32.mrb[229].mxu1  ;;  %v6304_v13 = vsel %vm2779_vm3, %v21587_v60, -inf  ;;  %v21599_v17 = vpop.permute.xlu0 %7309 }
 0x6d1   :  { %6305 = vmax.xlane.f32.xlu1 %v6304_v13  ;;  %v5550_v4 = vpop.f32.mrb[230].mxu1  ;;  %24903 = vst [vmem:[#allocation139_spill] sm:$0xff] %v21599_v17 }
 0x6d2   :  { %v17462_v27 = vpop.f32.mrb[231].mxu1 }
 0x6d4   :  { %v21595_v39 = vpop.f32.mrb[208].mxu0  ;;  %v21609_v43 = vpop.permute.xlu0 %7405 }
 0x6d5   :  { %v17515_v46 = vpop.f32.mrb[209].mxu0  ;;  %v6331_v34 = vsel %vm2779_vm3, %v21595_v39, -inf  ;;  %24905 = vst [vmem:[#allocation141_spill] sm:$0xff] %v21609_v43 }
 0x6d6   :  { %6332 = vmax.xlane.f32.xlu0 %v6331_v34  ;;  %v6000_v63 = vpop.f32.mrb[210].mxu0 }
 0x6d7   :  { %v21601_v22 = vpop.f32.mrb[232].mxu1  ;;  %v17516_v57 = vpop.f32.mrb[211].mxu0 }
 0x6d8   :  { %v17473_v13 = vpop.f32.mrb[233].mxu1  ;;  %v6310_v4 = vsel %vm2779_vm3, %v21601_v22, -inf  ;;  %v21613_v63 = vpop.permute.xlu1 %7069 }
 0x6d9   :  { %6311 = vmax.xlane.f32.xlu1 %v6310_v4  ;;  %v5650_v27 = vpop.f32.mrb[234].mxu1  ;;  %24906 = vst [vmem:[#allocation142_spill] sm:$0xff] %v21613_v63  ;;  %v21623_v43 = vpop.permute.xlu0 %7501 }
 0x6da   :  { %v17474_v48 = vpop.f32.mrb[235].mxu1  ;;  %24908 = vst [vmem:[#allocation144_spill] sm:$0xff] %v21623_v43 }
 0x6dc   :  { %v21607_v46 = vpop.f32.mrb[212].mxu0  ;;  %v21619_v9 = vpop.permute.xlu1 %7165 }
 0x6dd   :  { %v17527_v47 = vpop.f32.mrb[213].mxu0  ;;  %v6337_v34 = vsel %vm2779_vm3, %v21607_v46, -inf  ;;  %24907 = vst [vmem:[#allocation143_spill] sm:$0xff] %v21619_v9 }
 0x6de   :  { %6338 = vmax.xlane.f32.xlu0 %v6337_v34  ;;  %v6100_v57 = vpop.f32.mrb[214].mxu0 }
 0x6df   :  { %v21615_v17 = vpop.f32.mrb[236].mxu1  ;;  %v17528_v13 = vpop.f32.mrb[215].mxu0 }
 0x6e0   :  { %v17485_v8 = vpop.f32.mrb[237].mxu1  ;;  %v6316_v4 = vsel %vm2779_vm3, %v21615_v17, -inf }
 0x6e1   :  { %6317 = vmax.xlane.f32.xlu1 %v6316_v4  ;;  %v5750_v48 = vpop.f32.mrb[238].mxu1  ;;  %v21629_v4 = vpop.permute.xlu1 %7261 }
 0x6e2   :  { %v17486_v27 = vpop.f32.mrb[239].mxu1  ;;  %24909 = vst [vmem:[#allocation145_spill] sm:$0xff] %v21629_v4 }
 0x6e3   :  { %v21631_v27 = vpop.permute.xlu0 %7597 }
 0x6e4   :  { %v21621_v47 = vpop.f32.mrb[216].mxu0  ;;  %24910 = vst [vmem:[#allocation146_spill] sm:$0xff] %v21631_v27 }
 0x6e5   :  { %v17539_v15 = vpop.f32.mrb[217].mxu0  ;;  %v21635_v37 = vpop.permute.xlu1 %7357 }
 0x6e6   :  { %v6200_v63 = vpop.f32.mrb[218].mxu0  ;;  %24911 = vst [vmem:[#allocation147_spill] sm:$0xff] %v21635_v37 }
 0x6e7   :  { %v21625_v34 = vpop.f32.mrb[240].mxu1  ;;  %v17540_v57 = vpop.f32.mrb[219].mxu0 }
 0x6e8   :  { %v17497_v49 = vpop.f32.mrb[241].mxu1  ;;  %v6322_v8 = vsel %vm2779_vm3, %v21625_v34, -inf  ;;  %v21639_v57 = vpop.permute.xlu0 %7693 }
 0x6e9   :  { %6323 = vmax.xlane.f32.xlu1 %v6322_v8  ;;  %v5850_v13 = vpop.f32.mrb[242].mxu1  ;;  %24912 = vst [vmem:[#allocation148_spill] sm:$0xff] %v21639_v57  ;;  %v21641_v8 = vpop.permute.xlu1 %7453 }
 0x6ea   :  { %v17498_v48 = vpop.f32.mrb[243].mxu1  ;;  %24913 = vst [vmem:[#allocation149_spill] sm:$0xff] %v21641_v8 }
 0x6ec   :  { %v21643_v13 = vpop.permute.xlu0 %7789 }
 0x6ed   :  { %24914 = vst [vmem:[#allocation150_spill] sm:$0xff] %v21643_v13  ;;  %v21649_v42 = vpop.permute.xlu1 %7549 }
 0x6ee   :  { %24915 = vst [vmem:[#allocation151_spill] sm:$0xff] %v21649_v42  ;;  %v6343_v42 = vsel %vm2779_vm3, %v21621_v47, -inf }
 0x6ef   :  { %v21633_v9 = vpop.f32.mrb[244].mxu1 }
 0x6f0   :  { %v17509_v15 = vpop.f32.mrb[245].mxu1  ;;  %v6328_v63 = vsel %vm2779_vm3, %v21633_v9, -inf }
 0x6f1   :  { %6329 = vmax.xlane.f32.xlu1 %v6328_v63  ;;  %v5950_v49 = vpop.f32.mrb[246].mxu1  ;;  %v21656_v8 = vpop.permute.xlu1 %7645 }
 0x6f2   :  { %v17510_v43 = vpop.f32.mrb[247].mxu1  ;;  %24916 = vst [vmem:[#allocation152_spill] sm:$0xff] %v21656_v8 }
 0x6f7   :  { %v21645_v48 = vpop.f32.mrb[248].mxu1 }
 0x6f8   :  { %v17521_v27 = vpop.f32.mrb[249].mxu1  ;;  %v6334_v4 = vsel %vm2779_vm3, %v21645_v48, -inf }
 0x6f9   :  { %6335 = vmax.xlane.f32.xlu1 %v6334_v4  ;;  %v6050_v15 = vpop.f32.mrb[250].mxu1 }
 0x6fa   :  { %v17522_v37 = vpop.f32.mrb[251].mxu1 }
 0x6fb   :  { %v6255_v18 = vpop.xlane.xlu0 %6254 }
 0x6fc   :  { %v6349_v63 = vsub.f32 %v21487_v19, %v6255_v18 }
 0x6fe   :  { %v6381_v49 = vmul.f32 1.442695, %v6349_v63  ;;  %v21663_v63 = vpop.permute.xlu1 %7741 }
 0x6ff   :  { %v21652_v43 = vpop.f32.mrb[252].mxu1  ;;  %24917 = vst [vmem:[#allocation153_spill] sm:$0xff] %v21663_v63 }
 0x700   :  { %18820 = vpow2.f32 %v6381_v49  ;;  %v17533_v57 = vpop.f32.mrb[253].mxu1  ;;  %v6340_v13 = vsel %vm2779_vm3, %v21652_v43, -inf }
 0x701   :  { %6341 = vmax.xlane.f32.xlu1 %v6340_v13  ;;  %v6150_v27 = vpop.f32.mrb[254].mxu1 }
 0x702   :  { %v17534_v4 = vpop.f32.mrb[255].mxu1 }
 0x703   :  { %v6261_v15 = vpop.xlane.xlu0 %6260 }
 0x704   :  { %v6351_v37 = vsub.f32 %v21491_v55, %v6261_v15 }
 0x705   :  { %6344 = vmax.xlane.f32.xlu1 %v6343_v42  ;;  %v21671_v42 = vpop.permute.xlu1 %7837 }
 0x706   :  { %v6385_v18 = vmul.f32 1.442695, %v6351_v37  ;;  %24918 = vst [vmem:[#allocation154_spill] sm:$0xff] %v21671_v42 }
 0x707   :  { %v21661_v19 = vpop.f32.mrb[0].mxu1 }
 0x708   :  { %18822 = vpow2.f32 %v6385_v18  ;;  %v17545_v57 = vpop.f32.mrb[1].mxu1  ;;  %v6346_v13 = vsel %vm2779_vm3, %v21661_v19, -inf }
 0x709   :  { %v6250_v49 = vpop.f32.mrb[2].mxu1  ;;  %6347 = vmax.xlane.f32.xlu0 %v6346_v13  ;;  %v21677_v18 = vpop.permute.xlu1 %7885 }
 0x70a   :  { %v21667_v27 = vpop.eup %18820  ;;  %v17546_v4 = vpop.f32.mrb[3].mxu1  ;;  %24919 = vst [vmem:[#allocation155_spill] sm:$0xff] %v21677_v18 }
 0x70b   :  { %v6445_v55 = vsel %vm2779_vm3, %v21667_v27, 0.0 }
 0x70d   :  { %6446 = vadd.xlane.f32.xlu0 %v6445_v55  ;;  %v21679_v57 = vpop.permute.xlu1 %7933 }
 0x70e   :  { %24920 = vst [vmem:[#allocation156_spill] sm:$0xff] %v21679_v57 }
 0x712   :  { %v21673_v15 = vpop.eup %18822 }
 0x713   :  { %v6451_v37 = vsel %vm2779_vm3, %v21673_v15, 0.0 }
 0x714   :  { %6452 = vadd.xlane.f32.xlu0 %v6451_v37 }
 0x71e   :  { %v6258_v13 = vpop.xlane.xlu1 %6257 }
 0x71f   :  { %v6350_v49 = vsub.f32 %v21505_v11, %v6258_v13 }
 0x721   :  { %v6383_v4 = vmul.f32 1.442695, %v6350_v49 }
 0x723   :  { %18824 = vpow2.f32 %v6383_v4 }
 0x726   :  { %v6264_v63 = vpop.xlane.xlu0 %6263 }
 0x727   :  { %v6352_v55 = vsub.f32 %v21511_v45, %v6264_v63 }
 0x729   :  { %v6387_v8 = vmul.f32 1.442695, %v6352_v55 }
 0x72a   :  { %v6267_v42 = vpop.xlane.xlu0 %6266 }
 0x72b   :  { %18826 = vpow2.f32 %v6387_v8  ;;  %v6353_v20 = vsub.f32 %v21495_v28, %v6267_v42 }
 0x72d   :  { %v21684_v40 = vpop.eup %18824  ;;  %v6389_v52 = vmul.f32 1.442695, %v6353_v20 }
 0x72e   :  { %v6448_v37 = vsel %vm2779_vm3, %v21684_v40, 0.0  ;;  %v6273_v28 = vpop.xlane.xlu0 %6272 }
 0x72f   :  { %18828 = vpow2.f32 %v6389_v52  ;;  %6449 = vadd.xlane.f32.xlu1 %v6448_v37  ;;  %v6270_v52 = vpop.xlane.xlu1 %6269  ;;  %v6355_v49 = vsub.f32 %v21497_v35, %v6273_v28 }
 0x730   :  { %v6354_v42 = vsub.f32 %v21519_v25, %v6270_v52 }
 0x732   :  { %v6279_v20 = vpop.xlane.xlu0 %6278  ;;  %v6391_v4 = vmul.f32 1.442695, %v6354_v42 }
 0x733   :  { %v6357_v18 = vsub.f32 %v21503_v0, %v6279_v20 }
 0x734   :  { %18830 = vpow2.f32 %v6391_v4 }
 0x735   :  { %v21688_v57 = vpop.eup %18826  ;;  %v6397_v5 = vmul.f32 1.442695, %v6357_v18 }
 0x736   :  { %v6454_v11 = vsel %vm2779_vm3, %v21688_v57, 0.0  ;;  %v6285_v63 = vpop.xlane.xlu0 %6284  ;;  %v6276_v13 = vpop.xlane.xlu1 %6275 }
 0x737   :  { %6455 = vadd.xlane.f32.xlu1 %v6454_v11  ;;  %v6356_v55 = vsub.f32 %v21529_v41, %v6276_v13  ;;  %v6359_v25 = vsub.f32 %v21509_v23, %v6285_v63 }
 0x739   :  { %v21692_v45 = vpop.eup %18828  ;;  %v6401_v52 = vmul.f32 1.442695, %v6359_v25 }
 0x73a   :  { %v6457_v8 = vsel %vm2779_vm3, %v21692_v45, 0.0  ;;  %v6291_v37 = vpop.xlane.xlu0 %6290 }
 0x73b   :  { %6458 = vadd.xlane.f32.xlu0 %v6457_v8  ;;  %v6393_v8 = vmul.f32 1.442695, %v6355_v49  ;;  %v6361_v42 = vsub.f32 %v21515_v56, %v6291_v37 }
 0x73d   :  { %18832 = vpow2.f32 %v6393_v8  ;;  %v6405_v18 = vmul.f32 1.442695, %v6361_v42 }
 0x73e   :  { %v6282_v11 = vpop.xlane.xlu1 %6281  ;;  %v6297_v54 = vpop.xlane.xlu0 %6296 }
 0x73f   :  { %v6358_v59 = vsub.f32 %v21539_v14, %v6282_v11  ;;  %v21709_v49 = vpop.eup %18830 }
 0x740   :  { %v6460_v56 = vsel %vm2779_vm3, %v21709_v49, 0.0 }
 0x741   :  { %v6399_v35 = vmul.f32 1.442695, %v6358_v59 }
 0x742   :  { %v6303_v0 = vpop.xlane.xlu0 %6302 }
 0x743   :  { %v6365_v4 = vsub.f32 %v21535_v12, %v6303_v0 }
 0x745   :  { %v6413_v25 = vmul.f32 1.442695, %v6365_v4 }
 0x748   :  { %8029 = vrot.lane.b32.xlu1 %v21109_v62, %s19358_s4  ;;  %v6395_v62 = vmul.f32 1.442695, %v6356_v55 }
 0x74a   :  { %18834 = vpow2.f32 %v6395_v62  ;;  %v6363_v62 = vsub.f32 %v21525_v50, %v6297_v54 }
 0x74b   :  { %18836 = vpow2.f32 %v6397_v5  ;;  %v21713_v5 = vpop.eup %18832 }
 0x74c   :  { %18838 = vpow2.f32 %v6399_v35  ;;  %v6409_v63 = vmul.f32 1.442695, %v6363_v62  ;;  %v6463_v37 = vsel %vm2779_vm3, %v21713_v5, 0.0 }
 0x74d   :  { %18840 = vpow2.f32 %v6401_v52 }
 0x751   :  { %7981 = vrot.lane.b32.xlu0 %v21072_v2, %s19358_s4  ;;  %v6288_v2 = vpop.xlane.xlu1 %6287 }
 0x752   :  { %v6360_v28 = vsub.f32 %v21551_v51, %v6288_v2 }
 0x754   :  { %v6403_v20 = vmul.f32 1.442695, %v6360_v28  ;;  %v21717_v51 = vpop.eup %18834 }
 0x755   :  { %v6294_v41 = vpop.xlane.xlu1 %6293  ;;  %v21721_v55 = vpop.eup %18836  ;;  %v6466_v11 = vsel %vm2779_vm3, %v21717_v51, 0.0 }
 0x756   :  { %v6362_v14 = vsub.f32 %v21565_v36, %v6294_v41  ;;  %18842 = vpow2.f32 %v6403_v20  ;;  %v6309_v36 = vpop.xlane.xlu0 %6308  ;;  %v21727_v8 = vpop.eup %18838  ;;  %v6469_v42 = vsel %vm2779_vm3, %v21721_v55, 0.0 }
 0x757   :  { %18844 = vpow2.f32 %v6405_v18  ;;  %v6367_v12 = vsub.f32 %v21547_v30, %v6309_v36  ;;  %v21731_v41 = vpop.eup %18840  ;;  %v6472_v0 = vsel %vm2779_vm3, %v21727_v8, 0.0 }
 0x758   :  { %v6407_v59 = vmul.f32 1.442695, %v6362_v14 }
 0x759   :  { %v6300_v13 = vpop.xlane.xlu1 %6299  ;;  %v6417_v30 = vmul.f32 1.442695, %v6367_v12 }
 0x75a   :  { %v6364_v2 = vsub.f32 %v21575_v24, %v6300_v13  ;;  %18846 = vpow2.f32 %v6407_v59  ;;  %v6315_v35 = vpop.xlane.xlu0 %6314 }
 0x75b   :  { %18848 = vpow2.f32 %v6409_v63  ;;  %v6369_v14 = vsub.f32 %v21559_v58, %v6315_v35 }
 0x75c   :  { %v6411_v54 = vmul.f32 1.442695, %v6364_v2 }
 0x75d   :  { %v6421_v58 = vmul.f32 1.442695, %v6369_v14 }
 0x75e   :  { %v6306_v23 = vpop.xlane.xlu1 %6305  ;;  %18850 = vpow2.f32 %v6411_v54  ;;  %v6321_v13 = vpop.xlane.xlu0 %6320 }
 0x75f   :  { %v6366_v50 = vsub.f32 %v21587_v60, %v6306_v23  ;;  %18852 = vpow2.f32 %v6413_v25  ;;  %v6475_v23 = vsel %vm2779_vm3, %v21731_v41, 0.0  ;;  %v6371_v36 = vsub.f32 %v21571_v1, %v6321_v13 }
 0x760   :  { %v21737_v20 = vpop.eup %18842 }
 0x761   :  { %v6415_v60 = vmul.f32 1.442695, %v6366_v50  ;;  %v21741_v62 = vpop.eup %18844  ;;  %v6478_v2 = vsel %vm2779_vm3, %v21737_v20, 0.0 }
 0x762   :  { %v6327_v63 = vpop.xlane.xlu0 %6326 }
 0x763   :  { %18854 = vpow2.f32 %v6415_v60  ;;  %v6373_v1 = vsub.f32 %v21583_v6, %v6327_v63 }
 0x764   :  { %18856 = vpow2.f32 %v6417_v30 }
 0x765   :  { %v6429_v6 = vmul.f32 1.442695, %v6373_v1 }
 0x766   :  { %v6312_v24 = vpop.xlane.xlu1 %6311  ;;  %v6333_v35 = vpop.xlane.xlu0 %6332 }
 0x767   :  { %v6368_v28 = vsub.f32 %v21601_v22, %v6312_v24  ;;  %v6481_v24 = vsel %vm2779_vm3, %v21741_v62, 0.0 }
 0x769   :  { %v6419_v22 = vmul.f32 1.442695, %v6368_v28 }
 0x76b   :  { %18858 = vpow2.f32 %v6419_v22  ;;  %v6339_v13 = vpop.xlane.xlu0 %6338 }
 0x76c   :  { %6461 = vadd.xlane.f32.xlu1 %v6460_v56  ;;  %v21747_v56 = vpop.eup %18846  ;;  %18860 = vpow2.f32 %v6421_v58 }
 0x76d   :  { %v21751_v54 = vpop.eup %18848  ;;  %v6484_v50 = vsel %vm2779_vm3, %v21747_v56, 0.0 }
 0x76e   :  { %v6318_v52 = vpop.xlane.xlu1 %6317 }
 0x76f   :  { %v6370_v18 = vsub.f32 %v21615_v17, %v6318_v52  ;;  %v6487_v52 = vsel %vm2779_vm3, %v21751_v54, 0.0 }
 0x770   :  { %6464 = vadd.xlane.f32.xlu0 %v6463_v37  ;;  %6467 = vadd.xlane.f32.xlu1 %v6466_v11  ;;  %v21757_v37 = vpop.eup %18850  ;;  %v6425_v11 = vmul.f32 1.442695, %v6371_v36 }
 0x771   :  { %v6423_v17 = vmul.f32 1.442695, %v6370_v18  ;;  %v6490_v28 = vsel %vm2779_vm3, %v21757_v37, 0.0 }
 0x773   :  { %18862 = vpow2.f32 %v6423_v17 }
 0x774   :  { %6470 = vadd.xlane.f32.xlu0 %v6469_v42  ;;  %6473 = vadd.xlane.f32.xlu1 %v6472_v0  ;;  %18864 = vpow2.f32 %v6425_v11  ;;  %v6375_v0 = vsub.f32 %v21595_v39, %v6333_v35 }
 0x776   :  { %v6324_v59 = vpop.xlane.xlu1 %6323 }
 0x777   :  { %v6372_v4 = vsub.f32 %v21625_v34, %v6324_v59  ;;  %v21760_v34 = vpop.eup %18852  ;;  %v6433_v59 = vmul.f32 1.442695, %v6375_v0 }
 0x778   :  { %6479 = vadd.xlane.f32.xlu0 %v6478_v2  ;;  %6476 = vadd.xlane.f32.xlu1 %v6475_v23  ;;  %v21767_v42 = vpop.eup %18854  ;;  %v6493_v22 = vsel %vm2779_vm3, %v21760_v34, 0.0  ;;  %v6377_v2 = vsub.f32 %v21607_v46, %v6339_v13 }
 0x779   :  { %v6427_v25 = vmul.f32 1.442695, %v6372_v4  ;;  %v21770_v14 = vpop.eup %18856 }
 0x77a   :  { %v21776_v18 = vpop.eup %18858  ;;  %v6499_v63 = vsel %vm2779_vm3, %v21770_v14, 0.0 }
 0x77b   :  { %18866 = vpow2.f32 %v6427_v25  ;;  %v21779_v23 = vpop.eup %18860  ;;  %v6502_v36 = vsel %vm2779_vm3, %v21776_v18, 0.0 }
 0x77c   :  { %6485 = vadd.xlane.f32.xlu0 %v6484_v50  ;;  %6482 = vadd.xlane.f32.xlu1 %v6481_v24  ;;  %18868 = vpow2.f32 %v6429_v6  ;;  %v6437_v50 = vmul.f32 1.442695, %v6377_v2 }
 0x77d   :  { %v21786_v17 = vpop.eup %18862 }
 0x77e   :  { %v6330_v12 = vpop.xlane.xlu1 %6329  ;;  %v21788_v46 = vpop.eup %18864  ;;  %v6508_v24 = vsel %vm2779_vm3, %v21786_v17, 0.0 }
 0x77f   :  { %v6374_v60 = vsub.f32 %v21633_v9, %v6330_v12  ;;  %v6496_v9 = vsel %vm2779_vm3, %v21767_v42, 0.0 }
 0x780   :  { %6491 = vadd.xlane.f32.xlu0 %v6490_v28  ;;  %6488 = vadd.xlane.f32.xlu1 %v6487_v52 }
 0x781   :  { %v6431_v30 = vmul.f32 1.442695, %v6374_v60  ;;  %v6511_v60 = vsel %vm2779_vm3, %v21788_v46, 0.0 }
 0x783   :  { %18870 = vpow2.f32 %v6431_v30 }
 0x784   :  { %6497 = vadd.xlane.f32.xlu0 %v6496_v9  ;;  %6494 = vadd.xlane.f32.xlu1 %v6493_v22  ;;  %18872 = vpow2.f32 %v6433_v59 }
 0x785   :  { %v21794_v11 = vpop.eup %18866 }
 0x786   :  { %v6336_v39 = vpop.xlane.xlu1 %6335  ;;  %v21796_v25 = vpop.eup %18868  ;;  %v6514_v35 = vsel %vm2779_vm3, %v21794_v11, 0.0 }
 0x787   :  { %v6376_v58 = vsub.f32 %v21645_v48, %v6336_v39  ;;  %v6505_v48 = vsel %vm2779_vm3, %v21779_v23, 0.0  ;;  %v6517_v0 = vsel %vm2779_vm3, %v21796_v25, 0.0 }
 0x788   :  { %6503 = vadd.xlane.f32.xlu0 %v6502_v36  ;;  %6500 = vadd.xlane.f32.xlu1 %v6499_v63 }
 0x789   :  { %v6435_v4 = vmul.f32 1.442695, %v6376_v58 }
 0x78b   :  { %18874 = vpow2.f32 %v6435_v4 }
 0x78c   :  { %6509 = vadd.xlane.f32.xlu0 %v6508_v24  ;;  %6506 = vadd.xlane.f32.xlu1 %v6505_v48  ;;  %18876 = vpow2.f32 %v6437_v50  ;;  %v6739_v48 = vsel %vm3167_vm2, %v21545_v26, 0 }
 0x78d   :  { %v21803_v28 = vpop.eup %18870 }
 0x78e   :  { %v6342_v1 = vpop.xlane.xlu1 %6341  ;;  %v6520_v6 = vsel %vm2779_vm3, %v21803_v28, 0.0  ;;  %v21809_v30 = vpop.eup %18872 }
 0x78f   :  { %v6378_v12 = vsub.f32 %v21652_v43, %v6342_v1  ;;  %v6523_v22 = vsel %vm2779_vm3, %v21809_v30, 0.0 }
 0x790   :  { %6515 = vadd.xlane.f32.xlu0 %v6514_v35  ;;  %6512 = vadd.xlane.f32.xlu1 %v6511_v60 }
 0x791   :  { %v6439_v52 = vmul.f32 1.442695, %v6378_v12 }
 0x792   :  { %v6345_v26 = vpop.xlane.xlu1 %6344 }
 0x793   :  { %18878 = vpow2.f32 %v6439_v52  ;;  %v6379_v60 = vsub.f32 %v21621_v47, %v6345_v26 }
 0x794   :  { %6521 = vadd.xlane.f32.xlu0 %v6520_v6  ;;  %6518 = vadd.xlane.f32.xlu1 %v6517_v0 }
 0x795   :  { %v21811_v43 = vpop.eup %18874  ;;  %v6441_v6 = vmul.f32 1.442695, %v6379_v60  ;;  %v24925_v60 = vld [vmem:[#allocation26_spill] sm:$0xff] }
 0x796   :  { %v6348_v13 = vpop.xlane.xlu0 %6347  ;;  %v6526_v9 = vsel %vm2779_vm3, %v21811_v43, 0.0  ;;  %v21817_v59 = vpop.eup %18876 }
 0x797   :  { %v6529_v39 = vsel %vm2779_vm3, %v21817_v59, 0.0 }
 0x798   :  { %6527 = vadd.xlane.f32.xlu0 %v6526_v9  ;;  %6524 = vadd.xlane.f32.xlu1 %v6523_v22 }
 0x79a   :  { %v6447_v2 = vpop.xlane.xlu0 %6446 }
 0x79b   :  { %18880 = vrcp.f32 %v6447_v2 }
 0x79c   :  { %6530 = vadd.xlane.f32.xlu1 %v6529_v39 }
 0x79d   :  { %v21821_v58 = vpop.eup %18878 }
 0x79e   :  { %v6532_v36 = vsel %vm2779_vm3, %v21821_v58, 0.0 }
 0x79f   :  { %6533 = vadd.xlane.f32.xlu0 %v6532_v36  ;;  %v6787_v36 = vsel %vm3167_vm2, %v21581_v32, 0 }
 0x7a1   :  { %v6453_v63 = vpop.xlane.xlu0 %6452 }
 0x7a2   :  { %18882 = vrcp.f32 %v6453_v63 }
 0x7a5   :  { %v18881_v4 = vpop.eup %18880 }
 0x7a6   :  { %v6573_v50 = vmul.f32 %v18881_v4, %v21667_v27  ;;  %v6835_v27 = vsel %vm3167_vm2, %v21553_v10, 0 }
 0x7a8   :  { %v6605_v24 = vpack.c.bf16 %v6573_v50, %v6573_v50 }
 0x7aa   :  { %17550 = vmatmul.mubr.msk.bf16.vlgmr.msra.gmra.mrb[220].mxu0 %vm2779_vm3, %v6605_v24  ;;  %v6883_v24 = vsel %vm3167_vm2, %v21593_v7, 0  ;;  %v24921_v7 = vld [vmem:[#allocation22_spill] sm:$0xff] }
 0x7ab   :  { %17560 = vmatpush3.bf16.msra.mxu0 %v6739_v48  ;;  %17561 = vmatprep.mubr.msk.bf16.mxu0 %vm19357_vm0, %v24762_v44 }
 0x7ac   :  { %v18883_v1 = vpop.eup %18882  ;;  %17571 = vmatprep.subr.bf16.mxu0 %v24762_v44 }
 0x7ad   :  { %8125 = vrot.lane.b32.xlu1 %v21135_v31, %s19358_s4  ;;  %v6575_v12 = vmul.f32 %v18883_v1, %v21673_v15  ;;  %v6380_v15 = vsub.f32 %v21661_v19, %v6348_v13  ;;  %v6931_v1 = vsel %vm3167_vm2, %v21563_v29, 0  ;;  %v24922_v29 = vld [vmem:[#allocation28_spill] sm:$0xff] }
 0x7af   :  { %v6607_v35 = vpack.c.bf16 %v6575_v12, %v6575_v12  ;;  %v6443_v10 = vmul.f32 1.442695, %v6380_v15  ;;  %v24923_v12 = vld [vmem:[#allocation25_spill] sm:$0xff] }
 0x7b2   :  { %17562 = vmatmul.mubr.msk.bf16.vlgmr.msra.gmra.mrb[224].mxu0 %vm2779_vm3, %v6607_v35  ;;  %v24924_v35 = vld [vmem:[#allocation31_spill] sm:$0xff] }
 0x7b3   :  { %17572 = vmatpush3.bf16.msra.mxu0 %v6835_v27  ;;  %17573 = vmatprep.mubr.msk.bf16.mxu0 %vm19357_vm0, %v24762_v44 }
 0x7b4   :  { %17583 = vmatprep.subr.bf16.mxu0 %v24762_v44 }
 0x7b5   :  { %8077 = vrot.lane.b32.xlu0 %v21115_v61, %s19358_s4 }
 0x7bc   :  { %v6450_v52 = vpop.xlane.xlu1 %6449 }
 0x7bd   :  { %18884 = vrcp.f32 %v6450_v52  ;;  %v24926_v52 = vld [vmem:[#allocation32_spill] sm:$0xff] }
 0x7be   :  { %18886 = vpow2.f32 %v6441_v6 }
 0x7c4   :  { %v6456_v0 = vpop.xlane.xlu1 %6455 }
 0x7c5   :  { %18888 = vrcp.f32 %v6456_v0  ;;  %v24928_v0 = vld [vmem:[#allocation35_spill] sm:$0xff] }
 0x7c6   :  { %18890 = vpow2.f32 %v6443_v10  ;;  %v24927_v10 = vld [vmem:[#allocation29_spill] sm:$0xff] }
 0x7c7   :  { %v18885_v9 = vpop.eup %18884 }
 0x7c8   :  { %v6574_v22 = vmul.f32 %v18885_v9, %v21684_v40  ;;  %v6459_v2 = vpop.xlane.xlu0 %6458  ;;  %v21849_v47 = vpop.eup %18886 }
 0x7c9   :  { %18892 = vrcp.f32 %v6459_v2  ;;  %v6535_v63 = vsel %vm2779_vm3, %v21849_v47, 0.0  ;;  %v24929_v2 = vld [vmem:[#allocation30_spill] sm:$0xff] }
 0x7ca   :  { %v6606_v39 = vpack.c.bf16 %v6574_v22, %v6574_v22 }
 0x7cc   :  { %17556 = vmatmul.mubr.msk.bf16.vlgmr.msra.gmra.mrb[4].mxu1 %vm2779_vm3, %v6606_v39  ;;  %v21896_v27 = vpop.permute.xlu0 %7981  ;;  %v24930_v39 = vld [vmem:[#allocation34_spill] sm:$0xff] }
 0x7cd   :  { %17566 = vmatpush3.bf16.msra.mxu1 %v6787_v36  ;;  %17567 = vmatprep.mubr.msk.bf16.mxu1 %vm19357_vm0, %v24762_v44 }
 0x7ce   :  { %17577 = vmatprep.subr.bf16.mxu1 %v24762_v44 }
 0x7cf   :  { %v18889_v19 = vpop.eup %18888 }
 0x7d0   :  { %v21854_v13 = vpop.eup %18890  ;;  %v6576_v40 = vmul.f32 %v18889_v19, %v21688_v57 }
 0x7d1   :  { %6536 = vadd.xlane.f32.xlu1 %v6535_v63  ;;  %v6538_v50 = vsel %vm2779_vm3, %v21854_v13, 0.0  ;;  %v24932_v63 = vld [vmem:[#allocation37_spill] sm:$0xff] }
 0x7d2   :  { %v6608_v32 = vpack.c.bf16 %v6576_v40, %v6576_v40  ;;  %v24931_v40 = vld [vmem:[#allocation33_spill] sm:$0xff] }
 0x7d3   :  { %v18893_v4 = vpop.eup %18892 }
 0x7d4   :  { %6539 = vadd.xlane.f32.xlu0 %v6538_v50  ;;  %17568 = vmatmul.mubr.msk.bf16.vlgmr.msra.gmra.mrb[8].mxu1 %vm2779_vm3, %v6608_v32  ;;  %v6577_v48 = vmul.f32 %v18893_v4, %v21692_v45  ;;  %v21890_v45 = vpop.permute.xlu1 %8029 }
 0x7d5   :  { %17578 = vmatpush3.bf16.msra.mxu1 %v6883_v24  ;;  %17579 = vmatprep.mubr.msk.bf16.mxu1 %vm19357_vm0, %v24762_v44 }
 0x7d6   :  { %v6609_v57 = vpack.c.bf16 %v6577_v48, %v6577_v48  ;;  %17589 = vmatprep.subr.bf16.mxu1 %v24762_v44  ;;  %v24933_v48 = vld [vmem:[#allocation140_spill] sm:$0xff] }
 0x7d8   :  { %17574 = vmatmul.mubr.msk.bf16.vlgmr.msra.gmra.mrb[228].mxu0 %vm2779_vm3, %v6609_v57  ;;  %v6979_v57 = vsel %vm3167_vm2, %v24933_v48, 0  ;;  %v24939_v48 = vld [vmem:[#allocation142_spill] sm:$0xff] }
 0x7d9   :  { %17584 = vmatpush3.bf16.msra.mxu0 %v6931_v1  ;;  %17585 = vmatprep.mubr.msk.bf16.mxu0 %vm19357_vm0, %v24762_v44 }
 0x7da   :  { %17595 = vmatprep.subr.bf16.mxu0 %v24762_v44 }
 0x7e2   :  { %8241 = vrot.lane.b32.xlu1 %v19904_v3, %s19348_s1 }
 0x7e6   :  { %8239 = vrot.lane.b32.xlu1 %v24790_v38, %s19348_s1 }
 0x7ea   :  { %8191 = vrot.lane.b32.xlu0 %v19814_v16, %s19348_s1  ;;  %8341 = vrot.lane.b32.xlu1 %v24794_v21, %s19348_s1 }
 0x7ee   :  { %8189 = vrot.lane.b32.xlu0 %v19910_v53, %s19348_s1  ;;  %8339 = vrot.lane.b32.xlu1 %v24798_v33, %s19348_s1 }
 0x7f2   :  { %8291 = vrot.lane.b32.xlu0 %v24921_v7, %s19348_s1  ;;  %8441 = vrot.lane.b32.xlu1 %v24922_v29, %s19348_s1 }
 0x7f6   :  { %8289 = vrot.lane.b32.xlu0 %v24923_v12, %s19348_s1  ;;  %8439 = vrot.lane.b32.xlu1 %v24924_v35, %s19348_s1 }
 0x7f9   :  { %v6462_v26 = vpop.xlane.xlu1 %6461 }
 0x7fa   :  { %18894 = vrcp.f32 %v6462_v26  ;;  %8391 = vrot.lane.b32.xlu0 %v24925_v60, %s19348_s1  ;;  %8541 = vrot.lane.b32.xlu1 %v24926_v52, %s19348_s1 }
 0x7fd   :  { %v6465_v15 = vpop.xlane.xlu0 %6464  ;;  %v6468_v6 = vpop.xlane.xlu1 %6467 }
 0x7fe   :  { %18896 = vrcp.f32 %v6465_v15  ;;  %8389 = vrot.lane.b32.xlu0 %v24927_v10, %s19348_s1  ;;  %8539 = vrot.lane.b32.xlu1 %v24928_v0, %s19348_s1 }
 0x7ff   :  { %18898 = vrcp.f32 %v6468_v6  ;;  %v24935_v6 = vld [vmem:[#allocation36_spill] sm:$0xff] }
 0x801   :  { %v6471_v9 = vpop.xlane.xlu0 %6470  ;;  %v6474_v22 = vpop.xlane.xlu1 %6473 }
 0x802   :  { %18900 = vrcp.f32 %v6471_v9  ;;  %8491 = vrot.lane.b32.xlu0 %v24929_v2, %s19348_s1  ;;  %8641 = vrot.lane.b32.xlu1 %v24930_v39, %s19348_s1 }
 0x803   :  { %18902 = vrcp.f32 %v6474_v22 }
 0x804   :  { %v18895_v36 = vpop.eup %18894 }
 0x805   :  { %v6578_v19 = vmul.f32 %v18895_v36, %v21709_v49  ;;  %v6477_v4 = vpop.xlane.xlu1 %6476  ;;  %v24934_v49 = vld [vmem:[#allocation16_spill] sm:$0xff]  ;;  %v6480_v15 = vpop.xlane.xlu0 %6479 }
 0x806   :  { %8489 = vrot.lane.b32.xlu0 %v24931_v40, %s19348_s1  ;;  %8639 = vrot.lane.b32.xlu1 %v24932_v63, %s19348_s1  ;;  %18904 = vrcp.f32 %v6477_v4  ;;  %v24936_v36 = vld [vmem:[#allocation136_spill] sm:$0xff]  ;;  %v24938_v4 = vld [vmem:[#allocation39_spill] sm:$0xff] }
 0x807   :  { %v6610_v32 = vpack.c.bf16 %v6578_v19, %v6578_v19  ;;  %18906 = vrcp.f32 %v6480_v15 }
 0x808   :  { %v18897_v50 = vpop.eup %18896 }
 0x809   :  { %v18899_v24 = vpop.eup %18898  ;;  %17580 = vmatmul.mubr.msk.bf16.vlgmr.msra.gmra.mrb[12].mxu1 %vm2779_vm3, %v6610_v32  ;;  %v6579_v1 = vmul.f32 %v18897_v50, %v21713_v5  ;;  %v7027_v5 = vsel %vm3167_vm2, %v24936_v36, 0  ;;  %v6483_v32 = vpop.xlane.xlu1 %6482  ;;  %v24942_v36 = vld [vmem:[#allocation137_spill] sm:$0xff] }
 0x80a   :  { %17590 = vmatpush3.bf16.msra.mxu1 %v6979_v57  ;;  %8591 = vrot.lane.b32.xlu0 %v24934_v49, %s19348_s1  ;;  %v6580_v26 = vmul.f32 %v18899_v24, %v21717_v51  ;;  %v24937_v51 = vld [vmem:[#allocation17_spill] sm:$0xff]  ;;  %v7075_v57 = vsel %vm3167_vm2, %v24939_v48, 0  ;;  %18908 = vrcp.f32 %v6483_v32  ;;  %v6486_v15 = vpop.xlane.xlu0 %6485 }
 0x80b   :  { %8741 = vrot.lane.b32.xlu1 %v24935_v6, %s19348_s1  ;;  %v6611_v9 = vpack.c.bf16 %v6579_v1, %v6579_v1  ;;  %17591 = vmatprep.mubr.msk.bf16.mxu1 %vm19357_vm0, %v24762_v44  ;;  %v24940_v1 = vld [vmem:[#allocation18_spill] sm:$0xff]  ;;  %18910 = vrcp.f32 %v6486_v15 }
 0x80c   :  { %v18901_v22 = vpop.eup %18900  ;;  %17601 = vmatprep.subr.bf16.mxu1 %v24762_v44  ;;  %v6612_v19 = vpack.c.bf16 %v6580_v26, %v6580_v26 }
 0x80d   :  { %17586 = vmatmul.mubr.msk.bf16.vlgmr.msra.gmra.mrb[232].mxu0 %vm2779_vm3, %v6611_v9  ;;  %v6581_v50 = vmul.f32 %v18901_v22, %v21721_v55  ;;  %v18903_v24 = vpop.eup %18902  ;;  %v24941_v9 = vld [vmem:[#allocation38_spill] sm:$0xff]  ;;  %v6489_v32 = vpop.xlane.xlu1 %6488 }
 0x80e   :  { %17596 = vmatpush3.bf16.msra.mxu0 %v7027_v5  ;;  %8589 = vrot.lane.b32.xlu0 %v24937_v51, %s19348_s1  ;;  %v6582_v26 = vmul.f32 %v18903_v24, %v21727_v8  ;;  %v7123_v5 = vsel %vm3167_vm2, %v24942_v36, 0  ;;  %v24943_v8 = vld [vmem:[#allocation19_spill] sm:$0xff]  ;;  %18912 = vrcp.f32 %v6489_v32  ;;  %v6492_v36 = vpop.xlane.xlu0 %6491 }
 0x80f   :  { %8739 = vrot.lane.b32.xlu1 %v24938_v4, %s19348_s1  ;;  %17597 = vmatprep.mubr.msk.bf16.mxu0 %vm19357_vm0, %v24762_v44  ;;  %v6613_v55 = vpack.c.bf16 %v6581_v50, %v6581_v50  ;;  %v24944_v50 = vld [vmem:[#allocation40_spill] sm:$0xff]  ;;  %18914 = vrcp.f32 %v6492_v36 }
 0x810   :  { %17607 = vmatprep.subr.bf16.mxu0 %v24762_v44  ;;  %v18905_v22 = vpop.eup %18904 }
 0x811   :  { %17592 = vmatmul.mubr.msk.bf16.vlgmr.msra.gmra.mrb[16].mxu1 %vm2779_vm3, %v6612_v19  ;;  %v6614_v19 = vpack.c.bf16 %v6582_v26, %v6582_v26  ;;  %v6583_v24 = vmul.f32 %v18905_v22, %v21731_v41  ;;  %v18907_v48 = vpop.eup %18906  ;;  %v24946_v26 = vld [vmem:[#allocation20_spill] sm:$0xff] }
 0x812   :  { %17602 = vmatpush3.bf16.msra.mxu1 %v7075_v57  ;;  %8691 = vrot.lane.b32.xlu0 %v24940_v1, %s19348_s1  ;;  %v24945_v57 = vld [vmem:[#allocation143_spill] sm:$0xff] }
 0x813   :  { %8841 = vrot.lane.b32.xlu1 %v24941_v9, %s19348_s1  ;;  %17603 = vmatprep.mubr.msk.bf16.mxu1 %vm19357_vm0, %v24762_v44  ;;  %v7171_v15 = vsel %vm3167_vm2, %v24945_v57, 0  ;;  %v6615_v41 = vpack.c.bf16 %v6583_v24, %v6583_v24  ;;  %v24948_v57 = vld [vmem:[#allocation138_spill] sm:$0xff]  ;;  %v24950_v24 = vld [vmem:[#allocation45_spill] sm:$0xff] }
 0x814   :  { %17613 = vmatprep.subr.bf16.mxu1 %v24762_v44  ;;  %v18909_v22 = vpop.eup %18908 }
 0x815   :  { %17598 = vmatmul.mubr.msk.bf16.vlgmr.msra.gmra.mrb[236].mxu0 %vm2779_vm3, %v6613_v55  ;;  %v6584_v55 = vmul.f32 %v18907_v48, %v21737_v20  ;;  %v24949_v20 = vld [vmem:[#allocation21_spill] sm:$0xff]  ;;  %v6495_v48 = vpop.xlane.xlu1 %6494 }
 0x816   :  { %17608 = vmatpush3.bf16.msra.mxu0 %v7123_v5  ;;  %8689 = vrot.lane.b32.xlu0 %v24943_v8, %s19348_s1  ;;  %v24947_v5 = vld [vmem:[#allocation42_spill] sm:$0xff]  ;;  %18916 = vrcp.f32 %v6495_v48 }
 0x817   :  { %8839 = vrot.lane.b32.xlu1 %v24944_v50, %s19348_s1  ;;  %17609 = vmatprep.mubr.msk.bf16.mxu0 %vm19357_vm0, %v24762_v44  ;;  %v6616_v32 = vpack.c.bf16 %v6584_v55, %v6584_v55  ;;  %v24952_v55 = vld [vmem:[#allocation41_spill] sm:$0xff] }
 0x818   :  { %17619 = vmatprep.subr.bf16.mxu0 %v24762_v44 }
 0x819   :  { %17604 = vmatmul.mubr.msk.bf16.vlgmr.msra.gmra.mrb[20].mxu1 %vm2779_vm3, %v6614_v19  ;;  %v7219_v19 = vsel %vm3167_vm2, %v24948_v57, 0  ;;  %v24951_v57 = vld [vmem:[#allocation145_spill] sm:$0xff]  ;;  %v6501_v48 = vpop.xlane.xlu1 %6500 }
 0x81a   :  { %17614 = vmatpush3.bf16.msra.mxu1 %v7171_v15  ;;  %8791 = vrot.lane.b32.xlu0 %v24946_v26, %s19348_s1  ;;  %v6585_v15 = vmul.f32 %v18909_v22, %v21741_v62  ;;  %v7267_v36 = vsel %vm3167_vm2, %v24951_v57, 0  ;;  %v24954_v57 = vld [vmem:[#allocation139_spill] sm:$0xff] }
 0x81b   :  { %8941 = vrot.lane.b32.xlu1 %v24947_v5, %s19348_s1  ;;  %17615 = vmatprep.mubr.msk.bf16.mxu1 %vm19357_vm0, %v24762_v44  ;;  %v18911_v5 = vpop.eup %18910 }
 0x81c   :  { %17625 = vmatprep.subr.bf16.mxu1 %v24762_v44  ;;  %v6617_v62 = vpack.c.bf16 %v6585_v15, %v6585_v15  ;;  %v18913_v22 = vpop.eup %18912  ;;  %v24956_v15 = vld [vmem:[#allocation49_spill] sm:$0xff] }
 0x81d   :  { %17610 = vmatmul.mubr.msk.bf16.vlgmr.msra.gmra.mrb[240].mxu0 %vm2779_vm3, %v6615_v41  ;;  %v6586_v41 = vmul.f32 %v18911_v5, %v21747_v56  ;;  %v24955_v56 = vld [vmem:[#allocation43_spill] sm:$0xff] }
 0x81e   :  { %17620 = vmatpush3.bf16.msra.mxu0 %v7219_v19  ;;  %8789 = vrot.lane.b32.xlu0 %v24949_v20, %s19348_s1  ;;  %v6498_v19 = vpop.xlane.xlu0 %6497 }
 0x81f   :  { %8939 = vrot.lane.b32.xlu1 %v24950_v24, %s19348_s1  ;;  %17621 = vmatprep.mubr.msk.bf16.mxu0 %vm19357_vm0, %v24762_v44  ;;  %v24953_v24 = vld [vmem:[#allocation46_spill] sm:$0xff]  ;;  %18918 = vrcp.f32 %v6498_v19  ;;  %v6618_v5 = vpack.c.bf16 %v6586_v41, %v6586_v41  ;;  %v24958_v41 = vld [vmem:[#allocation44_spill] sm:$0xff] }
 0x820   :  { %17631 = vmatprep.subr.bf16.mxu0 %v24762_v44  ;;  %18920 = vrcp.f32 %v6501_v48  ;;  %v6507_v48 = vpop.xlane.xlu1 %6506 }
 0x821   :  { %17616 = vmatmul.mubr.msk.bf16.vlgmr.msra.gmra.mrb[24].mxu1 %vm2779_vm3, %v6616_v32  ;;  %v7315_v32 = vsel %vm3167_vm2, %v24954_v57, 0  ;;  %v24957_v57 = vld [vmem:[#allocation147_spill] sm:$0xff] }
 0x822   :  { %17626 = vmatpush3.bf16.msra.mxu1 %v7267_v36  ;;  %8891 = vrot.lane.b32.xlu0 %v24952_v55, %s19348_s1  ;;  %v6587_v36 = vmul.f32 %v18913_v22, %v21751_v54  ;;  %v7363_v19 = vsel %vm3167_vm2, %v24957_v57, 0  ;;  %v24960_v57 = vld [vmem:[#allocation141_spill] sm:$0xff] }
 0x823   :  { %9041 = vrot.lane.b32.xlu1 %v24953_v24, %s19348_s1  ;;  %17627 = vmatprep.mubr.msk.bf16.mxu1 %vm19357_vm0, %v24762_v44  ;;  %v18915_v24 = vpop.eup %18914 }
 0x824   :  { %17637 = vmatprep.subr.bf16.mxu1 %v24762_v44  ;;  %v6619_v54 = vpack.c.bf16 %v6587_v36, %v6587_v36  ;;  %v18917_v22 = vpop.eup %18916  ;;  %v24962_v36 = vld [vmem:[#allocation53_spill] sm:$0xff] }
 0x825   :  { %17622 = vmatmul.mubr.msk.bf16.vlgmr.msra.gmra.mrb[244].mxu0 %vm2779_vm3, %v6617_v62  ;;  %v6588_v62 = vmul.f32 %v18915_v24, %v21757_v37  ;;  %v24961_v37 = vld [vmem:[#allocation47_spill] sm:$0xff] }
 0x826   :  { %17632 = vmatpush3.bf16.msra.mxu0 %v7315_v32  ;;  %8889 = vrot.lane.b32.xlu0 %v24955_v56, %s19348_s1  ;;  %v6504_v32 = vpop.xlane.xlu0 %6503 }
 0x827   :  { %9039 = vrot.lane.b32.xlu1 %v24956_v15, %s19348_s1  ;;  %17633 = vmatprep.mubr.msk.bf16.mxu0 %vm19357_vm0, %v24762_v44  ;;  %v24959_v15 = vld [vmem:[#allocation50_spill] sm:$0xff]  ;;  %18922 = vrcp.f32 %v6504_v32  ;;  %v6620_v24 = vpack.c.bf16 %v6588_v62, %v6588_v62  ;;  %v24964_v62 = vld [vmem:[#allocation48_spill] sm:$0xff] }
 0x828   :  { %17643 = vmatprep.subr.bf16.mxu0 %v24762_v44  ;;  %18924 = vrcp.f32 %v6507_v48 }
 0x829   :  { %17628 = vmatmul.mubr.msk.bf16.vlgmr.msra.gmra.mrb[28].mxu1 %vm2779_vm3, %v6618_v5  ;;  %v7411_v5 = vsel %vm3167_vm2, %v24960_v57, 0  ;;  %v24963_v57 = vld [vmem:[#allocation149_spill] sm:$0xff] }
 0x82a   :  { %17638 = vmatpush3.bf16.msra.mxu1 %v7363_v19  ;;  %8991 = vrot.lane.b32.xlu0 %v24958_v41, %s19348_s1  ;;  %v6589_v19 = vmul.f32 %v18917_v22, %v21760_v34  ;;  %v7459_v32 = vsel %vm3167_vm2, %v24963_v57, 0  ;;  %v24966_v57 = vld [vmem:[#allocation144_spill] sm:$0xff] }
 0x82b   :  { %9141 = vrot.lane.b32.xlu1 %v24959_v15, %s19348_s1  ;;  %17639 = vmatprep.mubr.msk.bf16.mxu1 %vm19357_vm0, %v24762_v44  ;;  %v18919_v15 = vpop.eup %18918 }
 0x82c   :  { %17649 = vmatprep.subr.bf16.mxu1 %v24762_v44  ;;  %v6621_v34 = vpack.c.bf16 %v6589_v19, %v6589_v19  ;;  %v18921_v22 = vpop.eup %18920  ;;  %v6513_v19 = vpop.xlane.xlu1 %6512 }
 0x82d   :  { %17634 = vmatmul.mubr.msk.bf16.vlgmr.msra.gmra.mrb[248].mxu0 %vm2779_vm3, %v6619_v54  ;;  %v6590_v54 = vmul.f32 %v18919_v15, %v21767_v42  ;;  %v24967_v42 = vld [vmem:[#allocation51_spill] sm:$0xff]  ;;  %v6591_v48 = vmul.f32 %v18921_v22, %v21770_v14 }
 0x82e   :  { %17644 = vmatpush3.bf16.msra.mxu0 %v7411_v5  ;;  %8989 = vrot.lane.b32.xlu0 %v24961_v37, %s19348_s1  ;;  %v6510_v5 = vpop.xlane.xlu0 %6509 }
 0x82f   :  { %9139 = vrot.lane.b32.xlu1 %v24962_v36, %s19348_s1  ;;  %17645 = vmatprep.mubr.msk.bf16.mxu0 %vm19357_vm0, %v24762_v44  ;;  %v24965_v36 = vld [vmem:[#allocation54_spill] sm:$0xff]  ;;  %18926 = vrcp.f32 %v6510_v5  ;;  %v6622_v15 = vpack.c.bf16 %v6590_v54, %v6590_v54  ;;  %v24970_v54 = vld [vmem:[#allocation52_spill] sm:$0xff] }
 0x830   :  { %17655 = vmatprep.subr.bf16.mxu0 %v24762_v44  ;;  %18928 = vrcp.f32 %v6513_v19  ;;  %v6519_v19 = vpop.xlane.xlu1 %6518 }
 0x831   :  { %17640 = vmatmul.mubr.msk.bf16.vlgmr.msra.gmra.mrb[32].mxu1 %vm2779_vm3, %v6620_v24  ;;  %v7507_v24 = vsel %vm3167_vm2, %v24966_v57, 0  ;;  %v24969_v57 = vld [vmem:[#allocation151_spill] sm:$0xff] }
 0x832   :  { %17650 = vmatpush3.bf16.msra.mxu1 %v7459_v32  ;;  %9091 = vrot.lane.b32.xlu0 %v24964_v62, %s19348_s1  ;;  %v24968_v32 = vld [vmem:[#allocation58_spill] sm:$0xff]  ;;  %v7555_v5 = vsel %vm3167_vm2, %v24969_v57, 0  ;;  %v6516_v22 = vpop.xlane.xlu0 %6515 }
 0x833   :  { %9241 = vrot.lane.b32.xlu1 %v24965_v36, %s19348_s1  ;;  %17651 = vmatprep.mubr.msk.bf16.mxu1 %vm19357_vm0, %v24762_v44  ;;  %v18923_v36 = vpop.eup %18922  ;;  %v24972_v57 = vld [vmem:[#allocation146_spill] sm:$0xff]  ;;  %18930 = vrcp.f32 %v6516_v22 }
 0x834   :  { %17661 = vmatprep.subr.bf16.mxu1 %v24762_v44  ;;  %v6592_v14 = vmul.f32 %v18923_v36, %v21776_v18  ;;  %v24973_v18 = vld [vmem:[#allocation56_spill] sm:$0xff]  ;;  %18932 = vrcp.f32 %v6519_v19  ;;  %v6525_v19 = vpop.xlane.xlu1 %6524 }
 0x835   :  { %17646 = vmatmul.mubr.msk.bf16.vlgmr.msra.gmra.mrb[252].mxu0 %vm2779_vm3, %v6621_v34  ;;  %v6623_v34 = vpack.c.bf16 %v6591_v48, %v6591_v48 }
 0x836   :  { %17656 = vmatpush3.bf16.msra.mxu0 %v7507_v24  ;;  %9089 = vrot.lane.b32.xlu0 %v24967_v42, %s19348_s1  ;;  %v24971_v24 = vld [vmem:[#allocation57_spill] sm:$0xff]  ;;  %v6624_v36 = vpack.c.bf16 %v6592_v14, %v6592_v14  ;;  %v24976_v14 = vld [vmem:[#allocation55_spill] sm:$0xff]  ;;  %v6522_v22 = vpop.xlane.xlu0 %6521 }
 0x837   :  { %9239 = vrot.lane.b32.xlu1 %v24968_v32, %s19348_s1  ;;  %17657 = vmatprep.mubr.msk.bf16.mxu0 %vm19357_vm0, %v24762_v44  ;;  %v18925_v32 = vpop.eup %18924  ;;  %18934 = vrcp.f32 %v6522_v22 }
 0x838   :  { %17667 = vmatprep.subr.bf16.mxu0 %v24762_v44  ;;  %v6593_v48 = vmul.f32 %v18925_v32, %v21779_v23  ;;  %18936 = vrcp.f32 %v6525_v19  ;;  %v6531_v19 = vpop.xlane.xlu1 %6530 }
 0x839   :  { %17652 = vmatmul.mubr.msk.bf16.vlgmr.msra.gmra.mrb[36].mxu1 %vm2779_vm3, %v6622_v15  ;;  %v7603_v15 = vsel %vm3167_vm2, %v24972_v57, 0  ;;  %v24975_v57 = vld [vmem:[#allocation152_spill] sm:$0xff] }
 0x83a   :  { %17662 = vmatpush3.bf16.msra.mxu1 %v7555_v5  ;;  %9191 = vrot.lane.b32.xlu0 %v24970_v54, %s19348_s1  ;;  %v24974_v5 = vld [vmem:[#allocation62_spill] sm:$0xff]  ;;  %v6625_v32 = vpack.c.bf16 %v6593_v48, %v6593_v48  ;;  %v6528_v22 = vpop.xlane.xlu0 %6527 }
 0x83b   :  { %9341 = vrot.lane.b32.xlu1 %v24971_v24, %s19348_s1  ;;  %17663 = vmatprep.mubr.msk.bf16.mxu1 %vm19357_vm0, %v24762_v44  ;;  %v18927_v24 = vpop.eup %18926  ;;  %18938 = vrcp.f32 %v6528_v22 }
 0x83c   :  { %17673 = vmatprep.subr.bf16.mxu1 %v24762_v44  ;;  %v6594_v23 = vmul.f32 %v18927_v24, %v21786_v17  ;;  %v24979_v17 = vld [vmem:[#allocation60_spill] sm:$0xff]  ;;  %18940 = vrcp.f32 %v6531_v19  ;;  %v24992_v19 = vld [vmem:[#allocation74_spill] sm:$0xff] }
 0x83d   :  { %17658 = vmatmul.mubr.msk.bf16.vlgmr.msra.gmra.mrb[0].mxu0 %vm2779_vm3, %v6623_v34  ;;  %v7651_v34 = vsel %vm3167_vm2, %v24975_v57, 0  ;;  %v24978_v57 = vld [vmem:[#allocation148_spill] sm:$0xff] }
 0x83e   :  { %17668 = vmatpush3.bf16.msra.mxu0 %v7603_v15  ;;  %9189 = vrot.lane.b32.xlu0 %v24973_v18, %s19348_s1  ;;  %v24977_v15 = vld [vmem:[#allocation61_spill] sm:$0xff]  ;;  %v6626_v24 = vpack.c.bf16 %v6594_v23, %v6594_v23  ;;  %v24982_v23 = vld [vmem:[#allocation59_spill] sm:$0xff]  ;;  %v6534_v22 = vpop.xlane.xlu0 %6533 }
 0x83f   :  { %9339 = vrot.lane.b32.xlu1 %v24974_v5, %s19348_s1  ;;  %17669 = vmatprep.mubr.msk.bf16.mxu0 %vm19357_vm0, %v24762_v44  ;;  %v18929_v5 = vpop.eup %18928  ;;  %18942 = vrcp.f32 %v6534_v22  ;;  %v8126_v22 = vpop.permute.xlu1 %8125 }
 0x840   :  { %17679 = vmatprep.subr.bf16.mxu0 %v24762_v44  ;;  %v6595_v48 = vmul.f32 %v18929_v5, %v21788_v46 }
 0x841   :  { %17664 = vmatmul.mubr.msk.bf16.vlgmr.msra.gmra.mrb[40].mxu1 %vm2779_vm3, %v6624_v36  ;;  %v7699_v36 = vsel %vm3167_vm2, %v24978_v57, 0  ;;  %v24981_v57 = vld [vmem:[#allocation153_spill] sm:$0xff] }
 0x842   :  { %17674 = vmatpush3.bf16.msra.mxu1 %v7651_v34  ;;  %9291 = vrot.lane.b32.xlu0 %v24976_v14, %s19348_s1  ;;  %v24980_v34 = vld [vmem:[#allocation66_spill] sm:$0xff]  ;;  %v6627_v5 = vpack.c.bf16 %v6595_v48, %v6595_v48 }
 0x843   :  { %9441 = vrot.lane.b32.xlu1 %v24977_v15, %s19348_s1  ;;  %17675 = vmatprep.mubr.msk.bf16.mxu1 %vm19357_vm0, %v24762_v44  ;;  %v18931_v15 = vpop.eup %18930 }
 0x844   :  { %17685 = vmatprep.subr.bf16.mxu1 %v24762_v44  ;;  %v6596_v46 = vmul.f32 %v18931_v15, %v21794_v11  ;;  %v24985_v11 = vld [vmem:[#allocation64_spill] sm:$0xff] }
 0x845   :  { %17670 = vmatmul.mubr.msk.bf16.vlgmr.msra.gmra.mrb[4].mxu0 %vm2779_vm3, %v6625_v32  ;;  %v7747_v32 = vsel %vm3167_vm2, %v24981_v57, 0  ;;  %v24984_v57 = vld [vmem:[#allocation150_spill] sm:$0xff] }
 0x846   :  { %17680 = vmatpush3.bf16.msra.mxu0 %v7699_v36  ;;  %9289 = vrot.lane.b32.xlu0 %v24979_v17, %s19348_s1  ;;  %v24983_v36 = vld [vmem:[#allocation65_spill] sm:$0xff]  ;;  %v6628_v15 = vpack.c.bf16 %v6596_v46, %v6596_v46  ;;  %v24988_v46 = vld [vmem:[#allocation63_spill] sm:$0xff] }
 0x847   :  { %9439 = vrot.lane.b32.xlu1 %v24980_v34, %s19348_s1  ;;  %17681 = vmatprep.mubr.msk.bf16.mxu0 %vm19357_vm0, %v24762_v44  ;;  %v18933_v34 = vpop.eup %18932 }
 0x848   :  { %17691 = vmatprep.subr.bf16.mxu0 %v24762_v44  ;;  %v6597_v48 = vmul.f32 %v18933_v34, %v21796_v25 }
 0x849   :  { %17676 = vmatmul.mubr.msk.bf16.vlgmr.msra.gmra.mrb[44].mxu1 %vm2779_vm3, %v6626_v24  ;;  %v7795_v24 = vsel %vm3167_vm2, %v24984_v57, 0  ;;  %v24987_v57 = vld [vmem:[#allocation154_spill] sm:$0xff] }
 0x84a   :  { %17686 = vmatpush3.bf16.msra.mxu1 %v7747_v32  ;;  %9391 = vrot.lane.b32.xlu0 %v24982_v23, %s19348_s1  ;;  %v24986_v32 = vld [vmem:[#allocation70_spill] sm:$0xff]  ;;  %v6629_v34 = vpack.c.bf16 %v6597_v48, %v6597_v48 }
 0x84b   :  { %9541 = vrot.lane.b32.xlu1 %v24983_v36, %s19348_s1  ;;  %17687 = vmatprep.mubr.msk.bf16.mxu1 %vm19357_vm0, %v24762_v44  ;;  %v18935_v36 = vpop.eup %18934 }
 0x84c   :  { %17697 = vmatprep.subr.bf16.mxu1 %v24762_v44  ;;  %v6598_v25 = vmul.f32 %v18935_v36, %v21803_v28  ;;  %v24991_v28 = vld [vmem:[#allocation68_spill] sm:$0xff] }
 0x84d   :  { %17682 = vmatmul.mubr.msk.bf16.vlgmr.msra.gmra.mrb[8].mxu0 %vm2779_vm3, %v6627_v5  ;;  %v7843_v5 = vsel %vm3167_vm2, %v24987_v57, 0  ;;  %v24990_v57 = vld [vmem:[#allocation155_spill] sm:$0xff] }
 0x84e   :  { %17692 = vmatpush3.bf16.msra.mxu0 %v7795_v24  ;;  %9389 = vrot.lane.b32.xlu0 %v24985_v11, %s19348_s1  ;;  %v24989_v24 = vld [vmem:[#allocation69_spill] sm:$0xff]  ;;  %v6630_v36 = vpack.c.bf16 %v6598_v25, %v6598_v25  ;;  %v24994_v25 = vld [vmem:[#allocation67_spill] sm:$0xff] }
 0x84f   :  { %9539 = vrot.lane.b32.xlu1 %v24986_v32, %s19348_s1  ;;  %17693 = vmatprep.mubr.msk.bf16.mxu0 %vm19357_vm0, %v24762_v44  ;;  %v18937_v32 = vpop.eup %18936 }
 0x850   :  { %17703 = vmatprep.subr.bf16.mxu0 %v24762_v44  ;;  %v6599_v48 = vmul.f32 %v18937_v32, %v21809_v30 }
 0x851   :  { %17688 = vmatmul.mubr.msk.bf16.vlgmr.msra.gmra.mrb[48].mxu1 %vm2779_vm3, %v6628_v15  ;;  %v7891_v15 = vsel %vm3167_vm2, %v24990_v57, 0  ;;  %v24993_v57 = vld [vmem:[#allocation156_spill] sm:$0xff] }
 0x852   :  { %17698 = vmatpush3.bf16.msra.mxu1 %v7843_v5  ;;  %9491 = vrot.lane.b32.xlu0 %v24988_v46, %s19348_s1  ;;  %v18939_v5 = vpop.eup %18938  ;;  %v6631_v32 = vpack.c.bf16 %v6599_v48, %v6599_v48 }
 0x853   :  { %9641 = vrot.lane.b32.xlu1 %v24989_v24, %s19348_s1  ;;  %17699 = vmatprep.mubr.msk.bf16.mxu1 %vm19357_vm0, %v24762_v44  ;;  %v6600_v30 = vmul.f32 %v18939_v5, %v21811_v43 }
 0x854   :  { %17709 = vmatprep.subr.bf16.mxu1 %v24762_v44 }
 0x855   :  { %17694 = vmatmul.mubr.msk.bf16.vlgmr.msra.gmra.mrb[12].mxu0 %vm2779_vm3, %v6629_v34  ;;  %v7939_v34 = vsel %vm3167_vm2, %v24993_v57, 0  ;;  %v8078_v57 = vpop.permute.xlu0 %8077  ;;  %v6632_v48 = vpack.c.bf16 %v6600_v30, %v6600_v30 }
 0x856   :  { %17704 = vmatpush3.bf16.msra.mxu0 %v7891_v15  ;;  %9489 = vrot.lane.b32.xlu0 %v24991_v28, %s19348_s1  ;;  %v24995_v15 = vld [vmem:[#allocation73_spill] sm:$0xff] }
 0x857   :  { %9639 = vrot.lane.b32.xlu1 %v24992_v19, %s19348_s1  ;;  %17705 = vmatprep.mubr.msk.bf16.mxu0 %vm19357_vm0, %v24762_v44  ;;  %v18941_v19 = vpop.eup %18940 }
 0x858   :  { %17715 = vmatprep.subr.bf16.mxu0 %v24762_v44  ;;  %v6601_v5 = vmul.f32 %v18941_v19, %v21817_v59  ;;  %v24998_v59 = vld [vmem:[#allocation71_spill] sm:$0xff] }
 0x859   :  { %17700 = vmatmul.mubr.msk.bf16.vlgmr.msra.gmra.mrb[52].mxu1 %vm2779_vm3, %v6630_v36  ;;  %v7987_v36 = vsel %vm3167_vm2, %v21896_v27, 0  ;;  %v8035_v27 = vsel %vm3167_vm2, %v21890_v45, 0  ;;  %v8083_v45 = vsel %vm3167_vm2, %v8078_v57, 0  ;;  %v8131_v57 = vsel %vm3167_vm2, %v8126_v22, 0 }
 0x85a   :  { %17710 = vmatpush3.bf16.msra.mxu1 %v7939_v34  ;;  %9591 = vrot.lane.b32.xlu0 %v24994_v25, %s19348_s1  ;;  %v24996_v34 = vld [vmem:[#allocation72_spill] sm:$0xff]  ;;  %v18943_v25 = vpop.eup %18942  ;;  %v6633_v30 = vpack.c.bf16 %v6601_v5, %v6601_v5 }
 0x85b   :  { %9741 = vrot.lane.b32.xlu1 %v24995_v15, %s19348_s1  ;;  %17711 = vmatprep.mubr.msk.bf16.mxu1 %vm19357_vm0, %v24762_v44  ;;  %v24997_v15 = vld [vmem:[#allocation78_spill] sm:$0xff] }
 0x85c   :  { %17721 = vmatprep.subr.bf16.mxu1 %v24762_v44 }
 0x85d   :  { %17706 = vmatmul.mubr.msk.bf16.vlgmr.msra.gmra.mrb[16].mxu0 %vm2779_vm3, %v6631_v32 }
 0x85e   :  { %17716 = vmatpush3.bf16.msra.mxu0 %v7987_v36  ;;  %9589 = vrot.lane.b32.xlu0 %v24996_v34, %s19348_s1  ;;  %v6537_v43 = vpop.xlane.xlu1 %6536  ;;  %v6602_v36 = vmul.f32 %v18943_v25, %v21821_v58  ;;  %v25001_v58 = vld [vmem:[#allocation96_spill] sm:$0xff] }
 0x85f   :  { %9739 = vrot.lane.b32.xlu1 %v24997_v15, %s19348_s1  ;;  %18944 = vrcp.f32 %v6537_v43  ;;  %17717 = vmatprep.mubr.msk.bf16.mxu0 %vm19357_vm0, %v24762_v44  ;;  %v24999_v43 = vld [vmem:[#allocation77_spill] sm:$0xff] }
 0x860   :  { %17727 = vmatprep.subr.bf16.mxu0 %v24762_v44 }
 0x861   :  { %v6540_v32 = vpop.xlane.xlu0 %6539  ;;  %17712 = vmatmul.mubr.msk.bf16.vlgmr.msra.gmra.mrb[56].mxu1 %vm2779_vm3, %v6632_v48 }
 0x862   :  { %18946 = vrcp.f32 %v6540_v32  ;;  %17722 = vmatpush3.bf16.msra.mxu1 %v8035_v27  ;;  %9691 = vrot.lane.b32.xlu0 %v24998_v59, %s19348_s1  ;;  %v8242_v19 = vpop.permute.xlu1 %8241  ;;  %v25000_v27 = vld [vmem:[#allocation76_spill] sm:$0xff]  ;;  %v6634_v32 = vpack.c.bf16 %v6602_v36, %v6602_v36 }
 0x863   :  { %10221 = vrot.lane.b32.xlu1 %v24999_v43, %s19348_s1  ;;  %17723 = vmatprep.mubr.msk.bf16.mxu1 %vm19357_vm0, %v24762_v44 }
 0x864   :  { %17733 = vmatprep.subr.bf16.mxu1 %v24762_v44 }
 0x865   :  { %v8192_v48 = vpop.permute.xlu0 %8191  ;;  %17718 = vmatmul.mubr.msk.bf16.vlgmr.msra.gmra.mrb[20].mxu0 %vm2779_vm3, %v6633_v30 }
 0x866   :  { %17728 = vmatpush3.bf16.msra.mxu0 %v8083_v45  ;;  %9689 = vrot.lane.b32.xlu0 %v25000_v27, %s19348_s1  ;;  %v8240_v5 = vpop.permute.xlu1 %8239  ;;  %v25002_v45 = vld [vmem:[#allocation75_spill] sm:$0xff] }
 0x867   :  { %10317 = vrot.lane.b32.xlu1 %v25001_v58, %s19348_s1  ;;  %17729 = vmatprep.mubr.msk.bf16.mxu0 %vm19357_vm0, %v24762_v44  ;;  %v25003_v58 = vld [vmem:[#allocation98_spill] sm:$0xff] }
 0x868   :  { %17739 = vmatprep.subr.bf16.mxu0 %v24762_v44 }
 0x869   :  { %v18945_v25 = vpop.eup %18944  ;;  %v8190_v43 = vpop.permute.xlu0 %8189  ;;  %17724 = vmatmul.mubr.msk.bf16.vlgmr.msra.gmra.mrb[60].mxu1 %vm2779_vm3, %v6634_v32 }
 0x86a   :  { %v6603_v30 = vmul.f32 %v18945_v25, %v21849_v47  ;;  %17734 = vmatpush3.bf16.msra.mxu1 %v8131_v57  ;;  %10173 = vrot.lane.b32.xlu0 %v25002_v45, %s19348_s1  ;;  %v8342_v36 = vpop.permute.xlu1 %8341  ;;  %v8197_v47 = vsel %vm1306_vm1, %v8192_v48, 0  ;;  %v25004_v25 = vld [vmem:[#allocation95_spill] sm:$0xff]  ;;  %v8247_v48 = vsel %vm1306_vm1, %v8242_v19, 0 }
 0x86b   :  { %10413 = vrot.lane.b32.xlu1 %v25003_v58, %s19348_s1  ;;  %17735 = vmatprep.mubr.msk.bf16.mxu1 %vm19357_vm0, %v24762_v44  ;;  %v25005_v58 = vld [vmem:[#allocation100_spill] sm:$0xff] }
 0x86c   :  { %v18947_v27 = vpop.eup %18946  ;;  %v6635_v59 = vpack.c.bf16 %v6603_v30, %v6603_v30  ;;  %17745 = vmatprep.subr.bf16.mxu1 %v24762_v44  ;;  %v25007_v30 = vld [vmem:[#allocation102_spill] sm:$0xff] }
 0x86d   :  { %v6604_v22 = vmul.f32 %v18947_v27, %v21854_v13  ;;  %v8292_v32 = vpop.permute.xlu0 %8291  ;;  %v25006_v27 = vld [vmem:[#allocation97_spill] sm:$0xff] }
 0x86e   :  { %10269 = vrot.lane.b32.xlu0 %v25004_v25, %s19348_s1  ;;  %17730 = vmatmul.mubr.msk.bf16.vlgmr.msra.gmra.mrb[24].mxu0 %vm2779_vm3, %v6635_v59  ;;  %v8340_v57 = vpop.permute.xlu1 %8339 }
 0x86f   :  { %v6636_v45 = vpack.c.bf16 %v6604_v22, %v6604_v22  ;;  %10509 = vrot.lane.b32.xlu1 %v25005_v58, %s19348_s1  ;;  %17740 = vmatpush3.bf16.xpose.msra.mxu0 %v8197_v47  ;;  %v8297_v47 = vsel %vm1306_vm1, %v8292_v32, 0  ;;  %v25010_v32 = vld [vmem:[#allocation101_spill] sm:$0xff] }
 0x870   :  { %17741 = vmatprep.mubr.msk.bf16.mxu0 %vm19357_vm0, %v24762_v44  ;;  %17751 = vmatprep.subr.bf16.mxu0 %v24762_v44 }
 0x871   :  { %v8290_v13 = vpop.permute.xlu0 %8289  ;;  %17736 = vmatmul.mubr.msk.bf16.vlgmr.msra.gmra.mrb[64].mxu1 %vm2779_vm3, %v6636_v45  ;;  %v25008_v45 = vld [vmem:[#allocation99_spill] sm:$0xff] }
 0x872   :  { %10365 = vrot.lane.b32.xlu0 %v25006_v27, %s19348_s1  ;;  %v8442_v59 = vpop.permute.xlu1 %8441  ;;  %17747 = vmatprep.mubr.msk.bf16.mxu1 %vm19357_vm0, %v24762_v44  ;;  %v25009_v27 = vld [vmem:[#allocation104_spill] sm:$0xff] }
 0x873   :  { %10605 = vrot.lane.b32.xlu1 %v25007_v30, %s19348_s1  ;;  %17746 = vmatpush3.bf16.xpose.msra.mxu1 %v8247_v48  ;;  %v8347_v30 = vsel %vm1306_vm1, %v8342_v36, 0  ;;  %v8447_v15 = vsel %vm1306_vm1, %v8442_v59, 0 }
 0x874   :  { %17757 = vmatprep.subr.bf16.mxu1 %v24762_v44 }
 0x875   :  { %v8392_v22 = vpop.permute.xlu0 %8391 }
 0x876   :  { %10461 = vrot.lane.b32.xlu0 %v25008_v45, %s19348_s1  ;;  %17742 = vmatmul.mubr.msk.bf16.vlgmr.msra.gmra.mrb[28].mxu0 %vm1306_vm1, %v8190_v43  ;;  %v8440_v19 = vpop.permute.xlu1 %8439  ;;  %v25011_v43 = vld [vmem:[#allocation106_spill] sm:$0xff] }
 0x877   :  { %10701 = vrot.lane.b32.xlu1 %v25009_v27, %s19348_s1  ;;  %17752 = vmatpush3.bf16.xpose.msra.mxu0 %v8297_v47  ;;  %v8397_v27 = vsel %vm1306_vm1, %v8392_v22, 0 }
 0x878   :  { %17753 = vmatprep.mubr.msk.bf16.mxu0 %vm19357_vm0, %v24762_v44  ;;  %17763 = vmatprep.subr.bf16.mxu0 %v24762_v44 }
 0x879   :  { %v8390_v48 = vpop.permute.xlu0 %8389 }
 0x87a   :  { %17748 = vmatmul.mubr.msk.bf16.vlgmr.msra.gmra.mrb[68].mxu1 %vm1306_vm1, %v8240_v5  ;;  %10557 = vrot.lane.b32.xlu0 %v25010_v32, %s19348_s1  ;;  %v8542_v45 = vpop.permute.xlu1 %8541  ;;  %v25013_v5 = vld [vmem:[#allocation103_spill] sm:$0xff]  ;;  %v25014_v32 = vld [vmem:[#allocation108_spill] sm:$0xff] }
 0x87b   :  { %10797 = vrot.lane.b32.xlu1 %v25011_v43, %s19348_s1  ;;  %17758 = vmatpush3.bf16.xpose.msra.mxu1 %v8347_v30  ;;  %v8547_v34 = vsel %vm1306_vm1, %v8542_v45, 0  ;;  %v25022_v45 = vld [vmem:[#allocation79_spill] sm:$0xff] }
 0x87c   :  { %17759 = vmatprep.mubr.msk.bf16.mxu1 %vm19357_vm0, %v24762_v44  ;;  %17769 = vmatprep.subr.bf16.mxu1 %v24762_v44 }
 0x87d   :  { %v8492_v47 = vpop.permute.xlu0 %8491  ;;  %v22226_v58 = vpop.f32.mrb[220].mxu0 }
 0x87e   :  { %25012 = vst [vmem:[#allocation22_spill] sm:$0xff] %v22226_v58  ;;  %10653 = vrot.lane.b32.xlu0 %v25013_v5, %s19348_s1  ;;  %17754 = vmatmul.mubr.msk.bf16.vlgmr.msra.gmra.mrb[32].mxu0 %vm1306_vm1, %v8290_v13  ;;  %v8540_v36 = vpop.permute.xlu1 %8539  ;;  %v17551_v30 = vpop.f32.mrb[221].mxu0  ;;  %v25015_v13 = vld [vmem:[#allocation105_spill] sm:$0xff] }
 0x87f   :  { %10893 = vrot.lane.b32.xlu1 %v25014_v32, %s19348_s1  ;;  %17764 = vmatpush3.bf16.xpose.msra.mxu0 %v8397_v27  ;;  %v6682_v43 = vpop.f32.mrb[222].mxu0  ;;  %v25016_v32 = vld [vmem:[#allocation82_spill] sm:$0xff] }
 0x880   :  { %17765 = vmatprep.mubr.msk.bf16.mxu0 %vm19357_vm0, %v24762_v44  ;;  %17775 = vmatprep.subr.bf16.mxu0 %v24762_v44  ;;  %v17552_v22 = vpop.f32.mrb[223].mxu0  ;;  %v8497_v43 = vsel %vm1306_vm1, %v8492_v47, 0 }
 0x881   :  { %v8490_v25 = vpop.permute.xlu0 %8489  ;;  %v25019_v22 = vld [vmem:[#allocation81_spill] sm:$0xff] }
 0x882   :  { %17760 = vmatmul.mubr.msk.bf16.vlgmr.msra.gmra.mrb[72].mxu1 %vm1306_vm1, %v8340_v57  ;;  %10749 = vrot.lane.b32.xlu0 %v25015_v13, %s19348_s1  ;;  %v8642_v5 = vpop.permute.xlu1 %8641  ;;  %v25018_v57 = vld [vmem:[#allocation107_spill] sm:$0xff] }
 0x883   :  { %10989 = vrot.lane.b32.xlu1 %v25016_v32, %s19348_s1  ;;  %17770 = vmatpush3.bf16.xpose.msra.mxu1 %v8447_v15 }
 0x884   :  { %17771 = vmatprep.mubr.msk.bf16.mxu1 %vm19357_vm0, %v24762_v44  ;;  %17781 = vmatprep.subr.bf16.mxu1 %v24762_v44 }
 0x885   :  { %v8592_v27 = vpop.permute.xlu0 %8591  ;;  %v22246_v30 = vpop.f32.mrb[224].mxu0 }
 0x886   :  { %25017 = vst [vmem:[#allocation28_spill] sm:$0xff] %v22246_v30  ;;  %10845 = vrot.lane.b32.xlu0 %v25018_v57, %s19348_s1  ;;  %17766 = vmatmul.mubr.msk.bf16.vlgmr.msra.gmra.mrb[36].mxu0 %vm1306_vm1, %v8390_v48  ;;  %v8640_v59 = vpop.permute.xlu1 %8639  ;;  %v17563_v15 = vpop.f32.mrb[225].mxu0  ;;  %v25020_v48 = vld [vmem:[#allocation80_spill] sm:$0xff] }
 0x887   :  { %11085 = vrot.lane.b32.xlu1 %v25019_v22, %s19348_s1  ;;  %17776 = vmatpush3.bf16.xpose.msra.mxu0 %v8497_v43  ;;  %v6778_v32 = vpop.f32.mrb[226].mxu0  ;;  %v25021_v22 = vld [vmem:[#allocation84_spill] sm:$0xff]  ;;  %v8597_v43 = vsel %vm1306_vm1, %v8592_v27, 0  ;;  %v25023_v15 = vld [vmem:[#allocation86_spill] sm:$0xff]  ;;  %v25024_v27 = vld [vmem:[#allocation23_spill] sm:$0xff] }
 0x888   :  { %17777 = vmatprep.mubr.msk.bf16.mxu0 %vm19357_vm0, %v24762_v44  ;;  %17787 = vmatprep.subr.bf16.mxu0 %v24762_v44  ;;  %v17564_v47 = vpop.f32.mrb[227].mxu0 }
 0x889   :  { %v8590_v13 = vpop.permute.xlu0 %8589  ;;  %v8647_v47 = vsel %vm1306_vm1, %v8642_v5, 0  ;;  %v25026_v5 = vld [vmem:[#allocation24_spill] sm:$0xff] }
 0x88a   :  { %17772 = vmatmul.mubr.msk.bf16.vlgmr.msra.gmra.mrb[76].mxu1 %vm1306_vm1, %v8440_v19  ;;  %10941 = vrot.lane.b32.xlu0 %v25020_v48, %s19348_s1  ;;  %v8742_v57 = vpop.permute.xlu1 %8741 }
 0x88b   :  { %11181 = vrot.lane.b32.xlu1 %v25021_v22, %s19348_s1  ;;  %17782 = vmatpush3.bf16.xpose.msra.mxu1 %v8547_v34 }
 0x88c   :  { %17783 = vmatprep.mubr.msk.bf16.mxu1 %vm19357_vm0, %v24762_v44  ;;  %17793 = vmatprep.subr.bf16.mxu1 %v24762_v44 }
 0x88d   :  { %v8692_v32 = vpop.permute.xlu0 %8691 }
 0x88e   :  { %11037 = vrot.lane.b32.xlu0 %v25022_v45, %s19348_s1  ;;  %17778 = vmatmul.mubr.msk.bf16.vlgmr.msra.gmra.mrb[40].mxu0 %vm1306_vm1, %v8490_v25  ;;  %v8740_v19 = vpop.permute.xlu1 %8739  ;;  %v25025_v25 = vld [vmem:[#allocation83_spill] sm:$0xff] }
 0x88f   :  { %11277 = vrot.lane.b32.xlu1 %v25023_v15, %s19348_s1  ;;  %17788 = vmatpush3.bf16.xpose.msra.mxu0 %v8597_v43  ;;  %v8697_v15 = vsel %vm1306_vm1, %v8692_v32, 0  ;;  %v25028_v32 = vld [vmem:[#allocation27_spill] sm:$0xff] }
 0x890   :  { %17789 = vmatprep.mubr.msk.bf16.mxu0 %vm19357_vm0, %v24762_v44  ;;  %17799 = vmatprep.subr.bf16.mxu0 %v24762_v44 }
 0x891   :  { %v8690_v34 = vpop.permute.xlu0 %8689 }
 0x892   :  { %17784 = vmatmul.mubr.msk.bf16.vlgmr.msra.gmra.mrb[80].mxu1 %vm1306_vm1, %v8540_v36  ;;  %11133 = vrot.lane.b32.xlu0 %v25024_v27, %s19348_s1  ;;  %v8842_v45 = vpop.permute.xlu1 %8841  ;;  %v25027_v27 = vld [vmem:[#allocation85_spill] sm:$0xff] }
 0x893   :  { %11373 = vrot.lane.b32.xlu1 %v25025_v25, %s19348_s1  ;;  %17794 = vmatpush3.bf16.xpose.msra.mxu1 %v8647_v47  ;;  %v8747_v25 = vsel %vm1306_vm1, %v8742_v57, 0  ;;  %v8847_v48 = vsel %vm1306_vm1, %v8842_v45, 0 }
 0x894   :  { %17795 = vmatprep.mubr.msk.bf16.mxu1 %vm19357_vm0, %v24762_v44  ;;  %17805 = vmatprep.subr.bf16.mxu1 %v24762_v44 }
 0x895   :  { %v8792_v43 = vpop.permute.xlu0 %8791 }
 0x896   :  { %11229 = vrot.lane.b32.xlu0 %v25026_v5, %s19348_s1  ;;  %17790 = vmatmul.mubr.msk.bf16.vlgmr.msra.gmra.mrb[44].mxu0 %vm1306_vm1, %v8590_v13  ;;  %v8840_v36 = vpop.permute.xlu1 %8839  ;;  %v25029_v13 = vld [vmem:[#allocation90_spill] sm:$0xff] }
 0x897   :  { %11421 = vrot.lane.b32.xlu1 %v25027_v27, %s19348_s1  ;;  %17800 = vmatpush3.bf16.xpose.msra.mxu0 %v8697_v15  ;;  %v8797_v27 = vsel %vm1306_vm1, %v8792_v43, 0 }
 0x898   :  { %17801 = vmatprep.mubr.msk.bf16.mxu0 %vm19357_vm0, %v24762_v44  ;;  %17811 = vmatprep.subr.bf16.mxu0 %v24762_v44 }
 0x899   :  { %v8790_v47 = vpop.permute.xlu0 %8789 }
 0x89a   :  { %17796 = vmatmul.mubr.msk.bf16.vlgmr.msra.gmra.mrb[84].mxu1 %vm1306_vm1, %v8640_v59  ;;  %11325 = vrot.lane.b32.xlu0 %v25028_v32, %s19348_s1  ;;  %v8942_v5 = vpop.permute.xlu1 %8941 }
 0x89b   :  { %11469 = vrot.lane.b32.xlu1 %v25029_v13, %s19348_s1  ;;  %17806 = vmatpush3.bf16.xpose.msra.mxu1 %v8747_v25  ;;  %v8947_v58 = vsel %vm1306_vm1, %v8942_v5, 0 }
 0x89c   :  { %17807 = vmatprep.mubr.msk.bf16.mxu1 %vm19357_vm0, %v24762_v44  ;;  %17817 = vmatprep.subr.bf16.mxu1 %v24762_v44 }
 0x89d   :  { %v8892_v15 = vpop.permute.xlu0 %8891 }
 0x89e   :  { %17802 = vmatmul.mubr.msk.bf16.vlgmr.msra.gmra.mrb[48].mxu0 %vm1306_vm1, %v8690_v34  ;;  %v8940_v57 = vpop.permute.xlu1 %8939  ;;  %v8897_v25 = vsel %vm1306_vm1, %v8892_v15, 0 }
 0x89f   :  { %17812 = vmatpush3.bf16.xpose.msra.mxu0 %v8797_v27  ;;  %v22303_v59 = vpop.f32.mrb[4].mxu1  ;;  %17813 = vmatprep.mubr.msk.bf16.mxu0 %vm19357_vm0, %v24762_v44 }
 0x8a0   :  { %25030 = vst [vmem:[#allocation25_spill] sm:$0xff] %v22303_v59  ;;  %v17557_v32 = vpop.f32.mrb[5].mxu1  ;;  %17823 = vmatprep.subr.bf16.mxu0 %v24762_v44 }
 0x8a1   :  { %v8890_v13 = vpop.permute.xlu0 %8889  ;;  %v6730_v22 = vpop.f32.mrb[6].mxu1 }
 0x8a2   :  { %17808 = vmatmul.mubr.msk.bf16.vlgmr.msra.gmra.mrb[88].mxu1 %vm1306_vm1, %v8740_v19  ;;  %v17558_v34 = vpop.f32.mrb[7].mxu1  ;;  %v9042_v43 = vpop.permute.xlu1 %9041 }
 0x8a3   :  { %17818 = vmatpush3.bf16.xpose.msra.mxu1 %v8847_v48  ;;  %17819 = vmatprep.mubr.msk.bf16.mxu1 %vm19357_vm0, %v24762_v44 }
 0x8a4   :  { %17829 = vmatprep.subr.bf16.mxu1 %v24762_v44 }
 0x8a5   :  { %v8992_v27 = vpop.permute.xlu0 %8991 }
 0x8a6   :  { %17814 = vmatmul.mubr.msk.bf16.vlgmr.msra.gmra.mrb[52].mxu0 %vm1306_vm1, %v8790_v47  ;;  %v9040_v32 = vpop.permute.xlu1 %9039  ;;  %v8997_v30 = vsel %vm1306_vm1, %v8992_v27, 0 }
 0x8a7   :  { %17824 = vmatpush3.bf16.xpose.msra.mxu0 %v8897_v25  ;;  %v22317_v22 = vpop.f32.mrb[8].mxu1  ;;  %17825 = vmatprep.mubr.msk.bf16.mxu0 %vm19357_vm0, %v24762_v44 }
 0x8a8   :  { %25031 = vst [vmem:[#allocation140_spill] sm:$0xff] %v22317_v22  ;;  %v17569_v45 = vpop.f32.mrb[9].mxu1  ;;  %17835 = vmatprep.subr.bf16.mxu0 %v24762_v44 }
 0x8a9   :  { %v8990_v19 = vpop.permute.xlu0 %8989  ;;  %v6826_v34 = vpop.f32.mrb[10].mxu1 }
 0x8aa   :  { %17820 = vmatmul.mubr.msk.bf16.vlgmr.msra.gmra.mrb[92].mxu1 %vm1306_vm1, %v8840_v36  ;;  %v17570_v47 = vpop.f32.mrb[11].mxu1  ;;  %v9142_v15 = vpop.permute.xlu1 %9141  ;;  %v9047_v36 = vsel %vm1306_vm1, %v9042_v43, 0 }
 0x8ab   :  { %17830 = vmatpush3.bf16.xpose.msra.mxu1 %v8947_v58  ;;  %v22326_v25 = vpop.f32.mrb[228].mxu0  ;;  %17831 = vmatprep.mubr.msk.bf16.mxu1 %vm19357_vm0, %v24762_v44  ;;  %v9147_v43 = vsel %vm1306_vm1, %v9142_v15, 0 }
 0x8ac   :  { %25032 = vst [vmem:[#allocation136_spill] sm:$0xff] %v22326_v25  ;;  %v17575_v59 = vpop.f32.mrb[229].mxu0  ;;  %17841 = vmatprep.subr.bf16.mxu1 %v24762_v44 }
 0x8ad   :  { %v9092_v45 = vpop.permute.xlu0 %9091  ;;  %v6874_v48 = vpop.f32.mrb[230].mxu0 }
 0x8ae   :  { %17826 = vmatmul.mubr.msk.bf16.vlgmr.msra.gmra.mrb[56].mxu0 %vm1306_vm1, %v8890_v13  ;;  %v9140_v5 = vpop.permute.xlu1 %9139  ;;  %v17576_v34 = vpop.f32.mrb[231].mxu0 }
 0x8af   :  { %17836 = vmatpush3.bf16.xpose.msra.mxu0 %v8997_v30  ;;  %17837 = vmatprep.mubr.msk.bf16.mxu0 %vm19357_vm0, %v24762_v44  ;;  %v9097_v30 = vsel %vm1306_vm1, %v9092_v45, 0 }
 0x8b0   :  { %17847 = vmatprep.subr.bf16.mxu0 %v24762_v44 }
 0x8b1   :  { %v9090_v58 = vpop.permute.xlu0 %9089 }
 0x8b2   :  { %17832 = vmatmul.mubr.msk.bf16.vlgmr.msra.gmra.mrb[96].mxu1 %vm1306_vm1, %v8940_v57  ;;  %v9242_v59 = vpop.permute.xlu1 %9241 }
 0x8b3   :  { %17842 = vmatpush3.bf16.xpose.msra.mxu1 %v9047_v36  ;;  %17843 = vmatprep.mubr.msk.bf16.mxu1 %vm19357_vm0, %v24762_v44  ;;  %v9247_v15 = vsel %vm1306_vm1, %v9242_v59, 0 }
 0x8b4   :  { %17853 = vmatprep.subr.bf16.mxu1 %v24762_v44 }
 0x8b5   :  { %v9192_v13 = vpop.permute.xlu0 %9191 }
 0x8b6   :  { %17838 = vmatmul.mubr.msk.bf16.vlgmr.msra.gmra.mrb[60].mxu0 %vm1306_vm1, %v8990_v19  ;;  %v9240_v27 = vpop.permute.xlu1 %9239  ;;  %v9197_v47 = vsel %vm1306_vm1, %v9192_v13, 0 }
 0x8b7   :  { %17848 = vmatpush3.bf16.xpose.msra.mxu0 %v9097_v30  ;;  %17849 = vmatprep.mubr.msk.bf16.mxu0 %vm19357_vm0, %v24762_v44 }
 0x8b8   :  { %17859 = vmatprep.subr.bf16.mxu0 %v24762_v44 }
 0x8b9   :  { %v9190_v57 = vpop.permute.xlu0 %9189 }
 0x8ba   :  { %17844 = vmatmul.mubr.msk.bf16.vlgmr.msra.gmra.mrb[100].mxu1 %vm1306_vm1, %v9040_v32  ;;  %v9342_v48 = vpop.permute.xlu1 %9341 }
 0x8bb   :  { %17854 = vmatpush3.bf16.xpose.msra.mxu1 %v9147_v43  ;;  %17855 = vmatprep.mubr.msk.bf16.mxu1 %vm19357_vm0, %v24762_v44  ;;  %v9347_v59 = vsel %vm1306_vm1, %v9342_v48, 0 }
 0x8bc   :  { %17865 = vmatprep.subr.bf16.mxu1 %v24762_v44 }
 0x8bd   :  { %v9292_v19 = vpop.permute.xlu0 %9291 }
 0x8be   :  { %17850 = vmatmul.mubr.msk.bf16.vlgmr.msra.gmra.mrb[64].mxu0 %vm1306_vm1, %v9090_v58  ;;  %v9340_v45 = vpop.permute.xlu1 %9339  ;;  %v9297_v36 = vsel %vm1306_vm1, %v9292_v19, 0 }
 0x8bf   :  { %17860 = vmatpush3.bf16.xpose.msra.mxu0 %v9197_v47  ;;  %17861 = vmatprep.mubr.msk.bf16.mxu0 %vm19357_vm0, %v24762_v44 }
 0x8c0   :  { %17871 = vmatprep.subr.bf16.mxu0 %v24762_v44 }
 0x8c1   :  { %v9290_v32 = vpop.permute.xlu0 %9289 }
 0x8c2   :  { %17856 = vmatmul.mubr.msk.bf16.vlgmr.msra.gmra.mrb[104].mxu1 %vm1306_vm1, %v9140_v5  ;;  %v9442_v34 = vpop.permute.xlu1 %9441 }
 0x8c3   :  { %17866 = vmatpush3.bf16.xpose.msra.mxu1 %v9247_v15  ;;  %17867 = vmatprep.mubr.msk.bf16.mxu1 %vm19357_vm0, %v24762_v44  ;;  %v9447_v19 = vsel %vm1306_vm1, %v9442_v34, 0 }
 0x8c4   :  { %17877 = vmatprep.subr.bf16.mxu1 %v24762_v44 }
 0x8c5   :  { %v9392_v58 = vpop.permute.xlu0 %9391 }
 0x8c6   :  { %17862 = vmatmul.mubr.msk.bf16.vlgmr.msra.gmra.mrb[68].mxu0 %vm1306_vm1, %v9190_v57  ;;  %v9440_v13 = vpop.permute.xlu1 %9439  ;;  %v9397_v43 = vsel %vm1306_vm1, %v9392_v58, 0 }
 0x8c7   :  { %17872 = vmatpush3.bf16.xpose.msra.mxu0 %v9297_v36  ;;  %17873 = vmatprep.mubr.msk.bf16.mxu0 %vm19357_vm0, %v24762_v44 }
 0x8c8   :  { %17883 = vmatprep.subr.bf16.mxu0 %v24762_v44 }
 0x8c9   :  { %v9390_v5 = vpop.permute.xlu0 %9389 }
 0x8ca   :  { %17868 = vmatmul.mubr.msk.bf16.vlgmr.msra.gmra.mrb[108].mxu1 %vm1306_vm1, %v9240_v27  ;;  %v9542_v30 = vpop.permute.xlu1 %9541 }
 0x8cb   :  { %17878 = vmatpush3.bf16.xpose.msra.mxu1 %v9347_v59  ;;  %17879 = vmatprep.mubr.msk.bf16.mxu1 %vm19357_vm0, %v24762_v44 }
 0x8cc   :  { %17889 = vmatprep.subr.bf16.mxu1 %v24762_v44 }
 0x8cd   :  { %v9492_v57 = vpop.permute.xlu0 %9491 }
 0x8ce   :  { %17874 = vmatmul.mubr.msk.bf16.vlgmr.msra.gmra.mrb[72].mxu0 %vm1306_vm1, %v9290_v32  ;;  %v9540_v48 = vpop.permute.xlu1 %9539  ;;  %v9497_v32 = vsel %vm1306_vm1, %v9492_v57, 0 }
 0x8cf   :  { %17884 = vmatpush3.bf16.xpose.msra.mxu0 %v9397_v43  ;;  %17885 = vmatprep.mubr.msk.bf16.mxu0 %vm19357_vm0, %v24762_v44 }
 0x8d0   :  { %17895 = vmatprep.subr.bf16.mxu0 %v24762_v44 }
 0x8d1   :  { %v9490_v27 = vpop.permute.xlu0 %9489 }
 0x8d2   :  { %17880 = vmatmul.mubr.msk.bf16.vlgmr.msra.gmra.mrb[112].mxu1 %vm1306_vm1, %v9340_v45  ;;  %v9642_v15 = vpop.permute.xlu1 %9641  ;;  %v9547_v45 = vsel %vm1306_vm1, %v9542_v30, 0 }
 0x8d3   :  { %17890 = vmatpush3.bf16.xpose.msra.mxu1 %v9447_v19  ;;  %17891 = vmatprep.mubr.msk.bf16.mxu1 %vm19357_vm0, %v24762_v44 }
 0x8d4   :  { %17901 = vmatprep.subr.bf16.mxu1 %v24762_v44 }
 0x8d5   :  { %v9592_v47 = vpop.permute.xlu0 %9591 }
 0x8d6   :  { %17886 = vmatmul.mubr.msk.bf16.vlgmr.msra.gmra.mrb[76].mxu0 %vm1306_vm1, %v9390_v5  ;;  %v9640_v36 = vpop.permute.xlu1 %9639  ;;  %v9597_v57 = vsel %vm1306_vm1, %v9592_v47, 0 }
 0x8d7   :  { %17896 = vmatpush3.bf16.xpose.msra.mxu0 %v9497_v32  ;;  %17897 = vmatprep.mubr.msk.bf16.mxu0 %vm19357_vm0, %v24762_v44 }
 0x8d8   :  { %17907 = vmatprep.subr.bf16.mxu0 %v24762_v44 }
 0x8d9   :  { %v9590_v34 = vpop.permute.xlu0 %9589 }
 0x8da   :  { %17892 = vmatmul.mubr.msk.bf16.vlgmr.msra.gmra.mrb[116].mxu1 %vm1306_vm1, %v9440_v13  ;;  %v9742_v47 = vpop.permute.xlu1 %9741 }
 0x8db   :  { %17902 = vmatpush3.bf16.xpose.msra.mxu1 %v9547_v45  ;;  %17903 = vmatprep.mubr.msk.bf16.mxu1 %vm19357_vm0, %v24762_v44  ;;  %v9647_v45 = vsel %vm1306_vm1, %v9642_v15, 0  ;;  %v9747_v25 = vsel %vm1306_vm1, %v9742_v47, 0 }
 0x8dc   :  { %v22390_v58 = vpop.f32.mrb[12].mxu1  ;;  %17913 = vmatprep.subr.bf16.mxu1 %v24762_v44 }
 0x8dd   :  { %25033 = vst [vmem:[#allocation142_spill] sm:$0xff] %v22390_v58  ;;  %v17581_v59 = vpop.f32.mrb[13].mxu1  ;;  %v9692_v30 = vpop.permute.xlu0 %9691 }
 0x8de   :  { %v6922_v43 = vpop.f32.mrb[14].mxu1  ;;  %17898 = vmatmul.mubr.msk.bf16.vlgmr.msra.gmra.mrb[80].mxu0 %vm1306_vm1, %v9490_v27  ;;  %v9697_v15 = vsel %vm1306_vm1, %v9692_v30, 0 }
 0x8df   :  { %17908 = vmatpush3.bf16.xpose.msra.mxu0 %v9597_v57  ;;  %v17582_v13 = vpop.f32.mrb[15].mxu1  ;;  %17909 = vmatprep.mubr.msk.bf16.mxu0 %vm19357_vm0, %v24762_v44 }
 0x8e0   :  { %v22399_v19 = vpop.f32.mrb[232].mxu0  ;;  %17919 = vmatprep.subr.bf16.mxu0 %v24762_v44 }
 0x8e1   :  { %25034 = vst [vmem:[#allocation137_spill] sm:$0xff] %v22399_v19  ;;  %v17587_v32 = vpop.f32.mrb[233].mxu0  ;;  %v9690_v57 = vpop.permute.xlu0 %9689 }
 0x8e2   :  { %17904 = vmatmul.mubr.msk.bf16.vlgmr.msra.gmra.mrb[120].mxu1 %vm1306_vm1, %v9540_v48  ;;  %v6970_v59 = vpop.f32.mrb[234].mxu0 }
 0x8e3   :  { %17914 = vmatpush3.bf16.xpose.msra.mxu1 %v9647_v45  ;;  %v17588_v43 = vpop.f32.mrb[235].mxu0  ;;  %17915 = vmatprep.mubr.msk.bf16.mxu1 %vm19357_vm0, %v24762_v44  ;;  %v9740_v59 = vpop.permute.xlu1 %9739 }
 0x8e4   :  { %v22406_v27 = vpop.f32.mrb[16].mxu1  ;;  %17925 = vmatprep.subr.bf16.mxu1 %v24762_v44 }
 0x8e5   :  { %25035 = vst [vmem:[#allocation143_spill] sm:$0xff] %v22406_v27  ;;  %v17593_v32 = vpop.f32.mrb[17].mxu1  ;;  %v10174_v30 = vpop.permute.xlu0 %10173 }
 0x8e6   :  { %v7018_v5 = vpop.f32.mrb[18].mxu1  ;;  %17910 = vmatmul.mubr.msk.bf16.vlgmr.msra.gmra.mrb[84].mxu0 %vm1306_vm1, %v9590_v34 }
 0x8e7   :  { %17920 = vmatpush3.bf16.xpose.msra.mxu0 %v9697_v15  ;;  %v17594_v48 = vpop.f32.mrb[19].mxu1  ;;  %17921 = vmatprep.mubr.msk.bf16.mxu0 %vm19357_vm0, %v24762_v44 }
 0x8e8   :  { %v22415_v45 = vpop.f32.mrb[236].mxu0  ;;  %17931 = vmatprep.subr.bf16.mxu0 %v24762_v44 }
 0x8e9   :  { %25036 = vst [vmem:[#allocation138_spill] sm:$0xff] %v22415_v45  ;;  %v17599_v43 = vpop.f32.mrb[237].mxu0 }
 0x8ea   :  { %17916 = vmatmul.mubr.msk.bf16.vlgmr.msra.gmra.mrb[124].mxu1 %vm1306_vm1, %v9640_v36  ;;  %v7066_v32 = vpop.f32.mrb[238].mxu0  ;;  %v10179_v43 = vsel %vm3167_vm2, %v10174_v30, 0  ;;  %v10222_v36 = vpop.permute.xlu1 %10221 }
 0x8eb   :  { %17926 = vmatpush3.bf16.xpose.msra.mxu1 %v9747_v25  ;;  %v17600_v5 = vpop.f32.mrb[239].mxu0  ;;  %17927 = vmatprep.mubr.msk.bf16.mxu1 %vm19357_vm0, %v24762_v44  ;;  %v10227_v13 = vsel %vm3167_vm2, %v10222_v36, 0 }
 0x8ec   :  { %v22422_v34 = vpop.f32.mrb[20].mxu1  ;;  %17937 = vmatprep.subr.bf16.mxu1 %v24762_v44 }
 0x8ed   :  { %25037 = vst [vmem:[#allocation145_spill] sm:$0xff] %v22422_v34  ;;  %v17605_v48 = vpop.f32.mrb[21].mxu1 }
 0x8ee   :  { %v7114_v47 = vpop.f32.mrb[22].mxu1  ;;  %17922 = vmatmul.mubr.msk.bf16.vlgmr.msra.gmra.mrb[88].mxu0 %vm1306_vm1, %v9690_v57 }
 0x8ef   :  { %17932 = vmatpush3.bf16.msra.mxu0 %v10179_v43  ;;  %v17606_v25 = vpop.f32.mrb[23].mxu1  ;;  %17933 = vmatprep.mubr.msk.bf16.mxu0 %vm19357_vm0, %v24762_v44 }
 0x8f0   :  { %v22431_v32 = vpop.f32.mrb[240].mxu0  ;;  %17943 = vmatprep.subr.bf16.mxu0 %v24762_v44 }
 0x8f1   :  { %25038 = vst [vmem:[#allocation139_spill] sm:$0xff] %v22431_v32  ;;  %v17611_v5 = vpop.f32.mrb[241].mxu0 }
 0x8f2   :  { %17928 = vmatmul.mubr.msk.bf16.vlgmr.msra.gmra.mrb[128].mxu1 %vm1306_vm1, %v9740_v59  ;;  %v7162_v48 = vpop.f32.mrb[242].mxu0 }
 0x8f3   :  { %17938 = vmatpush3.bf16.msra.mxu1 %v10227_v13  ;;  %v17612_v30 = vpop.f32.mrb[243].mxu0  ;;  %17939 = vmatprep.mubr.msk.bf16.mxu1 %vm19357_vm0, %v24762_v44 }
 0x8f4   :  { %v22438_v57 = vpop.f32.mrb[24].mxu1  ;;  %17949 = vmatprep.subr.bf16.mxu1 %v24762_v44 }
 0x8f5   :  { %25039 = vst [vmem:[#allocation147_spill] sm:$0xff] %v22438_v57  ;;  %v17617_v47 = vpop.f32.mrb[25].mxu1 }
 0x8f6   :  { %v7210_v25 = vpop.f32.mrb[26].mxu1 }
 0x8f7   :  { %v17618_v5 = vpop.f32.mrb[27].mxu1 }
 0x8f8   :  { %v22443_v15 = vpop.f32.mrb[244].mxu0 }
 0x8f9   :  { %25040 = vst [vmem:[#allocation141_spill] sm:$0xff] %v22443_v15  ;;  %v17623_v36 = vpop.f32.mrb[245].mxu0 }
 0x8fa   :  { %v7258_v59 = vpop.f32.mrb[246].mxu0 }
 0x8fb   :  { %v17624_v48 = vpop.f32.mrb[247].mxu0 }
 0x8fc   :  { %v22445_v13 = vpop.f32.mrb[28].mxu1 }
 0x8fd   :  { %25041 = vst [vmem:[#allocation149_spill] sm:$0xff] %v22445_v13  ;;  %v17629_v45 = vpop.f32.mrb[29].mxu1 }
 0x8fe   :  { %v7306_v34 = vpop.f32.mrb[30].mxu1 }
 0x8ff   :  { %v17630_v19 = vpop.f32.mrb[31].mxu1 }
 0x900   :  { %v22449_v27 = vpop.f32.mrb[248].mxu0 }
 0x901   :  { %25042 = vst [vmem:[#allocation144_spill] sm:$0xff] %v22449_v27  ;;  %v17635_v58 = vpop.f32.mrb[249].mxu0 }
 0x902   :  { %v7354_v43 = vpop.f32.mrb[250].mxu0 }
 0x903   :  { %v17636_v47 = vpop.f32.mrb[251].mxu0 }
 0x904   :  { %v22451_v25 = vpop.f32.mrb[32].mxu1 }
 0x905   :  { %25043 = vst [vmem:[#allocation151_spill] sm:$0xff] %v22451_v25  ;;  %v17641_v36 = vpop.f32.mrb[33].mxu1 }
 0x906   :  { %v7402_v59 = vpop.f32.mrb[34].mxu1 }
 0x907   :  { %v17642_v48 = vpop.f32.mrb[35].mxu1 }
 0x908   :  { %v22455_v32 = vpop.f32.mrb[252].mxu0 }
 0x909   :  { %25044 = vst [vmem:[#allocation146_spill] sm:$0xff] %v22455_v32  ;;  %v17647_v57 = vpop.f32.mrb[253].mxu0 }
 0x90a   :  { %v7450_v30 = vpop.f32.mrb[254].mxu0 }
 0x90b   :  { %v17648_v45 = vpop.f32.mrb[255].mxu0 }
 0x90c   :  { %v22457_v34 = vpop.f32.mrb[36].mxu1 }
 0x90d   :  { %25045 = vst [vmem:[#allocation152_spill] sm:$0xff] %v22457_v34  ;;  %v17653_v19 = vpop.f32.mrb[37].mxu1 }
 0x90e   :  { %v7498_v43 = vpop.f32.mrb[38].mxu1 }
 0x90f   :  { %v17654_v47 = vpop.f32.mrb[39].mxu1 }
 0x910   :  { %v22461_v15 = vpop.f32.mrb[0].mxu0 }
 0x911   :  { %25046 = vst [vmem:[#allocation148_spill] sm:$0xff] %v22461_v15  ;;  %v17659_v13 = vpop.f32.mrb[1].mxu0 }
 0x912   :  { %v7546_v5 = vpop.f32.mrb[2].mxu0 }
 0x913   :  { %v17660_v36 = vpop.f32.mrb[3].mxu0 }
 0x914   :  { %v22463_v59 = vpop.f32.mrb[40].mxu1 }
 0x915   :  { %25047 = vst [vmem:[#allocation153_spill] sm:$0xff] %v22463_v59  ;;  %v17665_v30 = vpop.f32.mrb[41].mxu1 }
 0x916   :  { %v7594_v48 = vpop.f32.mrb[42].mxu1 }
 0x917   :  { %v17666_v45 = vpop.f32.mrb[43].mxu1 }
 0x918   :  { %v22467_v27 = vpop.f32.mrb[4].mxu0 }
 0x919   :  { %25048 = vst [vmem:[#allocation150_spill] sm:$0xff] %v22467_v27  ;;  %v17671_v25 = vpop.f32.mrb[5].mxu0 }
 0x91a   :  { %v7642_v58 = vpop.f32.mrb[6].mxu0 }
 0x91b   :  { %v17672_v19 = vpop.f32.mrb[7].mxu0 }
 0x91c   :  { %v22469_v43 = vpop.f32.mrb[44].mxu1 }
 0x91d   :  { %25049 = vst [vmem:[#allocation154_spill] sm:$0xff] %v22469_v43  ;;  %v17677_v5 = vpop.f32.mrb[45].mxu1 }
 0x91e   :  { %v7690_v47 = vpop.f32.mrb[46].mxu1 }
 0x91f   :  { %v17678_v36 = vpop.f32.mrb[47].mxu1 }
 0x920   :  { %v22473_v32 = vpop.f32.mrb[8].mxu0 }
 0x921   :  { %25050 = vst [vmem:[#allocation155_spill] sm:$0xff] %v22473_v32  ;;  %v17683_v34 = vpop.f32.mrb[9].mxu0 }
 0x922   :  { %v7738_v57 = vpop.f32.mrb[10].mxu0 }
 0x923   :  { %v17684_v30 = vpop.f32.mrb[11].mxu0 }
 0x924   :  { %v22475_v48 = vpop.f32.mrb[48].mxu1 }
 0x925   :  { %25051 = vst [vmem:[#allocation156_spill] sm:$0xff] %v22475_v48  ;;  %v17689_v58 = vpop.f32.mrb[49].mxu1 }
 0x926   :  { %v7786_v45 = vpop.f32.mrb[50].mxu1 }
 0x927   :  { %v17690_v19 = vpop.f32.mrb[51].mxu1 }
 0x928   :  { %v22479_v15 = vpop.f32.mrb[12].mxu0 }
 0x929   :  { %25052 = vst [vmem:[#allocation157_spill] sm:$0xff] %v22479_v15  ;;  %v17695_v59 = vpop.f32.mrb[13].mxu0 }
 0x92a   :  { %v7834_v13 = vpop.f32.mrb[14].mxu0 }
 0x92b   :  { %v17696_v5 = vpop.f32.mrb[15].mxu0 }
 0x92c   :  { %v22481_v47 = vpop.f32.mrb[52].mxu1 }
 0x92d   :  { %25053 = vst [vmem:[#allocation158_spill] sm:$0xff] %v22481_v47  ;;  %v17701_v57 = vpop.f32.mrb[53].mxu1 }
 0x92e   :  { %v7882_v36 = vpop.f32.mrb[54].mxu1 }
 0x92f   :  { %v17702_v30 = vpop.f32.mrb[55].mxu1 }
 0x930   :  { %v22485_v27 = vpop.f32.mrb[16].mxu0 }
 0x931   :  { %25054 = vst [vmem:[#allocation159_spill] sm:$0xff] %v22485_v27  ;;  %v17707_v43 = vpop.f32.mrb[17].mxu0 }
 0x932   :  { %v7930_v25 = vpop.f32.mrb[18].mxu0 }
 0x933   :  { %v17708_v58 = vpop.f32.mrb[19].mxu0 }
 0x934   :  { %v22487_v45 = vpop.f32.mrb[56].mxu1 }
 0x935   :  { %25055 = vst [vmem:[#allocation160_spill] sm:$0xff] %v22487_v45  ;;  %v17713_v13 = vpop.f32.mrb[57].mxu1 }
 0x936   :  { %v7978_v19 = vpop.f32.mrb[58].mxu1 }
 0x937   :  { %v17714_v5 = vpop.f32.mrb[59].mxu1 }
 0x938   :  { %v22491_v32 = vpop.f32.mrb[20].mxu0 }
 0x939   :  { %25056 = vst [vmem:[#allocation161_spill] sm:$0xff] %v22491_v32  ;;  %v17719_v48 = vpop.f32.mrb[21].mxu0 }
 0x93a   :  { %v8026_v34 = vpop.f32.mrb[22].mxu0 }
 0x93b   :  { %v17720_v57 = vpop.f32.mrb[23].mxu0 }
 0x93c   :  { %v22493_v36 = vpop.f32.mrb[60].mxu1 }
 0x93d   :  { %25057 = vst [vmem:[#allocation162_spill] sm:$0xff] %v22493_v36  ;;  %v17725_v25 = vpop.f32.mrb[61].mxu1 }
 0x93e   :  { %v8074_v30 = vpop.f32.mrb[62].mxu1 }
 0x93f   :  { %v17726_v58 = vpop.f32.mrb[63].mxu1 }
 0x941   :  { %v22497_v15 = vpop.f32.mrb[24].mxu0 }
 0x942   :  { %25058 = vst [vmem:[#allocation163_spill] sm:$0xff] %v22497_v15  ;;  %v17731_v47 = vpop.f32.mrb[25].mxu0 }
 0x943   :  { %v8122_v59 = vpop.f32.mrb[26].mxu0 }
 0x944   :  { %v17732_v13 = vpop.f32.mrb[27].mxu0  ;;  %v22499_v19 = vpop.f32.mrb[64].mxu1 }
 0x945   :  { %25059 = vst [vmem:[#allocation164_spill] sm:$0xff] %v22499_v19  ;;  %v17737_v34 = vpop.f32.mrb[65].mxu1 }
 0x946   :  { %v8170_v5 = vpop.f32.mrb[66].mxu1 }
 0x947   :  { %v17738_v57 = vpop.f32.mrb[67].mxu1 }
 0x949   :  { %v22503_v27 = vpop.f32.mrb[28].mxu0 }
 0x94a   :  { %v17743_v45 = vpop.f32.mrb[29].mxu0  ;;  %v9789_v25 = vsel %vm2779_vm3, %v22503_v27, -inf }
 0x94b   :  { %9790 = vmax.xlane.f32.xlu0 %v9789_v25  ;;  %v8236_v30 = vpop.f32.mrb[30].mxu0 }
 0x94c   :  { %v17744_v58 = vpop.f32.mrb[31].mxu0 }
 0x94d   :  { %v22507_v47 = vpop.f32.mrb[68].mxu1 }
 0x94e   :  { %v17749_v59 = vpop.f32.mrb[69].mxu1  ;;  %v9792_v13 = vsel %vm2779_vm3, %v22507_v47, -inf }
 0x94f   :  { %9793 = vmax.xlane.f32.xlu1 %v9792_v13  ;;  %v8286_v48 = vpop.f32.mrb[70].mxu1 }
 0x950   :  { %v17750_v34 = vpop.f32.mrb[71].mxu1 }
 0x951   :  { %v22511_v5 = vpop.f32.mrb[32].mxu0 }
 0x952   :  { %v17755_v57 = vpop.f32.mrb[33].mxu0  ;;  %v9795_v45 = vsel %vm2779_vm3, %v22511_v5, -inf }
 0x953   :  { %9796 = vmax.xlane.f32.xlu0 %v9795_v45  ;;  %v8336_v43 = vpop.f32.mrb[34].mxu0 }
 0x954   :  { %v17756_v25 = vpop.f32.mrb[35].mxu0 }
 0x955   :  { %v22515_v30 = vpop.f32.mrb[72].mxu1 }
 0x956   :  { %v17761_v58 = vpop.f32.mrb[73].mxu1  ;;  %v9798_v59 = vsel %vm2779_vm3, %v22515_v30, -inf }
 0x957   :  { %v8386_v15 = vpop.f32.mrb[74].mxu1  ;;  %9799 = vmax.xlane.f32.xlu0 %v9798_v59 }
 0x958   :  { %v17762_v13 = vpop.f32.mrb[75].mxu1 }
 0x959   :  { %v22519_v48 = vpop.f32.mrb[36].mxu0 }
 0x95a   :  { %v17767_v34 = vpop.f32.mrb[37].mxu0  ;;  %v9801_v57 = vsel %vm2779_vm3, %v22519_v48, -inf }
 0x95b   :  { %9802 = vmax.xlane.f32.xlu0 %v9801_v57  ;;  %v8436_v19 = vpop.f32.mrb[38].mxu0 }
 0x95c   :  { %v17768_v45 = vpop.f32.mrb[39].mxu0 }
 0x95d   :  { %v22523_v43 = vpop.f32.mrb[76].mxu1 }
 0x95e   :  { %v17773_v25 = vpop.f32.mrb[77].mxu1  ;;  %v9804_v58 = vsel %vm2779_vm3, %v22523_v43, -inf }
 0x95f   :  { %9805 = vmax.xlane.f32.xlu1 %v9804_v58  ;;  %v8486_v32 = vpop.f32.mrb[78].mxu1 }
 0x960   :  { %v17774_v15 = vpop.f32.mrb[79].mxu1 }
 0x961   :  { %v22527_v59 = vpop.f32.mrb[40].mxu0 }
 0x962   :  { %v17779_v13 = vpop.f32.mrb[41].mxu0  ;;  %v9807_v34 = vsel %vm2779_vm3, %v22527_v59, -inf }
 0x963   :  { %9808 = vmax.xlane.f32.xlu0 %v9807_v34  ;;  %v8536_v36 = vpop.f32.mrb[42].mxu0 }
 0x964   :  { %v17780_v57 = vpop.f32.mrb[43].mxu0 }
 0x965   :  { %v22531_v19 = vpop.f32.mrb[80].mxu1 }
 0x966   :  { %v17785_v45 = vpop.f32.mrb[81].mxu1  ;;  %v9810_v25 = vsel %vm2779_vm3, %v22531_v19, -inf }
 0x967   :  { %9811 = vmax.xlane.f32.xlu1 %v9810_v25  ;;  %v8586_v22 = vpop.f32.mrb[82].mxu1 }
 0x968   :  { %v17786_v58 = vpop.f32.mrb[83].mxu1 }
 0x969   :  { %v22535_v32 = vpop.f32.mrb[44].mxu0 }
 0x96a   :  { %v17791_v15 = vpop.f32.mrb[45].mxu0  ;;  %v9813_v13 = vsel %vm2779_vm3, %v22535_v32, -inf }
 0x96b   :  { %9814 = vmax.xlane.f32.xlu0 %v9813_v13  ;;  %v8636_v28 = vpop.f32.mrb[46].mxu0 }
 0x96c   :  { %v17792_v34 = vpop.f32.mrb[47].mxu0 }
 0x96d   :  { %v22539_v36 = vpop.f32.mrb[84].mxu1 }
 0x96e   :  { %v17797_v57 = vpop.f32.mrb[85].mxu1  ;;  %v9816_v45 = vsel %vm2779_vm3, %v22539_v36, -inf }
 0x96f   :  { %9817 = vmax.xlane.f32.xlu1 %v9816_v45  ;;  %v8686_v24 = vpop.f32.mrb[86].mxu1 }
 0x970   :  { %v17798_v25 = vpop.f32.mrb[87].mxu1 }
 0x971   :  { %v22543_v22 = vpop.f32.mrb[48].mxu0 }
 0x972   :  { %v17803_v58 = vpop.f32.mrb[49].mxu0  ;;  %v9819_v15 = vsel %vm2779_vm3, %v22543_v22, -inf }
 0x973   :  { %9820 = vmax.xlane.f32.xlu0 %v9819_v15  ;;  %v8736_v46 = vpop.f32.mrb[50].mxu0 }
 0x974   :  { %v17804_v13 = vpop.f32.mrb[51].mxu0 }
 0x975   :  { %v22547_v28 = vpop.f32.mrb[88].mxu1 }
 0x976   :  { %v17809_v34 = vpop.f32.mrb[89].mxu1  ;;  %v9822_v57 = vsel %vm2779_vm3, %v22547_v28, -inf }
 0x977   :  { %9823 = vmax.xlane.f32.xlu1 %v9822_v57  ;;  %v8786_v11 = vpop.f32.mrb[90].mxu1 }
 0x978   :  { %v17810_v45 = vpop.f32.mrb[91].mxu1 }
 0x979   :  { %v22551_v24 = vpop.f32.mrb[52].mxu0 }
 0x97a   :  { %v17815_v25 = vpop.f32.mrb[53].mxu0  ;;  %v9825_v58 = vsel %vm2779_vm3, %v22551_v24, -inf }
 0x97b   :  { %9826 = vmax.xlane.f32.xlu0 %v9825_v58  ;;  %v8836_v23 = vpop.f32.mrb[54].mxu0 }
 0x97c   :  { %v17816_v15 = vpop.f32.mrb[55].mxu0 }
 0x97d   :  { %v22555_v46 = vpop.f32.mrb[92].mxu1 }
 0x97e   :  { %v17821_v13 = vpop.f32.mrb[93].mxu1  ;;  %v9828_v34 = vsel %vm2779_vm3, %v22555_v46, -inf }
 0x97f   :  { %9829 = vmax.xlane.f32.xlu1 %v9828_v34  ;;  %v8886_v17 = vpop.f32.mrb[94].mxu1 }
 0x980   :  { %v17822_v57 = vpop.f32.mrb[95].mxu1 }
 0x981   :  { %v22559_v11 = vpop.f32.mrb[56].mxu0  ;;  %v22569_v57 = vpop.permute.xlu1 %10317 }
 0x982   :  { %v17827_v45 = vpop.f32.mrb[57].mxu0  ;;  %v9831_v25 = vsel %vm2779_vm3, %v22559_v11, -inf }
 0x983   :  { %9832 = vmax.xlane.f32.xlu0 %v9831_v25  ;;  %v8936_v14 = vpop.f32.mrb[58].mxu0 }
 0x984   :  { %v17828_v58 = vpop.f32.mrb[59].mxu0 }
 0x985   :  { %v22563_v23 = vpop.f32.mrb[96].mxu1 }
 0x986   :  { %v17833_v15 = vpop.f32.mrb[97].mxu1  ;;  %v9834_v13 = vsel %vm2779_vm3, %v22563_v23, -inf }
 0x987   :  { %9835 = vmax.xlane.f32.xlu1 %v9834_v13  ;;  %v8986_v18 = vpop.f32.mrb[98].mxu1  ;;  %v22577_v13 = vpop.permute.xlu1 %10413 }
 0x988   :  { %v17834_v34 = vpop.f32.mrb[99].mxu1 }
 0x989   :  { %v22567_v17 = vpop.f32.mrb[60].mxu0 }
 0x98a   :  { %v17839_v45 = vpop.f32.mrb[61].mxu0  ;;  %v9837_v54 = vsel %vm2779_vm3, %v22567_v17, -inf }
 0x98b   :  { %9838 = vmax.xlane.f32.xlu0 %v9837_v54  ;;  %v9036_v14 = vpop.f32.mrb[62].mxu0  ;;  %v22581_v45 = vpop.permute.xlu0 %10269 }
 0x98c   :  { %v17840_v25 = vpop.f32.mrb[63].mxu0  ;;  %v22587_v41 = vpop.permute.xlu1 %10509 }
 0x98d   :  { %v22573_v58 = vpop.f32.mrb[100].mxu1  ;;  %25060 = vst [vmem:[#allocation165_spill] sm:$0xff] %v22587_v41 }
 0x98e   :  { %v17845_v15 = vpop.f32.mrb[101].mxu1  ;;  %v9840_v42 = vsel %vm2779_vm3, %v22573_v58, -inf }
 0x98f   :  { %9841 = vmax.xlane.f32.xlu1 %v9840_v42  ;;  %v9086_v18 = vpop.f32.mrb[102].mxu1  ;;  %v22591_v56 = vpop.permute.xlu0 %10365 }
 0x990   :  { %v17846_v34 = vpop.f32.mrb[103].mxu1 }
 0x991   :  { %v22579_v62 = vpop.f32.mrb[64].mxu0 }
 0x992   :  { %v17851_v37 = vpop.f32.mrb[65].mxu0  ;;  %v9843_v54 = vsel %vm2779_vm3, %v22579_v62, -inf }
 0x993   :  { %9844 = vmax.xlane.f32.xlu0 %v9843_v54  ;;  %v9136_v14 = vpop.f32.mrb[66].mxu0  ;;  %v22601_v50 = vpop.permute.xlu0 %10461 }
 0x994   :  { %v17852_v25 = vpop.f32.mrb[67].mxu0 }
 0x995   :  { %v22585_v15 = vpop.f32.mrb[104].mxu1  ;;  %v22597_v25 = vpop.permute.xlu1 %10605 }
 0x996   :  { %v17857_v42 = vpop.f32.mrb[105].mxu1  ;;  %v9846_v18 = vsel %vm2779_vm3, %v22585_v15, -inf  ;;  %25061 = vst [vmem:[#allocation166_spill] sm:$0xff] %v22597_v25 }
 0x997   :  { %9847 = vmax.xlane.f32.xlu1 %v9846_v18  ;;  %v9186_v34 = vpop.f32.mrb[106].mxu1  ;;  %v22611_v1 = vpop.permute.xlu0 %10557 }
 0x998   :  { %v17858_v55 = vpop.f32.mrb[107].mxu1  ;;  %25063 = vst [vmem:[#allocation168_spill] sm:$0xff] %v22611_v1 }
 0x999   :  { %v22593_v37 = vpop.f32.mrb[68].mxu0  ;;  %v22607_v9 = vpop.permute.xlu1 %10701 }
 0x99a   :  { %v17863_v20 = vpop.f32.mrb[69].mxu0  ;;  %v9849_v54 = vsel %vm2779_vm3, %v22593_v37, -inf  ;;  %25062 = vst [vmem:[#allocation167_spill] sm:$0xff] %v22607_v9 }
 0x99b   :  { %9850 = vmax.xlane.f32.xlu0 %v9849_v54  ;;  %v9236_v14 = vpop.f32.mrb[70].mxu0  ;;  %v22621_v51 = vpop.permute.xlu0 %10653 }
 0x99c   :  { %v17864_v26 = vpop.f32.mrb[71].mxu0  ;;  %25065 = vst [vmem:[#allocation170_spill] sm:$0xff] %v22621_v51 }
 0x99d   :  { %v22599_v42 = vpop.f32.mrb[108].mxu1 }
 0x99e   :  { %v17869_v18 = vpop.f32.mrb[109].mxu1  ;;  %v9852_v34 = vsel %vm2779_vm3, %v22599_v42, -inf }
 0x99f   :  { %9853 = vmax.xlane.f32.xlu1 %v9852_v34  ;;  %v9286_v55 = vpop.f32.mrb[110].mxu1 }
 0x9a0   :  { %v17870_v8 = vpop.f32.mrb[111].mxu1  ;;  %v22617_v55 = vpop.permute.xlu1 %10797 }
 0x9a1   :  { %v22605_v20 = vpop.f32.mrb[72].mxu0  ;;  %25064 = vst [vmem:[#allocation169_spill] sm:$0xff] %v22617_v55  ;;  %v22631_v55 = vpop.permute.xlu0 %10749 }
 0x9a2   :  { %v17875_v54 = vpop.f32.mrb[73].mxu0  ;;  %v9855_v14 = vsel %vm2779_vm3, %v22605_v20, -inf  ;;  %25067 = vst [vmem:[#allocation172_spill] sm:$0xff] %v22631_v55 }
 0x9a3   :  { %9856 = vmax.xlane.f32.xlu0 %v9855_v14  ;;  %v9336_v26 = vpop.f32.mrb[74].mxu0 }
 0x9a4   :  { %v17876_v25 = vpop.f32.mrb[75].mxu0  ;;  %v22627_v6 = vpop.permute.xlu1 %10893 }
 0x9a5   :  { %v22613_v18 = vpop.f32.mrb[112].mxu1  ;;  %25066 = vst [vmem:[#allocation171_spill] sm:$0xff] %v22627_v6  ;;  %v22641_v41 = vpop.permute.xlu0 %10845 }
 0x9a6   :  { %v17881_v4 = vpop.f32.mrb[113].mxu1  ;;  %v9858_v34 = vsel %vm2779_vm3, %v22613_v18, -inf  ;;  %25069 = vst [vmem:[#allocation174_spill] sm:$0xff] %v22641_v41 }
 0x9a7   :  { %9859 = vmax.xlane.f32.xlu1 %v9858_v34  ;;  %v9386_v8 = vpop.f32.mrb[114].mxu1 }
 0x9a8   :  { %v17882_v9 = vpop.f32.mrb[115].mxu1 }
 0x9a9   :  { %v22619_v54 = vpop.f32.mrb[76].mxu0 }
 0x9aa   :  { %v17887_v14 = vpop.f32.mrb[77].mxu0  ;;  %v9861_v26 = vsel %vm2779_vm3, %v22619_v54, -inf }
 0x9ab   :  { %9862 = vmax.xlane.f32.xlu0 %v9861_v26  ;;  %v9436_v25 = vpop.f32.mrb[78].mxu0 }
 0x9ac   :  { %v17888_v1 = vpop.f32.mrb[79].mxu0  ;;  %v22637_v25 = vpop.permute.xlu1 %10989 }
 0x9ad   :  { %v22625_v4 = vpop.f32.mrb[116].mxu1  ;;  %25068 = vst [vmem:[#allocation173_spill] sm:$0xff] %v22637_v25  ;;  %v22651_v25 = vpop.permute.xlu0 %10941 }
 0x9ae   :  { %v17893_v34 = vpop.f32.mrb[117].mxu1  ;;  %v9864_v8 = vsel %vm2779_vm3, %v22625_v4, -inf  ;;  %25071 = vst [vmem:[#allocation176_spill] sm:$0xff] %v22651_v25 }
 0x9af   :  { %9865 = vmax.xlane.f32.xlu1 %v9864_v8  ;;  %v9486_v9 = vpop.f32.mrb[118].mxu1 }
 0x9b0   :  { %v17894_v51 = vpop.f32.mrb[119].mxu1  ;;  %v22647_v63 = vpop.permute.xlu1 %11085 }
 0x9b1   :  { %v22633_v14 = vpop.f32.mrb[80].mxu0  ;;  %25070 = vst [vmem:[#allocation175_spill] sm:$0xff] %v22647_v63  ;;  %v22661_v39 = vpop.permute.xlu0 %11037 }
 0x9b2   :  { %v17899_v49 = vpop.f32.mrb[81].mxu0  ;;  %v9867_v26 = vsel %vm2779_vm3, %v22633_v14, -inf  ;;  %25073 = vst [vmem:[#allocation178_spill] sm:$0xff] %v22661_v39 }
 0x9b3   :  { %9868 = vmax.xlane.f32.xlu0 %v9867_v26  ;;  %v9536_v1 = vpop.f32.mrb[82].mxu0 }
 0x9b4   :  { %v17900_v6 = vpop.f32.mrb[83].mxu0 }
 0x9b5   :  { %v22639_v34 = vpop.f32.mrb[120].mxu1 }
 0x9b6   :  { %v17905_v8 = vpop.f32.mrb[121].mxu1  ;;  %v9870_v9 = vsel %vm2779_vm3, %v22639_v34, -inf }
 0x9b7   :  { %9871 = vmax.xlane.f32.xlu1 %v9870_v9  ;;  %v9586_v51 = vpop.f32.mrb[122].mxu1 }
 0x9b8   :  { %v17906_v55 = vpop.f32.mrb[123].mxu1  ;;  %v22657_v51 = vpop.permute.xlu1 %11181 }
 0x9b9   :  { %v22645_v49 = vpop.f32.mrb[84].mxu0  ;;  %25072 = vst [vmem:[#allocation177_spill] sm:$0xff] %v22657_v51  ;;  %v22671_v51 = vpop.permute.xlu0 %11133 }
 0x9ba   :  { %v17911_v26 = vpop.f32.mrb[85].mxu0  ;;  %v9873_v1 = vsel %vm2779_vm3, %v22645_v49, -inf  ;;  %25075 = vst [vmem:[#allocation180_spill] sm:$0xff] %v22671_v51 }
 0x9bb   :  { %9874 = vmax.xlane.f32.xlu0 %v9873_v1  ;;  %v9636_v6 = vpop.f32.mrb[86].mxu0 }
 0x9bc   :  { %v17912_v41 = vpop.f32.mrb[87].mxu0  ;;  %v22667_v2 = vpop.permute.xlu1 %11277 }
 0x9bd   :  { %v22653_v8 = vpop.f32.mrb[124].mxu1  ;;  %25074 = vst [vmem:[#allocation179_spill] sm:$0xff] %v22667_v2  ;;  %v22675_v0 = vpop.permute.xlu0 %11229 }
 0x9be   :  { %v17917_v40 = vpop.f32.mrb[125].mxu1  ;;  %v9876_v9 = vsel %vm2779_vm3, %v22653_v8, -inf  ;;  %25077 = vst [vmem:[#allocation182_spill] sm:$0xff] %v22675_v0 }
 0x9bf   :  { %9877 = vmax.xlane.f32.xlu1 %v9876_v9  ;;  %v9686_v55 = vpop.f32.mrb[126].mxu1 }
 0x9c0   :  { %v17918_v63 = vpop.f32.mrb[127].mxu1 }
 0x9c1   :  { %v22659_v26 = vpop.f32.mrb[88].mxu0 }
 0x9c2   :  { %v17923_v1 = vpop.f32.mrb[89].mxu0  ;;  %v9879_v6 = vsel %vm2779_vm3, %v22659_v26, -inf }
 0x9c3   :  { %9880 = vmax.xlane.f32.xlu1 %v9879_v6  ;;  %v9736_v41 = vpop.f32.mrb[90].mxu0  ;;  %v22673_v1 = vpop.permute.xlu1 %11373 }
 0x9c4   :  { %v17924_v25 = vpop.f32.mrb[91].mxu0  ;;  %25076 = vst [vmem:[#allocation181_spill] sm:$0xff] %v22673_v1 }
 0x9c5   :  { %v22665_v40 = vpop.f32.mrb[128].mxu1  ;;  %v22679_v25 = vpop.permute.xlu0 %11325 }
 0x9c6   :  { %v17929_v9 = vpop.f32.mrb[129].mxu1  ;;  %v9882_v55 = vsel %vm2779_vm3, %v22665_v40, -inf  ;;  %25079 = vst [vmem:[#allocation184_spill] sm:$0xff] %v22679_v25 }
 0x9c7   :  { %v9786_v63 = vpop.f32.mrb[130].mxu1  ;;  %9883 = vmax.xlane.f32.xlu0 %v9882_v55  ;;  %v22677_v6 = vpop.permute.xlu1 %11421 }
 0x9c8   :  { %v17930_v39 = vpop.f32.mrb[131].mxu1  ;;  %25078 = vst [vmem:[#allocation183_spill] sm:$0xff] %v22677_v6 }
 0x9cb   :  { %v22681_v41 = vpop.permute.xlu1 %11469 }
 0x9cc   :  { %25080 = vst [vmem:[#allocation185_spill] sm:$0xff] %v22681_v41 }
 0x9d8   :  { %v9791_v2 = vpop.xlane.xlu0 %9790 }
 0x9d9   :  { %v9885_v9 = vsub.f32 %v22503_v27, %v9791_v2 }
 0x9db   :  { %v9917_v10 = vmul.f32 1.442695, %v9885_v9 }
 0x9dc   :  { %v9794_v52 = vpop.xlane.xlu1 %9793 }
 0x9dd   :  { %18948 = vpow2.f32 %v9917_v10  ;;  %v9886_v55 = vsub.f32 %v22507_v47, %v9794_v52 }
 0x9df   :  { %v9919_v63 = vmul.f32 1.442695, %v9886_v55 }
 0x9e0   :  { %v9797_v39 = vpop.xlane.xlu0 %9796 }
 0x9e1   :  { %18950 = vpow2.f32 %v9919_v63  ;;  %v9887_v1 = vsub.f32 %v22511_v5, %v9797_v39 }
 0x9e3   :  { %v9921_v0 = vmul.f32 1.442695, %v9887_v1  ;;  %v25081_v1 = vld [vmem:[#allocation87_spill] sm:$0xff] }
 0x9e4   :  { %v9800_v51 = vpop.xlane.xlu0 %9799 }
 0x9e5   :  { %18952 = vpow2.f32 %v9921_v0  ;;  %v9888_v6 = vsub.f32 %v22515_v30, %v9800_v51 }
 0x9e7   :  { %v22687_v25 = vpop.eup %18948  ;;  %v9923_v41 = vmul.f32 1.442695, %v9888_v6  ;;  %v25082_v6 = vld [vmem:[#allocation88_spill] sm:$0xff] }
 0x9e8   :  { %v9803_v60 = vpop.xlane.xlu0 %9802  ;;  %v9981_v2 = vsel %vm2779_vm3, %v22687_v25, 0.0 }
 0x9e9   :  { %18954 = vpow2.f32 %v9923_v41  ;;  %v9889_v52 = vsub.f32 %v22519_v48, %v9803_v60  ;;  %9982 = vadd.xlane.f32.xlu0 %v9981_v2 }
 0x9eb   :  { %v22692_v10 = vpop.eup %18950  ;;  %v9925_v27 = vmul.f32 1.442695, %v9889_v52 }
 0x9ec   :  { %v9984_v47 = vsel %vm2779_vm3, %v22692_v10, 0.0  ;;  %v9806_v41 = vpop.xlane.xlu1 %9805 }
 0x9ed   :  { %18956 = vpow2.f32 %v9925_v27  ;;  %9985 = vadd.xlane.f32.xlu1 %v9984_v47  ;;  %v9890_v9 = vsub.f32 %v22523_v43, %v9806_v41 }
 0x9ef   :  { %v22696_v0 = vpop.eup %18952  ;;  %v9927_v2 = vmul.f32 1.442695, %v9890_v9 }
 0x9f0   :  { %v9987_v5 = vsel %vm2779_vm3, %v22696_v0, 0.0  ;;  %v9809_v55 = vpop.xlane.xlu0 %9808 }
 0x9f1   :  { %9988 = vadd.xlane.f32.xlu0 %v9987_v5  ;;  %v9891_v39 = vsub.f32 %v22527_v59, %v9809_v55  ;;  %18958 = vpow2.f32 %v9927_v2 }
 0x9f3   :  { %v22700_v30 = vpop.eup %18954  ;;  %v9929_v5 = vmul.f32 1.442695, %v9891_v39 }
 0x9f4   :  { %v9990_v60 = vsel %vm2779_vm3, %v22700_v30, 0.0  ;;  %v9812_v63 = vpop.xlane.xlu1 %9811 }
 0x9f5   :  { %9991 = vadd.xlane.f32.xlu1 %v9990_v60  ;;  %v9892_v52 = vsub.f32 %v22531_v19, %v9812_v63  ;;  %18960 = vpow2.f32 %v9929_v5 }
 0x9f7   :  { %v22704_v48 = vpop.eup %18956 }
 0x9f8   :  { %v9993_v51 = vsel %vm2779_vm3, %v22704_v48, 0.0  ;;  %v9815_v27 = vpop.xlane.xlu0 %9814 }
 0x9f9   :  { %9994 = vadd.xlane.f32.xlu0 %v9993_v51  ;;  %v9893_v60 = vsub.f32 %v22535_v32, %v9815_v27  ;;  %v9931_v51 = vmul.f32 1.442695, %v9892_v52 }
 0x9fb   :  { %v9933_v43 = vmul.f32 1.442695, %v9893_v60  ;;  %18962 = vpow2.f32 %v9931_v51  ;;  %v22721_v27 = vpop.eup %18958 }
 0x9fc   :  { %v9818_v47 = vpop.xlane.xlu1 %9817  ;;  %v9996_v5 = vsel %vm2779_vm3, %v22721_v27, 0.0 }
 0x9fd   :  { %18964 = vpow2.f32 %v9933_v43 }
 0xa04   :  { %v9824_v35 = vpop.xlane.xlu1 %9823 }
 0xa05   :  { %v9896_v9 = vsub.f32 %v22547_v28, %v9824_v35 }
 0xa06   :  { %11565 = vrot.lane.b32.xlu1 %v25081_v1, %s19348_s1  ;;  %v9894_v1 = vsub.f32 %v22539_v36, %v9818_v47  ;;  %v22725_v47 = vpop.eup %18960 }
 0xa07   :  { %v9939_v39 = vmul.f32 1.442695, %v9896_v9  ;;  %v9999_v9 = vsel %vm2779_vm3, %v22725_v47, 0.0 }
 0xa08   :  { %v9935_v59 = vmul.f32 1.442695, %v9894_v1 }
 0xa0a   :  { %18966 = vpow2.f32 %v9935_v59 }
 0xa0c   :  { %v9830_v55 = vpop.xlane.xlu1 %9829 }
 0xa0d   :  { %v9898_v36 = vsub.f32 %v22555_v46, %v9830_v55  ;;  %v22729_v46 = vpop.eup %18962 }
 0xa0f   :  { %11517 = vrot.lane.b32.xlu0 %v25082_v6, %s19348_s1  ;;  %v9821_v6 = vpop.xlane.xlu0 %9820  ;;  %v9943_v35 = vmul.f32 1.442695, %v9898_v36 }
 0xa10   :  { %v9895_v41 = vsub.f32 %v22543_v22, %v9821_v6 }
 0xa12   :  { %v9937_v63 = vmul.f32 1.442695, %v9895_v41 }
 0xa13   :  { %v9827_v19 = vpop.xlane.xlu0 %9826 }
 0xa14   :  { %v9897_v32 = vsub.f32 %v22551_v24, %v9827_v19  ;;  %v9836_v52 = vpop.xlane.xlu1 %9835  ;;  %18968 = vpow2.f32 %v9937_v63  ;;  %v10002_v19 = vsel %vm2779_vm3, %v22729_v46, 0.0 }
 0xa15   :  { %18970 = vpow2.f32 %v9939_v39  ;;  %v9900_v28 = vsub.f32 %v22563_v23, %v9836_v52  ;;  %v22733_v23 = vpop.eup %18964 }
 0xa16   :  { %v9941_v22 = vmul.f32 1.442695, %v9897_v32  ;;  %v22739_v55 = vpop.eup %18966  ;;  %v10005_v52 = vsel %vm2779_vm3, %v22733_v23, 0.0 }
 0xa17   :  { %v9833_v2 = vpop.xlane.xlu0 %9832 }
 0xa18   :  { %v9899_v1 = vsub.f32 %v22559_v11, %v9833_v2  ;;  %18972 = vpow2.f32 %v9941_v22  ;;  %v9947_v11 = vmul.f32 1.442695, %v9900_v28  ;;  %v10008_v22 = vsel %vm2779_vm3, %v22739_v55, 0.0 }
 0xa19   :  { %18974 = vpow2.f32 %v9943_v35 }
 0xa1a   :  { %v9945_v60 = vmul.f32 1.442695, %v9899_v1 }
 0xa1b   :  { %v9839_v6 = vpop.xlane.xlu0 %9838 }
 0xa1c   :  { %v9842_v24 = vpop.xlane.xlu1 %9841  ;;  %v9901_v51 = vsub.f32 %v22567_v17, %v9839_v6  ;;  %18976 = vpow2.f32 %v9945_v60 }
 0xa1d   :  { %v9902_v43 = vsub.f32 %v22573_v58, %v9842_v24  ;;  %18978 = vpow2.f32 %v9947_v11 }
 0xa1e   :  { %v9949_v17 = vmul.f32 1.442695, %v9901_v51  ;;  %v22743_v36 = vpop.eup %18968 }
 0xa1f   :  { %v9951_v58 = vmul.f32 1.442695, %v9902_v43  ;;  %v22749_v1 = vpop.eup %18970  ;;  %v10011_v51 = vsel %vm2779_vm3, %v22743_v36, 0.0 }
 0xa20   :  { %v9845_v41 = vpop.xlane.xlu0 %9844  ;;  %18980 = vpow2.f32 %v9949_v17  ;;  %v10014_v60 = vsel %vm2779_vm3, %v22749_v1, 0.0 }
 0xa21   :  { %v9903_v63 = vsub.f32 %v22579_v62, %v9845_v41  ;;  %18982 = vpow2.f32 %v9951_v58 }
 0xa22   :  { %v22753_v24 = vpop.eup %18972 }
 0xa23   :  { %v9953_v62 = vmul.f32 1.442695, %v9903_v63  ;;  %v22759_v11 = vpop.eup %18974  ;;  %v10017_v17 = vsel %vm2779_vm3, %v22753_v24, 0.0 }
 0xa24   :  { %v9848_v59 = vpop.xlane.xlu1 %9847 }
 0xa25   :  { %v9904_v32 = vsub.f32 %v22585_v15, %v9848_v59  ;;  %18984 = vpow2.f32 %v9953_v62 }
 0xa27   :  { %v9955_v15 = vmul.f32 1.442695, %v9904_v32 }
 0xa28   :  { %v9851_v39 = vpop.xlane.xlu0 %9850 }
 0xa29   :  { %v9905_v35 = vsub.f32 %v22593_v37, %v9851_v39  ;;  %18986 = vpow2.f32 %v9955_v15 }
 0xa2a   :  { %9997 = vadd.xlane.f32.xlu1 %v9996_v5 }
 0xa2b   :  { %v9957_v37 = vmul.f32 1.442695, %v9905_v35 }
 0xa2c   :  { %v9854_v2 = vpop.xlane.xlu1 %9853 }
 0xa2d   :  { %v9906_v28 = vsub.f32 %v22599_v42, %v9854_v2  ;;  %18988 = vpow2.f32 %v9957_v37 }
 0xa2e   :  { %10000 = vadd.xlane.f32.xlu0 %v9999_v9  ;;  %10003 = vadd.xlane.f32.xlu1 %v10002_v19  ;;  %v22763_v9 = vpop.eup %18976  ;;  %v10020_v19 = vsel %vm2779_vm3, %v22759_v11, 0.0 }
 0xa2f   :  { %v9959_v42 = vmul.f32 1.442695, %v9906_v28  ;;  %v22769_v63 = vpop.eup %18978 }
 0xa30   :  { %v9857_v6 = vpop.xlane.xlu0 %9856  ;;  %v22772_v39 = vpop.eup %18980 }
 0xa31   :  { %v9907_v43 = vsub.f32 %v22605_v20, %v9857_v6  ;;  %18990 = vpow2.f32 %v9959_v42  ;;  %v22779_v62 = vpop.eup %18982 }
 0xa32   :  { %10006 = vadd.xlane.f32.xlu0 %v10005_v52  ;;  %10009 = vadd.xlane.f32.xlu1 %v10008_v22  ;;  %v10026_v52 = vsel %vm2779_vm3, %v22769_v63, 0.0  ;;  %v10023_v22 = vsel %vm2779_vm3, %v22763_v9, 0.0  ;;  %v22781_v28 = vpop.eup %18984 }
 0xa33   :  { %v9961_v58 = vmul.f32 1.442695, %v9907_v43 }
 0xa34   :  { %v9860_v5 = vpop.xlane.xlu1 %9859 }
 0xa35   :  { %v9908_v41 = vsub.f32 %v22613_v18, %v9860_v5  ;;  %18992 = vpow2.f32 %v9961_v58  ;;  %v10029_v5 = vsel %vm2779_vm3, %v22772_v39, 0.0 }
 0xa36   :  { %10015 = vadd.xlane.f32.xlu0 %v10014_v60  ;;  %10012 = vadd.xlane.f32.xlu1 %v10011_v51  ;;  %v22788_v60 = vpop.eup %18986 }
 0xa37   :  { %v9963_v32 = vmul.f32 1.442695, %v9908_v41  ;;  %v22790_v43 = vpop.eup %18988  ;;  %v10035_v41 = vsel %vm2779_vm3, %v22781_v28, 0.0 }
 0xa38   :  { %v9863_v59 = vpop.xlane.xlu0 %9862 }
 0xa39   :  { %v9909_v20 = vsub.f32 %v22619_v54, %v9863_v59  ;;  %18994 = vpow2.f32 %v9963_v32  ;;  %v10041_v32 = vsel %vm2779_vm3, %v22790_v43, 0.0 }
 0xa3a   :  { %10021 = vadd.xlane.f32.xlu0 %v10020_v19  ;;  %10018 = vadd.xlane.f32.xlu1 %v10017_v17 }
 0xa3b   :  { %v9965_v35 = vmul.f32 1.442695, %v9909_v20  ;;  %v22797_v59 = vpop.eup %18990 }
 0xa3c   :  { %v9866_v18 = vpop.xlane.xlu1 %9865 }
 0xa3d   :  { %v9910_v2 = vsub.f32 %v22625_v4, %v9866_v18  ;;  %v10032_v4 = vsel %vm2779_vm3, %v22779_v62, 0.0  ;;  %18996 = vpow2.f32 %v9965_v35 }
 0xa3e   :  { %10027 = vadd.xlane.f32.xlu0 %v10026_v52  ;;  %10024 = vadd.xlane.f32.xlu1 %v10023_v22 }
 0xa3f   :  { %v9967_v54 = vmul.f32 1.442695, %v9910_v2  ;;  %v22799_v58 = vpop.eup %18992 }
 0xa40   :  { %v9869_v15 = vpop.xlane.xlu0 %9868 }
 0xa41   :  { %v9911_v6 = vsub.f32 %v22633_v14, %v9869_v15  ;;  %18998 = vpow2.f32 %v9967_v54  ;;  %v10038_v14 = vsel %vm2779_vm3, %v22788_v60, 0.0  ;;  %v10047_v54 = vsel %vm2779_vm3, %v22799_v58, 0.0 }
 0xa42   :  { %10033 = vadd.xlane.f32.xlu0 %v10032_v4  ;;  %10030 = vadd.xlane.f32.xlu1 %v10029_v5 }
 0xa43   :  { %v9969_v51 = vmul.f32 1.442695, %v9911_v6  ;;  %v22806_v18 = vpop.eup %18994 }
 0xa44   :  { %v9872_v37 = vpop.xlane.xlu1 %9871 }
 0xa45   :  { %v9912_v42 = vsub.f32 %v22639_v34, %v9872_v37  ;;  %19000 = vpow2.f32 %v9969_v51  ;;  %v10044_v34 = vsel %vm2779_vm3, %v22797_v59, 0.0 }
 0xa46   :  { %10039 = vadd.xlane.f32.xlu0 %v10038_v14  ;;  %10036 = vadd.xlane.f32.xlu1 %v10035_v41 }
 0xa47   :  { %v9971_v19 = vmul.f32 1.442695, %v9912_v42  ;;  %v22808_v22 = vpop.eup %18996 }
 0xa48   :  { %v9875_v17 = vpop.xlane.xlu0 %9874  ;;  %v10053_v5 = vsel %vm2779_vm3, %v22808_v22, 0.0 }
 0xa49   :  { %19002 = vpow2.f32 %v9971_v19  ;;  %v9913_v20 = vsub.f32 %v22645_v49, %v9875_v17  ;;  %v10050_v49 = vsel %vm2779_vm3, %v22806_v18, 0.0 }
 0xa4a   :  { %10045 = vadd.xlane.f32.xlu0 %v10044_v34  ;;  %10042 = vadd.xlane.f32.xlu1 %v10041_v32 }
 0xa4b   :  { %v9973_v2 = vmul.f32 1.442695, %v9913_v20  ;;  %v22815_v15 = vpop.eup %18998 }
 0xa4c   :  { %v9878_v52 = vpop.xlane.xlu1 %9877  ;;  %v10056_v4 = vsel %vm2779_vm3, %v22815_v15, 0.0 }
 0xa4d   :  { %19004 = vpow2.f32 %v9973_v2  ;;  %v9914_v35 = vsub.f32 %v22653_v8, %v9878_v52 }
 0xa4e   :  { %10051 = vadd.xlane.f32.xlu0 %v10050_v49  ;;  %10048 = vadd.xlane.f32.xlu1 %v10047_v54 }
 0xa4f   :  { %v9975_v6 = vmul.f32 1.442695, %v9914_v35  ;;  %v22821_v51 = vpop.eup %19000 }
 0xa50   :  { %v10059_v42 = vsel %vm2779_vm3, %v22821_v51, 0.0  ;;  %v9881_v34 = vpop.xlane.xlu1 %9880 }
 0xa51   :  { %19006 = vpow2.f32 %v9975_v6  ;;  %v9915_v2 = vsub.f32 %v22659_v26, %v9881_v34  ;;  %v10275_v26 = vsel %vm3167_vm2, %v22581_v45, 0  ;;  %v10323_v34 = vsel %vm3167_vm2, %v22569_v57, 0 }
 0xa52   :  { %10057 = vadd.xlane.f32.xlu0 %v10056_v4  ;;  %10054 = vadd.xlane.f32.xlu1 %v10053_v5 }
 0xa53   :  { %v22823_v8 = vpop.eup %19002  ;;  %v9977_v49 = vmul.f32 1.442695, %v9915_v2 }
 0xa54   :  { %v10062_v37 = vsel %vm2779_vm3, %v22823_v8, 0.0  ;;  %v9884_v20 = vpop.xlane.xlu0 %9883 }
 0xa55   :  { %v9916_v35 = vsub.f32 %v22665_v40, %v9884_v20 }
 0xa56   :  { %10063 = vadd.xlane.f32.xlu0 %v10062_v37  ;;  %10060 = vadd.xlane.f32.xlu1 %v10059_v42 }
 0xa57   :  { %v22829_v14 = vpop.eup %19004  ;;  %v9979_v6 = vmul.f32 1.442695, %v9916_v35  ;;  %v10371_v35 = vsel %vm3167_vm2, %v22591_v56, 0  ;;  %v10419_v56 = vsel %vm3167_vm2, %v22577_v13, 0 }
 0xa58   :  { %v10065_v41 = vsel %vm2779_vm3, %v22829_v14, 0.0 }
 0xa5a   :  { %10066 = vadd.xlane.f32.xlu1 %v10065_v41 }
 0xa5b   :  { %v22833_v19 = vpop.eup %19006 }
 0xa5c   :  { %v10068_v17 = vsel %vm2779_vm3, %v22833_v19, 0.0 }
 0xa5d   :  { %10069 = vadd.xlane.f32.xlu0 %v10068_v17 }
 0xa6b   :  { %11661 = vrot.lane.b32.xlu1 %v21135_v31, %s19348_s1 }
 0xa73   :  { %11613 = vrot.lane.b32.xlu0 %v21115_v61, %s19348_s1 }
 0xa76   :  { %v9983_v32 = vpop.xlane.xlu0 %9982 }
 0xa77   :  { %19008 = vrcp.f32 %v9983_v32 }
 0xa7a   :  { %v9986_v52 = vpop.xlane.xlu1 %9985 }
 0xa7b   :  { %19010 = vrcp.f32 %v9986_v52 }
 0xa7e   :  { %v9989_v54 = vpop.xlane.xlu0 %9988 }
 0xa7f   :  { %19012 = vrcp.f32 %v9989_v54 }
 0xa80   :  { %19014 = vpow2.f32 %v9977_v49 }
 0xa81   :  { %v19009_v4 = vpop.eup %19008 }
 0xa82   :  { %v10109_v5 = vmul.f32 %v19009_v4, %v22687_v25  ;;  %v9992_v37 = vpop.xlane.xlu1 %9991 }
 0xa83   :  { %19016 = vrcp.f32 %v9992_v37  ;;  %v25088_v37 = vld [vmem:[#allocation30_spill] sm:$0xff] }
 0xa84   :  { %19018 = vpow2.f32 %v9979_v6  ;;  %v10141_v42 = vpack.c.bf16 %v10109_v5, %v10109_v5  ;;  %v10467_v5 = vsel %vm3167_vm2, %v22601_v50, 0  ;;  %v25086_v50 = vld [vmem:[#allocation29_spill] sm:$0xff] }
 0xa85   :  { %v19011_v41 = vpop.eup %19010 }
 0xa86   :  { %v10110_v17 = vmul.f32 %v19011_v41, %v22692_v10  ;;  %17934 = vmatmul.mubr.msk.bf16.vlgmr.msra.gmra.mrb[92].mxu0 %vm2779_vm3, %v10141_v42  ;;  %v9995_v40 = vpop.xlane.xlu0 %9994  ;;  %v25089_v42 = vld [vmem:[#allocation34_spill] sm:$0xff] }
 0xa87   :  { %17944 = vmatpush3.bf16.msra.mxu0 %v10275_v26  ;;  %19020 = vrcp.f32 %v9995_v40  ;;  %17945 = vmatprep.mubr.msk.bf16.mxu0 %vm19357_vm0, %v24762_v44  ;;  %v25091_v40 = vld [vmem:[#allocation37_spill] sm:$0xff] }
 0xa88   :  { %v10142_v20 = vpack.c.bf16 %v10110_v17, %v10110_v17  ;;  %17955 = vmatprep.subr.bf16.mxu0 %v24762_v44  ;;  %v25090_v17 = vld [vmem:[#allocation33_spill] sm:$0xff] }
 0xa89   :  { %v19013_v25 = vpop.eup %19012 }
 0xa8a   :  { %v10111_v32 = vmul.f32 %v19013_v25, %v22696_v0  ;;  %17940 = vmatmul.mubr.msk.bf16.vlgmr.msra.gmra.mrb[132].mxu1 %vm2779_vm3, %v10142_v20  ;;  %v22855_v45 = vpop.eup %19014 }
 0xa8b   :  { %17950 = vmatpush3.bf16.msra.mxu1 %v10323_v34  ;;  %17951 = vmatprep.mubr.msk.bf16.mxu1 %vm19357_vm0, %v24762_v44  ;;  %v10071_v0 = vsel %vm2779_vm3, %v22855_v45, 0.0 }
 0xa8c   :  { %v10143_v10 = vpack.c.bf16 %v10111_v32, %v10111_v32  ;;  %17961 = vmatprep.subr.bf16.mxu1 %v24762_v44 }
 0xa8d   :  { %v19017_v2 = vpop.eup %19016 }
 0xa8e   :  { %v22860_v52 = vpop.eup %19018  ;;  %v10112_v57 = vmul.f32 %v19017_v2, %v22700_v30  ;;  %17946 = vmatmul.mubr.msk.bf16.vlgmr.msra.gmra.mrb[96].mxu0 %vm2779_vm3, %v10143_v10  ;;  %v25092_v10 = vld [vmem:[#allocation165_spill] sm:$0xff] }
 0xa8f   :  { %17956 = vmatpush3.bf16.msra.mxu0 %v10371_v35  ;;  %10072 = vadd.xlane.f32.xlu1 %v10071_v0  ;;  %v10074_v6 = vsel %vm2779_vm3, %v22860_v52, 0.0  ;;  %v10515_v2 = vsel %vm3167_vm2, %v25092_v10, 0 }
 0xa90   :  { %v10144_v49 = vpack.c.bf16 %v10112_v57, %v10112_v57  ;;  %17957 = vmatprep.mubr.msk.bf16.mxu0 %vm19357_vm0, %v24762_v44  ;;  %17967 = vmatprep.subr.bf16.mxu0 %v24762_v44 }
 0xa91   :  { %v19021_v54 = vpop.eup %19020 }
 0xa92   :  { %v10113_v30 = vmul.f32 %v19021_v54, %v22704_v48  ;;  %10075 = vadd.xlane.f32.xlu0 %v10074_v6  ;;  %17952 = vmatmul.mubr.msk.bf16.vlgmr.msra.gmra.mrb[136].mxu1 %vm2779_vm3, %v10144_v49  ;;  %v25094_v54 = vld [vmem:[#allocation36_spill] sm:$0xff] }
 0xa93   :  { %17962 = vmatpush3.bf16.msra.mxu1 %v10419_v56  ;;  %17963 = vmatprep.mubr.msk.bf16.mxu1 %vm19357_vm0, %v24762_v44 }
 0xa94   :  { %v10145_v4 = vpack.c.bf16 %v10113_v30, %v10113_v30  ;;  %17973 = vmatprep.subr.bf16.mxu1 %v24762_v44  ;;  %v25096_v30 = vld [vmem:[#allocation17_spill] sm:$0xff] }
 0xa96   :  { %17958 = vmatmul.mubr.msk.bf16.vlgmr.msra.gmra.mrb[100].mxu0 %vm2779_vm3, %v10145_v4 }
 0xa97   :  { %17968 = vmatpush3.bf16.msra.mxu0 %v10467_v5  ;;  %17969 = vmatprep.mubr.msk.bf16.mxu0 %vm19357_vm0, %v24762_v44 }
 0xa98   :  { %17979 = vmatprep.subr.bf16.mxu0 %v24762_v44 }
 0xaa0   :  { %11777 = vrot.lane.b32.xlu1 %v19904_v3, %s19359_s8  ;;  %v22902_v3 = vpop.permute.xlu1 %11565 }
 0xaa4   :  { %11775 = vrot.lane.b32.xlu1 %v24790_v38, %s19359_s8  ;;  %v22908_v38 = vpop.permute.xlu0 %11517 }
 0xaa8   :  { %11727 = vrot.lane.b32.xlu0 %v19814_v16, %s19359_s8  ;;  %11877 = vrot.lane.b32.xlu1 %v24794_v21, %s19359_s8  ;;  %v25083_v16 = vld [vmem:[#allocation31_spill] sm:$0xff]  ;;  %v25084_v21 = vld [vmem:[#allocation26_spill] sm:$0xff] }
 0xaac   :  { %11725 = vrot.lane.b32.xlu0 %v19910_v53, %s19359_s8  ;;  %11875 = vrot.lane.b32.xlu1 %v24798_v33, %s19359_s8  ;;  %v25085_v33 = vld [vmem:[#allocation32_spill] sm:$0xff] }
 0xab0   :  { %11827 = vrot.lane.b32.xlu0 %v24921_v7, %s19359_s8  ;;  %11977 = vrot.lane.b32.xlu1 %v24922_v29, %s19359_s8 }
 0xab4   :  { %11825 = vrot.lane.b32.xlu0 %v24923_v12, %s19359_s8  ;;  %11975 = vrot.lane.b32.xlu1 %v25083_v16, %s19359_s8  ;;  %v25087_v12 = vld [vmem:[#allocation35_spill] sm:$0xff] }
 0xab5   :  { %v25097_v16 = vld [vmem:[#allocation39_spill] sm:$0xff] }
 0xab7   :  { %v9998_v53 = vpop.xlane.xlu1 %9997 }
 0xab8   :  { %11927 = vrot.lane.b32.xlu0 %v25084_v21, %s19359_s8  ;;  %19022 = vrcp.f32 %v9998_v53  ;;  %12077 = vrot.lane.b32.xlu1 %v25085_v33, %s19359_s8  ;;  %v25098_v21 = vld [vmem:[#allocation166_spill] sm:$0xff] }
 0xab9   :  { %v10611_v33 = vsel %vm3167_vm2, %v25098_v21, 0  ;;  %v25113_v21 = vld [vmem:[#allocation174_spill] sm:$0xff] }
 0xabb   :  { %v10001_v7 = vpop.xlane.xlu0 %10000  ;;  %v10004_v29 = vpop.xlane.xlu1 %10003 }
 0xabc   :  { %11925 = vrot.lane.b32.xlu0 %v25086_v50, %s19359_s8  ;;  %19024 = vrcp.f32 %v10001_v7  ;;  %12075 = vrot.lane.b32.xlu1 %v25087_v12, %s19359_s8  ;;  %v25099_v7 = vld [vmem:[#allocation18_spill] sm:$0xff] }
 0xabd   :  { %19026 = vrcp.f32 %v10004_v29  ;;  %v25100_v12 = vld [vmem:[#allocation38_spill] sm:$0xff] }
 0xabf   :  { %v10007_v13 = vpop.xlane.xlu0 %10006  ;;  %v10010_v48 = vpop.xlane.xlu1 %10009 }
 0xac0   :  { %12027 = vrot.lane.b32.xlu0 %v25088_v37, %s19359_s8  ;;  %19028 = vrcp.f32 %v10007_v13  ;;  %12177 = vrot.lane.b32.xlu1 %v25089_v42, %s19359_s8  ;;  %v25102_v42 = vld [vmem:[#allocation19_spill] sm:$0xff] }
 0xac1   :  { %19030 = vrcp.f32 %v10010_v48  ;;  %v25101_v48 = vld [vmem:[#allocation170_spill] sm:$0xff] }
 0xac2   :  { %v19023_v41 = vpop.eup %19022  ;;  %v10659_v37 = vsel %vm3167_vm2, %v25101_v48, 0 }
 0xac3   :  { %v10114_v26 = vmul.f32 %v19023_v41, %v22721_v27  ;;  %v10013_v25 = vpop.xlane.xlu1 %10012  ;;  %v25093_v27 = vld [vmem:[#allocation16_spill] sm:$0xff]  ;;  %v10016_v49 = vpop.xlane.xlu0 %10015 }
 0xac4   :  { %12025 = vrot.lane.b32.xlu0 %v25090_v17, %s19359_s8  ;;  %12175 = vrot.lane.b32.xlu1 %v25091_v40, %s19359_s8  ;;  %19032 = vrcp.f32 %v10013_v25  ;;  %v25103_v17 = vld [vmem:[#allocation40_spill] sm:$0xff] }
 0xac5   :  { %v10146_v20 = vpack.c.bf16 %v10114_v26, %v10114_v26  ;;  %19034 = vrcp.f32 %v10016_v49 }
 0xac6   :  { %v19025_v34 = vpop.eup %19024 }
 0xac7   :  { %v19027_v32 = vpop.eup %19026  ;;  %v10115_v35 = vmul.f32 %v19025_v34, %v22725_v47  ;;  %17964 = vmatmul.mubr.msk.bf16.vlgmr.msra.gmra.mrb[140].mxu1 %vm2779_vm3, %v10146_v20  ;;  %v25095_v47 = vld [vmem:[#allocation168_spill] sm:$0xff]  ;;  %v10019_v5 = vpop.xlane.xlu1 %10018  ;;  %v25104_v20 = vld [vmem:[#allocation167_spill] sm:$0xff] }
 0xac8   :  { %12127 = vrot.lane.b32.xlu0 %v25093_v27, %s19359_s8  ;;  %17974 = vmatpush3.bf16.msra.mxu1 %v10515_v2  ;;  %v10116_v0 = vmul.f32 %v19027_v32, %v22729_v46  ;;  %v10563_v56 = vsel %vm3167_vm2, %v25095_v47, 0  ;;  %19036 = vrcp.f32 %v10019_v5  ;;  %v10022_v50 = vpop.xlane.xlu0 %10021  ;;  %v10707_v25 = vsel %vm3167_vm2, %v25104_v20, 0  ;;  %v25105_v34 = vld [vmem:[#allocation20_spill] sm:$0xff]  ;;  %v25106_v2 = vld [vmem:[#allocation42_spill] sm:$0xff]  ;;  %v25120_v20 = vld [vmem:[#allocation47_spill] sm:$0xff] }
 0xac9   :  { %v10147_v57 = vpack.c.bf16 %v10115_v35, %v10115_v35  ;;  %12277 = vrot.lane.b32.xlu1 %v25094_v54, %s19359_s8  ;;  %17975 = vmatprep.mubr.msk.bf16.mxu1 %vm19357_vm0, %v24762_v44  ;;  %19038 = vrcp.f32 %v10022_v50  ;;  %v25107_v27 = vld [vmem:[#allocation172_spill] sm:$0xff]  ;;  %v25115_v50 = vld [vmem:[#allocation49_spill] sm:$0xff] }
 0xaca   :  { %v19029_v6 = vpop.eup %19028  ;;  %17985 = vmatprep.subr.bf16.mxu1 %v24762_v44  ;;  %v10148_v46 = vpack.c.bf16 %v10116_v0, %v10116_v0  ;;  %v25108_v0 = vld [vmem:[#allocation21_spill] sm:$0xff] }
 0xacb   :  { %17970 = vmatmul.mubr.msk.bf16.vlgmr.msra.gmra.mrb[104].mxu0 %vm2779_vm3, %v10147_v57  ;;  %v10117_v4 = vmul.f32 %v19029_v6, %v22733_v23  ;;  %v19031_v53 = vpop.eup %19030  ;;  %v10025_v26 = vpop.xlane.xlu1 %10024  ;;  %v10755_v57 = vsel %vm3167_vm2, %v25107_v27, 0  ;;  %v25109_v6 = vld [vmem:[#allocation45_spill] sm:$0xff] }
 0xacc   :  { %12125 = vrot.lane.b32.xlu0 %v25096_v30, %s19359_s8  ;;  %17980 = vmatpush3.bf16.msra.mxu0 %v10563_v56  ;;  %v10118_v29 = vmul.f32 %v19031_v53, %v22739_v55  ;;  %19040 = vrcp.f32 %v10025_v26  ;;  %v10028_v10 = vpop.xlane.xlu0 %10027  ;;  %v25110_v56 = vld [vmem:[#allocation169_spill] sm:$0xff] }
 0xacd   :  { %12275 = vrot.lane.b32.xlu1 %v25097_v16, %s19359_s8  ;;  %17981 = vmatprep.mubr.msk.bf16.mxu0 %vm19357_vm0, %v24762_v44  ;;  %v10149_v23 = vpack.c.bf16 %v10117_v4, %v10117_v4  ;;  %19042 = vrcp.f32 %v10028_v10  ;;  %v10803_v30 = vsel %vm3167_vm2, %v25110_v56, 0  ;;  %v25112_v16 = vld [vmem:[#allocation46_spill] sm:$0xff]  ;;  %v25122_v10 = vld [vmem:[#allocation173_spill] sm:$0xff] }
 0xace   :  { %17991 = vmatprep.subr.bf16.mxu0 %v24762_v44  ;;  %v19033_v13 = vpop.eup %19032  ;;  %v10150_v55 = vpack.c.bf16 %v10118_v29, %v10118_v29 }
 0xacf   :  { %17976 = vmatmul.mubr.msk.bf16.vlgmr.msra.gmra.mrb[144].mxu1 %vm2779_vm3, %v10148_v46  ;;  %v10119_v41 = vmul.f32 %v19033_v13, %v22743_v36  ;;  %v19035_v40 = vpop.eup %19034  ;;  %v10031_v54 = vpop.xlane.xlu1 %10030  ;;  %v25111_v46 = vld [vmem:[#allocation41_spill] sm:$0xff]  ;;  %v25116_v13 = vld [vmem:[#allocation171_spill] sm:$0xff] }
 0xad0   :  { %12227 = vrot.lane.b32.xlu0 %v25099_v7, %s19359_s8  ;;  %17986 = vmatpush3.bf16.msra.mxu1 %v10611_v33  ;;  %v10120_v36 = vmul.f32 %v19035_v40, %v22749_v1  ;;  %19044 = vrcp.f32 %v10031_v54  ;;  %v10034_v5 = vpop.xlane.xlu0 %10033  ;;  %v10851_v33 = vsel %vm3167_vm2, %v25113_v21, 0  ;;  %v25114_v7 = vld [vmem:[#allocation43_spill] sm:$0xff]  ;;  %v10899_v48 = vsel %vm3167_vm2, %v25116_v13, 0  ;;  %v25130_v21 = vld [vmem:[#allocation57_spill] sm:$0xff] }
 0xad1   :  { %12377 = vrot.lane.b32.xlu1 %v25100_v12, %s19359_s8  ;;  %17987 = vmatprep.mubr.msk.bf16.mxu1 %vm19357_vm0, %v24762_v44  ;;  %v10151_v32 = vpack.c.bf16 %v10119_v41, %v10119_v41  ;;  %19046 = vrcp.f32 %v10034_v5  ;;  %v25118_v41 = vld [vmem:[#allocation50_spill] sm:$0xff]  ;;  %v25129_v5 = vld [vmem:[#allocation52_spill] sm:$0xff] }
 0xad2   :  { %17997 = vmatprep.subr.bf16.mxu1 %v24762_v44  ;;  %v19037_v35 = vpop.eup %19036  ;;  %v10152_v1 = vpack.c.bf16 %v10120_v36, %v10120_v36  ;;  %v25121_v36 = vld [vmem:[#allocation53_spill] sm:$0xff] }
 0xad3   :  { %17982 = vmatmul.mubr.msk.bf16.vlgmr.msra.gmra.mrb[108].mxu0 %vm2779_vm3, %v10149_v23  ;;  %v10121_v49 = vmul.f32 %v19037_v35, %v22753_v24  ;;  %v19039_v47 = vpop.eup %19038  ;;  %v10037_v29 = vpop.xlane.xlu1 %10036  ;;  %v25123_v35 = vld [vmem:[#allocation48_spill] sm:$0xff] }
 0xad4   :  { %12225 = vrot.lane.b32.xlu0 %v25102_v42, %s19359_s8  ;;  %17992 = vmatpush3.bf16.msra.mxu0 %v10659_v37  ;;  %v10122_v24 = vmul.f32 %v19039_v47, %v22759_v11  ;;  %19048 = vrcp.f32 %v10037_v29  ;;  %v25117_v37 = vld [vmem:[#allocation44_spill] sm:$0xff] }
 0xad5   :  { %12375 = vrot.lane.b32.xlu1 %v25103_v17, %s19359_s8  ;;  %17993 = vmatprep.mubr.msk.bf16.mxu0 %vm19357_vm0, %v24762_v44  ;;  %v10153_v4 = vpack.c.bf16 %v10121_v49, %v10121_v49  ;;  %v25119_v17 = vld [vmem:[#allocation176_spill] sm:$0xff]  ;;  %v25125_v49 = vld [vmem:[#allocation178_spill] sm:$0xff] }
 0xad6   :  { %18003 = vmatprep.subr.bf16.mxu0 %v24762_v44  ;;  %v19041_v53 = vpop.eup %19040  ;;  %v10154_v11 = vpack.c.bf16 %v10122_v24, %v10122_v24  ;;  %v10947_v40 = vsel %vm3167_vm2, %v25119_v17, 0  ;;  %v11043_v54 = vsel %vm3167_vm2, %v25125_v49, 0  ;;  %v25128_v24 = vld [vmem:[#allocation175_spill] sm:$0xff]  ;;  %v25137_v17 = vld [vmem:[#allocation182_spill] sm:$0xff]  ;;  %v25144_v49 = vld [vmem:[#allocation64_spill] sm:$0xff] }
 0xad7   :  { %17988 = vmatmul.mubr.msk.bf16.vlgmr.msra.gmra.mrb[148].mxu1 %vm2779_vm3, %v10150_v55  ;;  %v10123_v23 = vmul.f32 %v19041_v53, %v22763_v9  ;;  %v19043_v12 = vpop.eup %19042  ;;  %v10040_v55 = vpop.xlane.xlu0 %10039 }
 0xad8   :  { %12327 = vrot.lane.b32.xlu0 %v25105_v34, %s19359_s8  ;;  %17998 = vmatpush3.bf16.msra.mxu1 %v10707_v25  ;;  %v10124_v9 = vmul.f32 %v19043_v12, %v22769_v63  ;;  %19050 = vrcp.f32 %v10040_v55  ;;  %v10043_v34 = vpop.xlane.xlu1 %10042  ;;  %v25133_v12 = vld [vmem:[#allocation62_spill] sm:$0xff] }
 0xad9   :  { %12477 = vrot.lane.b32.xlu1 %v25106_v2, %s19359_s8  ;;  %17999 = vmatprep.mubr.msk.bf16.mxu1 %vm19357_vm0, %v24762_v44  ;;  %v10155_v42 = vpack.c.bf16 %v10123_v23, %v10123_v23  ;;  %v10995_v2 = vsel %vm3167_vm2, %v25122_v10, 0  ;;  %19052 = vrcp.f32 %v10043_v34  ;;  %v25132_v23 = vld [vmem:[#allocation56_spill] sm:$0xff]  ;;  %v25139_v34 = vld [vmem:[#allocation66_spill] sm:$0xff] }
 0xada   :  { %18009 = vmatprep.subr.bf16.mxu1 %v24762_v44  ;;  %v19045_v26 = vpop.eup %19044  ;;  %v10156_v63 = vpack.c.bf16 %v10124_v9, %v10124_v9  ;;  %v25135_v9 = vld [vmem:[#allocation55_spill] sm:$0xff] }
 0xadb   :  { %17994 = vmatmul.mubr.msk.bf16.vlgmr.msra.gmra.mrb[112].mxu0 %vm2779_vm3, %v10151_v32  ;;  %v10125_v25 = vmul.f32 %v19045_v26, %v22772_v39  ;;  %v19047_v32 = vpop.eup %19046 }
 0xadc   :  { %12325 = vrot.lane.b32.xlu0 %v25108_v0, %s19359_s8  ;;  %18004 = vmatpush3.bf16.msra.mxu0 %v10755_v57  ;;  %v10126_v39 = vmul.f32 %v19047_v32, %v22779_v62  ;;  %v10046_v57 = vpop.xlane.xlu0 %10045  ;;  %v25124_v0 = vld [vmem:[#allocation54_spill] sm:$0xff]  ;;  %v10049_v56 = vpop.xlane.xlu1 %10048  ;;  %v25140_v32 = vld [vmem:[#allocation179_spill] sm:$0xff] }
 0xadd   :  { %12475 = vrot.lane.b32.xlu1 %v25109_v6, %s19359_s8  ;;  %18005 = vmatprep.mubr.msk.bf16.mxu0 %vm19357_vm0, %v24762_v44  ;;  %v10157_v27 = vpack.c.bf16 %v10125_v25, %v10125_v25  ;;  %19054 = vrcp.f32 %v10046_v57  ;;  %v25126_v6 = vld [vmem:[#allocation51_spill] sm:$0xff]  ;;  %v11283_v10 = vsel %vm3167_vm2, %v25140_v32, 0 }
 0xade   :  { %18015 = vmatprep.subr.bf16.mxu0 %v24762_v44  ;;  %v10158_v62 = vpack.c.bf16 %v10126_v39, %v10126_v39  ;;  %19056 = vrcp.f32 %v10049_v56  ;;  %v25146_v56 = vld [vmem:[#allocation181_spill] sm:$0xff] }
 0xadf   :  { %18000 = vmatmul.mubr.msk.bf16.vlgmr.msra.gmra.mrb[152].mxu1 %vm2779_vm3, %v10152_v1  ;;  %v19049_v1 = vpop.eup %19048 }
 0xae0   :  { %12427 = vrot.lane.b32.xlu0 %v25111_v46, %s19359_s8  ;;  %18010 = vmatpush3.bf16.msra.mxu1 %v10803_v30  ;;  %v10127_v47 = vmul.f32 %v19049_v1, %v22781_v28  ;;  %v25127_v30 = vld [vmem:[#allocation58_spill] sm:$0xff]  ;;  %v10052_v53 = vpop.xlane.xlu0 %10051 }
 0xae1   :  { %12577 = vrot.lane.b32.xlu1 %v25112_v16, %s19359_s8  ;;  %18011 = vmatprep.mubr.msk.bf16.mxu1 %vm19357_vm0, %v24762_v44  ;;  %19058 = vrcp.f32 %v10052_v53 }
 0xae2   :  { %18021 = vmatprep.subr.bf16.mxu1 %v24762_v44  ;;  %v19051_v46 = vpop.eup %19050  ;;  %v10159_v16 = vpack.c.bf16 %v10127_v47, %v10127_v47 }
 0xae3   :  { %18006 = vmatmul.mubr.msk.bf16.vlgmr.msra.gmra.mrb[116].mxu0 %vm2779_vm3, %v10153_v4  ;;  %v11091_v4 = vsel %vm3167_vm2, %v25128_v24, 0  ;;  %v10128_v28 = vmul.f32 %v19051_v46, %v22788_v60  ;;  %v25147_v46 = vld [vmem:[#allocation63_spill] sm:$0xff] }
 0xae4   :  { %12425 = vrot.lane.b32.xlu0 %v25114_v7, %s19359_s8  ;;  %18016 = vmatpush3.bf16.msra.mxu0 %v10851_v33  ;;  %v19053_v33 = vpop.eup %19052  ;;  %v25131_v7 = vld [vmem:[#allocation180_spill] sm:$0xff]  ;;  %v10058_v55 = vpop.xlane.xlu0 %10057 }
 0xae5   :  { %12575 = vrot.lane.b32.xlu1 %v25115_v50, %s19359_s8  ;;  %18017 = vmatprep.mubr.msk.bf16.mxu0 %vm19357_vm0, %v24762_v44  ;;  %v10160_v60 = vpack.c.bf16 %v10128_v28, %v10128_v28  ;;  %v10129_v29 = vmul.f32 %v19053_v33, %v22790_v43  ;;  %v10055_v50 = vpop.xlane.xlu1 %10054 }
 0xae6   :  { %18027 = vmatprep.subr.bf16.mxu0 %v24762_v44  ;;  %19060 = vrcp.f32 %v10055_v50  ;;  %v25153_v50 = vld [vmem:[#allocation67_spill] sm:$0xff] }
 0xae7   :  { %18012 = vmatmul.mubr.msk.bf16.vlgmr.msra.gmra.mrb[156].mxu1 %vm2779_vm3, %v10154_v11  ;;  %v11139_v11 = vsel %vm3167_vm2, %v25131_v7, 0  ;;  %v19055_v13 = vpop.eup %19054  ;;  %19062 = vrcp.f32 %v10058_v55  ;;  %v25151_v7 = vld [vmem:[#allocation74_spill] sm:$0xff] }
 0xae8   :  { %12527 = vrot.lane.b32.xlu0 %v25117_v37, %s19359_s8  ;;  %18022 = vmatpush3.bf16.msra.mxu1 %v10899_v48  ;;  %v25134_v48 = vld [vmem:[#allocation177_spill] sm:$0xff]  ;;  %v10130_v43 = vmul.f32 %v19055_v13, %v22797_v59  ;;  %v19057_v26 = vpop.eup %19056  ;;  %v10064_v39 = vpop.xlane.xlu0 %10063 }
 0xae9   :  { %12677 = vrot.lane.b32.xlu1 %v25118_v41, %s19359_s8  ;;  %18023 = vmatprep.mubr.msk.bf16.mxu1 %vm19357_vm0, %v24762_v44  ;;  %v11187_v37 = vsel %vm3167_vm2, %v25134_v48, 0  ;;  %v25136_v41 = vld [vmem:[#allocation61_spill] sm:$0xff]  ;;  %v10061_v25 = vpop.xlane.xlu1 %10060 }
 0xaea   :  { %18033 = vmatprep.subr.bf16.mxu1 %v24762_v44  ;;  %v10162_v59 = vpack.c.bf16 %v10130_v43, %v10130_v43  ;;  %19064 = vrcp.f32 %v10061_v25  ;;  %v25154_v13 = vld [vmem:[#allocation73_spill] sm:$0xff]  ;;  %v25155_v43 = vld [vmem:[#allocation72_spill] sm:$0xff] }
 0xaeb   :  { %18018 = vmatmul.mubr.msk.bf16.vlgmr.msra.gmra.mrb[120].mxu0 %vm2779_vm3, %v10155_v42  ;;  %v10161_v42 = vpack.c.bf16 %v10129_v29, %v10129_v29  ;;  %19066 = vrcp.f32 %v10064_v39  ;;  %v25161_v39 = vld [vmem:[#allocation75_spill] sm:$0xff] }
 0xaec   :  { %12525 = vrot.lane.b32.xlu0 %v25120_v20, %s19359_s8  ;;  %18028 = vmatpush3.bf16.msra.mxu0 %v10947_v40  ;;  %v11235_v40 = vsel %vm3167_vm2, %v25137_v17, 0  ;;  %v25138_v20 = vld [vmem:[#allocation60_spill] sm:$0xff] }
 0xaed   :  { %12675 = vrot.lane.b32.xlu1 %v25121_v36, %s19359_s8  ;;  %18029 = vmatprep.mubr.msk.bf16.mxu0 %vm19357_vm0, %v24762_v44  ;;  %v19059_v36 = vpop.eup %19058 }
 0xaee   :  { %18039 = vmatprep.subr.bf16.mxu0 %v24762_v44 }
 0xaef   :  { %18024 = vmatmul.mubr.msk.bf16.vlgmr.msra.gmra.mrb[160].mxu1 %vm2779_vm3, %v10156_v63  ;;  %v10131_v63 = vmul.f32 %v19057_v26, %v22799_v58  ;;  %v10132_v58 = vmul.f32 %v19059_v36, %v22806_v18 }
 0xaf0   :  { %12627 = vrot.lane.b32.xlu0 %v25123_v35, %s19359_s8  ;;  %18034 = vmatpush3.bf16.msra.mxu1 %v10995_v2  ;;  %v25141_v2 = vld [vmem:[#allocation59_spill] sm:$0xff]  ;;  %v19061_v57 = vpop.eup %19060 }
 0xaf1   :  { %12777 = vrot.lane.b32.xlu1 %v25124_v0, %s19359_s8  ;;  %18035 = vmatprep.mubr.msk.bf16.mxu1 %vm19357_vm0, %v24762_v44  ;;  %v10163_v35 = vpack.c.bf16 %v10131_v63, %v10131_v63  ;;  %v25143_v0 = vld [vmem:[#allocation184_spill] sm:$0xff]  ;;  %v10164_v18 = vpack.c.bf16 %v10132_v58, %v10132_v58  ;;  %v19063_v47 = vpop.eup %19062  ;;  %v25158_v63 = vld [vmem:[#allocation77_spill] sm:$0xff] }
 0xaf2   :  { %18045 = vmatprep.subr.bf16.mxu1 %v24762_v44  ;;  %v11331_v1 = vsel %vm3167_vm2, %v25143_v0, 0 }
 0xaf3   :  { %18030 = vmatmul.mubr.msk.bf16.vlgmr.msra.gmra.mrb[124].mxu0 %vm2779_vm3, %v10157_v27  ;;  %v25142_v27 = vld [vmem:[#allocation65_spill] sm:$0xff] }
 0xaf4   :  { %12625 = vrot.lane.b32.xlu0 %v25126_v6, %s19359_s8  ;;  %18040 = vmatpush3.bf16.msra.mxu0 %v11043_v54  ;;  %v10133_v54 = vmul.f32 %v19061_v57, %v22808_v22  ;;  %v10067_v6 = vpop.xlane.xlu1 %10066  ;;  %v10134_v22 = vmul.f32 %v19063_v47, %v22815_v15  ;;  %v19065_v28 = vpop.eup %19064  ;;  %v25162_v57 = vld [vmem:[#allocation98_spill] sm:$0xff]  ;;  %v25164_v47 = vld [vmem:[#allocation100_spill] sm:$0xff] }
 0xaf5   :  { %12775 = vrot.lane.b32.xlu1 %v25127_v30, %s19359_s8  ;;  %18041 = vmatprep.mubr.msk.bf16.mxu0 %vm19357_vm0, %v24762_v44  ;;  %v11379_v30 = vsel %vm3167_vm2, %v25146_v56, 0  ;;  %19068 = vrcp.f32 %v10067_v6  ;;  %v10135_v33 = vmul.f32 %v19065_v28, %v22821_v51 }
 0xaf6   :  { %18051 = vmatprep.subr.bf16.mxu0 %v24762_v44  ;;  %v10165_v24 = vpack.c.bf16 %v10133_v54, %v10133_v54  ;;  %v10166_v15 = vpack.c.bf16 %v10134_v22, %v10134_v22  ;;  %v25163_v54 = vld [vmem:[#allocation95_spill] sm:$0xff]  ;;  %v25166_v22 = vld [vmem:[#allocation102_spill] sm:$0xff] }
 0xaf7   :  { %18036 = vmatmul.mubr.msk.bf16.vlgmr.msra.gmra.mrb[164].mxu1 %vm2779_vm3, %v10158_v62  ;;  %v25145_v62 = vld [vmem:[#allocation70_spill] sm:$0xff] }
 0xaf8   :  { %12727 = vrot.lane.b32.xlu0 %v25129_v5, %s19359_s8  ;;  %18046 = vmatpush3.bf16.msra.mxu1 %v11091_v4  ;;  %v10070_v4 = vpop.xlane.xlu0 %10069  ;;  %v25148_v5 = vld [vmem:[#allocation69_spill] sm:$0xff]  ;;  %v11662_v29 = vpop.permute.xlu1 %11661 }
 0xaf9   :  { %12877 = vrot.lane.b32.xlu1 %v25130_v21, %s19359_s8  ;;  %18047 = vmatprep.mubr.msk.bf16.mxu1 %vm19357_vm0, %v24762_v44  ;;  %19070 = vrcp.f32 %v10070_v4  ;;  %v25150_v21 = vld [vmem:[#allocation68_spill] sm:$0xff] }
 0xafa   :  { %18057 = vmatprep.subr.bf16.mxu1 %v24762_v44 }
 0xafb   :  { %18042 = vmatmul.mubr.msk.bf16.vlgmr.msra.gmra.mrb[128].mxu0 %vm2779_vm3, %v10159_v16  ;;  %v25149_v16 = vld [vmem:[#allocation183_spill] sm:$0xff] }
 0xafc   :  { %12725 = vrot.lane.b32.xlu0 %v25132_v23, %s19359_s8  ;;  %18052 = vmatpush3.bf16.msra.mxu0 %v11139_v11  ;;  %v11427_v53 = vsel %vm3167_vm2, %v25149_v16, 0  ;;  %v19067_v11 = vpop.eup %19066  ;;  %v25152_v23 = vld [vmem:[#allocation185_spill] sm:$0xff]  ;;  %v25168_v16 = vld [vmem:[#allocation104_spill] sm:$0xff] }
 0xafd   :  { %12875 = vrot.lane.b32.xlu1 %v25133_v12, %s19359_s8  ;;  %18053 = vmatprep.mubr.msk.bf16.mxu0 %vm19357_vm0, %v24762_v44  ;;  %v10136_v51 = vmul.f32 %v19067_v11, %v22823_v8  ;;  %v10167_v12 = vpack.c.bf16 %v10135_v33, %v10135_v33 }
 0xafe   :  { %18063 = vmatprep.subr.bf16.mxu0 %v24762_v44 }
 0xaff   :  { %18048 = vmatmul.mubr.msk.bf16.vlgmr.msra.gmra.mrb[168].mxu1 %vm2779_vm3, %v10160_v60  ;;  %v11475_v60 = vsel %vm3167_vm2, %v25152_v23, 0  ;;  %v19069_v48 = vpop.eup %19068 }
 0xb00   :  { %12827 = vrot.lane.b32.xlu0 %v25135_v9, %s19359_s8  ;;  %18058 = vmatpush3.bf16.msra.mxu1 %v11187_v37  ;;  %v11523_v37 = vsel %vm3167_vm2, %v22908_v38, 0  ;;  %v11614_v9 = vpop.permute.xlu0 %11613  ;;  %v10137_v55 = vmul.f32 %v19069_v48, %v22829_v14  ;;  %v11571_v38 = vsel %vm3167_vm2, %v22902_v3, 0 }
 0xb01   :  { %12977 = vrot.lane.b32.xlu1 %v25136_v41, %s19359_s8  ;;  %18059 = vmatprep.mubr.msk.bf16.mxu1 %vm19357_vm0, %v24762_v44  ;;  %v25156_v41 = vld [vmem:[#allocation78_spill] sm:$0xff]  ;;  %v11619_v3 = vsel %vm3167_vm2, %v11614_v9, 0 }
 0xb02   :  { %18069 = vmatprep.subr.bf16.mxu1 %v24762_v44 }
 0xb03   :  { %18054 = vmatmul.mubr.msk.bf16.vlgmr.msra.gmra.mrb[132].mxu0 %vm2779_vm3, %v10161_v42  ;;  %v10168_v42 = vpack.c.bf16 %v10136_v51, %v10136_v51  ;;  %v19071_v26 = vpop.eup %19070 }
 0xb04   :  { %12825 = vrot.lane.b32.xlu0 %v25138_v20, %s19359_s8  ;;  %18064 = vmatpush3.bf16.msra.mxu0 %v11235_v40  ;;  %v25157_v40 = vld [vmem:[#allocation71_spill] sm:$0xff]  ;;  %v10169_v20 = vpack.c.bf16 %v10137_v55, %v10137_v55  ;;  %v25176_v55 = vld [vmem:[#allocation81_spill] sm:$0xff] }
 0xb05   :  { %12975 = vrot.lane.b32.xlu1 %v25139_v34, %s19359_s8  ;;  %18065 = vmatprep.mubr.msk.bf16.mxu0 %vm19357_vm0, %v24762_v44  ;;  %v25159_v34 = vld [vmem:[#allocation76_spill] sm:$0xff] }
 0xb06   :  { %18075 = vmatprep.subr.bf16.mxu0 %v24762_v44 }
 0xb07   :  { %18060 = vmatmul.mubr.msk.bf16.vlgmr.msra.gmra.mrb[172].mxu1 %vm2779_vm3, %v10162_v59  ;;  %v10138_v59 = vmul.f32 %v19071_v26, %v22833_v19  ;;  %v25160_v19 = vld [vmem:[#allocation96_spill] sm:$0xff] }
 0xb08   :  { %12927 = vrot.lane.b32.xlu0 %v25141_v2, %s19359_s8  ;;  %18070 = vmatpush3.bf16.msra.mxu1 %v11283_v10  ;;  %v11667_v2 = vsel %vm3167_vm2, %v11662_v29, 0 }
 0xb09   :  { %13077 = vrot.lane.b32.xlu1 %v25142_v27, %s19359_s8  ;;  %18071 = vmatprep.mubr.msk.bf16.mxu1 %vm19357_vm0, %v24762_v44  ;;  %v10170_v32 = vpack.c.bf16 %v10138_v59, %v10138_v59  ;;  %v25179_v59 = vld [vmem:[#allocation79_spill] sm:$0xff] }
 0xb0a   :  { %18081 = vmatprep.subr.bf16.mxu1 %v24762_v44 }
 0xb0b   :  { %18066 = vmatmul.mubr.msk.bf16.vlgmr.msra.gmra.mrb[136].mxu0 %vm2779_vm3, %v10163_v35 }
 0xb0c   :  { %12925 = vrot.lane.b32.xlu0 %v25144_v49, %s19359_s8  ;;  %18076 = vmatpush3.bf16.msra.mxu0 %v11331_v1 }
 0xb0d   :  { %13075 = vrot.lane.b32.xlu1 %v25145_v62, %s19359_s8  ;;  %18077 = vmatprep.mubr.msk.bf16.mxu0 %vm19357_vm0, %v24762_v44 }
 0xb0e   :  { %18087 = vmatprep.subr.bf16.mxu0 %v24762_v44 }
 0xb0f   :  { %18072 = vmatmul.mubr.msk.bf16.vlgmr.msra.gmra.mrb[176].mxu1 %vm2779_vm3, %v10164_v18 }
 0xb10   :  { %13027 = vrot.lane.b32.xlu0 %v25147_v46, %s19359_s8  ;;  %18082 = vmatpush3.bf16.msra.mxu1 %v11379_v30  ;;  %v25165_v30 = vld [vmem:[#allocation97_spill] sm:$0xff] }
 0xb11   :  { %13177 = vrot.lane.b32.xlu1 %v25148_v5, %s19359_s8  ;;  %18083 = vmatprep.mubr.msk.bf16.mxu1 %vm19357_vm0, %v24762_v44  ;;  %v25167_v5 = vld [vmem:[#allocation99_spill] sm:$0xff] }
 0xb12   :  { %18093 = vmatprep.subr.bf16.mxu1 %v24762_v44 }
 0xb13   :  { %18078 = vmatmul.mubr.msk.bf16.vlgmr.msra.gmra.mrb[140].mxu0 %vm2779_vm3, %v10165_v24 }
 0xb14   :  { %13025 = vrot.lane.b32.xlu0 %v25150_v21, %s19359_s8  ;;  %18088 = vmatpush3.bf16.msra.mxu0 %v11427_v53 }
 0xb15   :  { %13175 = vrot.lane.b32.xlu1 %v25151_v7, %s19359_s8  ;;  %18089 = vmatprep.mubr.msk.bf16.mxu0 %vm19357_vm0, %v24762_v44  ;;  %v25170_v7 = vld [vmem:[#allocation106_spill] sm:$0xff] }
 0xb16   :  { %18099 = vmatprep.subr.bf16.mxu0 %v24762_v44 }
 0xb17   :  { %18084 = vmatmul.mubr.msk.bf16.vlgmr.msra.gmra.mrb[180].mxu1 %vm2779_vm3, %v10166_v15  ;;  %v25169_v15 = vld [vmem:[#allocation101_spill] sm:$0xff] }
 0xb18   :  { %13127 = vrot.lane.b32.xlu0 %v25153_v50, %s19359_s8  ;;  %18094 = vmatpush3.bf16.msra.mxu1 %v11475_v60  ;;  %v25171_v60 = vld [vmem:[#allocation103_spill] sm:$0xff]  ;;  %v25172_v50 = vld [vmem:[#allocation108_spill] sm:$0xff] }
 0xb19   :  { %13277 = vrot.lane.b32.xlu1 %v25154_v13, %s19359_s8  ;;  %18095 = vmatprep.mubr.msk.bf16.mxu1 %vm19357_vm0, %v24762_v44  ;;  %v25173_v13 = vld [vmem:[#allocation105_spill] sm:$0xff] }
 0xb1a   :  { %18105 = vmatprep.subr.bf16.mxu1 %v24762_v44 }
 0xb1b   :  { %18090 = vmatmul.mubr.msk.bf16.vlgmr.msra.gmra.mrb[144].mxu0 %vm2779_vm3, %v10167_v12 }
 0xb1c   :  { %13125 = vrot.lane.b32.xlu0 %v25155_v43, %s19359_s8  ;;  %18100 = vmatpush3.bf16.msra.mxu0 %v11523_v37  ;;  %v10073_v8 = vpop.xlane.xlu1 %10072  ;;  %v25174_v37 = vld [vmem:[#allocation82_spill] sm:$0xff] }
 0xb1d   :  { %13275 = vrot.lane.b32.xlu1 %v25156_v41, %s19359_s8  ;;  %19072 = vrcp.f32 %v10073_v8  ;;  %18101 = vmatprep.mubr.msk.bf16.mxu0 %vm19357_vm0, %v24762_v44  ;;  %v25175_v8 = vld [vmem:[#allocation107_spill] sm:$0xff] }
 0xb1e   :  { %18111 = vmatprep.subr.bf16.mxu0 %v24762_v44 }
 0xb1f   :  { %v10076_v17 = vpop.xlane.xlu0 %10075  ;;  %18096 = vmatmul.mubr.msk.bf16.vlgmr.msra.gmra.mrb[184].mxu1 %vm2779_vm3, %v10168_v42 }
 0xb20   :  { %19074 = vrcp.f32 %v10076_v17  ;;  %13227 = vrot.lane.b32.xlu0 %v25157_v40, %s19359_s8  ;;  %18106 = vmatpush3.bf16.msra.mxu1 %v11571_v38  ;;  %v11778_v14 = vpop.permute.xlu1 %11777  ;;  %v25177_v38 = vld [vmem:[#allocation80_spill] sm:$0xff] }
 0xb21   :  { %13757 = vrot.lane.b32.xlu1 %v25158_v63, %s19359_s8  ;;  %18107 = vmatprep.mubr.msk.bf16.mxu1 %vm19357_vm0, %v24762_v44  ;;  %v11783_v56 = vsel %vm1306_vm1, %v11778_v14, 0  ;;  %v25178_v40 = vld [vmem:[#allocation84_spill] sm:$0xff] }
 0xb22   :  { %18117 = vmatprep.subr.bf16.mxu1 %v24762_v44 }
 0xb23   :  { %v11728_v25 = vpop.permute.xlu0 %11727  ;;  %18102 = vmatmul.mubr.msk.bf16.vlgmr.msra.gmra.mrb[148].mxu0 %vm2779_vm3, %v10169_v20 }
 0xb24   :  { %13225 = vrot.lane.b32.xlu0 %v25159_v34, %s19359_s8  ;;  %18112 = vmatpush3.bf16.msra.mxu0 %v11619_v3  ;;  %v11776_v36 = vpop.permute.xlu1 %11775  ;;  %v25180_v3 = vld [vmem:[#allocation86_spill] sm:$0xff] }
 0xb25   :  { %13853 = vrot.lane.b32.xlu1 %v25160_v19, %s19359_s8  ;;  %18113 = vmatprep.mubr.msk.bf16.mxu0 %vm19357_vm0, %v24762_v44 }
 0xb26   :  { %18123 = vmatprep.subr.bf16.mxu0 %v24762_v44 }
 0xb27   :  { %v19073_v10 = vpop.eup %19072  ;;  %v11726_v58 = vpop.permute.xlu0 %11725  ;;  %18108 = vmatmul.mubr.msk.bf16.vlgmr.msra.gmra.mrb[188].mxu1 %vm2779_vm3, %v10170_v32 }
 0xb28   :  { %v10139_v35 = vmul.f32 %v19073_v10, %v22855_v45  ;;  %13709 = vrot.lane.b32.xlu0 %v25161_v39, %s19359_s8  ;;  %18118 = vmatpush3.bf16.msra.mxu1 %v11667_v2  ;;  %v11878_v27 = vpop.permute.xlu1 %11877  ;;  %v11733_v45 = vsel %vm1306_vm1, %v11728_v25, 0  ;;  %v25182_v2 = vld [vmem:[#allocation24_spill] sm:$0xff] }
 0xb29   :  { %13949 = vrot.lane.b32.xlu1 %v25162_v57, %s19359_s8  ;;  %18119 = vmatprep.mubr.msk.bf16.mxu1 %vm19357_vm0, %v24762_v44  ;;  %v11883_v21 = vsel %vm1306_vm1, %v11878_v27, 0 }
 0xb2a   :  { %v19075_v0 = vpop.eup %19074  ;;  %v10171_v1 = vpack.c.bf16 %v10139_v35, %v10139_v35  ;;  %18129 = vmatprep.subr.bf16.mxu1 %v24762_v44 }
 0xb2b   :  { %v10140_v49 = vmul.f32 %v19075_v0, %v22860_v52  ;;  %v11828_v18 = vpop.permute.xlu0 %11827 }
 0xb2c   :  { %13805 = vrot.lane.b32.xlu0 %v25163_v54, %s19359_s8  ;;  %18114 = vmatmul.mubr.msk.bf16.vlgmr.msra.gmra.mrb[152].mxu0 %vm2779_vm3, %v10171_v1  ;;  %v11876_v6 = vpop.permute.xlu1 %11875  ;;  %v11833_v4 = vsel %vm1306_vm1, %v11828_v18, 0 }
 0xb2d   :  { %v10172_v62 = vpack.c.bf16 %v10140_v49, %v10140_v49  ;;  %14045 = vrot.lane.b32.xlu1 %v25164_v47, %s19359_s8  ;;  %18124 = vmatpush3.bf16.xpose.msra.mxu0 %v11733_v45 }
 0xb2e   :  { %18125 = vmatprep.mubr.msk.bf16.mxu0 %vm19357_vm0, %v24762_v44  ;;  %18135 = vmatprep.subr.bf16.mxu0 %v24762_v44 }
 0xb2f   :  { %v11826_v52 = vpop.permute.xlu0 %11825  ;;  %18120 = vmatmul.mubr.msk.bf16.vlgmr.msra.gmra.mrb[192].mxu1 %vm2779_vm3, %v10172_v62 }
 0xb30   :  { %13901 = vrot.lane.b32.xlu0 %v25165_v30, %s19359_s8  ;;  %v11978_v46 = vpop.permute.xlu1 %11977  ;;  %18131 = vmatprep.mubr.msk.bf16.mxu1 %vm19357_vm0, %v24762_v44 }
 0xb31   :  { %14141 = vrot.lane.b32.xlu1 %v25166_v22, %s19359_s8  ;;  %18130 = vmatpush3.bf16.xpose.msra.mxu1 %v11783_v56  ;;  %v11983_v12 = vsel %vm1306_vm1, %v11978_v46, 0 }
 0xb32   :  { %18141 = vmatprep.subr.bf16.mxu1 %v24762_v44 }
 0xb33   :  { %v11928_v24 = vpop.permute.xlu0 %11927 }
 0xb34   :  { %13997 = vrot.lane.b32.xlu0 %v25167_v5, %s19359_s8  ;;  %18126 = vmatmul.mubr.msk.bf16.vlgmr.msra.gmra.mrb[156].mxu0 %vm1306_vm1, %v11726_v58  ;;  %v11976_v28 = vpop.permute.xlu1 %11975  ;;  %v11933_v23 = vsel %vm1306_vm1, %v11928_v24, 0 }
 0xb35   :  { %14237 = vrot.lane.b32.xlu1 %v25168_v16, %s19359_s8  ;;  %18136 = vmatpush3.bf16.xpose.msra.mxu0 %v11833_v4 }
 0xb36   :  { %18137 = vmatprep.mubr.msk.bf16.mxu0 %vm19357_vm0, %v24762_v44  ;;  %18147 = vmatprep.subr.bf16.mxu0 %v24762_v44 }
 0xb37   :  { %v11926_v53 = vpop.permute.xlu0 %11925 }
 0xb38   :  { %14093 = vrot.lane.b32.xlu0 %v25169_v15, %s19359_s8  ;;  %18132 = vmatmul.mubr.msk.bf16.vlgmr.msra.gmra.mrb[196].mxu1 %vm1306_vm1, %v11776_v36  ;;  %v12078_v33 = vpop.permute.xlu1 %12077  ;;  %v25181_v36 = vld [vmem:[#allocation23_spill] sm:$0xff] }
 0xb39   :  { %14333 = vrot.lane.b32.xlu1 %v25170_v7, %s19359_s8  ;;  %18142 = vmatpush3.bf16.xpose.msra.mxu1 %v11883_v21  ;;  %v12083_v26 = vsel %vm1306_vm1, %v12078_v33, 0 }
 0xb3a   :  { %18143 = vmatprep.mubr.msk.bf16.mxu1 %vm19357_vm0, %v24762_v44  ;;  %18153 = vmatprep.subr.bf16.mxu1 %v24762_v44 }
 0xb3b   :  { %v12028_v11 = vpop.permute.xlu0 %12027 }
 0xb3c   :  { %14189 = vrot.lane.b32.xlu0 %v25171_v60, %s19359_s8  ;;  %18138 = vmatmul.mubr.msk.bf16.vlgmr.msra.gmra.mrb[160].mxu0 %vm1306_vm1, %v11826_v52  ;;  %v12076_v29 = vpop.permute.xlu1 %12075  ;;  %v12033_v43 = vsel %vm1306_vm1, %v12028_v11, 0 }
 0xb3d   :  { %14429 = vrot.lane.b32.xlu1 %v25172_v50, %s19359_s8  ;;  %18148 = vmatpush3.bf16.xpose.msra.mxu0 %v11933_v23 }
 0xb3e   :  { %18149 = vmatprep.mubr.msk.bf16.mxu0 %vm19357_vm0, %v24762_v44  ;;  %18159 = vmatprep.subr.bf16.mxu0 %v24762_v44 }
 0xb3f   :  { %v12026_v51 = vpop.permute.xlu0 %12025 }
 0xb40   :  { %14285 = vrot.lane.b32.xlu0 %v25173_v13, %s19359_s8  ;;  %18144 = vmatmul.mubr.msk.bf16.vlgmr.msra.gmra.mrb[200].mxu1 %vm1306_vm1, %v11876_v6  ;;  %v12178_v48 = vpop.permute.xlu1 %12177 }
 0xb41   :  { %14525 = vrot.lane.b32.xlu1 %v25174_v37, %s19359_s8  ;;  %18154 = vmatpush3.bf16.xpose.msra.mxu1 %v11983_v12  ;;  %v12183_v34 = vsel %vm1306_vm1, %v12178_v48, 0 }
 0xb42   :  { %18155 = vmatprep.mubr.msk.bf16.mxu1 %vm19357_vm0, %v24762_v44  ;;  %18165 = vmatprep.subr.bf16.mxu1 %v24762_v44 }
 0xb43   :  { %v12128_v9 = vpop.permute.xlu0 %12127 }
 0xb44   :  { %14381 = vrot.lane.b32.xlu0 %v25175_v8, %s19359_s8  ;;  %18150 = vmatmul.mubr.msk.bf16.vlgmr.msra.gmra.mrb[164].mxu0 %vm1306_vm1, %v11926_v53  ;;  %v12176_v42 = vpop.permute.xlu1 %12175  ;;  %v12133_v20 = vsel %vm1306_vm1, %v12128_v9, 0 }
 0xb45   :  { %14621 = vrot.lane.b32.xlu1 %v25176_v55, %s19359_s8  ;;  %18160 = vmatpush3.bf16.xpose.msra.mxu0 %v12033_v43 }
 0xb46   :  { %18161 = vmatprep.mubr.msk.bf16.mxu0 %vm19357_vm0, %v24762_v44  ;;  %18171 = vmatprep.subr.bf16.mxu0 %v24762_v44 }
 0xb47   :  { %v12126_v41 = vpop.permute.xlu0 %12125 }
 0xb48   :  { %14477 = vrot.lane.b32.xlu0 %v25177_v38, %s19359_s8  ;;  %18156 = vmatmul.mubr.msk.bf16.vlgmr.msra.gmra.mrb[204].mxu1 %vm1306_vm1, %v11976_v28  ;;  %v12278_v17 = vpop.permute.xlu1 %12277 }
 0xb49   :  { %14717 = vrot.lane.b32.xlu1 %v25178_v40, %s19359_s8  ;;  %18166 = vmatpush3.bf16.xpose.msra.mxu1 %v12083_v26  ;;  %v12283_v39 = vsel %vm1306_vm1, %v12278_v17, 0 }
 0xb4a   :  { %18167 = vmatprep.mubr.msk.bf16.mxu1 %vm19357_vm0, %v24762_v44  ;;  %18177 = vmatprep.subr.bf16.mxu1 %v24762_v44 }
 0xb4b   :  { %v12228_v14 = vpop.permute.xlu0 %12227 }
 0xb4c   :  { %14573 = vrot.lane.b32.xlu0 %v25179_v59, %s19359_s8  ;;  %18162 = vmatmul.mubr.msk.bf16.vlgmr.msra.gmra.mrb[168].mxu0 %vm1306_vm1, %v12026_v51  ;;  %v12276_v63 = vpop.permute.xlu1 %12275  ;;  %v12233_v10 = vsel %vm1306_vm1, %v12228_v14, 0 }
 0xb4d   :  { %14813 = vrot.lane.b32.xlu1 %v25180_v3, %s19359_s8  ;;  %18172 = vmatpush3.bf16.xpose.msra.mxu0 %v12133_v20 }
 0xb4e   :  { %18173 = vmatprep.mubr.msk.bf16.mxu0 %vm19357_vm0, %v24762_v44  ;;  %18183 = vmatprep.subr.bf16.mxu0 %v24762_v44 }
 0xb4f   :  { %v12226_v25 = vpop.permute.xlu0 %12225 }
 0xb50   :  { %14669 = vrot.lane.b32.xlu0 %v25181_v36, %s19359_s8  ;;  %18168 = vmatmul.mubr.msk.bf16.vlgmr.msra.gmra.mrb[208].mxu1 %vm1306_vm1, %v12076_v29  ;;  %v12378_v32 = vpop.permute.xlu1 %12377 }
 0xb51   :  { %18178 = vmatpush3.bf16.xpose.msra.mxu1 %v12183_v34  ;;  %18179 = vmatprep.mubr.msk.bf16.mxu1 %vm19357_vm0, %v24762_v44  ;;  %v12383_v30 = vsel %vm1306_vm1, %v12378_v32, 0 }
 0xb52   :  { %18189 = vmatprep.subr.bf16.mxu1 %v24762_v44 }
 0xb53   :  { %v12328_v19 = vpop.permute.xlu0 %12327 }
 0xb54   :  { %14765 = vrot.lane.b32.xlu0 %v25182_v2, %s19359_s8  ;;  %18174 = vmatmul.mubr.msk.bf16.vlgmr.msra.gmra.mrb[172].mxu0 %vm1306_vm1, %v12126_v41  ;;  %v12376_v58 = vpop.permute.xlu1 %12375  ;;  %v12333_v18 = vsel %vm1306_vm1, %v12328_v19, 0 }
 0xb55   :  { %18184 = vmatpush3.bf16.xpose.msra.mxu0 %v12233_v10  ;;  %18185 = vmatprep.mubr.msk.bf16.mxu0 %vm19357_vm0, %v24762_v44 }
 0xb56   :  { %18195 = vmatprep.subr.bf16.mxu0 %v24762_v44 }
 0xb57   :  { %v12326_v35 = vpop.permute.xlu0 %12325 }
 0xb58   :  { %18180 = vmatmul.mubr.msk.bf16.vlgmr.msra.gmra.mrb[212].mxu1 %vm1306_vm1, %v12176_v42  ;;  %v12478_v27 = vpop.permute.xlu1 %12477 }
 0xb59   :  { %18190 = vmatpush3.bf16.xpose.msra.mxu1 %v12283_v39  ;;  %v23298_v57 = vpop.f32.mrb[92].mxu0  ;;  %18191 = vmatprep.mubr.msk.bf16.mxu1 %vm19357_vm0, %v24762_v44  ;;  %v12483_v60 = vsel %vm1306_vm1, %v12478_v27, 0 }
 0xb5a   :  { %v17935_v0 = vpop.f32.mrb[93].mxu0  ;;  %18201 = vmatprep.subr.bf16.mxu1 %v24762_v44 }
 0xb5b   :  { %v12428_v1 = vpop.permute.xlu0 %12427  ;;  %v10218_v49 = vpop.f32.mrb[94].mxu0 }
 0xb5c   :  { %18186 = vmatmul.mubr.msk.bf16.vlgmr.msra.gmra.mrb[176].mxu0 %vm1306_vm1, %v12226_v25  ;;  %v12476_v45 = vpop.permute.xlu1 %12475  ;;  %v17936_v54 = vpop.f32.mrb[95].mxu0  ;;  %v12433_v16 = vsel %vm1306_vm1, %v12428_v1, 0 }
 0xb5d   :  { %v23305_v6 = vpop.f32.mrb[132].mxu1  ;;  %18196 = vmatpush3.bf16.xpose.msra.mxu0 %v12333_v18  ;;  %18197 = vmatprep.mubr.msk.bf16.mxu0 %vm19357_vm0, %v24762_v44 }
 0xb5e   :  { %v17941_v47 = vpop.f32.mrb[133].mxu1  ;;  %18207 = vmatprep.subr.bf16.mxu0 %v24762_v44 }
 0xb5f   :  { %v12426_v52 = vpop.permute.xlu0 %12425  ;;  %v10266_v56 = vpop.f32.mrb[134].mxu1 }
 0xb60   :  { %v17942_v46 = vpop.f32.mrb[135].mxu1  ;;  %18192 = vmatmul.mubr.msk.bf16.vlgmr.msra.gmra.mrb[216].mxu1 %vm1306_vm1, %v12276_v63  ;;  %v12578_v22 = vpop.permute.xlu1 %12577 }
 0xb61   :  { %18202 = vmatpush3.bf16.xpose.msra.mxu1 %v12383_v30  ;;  %v23314_v24 = vpop.f32.mrb[96].mxu0  ;;  %18203 = vmatprep.mubr.msk.bf16.mxu1 %vm19357_vm0, %v24762_v44  ;;  %v12583_v42 = vsel %vm1306_vm1, %v12578_v22, 0 }
 0xb62   :  { %v17947_v4 = vpop.f32.mrb[97].mxu0  ;;  %18213 = vmatprep.subr.bf16.mxu1 %v24762_v44 }
 0xb63   :  { %v12528_v5 = vpop.permute.xlu0 %12527  ;;  %v10314_v28 = vpop.f32.mrb[98].mxu0 }
 0xb64   :  { %18198 = vmatmul.mubr.msk.bf16.vlgmr.msra.gmra.mrb[180].mxu0 %vm1306_vm1, %v12326_v35  ;;  %v12576_v53 = vpop.permute.xlu1 %12575  ;;  %v17948_v21 = vpop.f32.mrb[99].mxu0  ;;  %v12533_v37 = vsel %vm1306_vm1, %v12528_v5, 0 }
 0xb65   :  { %18208 = vmatpush3.bf16.xpose.msra.mxu0 %v12433_v16  ;;  %v23321_v15 = vpop.f32.mrb[136].mxu1  ;;  %18209 = vmatprep.mubr.msk.bf16.mxu0 %vm19357_vm0, %v24762_v44 }
 0xb66   :  { %v17953_v7 = vpop.f32.mrb[137].mxu1  ;;  %18219 = vmatprep.subr.bf16.mxu0 %v24762_v44 }
 0xb67   :  { %v12526_v11 = vpop.permute.xlu0 %12525  ;;  %v10362_v23 = vpop.f32.mrb[138].mxu1 }
 0xb68   :  { %18204 = vmatmul.mubr.msk.bf16.vlgmr.msra.gmra.mrb[220].mxu1 %vm1306_vm1, %v12376_v58  ;;  %v17954_v29 = vpop.f32.mrb[139].mxu1  ;;  %v12678_v50 = vpop.permute.xlu1 %12677 }
 0xb69   :  { %18214 = vmatpush3.bf16.xpose.msra.mxu1 %v12483_v60  ;;  %v23330_v51 = vpop.f32.mrb[100].mxu0  ;;  %18215 = vmatprep.mubr.msk.bf16.mxu1 %vm19357_vm0, %v24762_v44  ;;  %v12683_v40 = vsel %vm1306_vm1, %v12678_v50, 0 }
 0xb6a   :  { %v17959_v12 = vpop.f32.mrb[101].mxu0  ;;  %18225 = vmatprep.subr.bf16.mxu1 %v24762_v44 }
 0xb6b   :  { %v12628_v13 = vpop.permute.xlu0 %12627  ;;  %v10410_v48 = vpop.f32.mrb[102].mxu0 }
 0xb6c   :  { %18210 = vmatmul.mubr.msk.bf16.vlgmr.msra.gmra.mrb[184].mxu0 %vm1306_vm1, %v12426_v52  ;;  %v12676_v9 = vpop.permute.xlu1 %12675  ;;  %v17960_v43 = vpop.f32.mrb[103].mxu0  ;;  %v12633_v26 = vsel %vm1306_vm1, %v12628_v13, 0 }
 0xb6d   :  { %18220 = vmatpush3.bf16.xpose.msra.mxu0 %v12533_v37  ;;  %18221 = vmatprep.mubr.msk.bf16.mxu0 %vm19357_vm0, %v24762_v44 }
 0xb6e   :  { %18231 = vmatprep.subr.bf16.mxu0 %v24762_v44 }
 0xb6f   :  { %v12626_v8 = vpop.permute.xlu0 %12625 }
 0xb70   :  { %18216 = vmatmul.mubr.msk.bf16.vlgmr.msra.gmra.mrb[224].mxu1 %vm1306_vm1, %v12476_v45  ;;  %v12778_v55 = vpop.permute.xlu1 %12777 }
 0xb71   :  { %18226 = vmatpush3.bf16.xpose.msra.mxu1 %v12583_v42  ;;  %18227 = vmatprep.mubr.msk.bf16.mxu1 %vm19357_vm0, %v24762_v44  ;;  %v12783_v25 = vsel %vm1306_vm1, %v12778_v55, 0 }
 0xb72   :  { %18237 = vmatprep.subr.bf16.mxu1 %v24762_v44 }
 0xb73   :  { %v12728_v41 = vpop.permute.xlu0 %12727 }
 0xb74   :  { %18222 = vmatmul.mubr.msk.bf16.vlgmr.msra.gmra.mrb[188].mxu0 %vm1306_vm1, %v12526_v11  ;;  %v12776_v38 = vpop.permute.xlu1 %12775  ;;  %v12733_v59 = vsel %vm1306_vm1, %v12728_v41, 0 }
 0xb75   :  { %18232 = vmatpush3.bf16.xpose.msra.mxu0 %v12633_v26  ;;  %18233 = vmatprep.mubr.msk.bf16.mxu0 %vm19357_vm0, %v24762_v44 }
 0xb76   :  { %18243 = vmatprep.subr.bf16.mxu0 %v24762_v44 }
 0xb77   :  { %v12726_v17 = vpop.permute.xlu0 %12725 }
 0xb78   :  { %18228 = vmatmul.mubr.msk.bf16.vlgmr.msra.gmra.mrb[228].mxu1 %vm1306_vm1, %v12576_v53  ;;  %v12878_v14 = vpop.permute.xlu1 %12877 }
 0xb79   :  { %18238 = vmatpush3.bf16.xpose.msra.mxu1 %v12683_v40  ;;  %18239 = vmatprep.mubr.msk.bf16.mxu1 %vm19357_vm0, %v24762_v44  ;;  %v12883_v2 = vsel %vm1306_vm1, %v12878_v14, 0 }
 0xb7a   :  { %18249 = vmatprep.subr.bf16.mxu1 %v24762_v44 }
 0xb7b   :  { %v12828_v20 = vpop.permute.xlu0 %12827 }
 0xb7c   :  { %18234 = vmatmul.mubr.msk.bf16.vlgmr.msra.gmra.mrb[192].mxu0 %vm1306_vm1, %v12626_v8  ;;  %v12876_v63 = vpop.permute.xlu1 %12875  ;;  %v12833_v32 = vsel %vm1306_vm1, %v12828_v20, 0 }
 0xb7d   :  { %18244 = vmatpush3.bf16.xpose.msra.mxu0 %v12733_v59  ;;  %18245 = vmatprep.mubr.msk.bf16.mxu0 %vm19357_vm0, %v24762_v44 }
 0xb7e   :  { %18255 = vmatprep.subr.bf16.mxu0 %v24762_v44 }
 0xb7f   :  { %v12826_v3 = vpop.permute.xlu0 %12825 }
 0xb80   :  { %18240 = vmatmul.mubr.msk.bf16.vlgmr.msra.gmra.mrb[232].mxu1 %vm1306_vm1, %v12676_v9  ;;  %v12978_v34 = vpop.permute.xlu1 %12977 }
 0xb81   :  { %18250 = vmatpush3.bf16.xpose.msra.mxu1 %v12783_v25  ;;  %18251 = vmatprep.mubr.msk.bf16.mxu1 %vm19357_vm0, %v24762_v44  ;;  %v12983_v1 = vsel %vm1306_vm1, %v12978_v34, 0 }
 0xb82   :  { %18261 = vmatprep.subr.bf16.mxu1 %v24762_v44 }
 0xb83   :  { %v12928_v36 = vpop.permute.xlu0 %12927 }
 0xb84   :  { %18246 = vmatmul.mubr.msk.bf16.vlgmr.msra.gmra.mrb[196].mxu0 %vm1306_vm1, %v12726_v17  ;;  %v12976_v19 = vpop.permute.xlu1 %12975  ;;  %v12933_v39 = vsel %vm1306_vm1, %v12928_v36, 0 }
 0xb85   :  { %18256 = vmatpush3.bf16.xpose.msra.mxu0 %v12833_v32  ;;  %18257 = vmatprep.mubr.msk.bf16.mxu0 %vm19357_vm0, %v24762_v44 }
 0xb86   :  { %18267 = vmatprep.subr.bf16.mxu0 %v24762_v44 }
 0xb87   :  { %v12926_v10 = vpop.permute.xlu0 %12925 }
 0xb88   :  { %18252 = vmatmul.mubr.msk.bf16.vlgmr.msra.gmra.mrb[236].mxu1 %vm1306_vm1, %v12776_v38  ;;  %v13078_v58 = vpop.permute.xlu1 %13077 }
 0xb89   :  { %18262 = vmatpush3.bf16.xpose.msra.mxu1 %v12883_v2  ;;  %18263 = vmatprep.mubr.msk.bf16.mxu1 %vm19357_vm0, %v24762_v44  ;;  %v13083_v47 = vsel %vm1306_vm1, %v13078_v58, 0 }
 0xb8a   :  { %18273 = vmatprep.subr.bf16.mxu1 %v24762_v44 }
 0xb8b   :  { %v13028_v35 = vpop.permute.xlu0 %13027 }
 0xb8c   :  { %18258 = vmatmul.mubr.msk.bf16.vlgmr.msra.gmra.mrb[200].mxu0 %vm1306_vm1, %v12826_v3  ;;  %v13076_v27 = vpop.permute.xlu1 %13075  ;;  %v13033_v18 = vsel %vm1306_vm1, %v13028_v35, 0 }
 0xb8d   :  { %18268 = vmatpush3.bf16.xpose.msra.mxu0 %v12933_v39  ;;  %18269 = vmatprep.mubr.msk.bf16.mxu0 %vm19357_vm0, %v24762_v44 }
 0xb8e   :  { %18279 = vmatprep.subr.bf16.mxu0 %v24762_v44 }
 0xb8f   :  { %v13026_v0 = vpop.permute.xlu0 %13025 }
 0xb90   :  { %18264 = vmatmul.mubr.msk.bf16.vlgmr.msra.gmra.mrb[240].mxu1 %vm1306_vm1, %v12876_v63  ;;  %v13178_v45 = vpop.permute.xlu1 %13177 }
 0xb91   :  { %18274 = vmatpush3.bf16.xpose.msra.mxu1 %v12983_v1  ;;  %18275 = vmatprep.mubr.msk.bf16.mxu1 %vm19357_vm0, %v24762_v44  ;;  %v13183_v21 = vsel %vm1306_vm1, %v13178_v45, 0 }
 0xb92   :  { %18285 = vmatprep.subr.bf16.mxu1 %v24762_v44 }
 0xb93   :  { %v13128_v49 = vpop.permute.xlu0 %13127 }
 0xb94   :  { %18270 = vmatmul.mubr.msk.bf16.vlgmr.msra.gmra.mrb[204].mxu0 %vm1306_vm1, %v12926_v10  ;;  %v13176_v56 = vpop.permute.xlu1 %13175  ;;  %v13133_v22 = vsel %vm1306_vm1, %v13128_v49, 0 }
 0xb95   :  { %18280 = vmatpush3.bf16.xpose.msra.mxu0 %v13033_v18  ;;  %18281 = vmatprep.mubr.msk.bf16.mxu0 %vm19357_vm0, %v24762_v44 }
 0xb96   :  { %18291 = vmatprep.subr.bf16.mxu0 %v24762_v44 }
 0xb97   :  { %v13126_v54 = vpop.permute.xlu0 %13125 }
 0xb98   :  { %18276 = vmatmul.mubr.msk.bf16.vlgmr.msra.gmra.mrb[244].mxu1 %vm1306_vm1, %v12976_v19  ;;  %v13278_v11 = vpop.permute.xlu1 %13277 }
 0xb99   :  { %18286 = vmatpush3.bf16.xpose.msra.mxu1 %v13083_v47  ;;  %18287 = vmatprep.mubr.msk.bf16.mxu1 %vm19357_vm0, %v24762_v44  ;;  %v13283_v42 = vsel %vm1306_vm1, %v13278_v11, 0 }
 0xb9a   :  { %v23394_v52 = vpop.f32.mrb[140].mxu1  ;;  %18297 = vmatprep.subr.bf16.mxu1 %v24762_v44 }
 0xb9b   :  { %v17965_v46 = vpop.f32.mrb[141].mxu1  ;;  %v13228_v5 = vpop.permute.xlu0 %13227 }
 0xb9c   :  { %v10458_v4 = vpop.f32.mrb[142].mxu1  ;;  %18282 = vmatmul.mubr.msk.bf16.vlgmr.msra.gmra.mrb[208].mxu0 %vm1306_vm1, %v13026_v0  ;;  %v13233_v13 = vsel %vm1306_vm1, %v13228_v5, 0  ;;  %v13276_v43 = vpop.permute.xlu1 %13275 }
 0xb9d   :  { %18292 = vmatpush3.bf16.xpose.msra.mxu0 %v13133_v22  ;;  %v17966_v28 = vpop.f32.mrb[143].mxu1  ;;  %18293 = vmatprep.mubr.msk.bf16.mxu0 %vm19357_vm0, %v24762_v44 }
 0xb9e   :  { %v23403_v16 = vpop.f32.mrb[104].mxu0  ;;  %18303 = vmatprep.subr.bf16.mxu0 %v24762_v44 }
 0xb9f   :  { %v17971_v53 = vpop.f32.mrb[105].mxu0  ;;  %v13226_v29 = vpop.permute.xlu0 %13225 }
 0xba0   :  { %18288 = vmatmul.mubr.msk.bf16.vlgmr.msra.gmra.mrb[248].mxu1 %vm1306_vm1, %v13076_v27  ;;  %v10506_v7 = vpop.f32.mrb[106].mxu0  ;;  %v13758_v59 = vpop.permute.xlu1 %13757 }
 0xba1   :  { %18298 = vmatpush3.bf16.xpose.msra.mxu1 %v13183_v21  ;;  %v17972_v23 = vpop.f32.mrb[107].mxu0  ;;  %18299 = vmatprep.mubr.msk.bf16.mxu1 %vm19357_vm0, %v24762_v44  ;;  %v13763_v34 = vsel %vm3167_vm2, %v13758_v59, 0 }
 0xba2   :  { %v23410_v60 = vpop.f32.mrb[144].mxu1  ;;  %18309 = vmatprep.subr.bf16.mxu1 %v24762_v44 }
 0xba3   :  { %v17977_v12 = vpop.f32.mrb[145].mxu1  ;;  %v13710_v41 = vpop.permute.xlu0 %13709 }
 0xba4   :  { %v10554_v48 = vpop.f32.mrb[146].mxu1  ;;  %18294 = vmatmul.mubr.msk.bf16.vlgmr.msra.gmra.mrb[212].mxu0 %vm1306_vm1, %v13126_v54  ;;  %v13715_v14 = vsel %vm3167_vm2, %v13710_v41, 0 }
 0xba5   :  { %18304 = vmatpush3.bf16.xpose.msra.mxu0 %v13233_v13  ;;  %v17978_v37 = vpop.f32.mrb[147].mxu1  ;;  %18305 = vmatprep.mubr.msk.bf16.mxu0 %vm19357_vm0, %v24762_v44 }
 0xba6   :  { %v23419_v9 = vpop.f32.mrb[108].mxu0  ;;  %18315 = vmatprep.subr.bf16.mxu0 %v24762_v44 }
 0xba7   :  { %25183 = vst [vmem:[#allocation31_spill] sm:$0xff] %v23419_v9  ;;  %v17983_v8 = vpop.f32.mrb[109].mxu0 }
 0xba8   :  { %18300 = vmatmul.mubr.msk.bf16.vlgmr.msra.gmra.mrb[252].mxu1 %vm1306_vm1, %v13176_v56  ;;  %v10602_v55 = vpop.f32.mrb[110].mxu0 }
 0xba9   :  { %18310 = vmatpush3.bf16.xpose.msra.mxu1 %v13283_v42  ;;  %v17984_v26 = vpop.f32.mrb[111].mxu0  ;;  %18311 = vmatprep.mubr.msk.bf16.mxu1 %vm19357_vm0, %v24762_v44 }
 0xbaa   :  { %v23426_v38 = vpop.f32.mrb[148].mxu1  ;;  %18321 = vmatprep.subr.bf16.mxu1 %v24762_v44 }
 0xbab   :  { %v17989_v40 = vpop.f32.mrb[149].mxu1 }
 0xbac   :  { %v10650_v20 = vpop.f32.mrb[150].mxu1  ;;  %18306 = vmatmul.mubr.msk.bf16.vlgmr.msra.gmra.mrb[216].mxu0 %vm1306_vm1, %v13226_v29 }
 0xbad   :  { %18316 = vmatpush3.bf16.msra.mxu0 %v13715_v14  ;;  %v17990_v63 = vpop.f32.mrb[151].mxu1  ;;  %18317 = vmatprep.mubr.msk.bf16.mxu0 %vm19357_vm0, %v24762_v44 }
 0xbae   :  { %v23435_v3 = vpop.f32.mrb[112].mxu0  ;;  %18327 = vmatprep.subr.bf16.mxu0 %v24762_v44 }
 0xbaf   :  { %25184 = vst [vmem:[#allocation26_spill] sm:$0xff] %v23435_v3  ;;  %v17995_v25 = vpop.f32.mrb[113].mxu0 }
 0xbb0   :  { %18312 = vmatmul.mubr.msk.bf16.vlgmr.msra.gmra.mrb[0].mxu1 %vm1306_vm1, %v13276_v43  ;;  %v10698_v36 = vpop.f32.mrb[114].mxu0 }
 0xbb1   :  { %18322 = vmatpush3.bf16.msra.mxu1 %v13763_v34  ;;  %v17996_v32 = vpop.f32.mrb[115].mxu0  ;;  %18323 = vmatprep.mubr.msk.bf16.mxu1 %vm19357_vm0, %v24762_v44 }
 0xbb2   :  { %v23442_v19 = vpop.f32.mrb[152].mxu1  ;;  %18333 = vmatprep.subr.bf16.mxu1 %v24762_v44 }
 0xbb3   :  { %25185 = vst [vmem:[#allocation32_spill] sm:$0xff] %v23442_v19  ;;  %v18001_v2 = vpop.f32.mrb[153].mxu1 }
 0xbb4   :  { %v10746_v58 = vpop.f32.mrb[154].mxu1 }
 0xbb5   :  { %v18002_v35 = vpop.f32.mrb[155].mxu1 }
 0xbb6   :  { %v23447_v39 = vpop.f32.mrb[116].mxu0 }
 0xbb7   :  { %25186 = vst [vmem:[#allocation29_spill] sm:$0xff] %v23447_v39  ;;  %v18007_v27 = vpop.f32.mrb[117].mxu0 }
 0xbb8   :  { %v10794_v0 = vpop.f32.mrb[118].mxu0 }
 0xbb9   :  { %v18008_v1 = vpop.f32.mrb[119].mxu0 }
 0xbba   :  { %v23449_v49 = vpop.f32.mrb[156].mxu1 }
 0xbbb   :  { %25187 = vst [vmem:[#allocation35_spill] sm:$0xff] %v23449_v49  ;;  %v18013_v45 = vpop.f32.mrb[157].mxu1 }
 0xbbc   :  { %v10842_v54 = vpop.f32.mrb[158].mxu1 }
 0xbbd   :  { %v18014_v47 = vpop.f32.mrb[159].mxu1 }
 0xbbe   :  { %v23453_v56 = vpop.f32.mrb[120].mxu0 }
 0xbbf   :  { %25188 = vst [vmem:[#allocation30_spill] sm:$0xff] %v23453_v56  ;;  %v18019_v46 = vpop.f32.mrb[121].mxu0 }
 0xbc0   :  { %v10890_v22 = vpop.f32.mrb[122].mxu0 }
 0xbc1   :  { %v18020_v4 = vpop.f32.mrb[123].mxu0 }
 0xbc2   :  { %v23455_v5 = vpop.f32.mrb[160].mxu1 }
 0xbc3   :  { %25189 = vst [vmem:[#allocation34_spill] sm:$0xff] %v23455_v5  ;;  %v18025_v53 = vpop.f32.mrb[161].mxu1 }
 0xbc4   :  { %v10938_v21 = vpop.f32.mrb[162].mxu1 }
 0xbc5   :  { %v18026_v7 = vpop.f32.mrb[163].mxu1 }
 0xbc6   :  { %v23459_v11 = vpop.f32.mrb[124].mxu0 }
 0xbc7   :  { %25190 = vst [vmem:[#allocation33_spill] sm:$0xff] %v23459_v11  ;;  %v18031_v23 = vpop.f32.mrb[125].mxu0 }
 0xbc8   :  { %v10986_v29 = vpop.f32.mrb[126].mxu0 }
 0xbc9   :  { %v18032_v12 = vpop.f32.mrb[127].mxu0 }
 0xbca   :  { %v23461_v13 = vpop.f32.mrb[164].mxu1 }
 0xbcb   :  { %25191 = vst [vmem:[#allocation37_spill] sm:$0xff] %v23461_v13  ;;  %v18037_v37 = vpop.f32.mrb[165].mxu1 }
 0xbcc   :  { %v11034_v43 = vpop.f32.mrb[166].mxu1 }
 0xbcd   :  { %v18038_v8 = vpop.f32.mrb[167].mxu1 }
 0xbce   :  { %v23465_v42 = vpop.f32.mrb[128].mxu0 }
 0xbcf   :  { %25192 = vst [vmem:[#allocation165_spill] sm:$0xff] %v23465_v42  ;;  %v18043_v55 = vpop.f32.mrb[129].mxu0 }
 0xbd0   :  { %v11082_v41 = vpop.f32.mrb[130].mxu0 }
 0xbd1   :  { %v18044_v26 = vpop.f32.mrb[131].mxu0 }
 0xbd2   :  { %v23467_v40 = vpop.f32.mrb[168].mxu1 }
 0xbd3   :  { %25193 = vst [vmem:[#allocation16_spill] sm:$0xff] %v23467_v40  ;;  %v18049_v20 = vpop.f32.mrb[169].mxu1 }
 0xbd4   :  { %v11130_v59 = vpop.f32.mrb[170].mxu1 }
 0xbd5   :  { %v18050_v63 = vpop.f32.mrb[171].mxu1 }
 0xbd6   :  { %v23471_v25 = vpop.f32.mrb[132].mxu0 }
 0xbd7   :  { %25194 = vst [vmem:[#allocation36_spill] sm:$0xff] %v23471_v25  ;;  %v18055_v34 = vpop.f32.mrb[133].mxu0 }
 0xbd8   :  { %v11178_v36 = vpop.f32.mrb[134].mxu0 }
 0xbd9   :  { %v18056_v32 = vpop.f32.mrb[135].mxu0 }
 0xbda   :  { %v23473_v2 = vpop.f32.mrb[172].mxu1 }
 0xbdb   :  { %25195 = vst [vmem:[#allocation168_spill] sm:$0xff] %v23473_v2  ;;  %v18061_v35 = vpop.f32.mrb[173].mxu1 }
 0xbdc   :  { %v11226_v27 = vpop.f32.mrb[174].mxu1 }
 0xbdd   :  { %v18062_v0 = vpop.f32.mrb[175].mxu1 }
 0xbde   :  { %v23477_v1 = vpop.f32.mrb[136].mxu0 }
 0xbdf   :  { %25196 = vst [vmem:[#allocation17_spill] sm:$0xff] %v23477_v1  ;;  %v18067_v45 = vpop.f32.mrb[137].mxu0 }
 0xbe0   :  { %v11274_v54 = vpop.f32.mrb[138].mxu0 }
 0xbe1   :  { %v18068_v47 = vpop.f32.mrb[139].mxu0 }
 0xbe2   :  { %v23479_v46 = vpop.f32.mrb[176].mxu1 }
 0xbe3   :  { %25197 = vst [vmem:[#allocation39_spill] sm:$0xff] %v23479_v46  ;;  %v18073_v4 = vpop.f32.mrb[177].mxu1 }
 0xbe4   :  { %v11322_v53 = vpop.f32.mrb[178].mxu1 }
 0xbe5   :  { %v18074_v21 = vpop.f32.mrb[179].mxu1 }
 0xbe6   :  { %v23483_v7 = vpop.f32.mrb[140].mxu0 }
 0xbe7   :  { %25198 = vst [vmem:[#allocation166_spill] sm:$0xff] %v23483_v7  ;;  %v18079_v23 = vpop.f32.mrb[141].mxu0 }
 0xbe8   :  { %v11370_v29 = vpop.f32.mrb[142].mxu0 }
 0xbe9   :  { %v18080_v12 = vpop.f32.mrb[143].mxu0 }
 0xbea   :  { %v23485_v37 = vpop.f32.mrb[180].mxu1 }
 0xbeb   :  { %25199 = vst [vmem:[#allocation18_spill] sm:$0xff] %v23485_v37  ;;  %v18085_v8 = vpop.f32.mrb[181].mxu1 }
 0xbec   :  { %v11418_v55 = vpop.f32.mrb[182].mxu1 }
 0xbed   :  { %v18086_v41 = vpop.f32.mrb[183].mxu1 }
 0xbee   :  { %v23489_v26 = vpop.f32.mrb[144].mxu0 }
 0xbef   :  { %25200 = vst [vmem:[#allocation38_spill] sm:$0xff] %v23489_v26  ;;  %v18091_v20 = vpop.f32.mrb[145].mxu0 }
 0xbf0   :  { %v11466_v59 = vpop.f32.mrb[146].mxu0 }
 0xbf1   :  { %v18092_v63 = vpop.f32.mrb[147].mxu0 }
 0xbf2   :  { %v23491_v34 = vpop.f32.mrb[184].mxu1 }
 0xbf3   :  { %25201 = vst [vmem:[#allocation170_spill] sm:$0xff] %v23491_v34  ;;  %v18097_v32 = vpop.f32.mrb[185].mxu1 }
 0xbf4   :  { %v11514_v35 = vpop.f32.mrb[186].mxu1 }
 0xbf5   :  { %v18098_v27 = vpop.f32.mrb[187].mxu1 }
 0xbf6   :  { %v23495_v0 = vpop.f32.mrb[148].mxu0 }
 0xbf7   :  { %25202 = vst [vmem:[#allocation19_spill] sm:$0xff] %v23495_v0  ;;  %v18103_v45 = vpop.f32.mrb[149].mxu0 }
 0xbf8   :  { %v11562_v54 = vpop.f32.mrb[150].mxu0 }
 0xbf9   :  { %v18104_v47 = vpop.f32.mrb[151].mxu0 }
 0xbfa   :  { %v23497_v4 = vpop.f32.mrb[188].mxu1 }
 0xbfb   :  { %25203 = vst [vmem:[#allocation40_spill] sm:$0xff] %v23497_v4  ;;  %v18109_v21 = vpop.f32.mrb[189].mxu1 }
 0xbfc   :  { %v11610_v23 = vpop.f32.mrb[190].mxu1 }
 0xbfd   :  { %v18110_v29 = vpop.f32.mrb[191].mxu1 }
 0xbff   :  { %v23501_v12 = vpop.f32.mrb[152].mxu0 }
 0xc00   :  { %25204 = vst [vmem:[#allocation167_spill] sm:$0xff] %v23501_v12  ;;  %v18115_v8 = vpop.f32.mrb[153].mxu0 }
 0xc01   :  { %v11658_v55 = vpop.f32.mrb[154].mxu0 }
 0xc02   :  { %v18116_v41 = vpop.f32.mrb[155].mxu0  ;;  %v23503_v20 = vpop.f32.mrb[192].mxu1 }
 0xc03   :  { %25205 = vst [vmem:[#allocation20_spill] sm:$0xff] %v23503_v20  ;;  %v18121_v63 = vpop.f32.mrb[193].mxu1 }
 0xc04   :  { %v11706_v32 = vpop.f32.mrb[194].mxu1 }
 0xc05   :  { %v18122_v35 = vpop.f32.mrb[195].mxu1 }
 0xc07   :  { %v23507_v27 = vpop.f32.mrb[156].mxu0 }
 0xc08   :  { %v18127_v45 = vpop.f32.mrb[157].mxu0  ;;  %v13325_v54 = vsel %vm2779_vm3, %v23507_v27, -inf }
 0xc09   :  { %13326 = vmax.xlane.f32.xlu0 %v13325_v54  ;;  %v11772_v47 = vpop.f32.mrb[158].mxu0 }
 0xc0a   :  { %v18128_v21 = vpop.f32.mrb[159].mxu0 }
 0xc0b   :  { %v23511_v23 = vpop.f32.mrb[196].mxu1 }
 0xc0c   :  { %v18133_v29 = vpop.f32.mrb[197].mxu1  ;;  %v13328_v8 = vsel %vm2779_vm3, %v23511_v23, -inf }
 0xc0d   :  { %13329 = vmax.xlane.f32.xlu1 %v13328_v8  ;;  %v11822_v55 = vpop.f32.mrb[198].mxu1 }
 0xc0e   :  { %v18134_v41 = vpop.f32.mrb[199].mxu1 }
 0xc0f   :  { %v23515_v63 = vpop.f32.mrb[160].mxu0 }
 0xc10   :  { %v18139_v32 = vpop.f32.mrb[161].mxu0  ;;  %v13331_v35 = vsel %vm2779_vm3, %v23515_v63, -inf }
 0xc11   :  { %13332 = vmax.xlane.f32.xlu0 %v13331_v35  ;;  %v11872_v45 = vpop.f32.mrb[162].mxu0 }
 0xc12   :  { %v18140_v54 = vpop.f32.mrb[163].mxu0 }
 0xc13   :  { %v23519_v47 = vpop.f32.mrb[200].mxu1 }
 0xc14   :  { %v18145_v21 = vpop.f32.mrb[201].mxu1  ;;  %v13334_v29 = vsel %vm2779_vm3, %v23519_v47, -inf }
 0xc15   :  { %v11922_v59 = vpop.f32.mrb[202].mxu1  ;;  %13335 = vmax.xlane.f32.xlu0 %v13334_v29 }
 0xc16   :  { %v18146_v8 = vpop.f32.mrb[203].mxu1 }
 0xc17   :  { %v23523_v55 = vpop.f32.mrb[164].mxu0 }
 0xc18   :  { %v18151_v41 = vpop.f32.mrb[165].mxu0  ;;  %v13337_v32 = vsel %vm2779_vm3, %v23523_v55, -inf }
 0xc19   :  { %13338 = vmax.xlane.f32.xlu0 %v13337_v32  ;;  %v11972_v53 = vpop.f32.mrb[166].mxu0 }
 0xc1a   :  { %v18152_v35 = vpop.f32.mrb[167].mxu0 }
 0xc1b   :  { %v23527_v45 = vpop.f32.mrb[204].mxu1 }
 0xc1c   :  { %v18157_v54 = vpop.f32.mrb[205].mxu1  ;;  %v13340_v21 = vsel %vm2779_vm3, %v23527_v45, -inf }
 0xc1d   :  { %13341 = vmax.xlane.f32.xlu1 %v13340_v21  ;;  %v12022_v36 = vpop.f32.mrb[206].mxu1 }
 0xc1e   :  { %v18158_v59 = vpop.f32.mrb[207].mxu1 }
 0xc1f   :  { %v23531_v29 = vpop.f32.mrb[168].mxu0 }
 0xc20   :  { %v18163_v8 = vpop.f32.mrb[169].mxu0  ;;  %v13343_v41 = vsel %vm2779_vm3, %v23531_v29, -inf }
 0xc21   :  { %13344 = vmax.xlane.f32.xlu0 %v13343_v41  ;;  %v12072_v43 = vpop.f32.mrb[170].mxu0 }
 0xc22   :  { %v18164_v32 = vpop.f32.mrb[171].mxu0 }
 0xc23   :  { %v23535_v53 = vpop.f32.mrb[208].mxu1 }
 0xc24   :  { %v18169_v35 = vpop.f32.mrb[209].mxu1  ;;  %v13346_v54 = vsel %vm2779_vm3, %v23535_v53, -inf }
 0xc25   :  { %13347 = vmax.xlane.f32.xlu1 %v13346_v54  ;;  %v12122_v22 = vpop.f32.mrb[210].mxu1 }
 0xc26   :  { %v18170_v21 = vpop.f32.mrb[211].mxu1 }
 0xc27   :  { %v23539_v36 = vpop.f32.mrb[172].mxu0 }
 0xc28   :  { %v18175_v59 = vpop.f32.mrb[173].mxu0  ;;  %v13349_v8 = vsel %vm2779_vm3, %v23539_v36, -inf }
 0xc29   :  { %13350 = vmax.xlane.f32.xlu0 %v13349_v8  ;;  %v12172_v58 = vpop.f32.mrb[174].mxu0 }
 0xc2a   :  { %v18176_v41 = vpop.f32.mrb[175].mxu0 }
 0xc2b   :  { %v23543_v43 = vpop.f32.mrb[212].mxu1 }
 0xc2c   :  { %v18181_v32 = vpop.f32.mrb[213].mxu1  ;;  %v13352_v35 = vsel %vm2779_vm3, %v23543_v43, -inf }
 0xc2d   :  { %13353 = vmax.xlane.f32.xlu1 %v13352_v35  ;;  %v12222_v14 = vpop.f32.mrb[214].mxu1 }
 0xc2e   :  { %v18182_v54 = vpop.f32.mrb[215].mxu1 }
 0xc2f   :  { %v23547_v22 = vpop.f32.mrb[176].mxu0 }
 0xc30   :  { %v18187_v21 = vpop.f32.mrb[177].mxu0  ;;  %v13355_v59 = vsel %vm2779_vm3, %v23547_v22, -inf }
 0xc31   :  { %13356 = vmax.xlane.f32.xlu0 %v13355_v59  ;;  %v12272_v48 = vpop.f32.mrb[178].mxu0 }
 0xc32   :  { %v18188_v8 = vpop.f32.mrb[179].mxu0 }
 0xc33   :  { %v23551_v58 = vpop.f32.mrb[216].mxu1 }
 0xc34   :  { %v18193_v41 = vpop.f32.mrb[217].mxu1  ;;  %v13358_v32 = vsel %vm2779_vm3, %v23551_v58, -inf }
 0xc35   :  { %13359 = vmax.xlane.f32.xlu1 %v13358_v32  ;;  %v12322_v28 = vpop.f32.mrb[218].mxu1 }
 0xc36   :  { %v18194_v35 = vpop.f32.mrb[219].mxu1 }
 0xc37   :  { %v23555_v14 = vpop.f32.mrb[180].mxu0 }
 0xc38   :  { %v18199_v54 = vpop.f32.mrb[181].mxu0  ;;  %v13361_v21 = vsel %vm2779_vm3, %v23555_v14, -inf }
 0xc39   :  { %13362 = vmax.xlane.f32.xlu0 %v13361_v21  ;;  %v12372_v18 = vpop.f32.mrb[182].mxu0 }
 0xc3a   :  { %v18200_v59 = vpop.f32.mrb[183].mxu0 }
 0xc3b   :  { %v23559_v48 = vpop.f32.mrb[220].mxu1 }
 0xc3c   :  { %v18205_v8 = vpop.f32.mrb[221].mxu1  ;;  %v13364_v41 = vsel %vm2779_vm3, %v23559_v48, -inf }
 0xc3d   :  { %13365 = vmax.xlane.f32.xlu1 %v13364_v41  ;;  %v12422_v10 = vpop.f32.mrb[222].mxu1 }
 0xc3e   :  { %v18206_v32 = vpop.f32.mrb[223].mxu1 }
 0xc3f   :  { %v23563_v28 = vpop.f32.mrb[184].mxu0 }
 0xc40   :  { %v18211_v35 = vpop.f32.mrb[185].mxu0  ;;  %v13367_v54 = vsel %vm2779_vm3, %v23563_v28, -inf }
 0xc41   :  { %13368 = vmax.xlane.f32.xlu0 %v13367_v54  ;;  %v12472_v17 = vpop.f32.mrb[186].mxu0 }
 0xc42   :  { %v18212_v21 = vpop.f32.mrb[187].mxu0 }
 0xc43   :  { %v23567_v18 = vpop.f32.mrb[224].mxu1 }
 0xc44   :  { %v18217_v59 = vpop.f32.mrb[225].mxu1  ;;  %v13370_v8 = vsel %vm2779_vm3, %v23567_v18, -inf }
 0xc45   :  { %13371 = vmax.xlane.f32.xlu1 %v13370_v8  ;;  %v12522_v50 = vpop.f32.mrb[226].mxu1 }
 0xc46   :  { %v18218_v41 = vpop.f32.mrb[227].mxu1 }
 0xc47   :  { %v23571_v10 = vpop.f32.mrb[188].mxu0 }
 0xc48   :  { %v18223_v32 = vpop.f32.mrb[189].mxu0  ;;  %v13373_v35 = vsel %vm2779_vm3, %v23571_v10, -inf }
 0xc49   :  { %13374 = vmax.xlane.f32.xlu0 %v13373_v35  ;;  %v12572_v30 = vpop.f32.mrb[190].mxu0 }
 0xc4a   :  { %v18224_v54 = vpop.f32.mrb[191].mxu0 }
 0xc4b   :  { %v23575_v17 = vpop.f32.mrb[228].mxu1 }
 0xc4c   :  { %v18229_v21 = vpop.f32.mrb[229].mxu1  ;;  %v13376_v59 = vsel %vm2779_vm3, %v23575_v17, -inf }
 0xc4d   :  { %13377 = vmax.xlane.f32.xlu1 %v13376_v59  ;;  %v12622_v33 = vpop.f32.mrb[230].mxu1  ;;  %v23587_v59 = vpop.permute.xlu0 %13805 }
 0xc4e   :  { %v18230_v8 = vpop.f32.mrb[231].mxu1 }
 0xc4f   :  { %v23579_v50 = vpop.f32.mrb[192].mxu0 }
 0xc50   :  { %v18235_v41 = vpop.f32.mrb[193].mxu0  ;;  %v13379_v32 = vsel %vm2779_vm3, %v23579_v50, -inf }
 0xc51   :  { %13380 = vmax.xlane.f32.xlu0 %v13379_v32  ;;  %v12672_v62 = vpop.f32.mrb[194].mxu0  ;;  %v23593_v32 = vpop.permute.xlu1 %13853 }
 0xc52   :  { %v18236_v35 = vpop.f32.mrb[195].mxu0  ;;  %v23597_v0 = vpop.permute.xlu0 %13901 }
 0xc53   :  { %v23583_v30 = vpop.f32.mrb[232].mxu1 }
 0xc54   :  { %v18241_v54 = vpop.f32.mrb[233].mxu1  ;;  %v13382_v21 = vsel %vm2779_vm3, %v23583_v30, -inf }
 0xc55   :  { %13383 = vmax.xlane.f32.xlu1 %v13382_v21  ;;  %v12722_v12 = vpop.f32.mrb[234].mxu1  ;;  %v23603_v26 = vpop.permute.xlu1 %13949 }
 0xc56   :  { %v18242_v33 = vpop.f32.mrb[235].mxu1  ;;  %25206 = vst [vmem:[#allocation42_spill] sm:$0xff] %v23603_v26  ;;  %v23607_v34 = vpop.permute.xlu0 %13997 }
 0xc57   :  { %v23589_v8 = vpop.f32.mrb[196].mxu0  ;;  %25207 = vst [vmem:[#allocation172_spill] sm:$0xff] %v23607_v34 }
 0xc58   :  { %v18247_v41 = vpop.f32.mrb[197].mxu0  ;;  %v13385_v20 = vsel %vm2779_vm3, %v23589_v8, -inf }
 0xc59   :  { %13386 = vmax.xlane.f32.xlu0 %v13385_v20  ;;  %v12772_v62 = vpop.f32.mrb[198].mxu0 }
 0xc5a   :  { %v18248_v35 = vpop.f32.mrb[199].mxu0  ;;  %v23617_v46 = vpop.permute.xlu0 %14093 }
 0xc5b   :  { %v23595_v54 = vpop.f32.mrb[236].mxu1  ;;  %25209 = vst [vmem:[#allocation45_spill] sm:$0xff] %v23617_v46 }
 0xc5c   :  { %v18253_v21 = vpop.f32.mrb[237].mxu1  ;;  %v13388_v12 = vsel %vm2779_vm3, %v23595_v54, -inf }
 0xc5d   :  { %13389 = vmax.xlane.f32.xlu1 %v13388_v12  ;;  %v12822_v33 = vpop.f32.mrb[238].mxu1 }
 0xc5e   :  { %v18254_v4 = vpop.f32.mrb[239].mxu1  ;;  %v23613_v33 = vpop.permute.xlu1 %14045 }
 0xc5f   :  { %v23601_v41 = vpop.f32.mrb[200].mxu0  ;;  %25208 = vst [vmem:[#allocation21_spill] sm:$0xff] %v23613_v33  ;;  %v23627_v42 = vpop.permute.xlu0 %14189 }
 0xc60   :  { %v18259_v20 = vpop.f32.mrb[201].mxu0  ;;  %v13391_v62 = vsel %vm2779_vm3, %v23601_v41, -inf  ;;  %25211 = vst [vmem:[#allocation41_spill] sm:$0xff] %v23627_v42 }
 0xc61   :  { %13392 = vmax.xlane.f32.xlu0 %v13391_v62  ;;  %v12872_v35 = vpop.f32.mrb[202].mxu0 }
 0xc62   :  { %v18260_v7 = vpop.f32.mrb[203].mxu0  ;;  %v23623_v2 = vpop.permute.xlu1 %14141 }
 0xc63   :  { %v23609_v21 = vpop.f32.mrb[240].mxu1  ;;  %25210 = vst [vmem:[#allocation169_spill] sm:$0xff] %v23623_v2  ;;  %v23637_v2 = vpop.permute.xlu0 %14285 }
 0xc64   :  { %v18265_v37 = vpop.f32.mrb[241].mxu1  ;;  %v13394_v12 = vsel %vm2779_vm3, %v23609_v21, -inf  ;;  %25213 = vst [vmem:[#allocation174_spill] sm:$0xff] %v23637_v2 }
 0xc65   :  { %13395 = vmax.xlane.f32.xlu1 %v13394_v12  ;;  %v12922_v4 = vpop.f32.mrb[242].mxu1 }
 0xc66   :  { %v18266_v1 = vpop.f32.mrb[243].mxu1 }
 0xc67   :  { %v23615_v20 = vpop.f32.mrb[204].mxu0 }
 0xc68   :  { %v18271_v62 = vpop.f32.mrb[205].mxu0  ;;  %v13397_v35 = vsel %vm2779_vm3, %v23615_v20, -inf }
 0xc69   :  { %13398 = vmax.xlane.f32.xlu0 %v13397_v35  ;;  %v12972_v7 = vpop.f32.mrb[206].mxu0 }
 0xc6a   :  { %v18272_v25 = vpop.f32.mrb[207].mxu0  ;;  %v23633_v7 = vpop.permute.xlu1 %14237 }
 0xc6b   :  { %v23621_v37 = vpop.f32.mrb[244].mxu1  ;;  %25212 = vst [vmem:[#allocation46_spill] sm:$0xff] %v23633_v7  ;;  %v23647_v7 = vpop.permute.xlu0 %14381 }
 0xc6c   :  { %v18277_v12 = vpop.f32.mrb[245].mxu1  ;;  %v13400_v4 = vsel %vm2779_vm3, %v23621_v37, -inf  ;;  %25215 = vst [vmem:[#allocation49_spill] sm:$0xff] %v23647_v7 }
 0xc6d   :  { %13401 = vmax.xlane.f32.xlu1 %v13400_v4  ;;  %v13022_v1 = vpop.f32.mrb[246].mxu1 }
 0xc6e   :  { %v18278_v40 = vpop.f32.mrb[247].mxu1  ;;  %v23643_v33 = vpop.permute.xlu1 %14333 }
 0xc6f   :  { %v23629_v62 = vpop.f32.mrb[208].mxu0  ;;  %25214 = vst [vmem:[#allocation43_spill] sm:$0xff] %v23643_v33  ;;  %v23657_v26 = vpop.permute.xlu0 %14477 }
 0xc70   :  { %v18283_v11 = vpop.f32.mrb[209].mxu0  ;;  %v13403_v35 = vsel %vm2779_vm3, %v23629_v62, -inf  ;;  %25217 = vst [vmem:[#allocation44_spill] sm:$0xff] %v23657_v26 }
 0xc71   :  { %13404 = vmax.xlane.f32.xlu0 %v13403_v35  ;;  %v13072_v25 = vpop.f32.mrb[210].mxu0 }
 0xc72   :  { %v18284_v13 = vpop.f32.mrb[211].mxu0 }
 0xc73   :  { %v23635_v12 = vpop.f32.mrb[248].mxu1 }
 0xc74   :  { %v18289_v4 = vpop.f32.mrb[249].mxu1  ;;  %v13406_v1 = vsel %vm2779_vm3, %v23635_v12, -inf }
 0xc75   :  { %13407 = vmax.xlane.f32.xlu1 %v13406_v1  ;;  %v13122_v40 = vpop.f32.mrb[250].mxu1 }
 0xc76   :  { %v18290_v42 = vpop.f32.mrb[251].mxu1  ;;  %v23653_v40 = vpop.permute.xlu1 %14429 }
 0xc77   :  { %v23641_v11 = vpop.f32.mrb[212].mxu0  ;;  %25216 = vst [vmem:[#allocation171_spill] sm:$0xff] %v23653_v40  ;;  %v23667_v40 = vpop.permute.xlu0 %14573 }
 0xc78   :  { %v18295_v35 = vpop.f32.mrb[213].mxu0  ;;  %v13409_v25 = vsel %vm2779_vm3, %v23641_v11, -inf  ;;  %25219 = vst [vmem:[#allocation176_spill] sm:$0xff] %v23667_v40 }
 0xc79   :  { %13410 = vmax.xlane.f32.xlu0 %v13409_v25  ;;  %v13172_v13 = vpop.f32.mrb[214].mxu0 }
 0xc7a   :  { %v18296_v2 = vpop.f32.mrb[215].mxu0  ;;  %v23663_v56 = vpop.permute.xlu1 %14525 }
 0xc7b   :  { %v23649_v4 = vpop.f32.mrb[252].mxu1  ;;  %25218 = vst [vmem:[#allocation50_spill] sm:$0xff] %v23663_v56  ;;  %v23671_v5 = vpop.permute.xlu0 %14669 }
 0xc7c   :  { %v18301_v46 = vpop.f32.mrb[253].mxu1  ;;  %v13412_v1 = vsel %vm2779_vm3, %v23649_v4, -inf  ;;  %25221 = vst [vmem:[#allocation53_spill] sm:$0xff] %v23671_v5 }
 0xc7d   :  { %13413 = vmax.xlane.f32.xlu1 %v13412_v1  ;;  %v13222_v42 = vpop.f32.mrb[254].mxu1 }
 0xc7e   :  { %v18302_v33 = vpop.f32.mrb[255].mxu1 }
 0xc7f   :  { %v23655_v35 = vpop.f32.mrb[216].mxu0 }
 0xc80   :  { %v18307_v25 = vpop.f32.mrb[217].mxu0  ;;  %v13415_v13 = vsel %vm2779_vm3, %v23655_v35, -inf }
 0xc81   :  { %13416 = vmax.xlane.f32.xlu1 %v13415_v13  ;;  %v13272_v2 = vpop.f32.mrb[218].mxu0  ;;  %v23669_v25 = vpop.permute.xlu1 %14621 }
 0xc82   :  { %v18308_v7 = vpop.f32.mrb[219].mxu0  ;;  %25220 = vst [vmem:[#allocation47_spill] sm:$0xff] %v23669_v25 }
 0xc83   :  { %v23661_v46 = vpop.f32.mrb[0].mxu1  ;;  %v23675_v7 = vpop.permute.xlu0 %14765 }
 0xc84   :  { %v18313_v1 = vpop.f32.mrb[1].mxu1  ;;  %v13418_v42 = vsel %vm2779_vm3, %v23661_v46, -inf  ;;  %25223 = vst [vmem:[#allocation48_spill] sm:$0xff] %v23675_v7 }
 0xc85   :  { %v13322_v33 = vpop.f32.mrb[2].mxu1  ;;  %13419 = vmax.xlane.f32.xlu0 %v13418_v42  ;;  %v23673_v13 = vpop.permute.xlu1 %14717 }
 0xc86   :  { %v18314_v26 = vpop.f32.mrb[3].mxu1  ;;  %25222 = vst [vmem:[#allocation173_spill] sm:$0xff] %v23673_v13 }
 0xc89   :  { %v23677_v2 = vpop.permute.xlu1 %14813 }
 0xc8a   :  { %25224 = vst [vmem:[#allocation54_spill] sm:$0xff] %v23677_v2 }
 0xc96   :  { %v13327_v56 = vpop.xlane.xlu0 %13326 }
 0xc97   :  { %v13421_v1 = vsub.f32 %v23507_v27, %v13327_v56  ;;  %v25226_v27 = vld [vmem:[#allocation85_spill] sm:$0xff] }
 0xc99   :  { %v13453_v39 = vmul.f32 1.442695, %v13421_v1 }
 0xc9a   :  { %v13330_v49 = vpop.xlane.xlu1 %13329 }
 0xc9b   :  { %19076 = vpow2.f32 %v13453_v39  ;;  %v13422_v42 = vsub.f32 %v23511_v23, %v13330_v49  ;;  %v25227_v23 = vld [vmem:[#allocation90_spill] sm:$0xff] }
 0xc9d   :  { %v13455_v33 = vmul.f32 1.442695, %v13422_v42 }
 0xc9e   :  { %v13333_v26 = vpop.xlane.xlu0 %13332 }
 0xc9f   :  { %19078 = vpow2.f32 %v13455_v33  ;;  %v13423_v25 = vsub.f32 %v23515_v63, %v13333_v26 }
 0xca1   :  { %v13457_v5 = vmul.f32 1.442695, %v13423_v25  ;;  %v25228_v25 = vld [vmem:[#allocation27_spill] sm:$0xff] }
 0xca2   :  { %v13336_v63 = vpop.xlane.xlu0 %13335 }
 0xca3   :  { %19080 = vpow2.f32 %v13457_v5  ;;  %v25225_v5 = vld [vmem:[#allocation83_spill] sm:$0xff] }
 0xca5   :  { %v23682_v13 = vpop.eup %19076 }
 0xca6   :  { %v13517_v2 = vsel %vm2779_vm3, %v23682_v13, 0.0 }
 0xca7   :  { %13518 = vadd.xlane.f32.xlu0 %v13517_v2  ;;  %v13339_v2 = vpop.xlane.xlu0 %13338 }
 0xca8   :  { %v13425_v42 = vsub.f32 %v23523_v55, %v13339_v2 }
 0xca9   :  { %v23686_v7 = vpop.eup %19078 }
 0xcaa   :  { %v13520_v39 = vsel %vm2779_vm3, %v23686_v7, 0.0  ;;  %v13342_v1 = vpop.xlane.xlu1 %13341 }
 0xcab   :  { %13521 = vadd.xlane.f32.xlu1 %v13520_v39  ;;  %v13424_v39 = vsub.f32 %v23519_v47, %v13336_v63 }
 0xcad   :  { %v23690_v49 = vpop.eup %19080  ;;  %v13459_v34 = vmul.f32 1.442695, %v13424_v39 }
 0xcae   :  { %v13523_v56 = vsel %vm2779_vm3, %v23690_v49, 0.0  ;;  %v13345_v33 = vpop.xlane.xlu0 %13344 }
 0xcaf   :  { %13524 = vadd.xlane.f32.xlu0 %v13523_v56  ;;  %v13461_v56 = vmul.f32 1.442695, %v13425_v42 }
 0xcb1   :  { %19082 = vpow2.f32 %v13461_v56 }
 0xcb2   :  { %v13348_v26 = vpop.xlane.xlu1 %13347  ;;  %19084 = vpow2.f32 %v13459_v34 }
 0xcb3   :  { %v13428_v55 = vsub.f32 %v23535_v53, %v13348_v26 }
 0xcb6   :  { %v13351_v40 = vpop.xlane.xlu0 %13350 }
 0xcbc   :  { %14909 = vrot.lane.b32.xlu1 %v25225_v5, %s19359_s8  ;;  %v13427_v5 = vsub.f32 %v23531_v29, %v13345_v33  ;;  %v13467_v29 = vmul.f32 1.442695, %v13428_v55 }
 0xcbe   :  { %v13465_v3 = vmul.f32 1.442695, %v13427_v5 }
 0xcc0   :  { %14957 = vrot.lane.b32.xlu1 %v25226_v27, %s19359_s8  ;;  %v13354_v27 = vpop.xlane.xlu1 %13353  ;;  %19086 = vpow2.f32 %v13465_v3 }
 0xcc1   :  { %v13430_v42 = vsub.f32 %v23543_v43, %v13354_v27 }
 0xcc3   :  { %v13471_v34 = vmul.f32 1.442695, %v13430_v42 }
 0xcc4   :  { %15005 = vrot.lane.b32.xlu1 %v25227_v23, %s19359_s8  ;;  %v13426_v23 = vsub.f32 %v23527_v45, %v13342_v1  ;;  %v13360_v19 = vpop.xlane.xlu1 %13359  ;;  %v13357_v45 = vpop.xlane.xlu0 %13356 }
 0xcc5   :  { %14861 = vrot.lane.b32.xlu0 %v25228_v25, %s19359_s8  ;;  %v13429_v25 = vsub.f32 %v23539_v36, %v13351_v40  ;;  %v13432_v47 = vsub.f32 %v23551_v58, %v13360_v19  ;;  %v23711_v40 = vpop.eup %19082  ;;  %v13431_v3 = vsub.f32 %v23547_v22, %v13357_v45 }
 0xcc6   :  { %v13463_v9 = vmul.f32 1.442695, %v13426_v23  ;;  %v23715_v58 = vpop.eup %19084  ;;  %v13529_v26 = vsel %vm2779_vm3, %v23711_v40, 0.0 }
 0xcc7   :  { %v13469_v2 = vmul.f32 1.442695, %v13429_v25  ;;  %v13475_v1 = vmul.f32 1.442695, %v13432_v47  ;;  %v13526_v25 = vsel %vm2779_vm3, %v23715_v58, 0.0 }
 0xcc8   :  { %19088 = vpow2.f32 %v13463_v9  ;;  %v13363_v53 = vpop.xlane.xlu0 %13362 }
 0xcc9   :  { %19090 = vpow2.f32 %v13469_v2  ;;  %v13433_v56 = vsub.f32 %v23555_v14, %v13363_v53 }
 0xcca   :  { %v13366_v63 = vpop.xlane.xlu1 %13365  ;;  %19092 = vpow2.f32 %v13467_v29  ;;  %v23719_v39 = vpop.eup %19086 }
 0xccb   :  { %v13434_v33 = vsub.f32 %v23559_v48, %v13366_v63  ;;  %19094 = vpow2.f32 %v13475_v1  ;;  %v13473_v48 = vmul.f32 1.442695, %v13431_v3  ;;  %v13535_v55 = vsel %vm2779_vm3, %v23719_v39, 0.0 }
 0xccc   :  { %19096 = vpow2.f32 %v13471_v34  ;;  %v13477_v14 = vmul.f32 1.442695, %v13433_v56 }
 0xccd   :  { %v13479_v19 = vmul.f32 1.442695, %v13434_v33 }
 0xcce   :  { %v13369_v22 = vpop.xlane.xlu0 %13368 }
 0xccf   :  { %19098 = vpow2.f32 %v13479_v19  ;;  %v13435_v47 = vsub.f32 %v23563_v28, %v13369_v22 }
 0xcd0   :  { %19100 = vpow2.f32 %v13473_v48 }
 0xcd1   :  { %v13481_v28 = vmul.f32 1.442695, %v13435_v47 }
 0xcd2   :  { %v13372_v36 = vpop.xlane.xlu1 %13371  ;;  %v23723_v23 = vpop.eup %19088 }
 0xcd3   :  { %v13436_v9 = vsub.f32 %v23567_v18, %v13372_v36  ;;  %v23729_v2 = vpop.eup %19090  ;;  %v13532_v1 = vsel %vm2779_vm3, %v23723_v23, 0.0 }
 0xcd4   :  { %v23733_v42 = vpop.eup %19092  ;;  %v13541_v33 = vsel %vm2779_vm3, %v23729_v2, 0.0 }
 0xcd5   :  { %v13483_v5 = vmul.f32 1.442695, %v13436_v9  ;;  %v23739_v36 = vpop.eup %19094  ;;  %v13538_v9 = vsel %vm2779_vm3, %v23733_v42, 0.0 }
 0xcd6   :  { %v13375_v63 = vpop.xlane.xlu0 %13374  ;;  %v23743_v19 = vpop.eup %19096 }
 0xcd7   :  { %19102 = vpow2.f32 %v13483_v5  ;;  %v13437_v34 = vsub.f32 %v23571_v10, %v13375_v63 }
 0xcd8   :  { %19104 = vpow2.f32 %v13477_v14 }
 0xcd9   :  { %v13485_v48 = vmul.f32 1.442695, %v13437_v34 }
 0xcda   :  { %v13378_v43 = vpop.xlane.xlu1 %13377 }
 0xcdb   :  { %v13438_v27 = vsub.f32 %v23575_v17, %v13378_v43  ;;  %v13550_v43 = vsel %vm2779_vm3, %v23739_v36, 0.0 }
 0xcdd   :  { %v13487_v17 = vmul.f32 1.442695, %v13438_v27 }
 0xcde   :  { %v13381_v3 = vpop.xlane.xlu0 %13380 }
 0xcdf   :  { %19106 = vpow2.f32 %v13487_v17  ;;  %v13439_v10 = vsub.f32 %v23579_v50, %v13381_v3 }
 0xce0   :  { %19108 = vpow2.f32 %v13481_v28 }
 0xce1   :  { %v13489_v50 = vmul.f32 1.442695, %v13439_v10 }
 0xce2   :  { %v13384_v18 = vpop.xlane.xlu1 %13383 }
 0xce3   :  { %v13440_v29 = vsub.f32 %v23583_v30, %v13384_v18  ;;  %v13544_v18 = vsel %vm2779_vm3, %v23743_v19, 0.0 }
 0xce4   :  { %13530 = vadd.xlane.f32.xlu0 %v13529_v26  ;;  %v23749_v26 = vpop.eup %19098 }
 0xce5   :  { %v13491_v30 = vmul.f32 1.442695, %v13440_v29 }
 0xce6   :  { %v13387_v5 = vpop.xlane.xlu0 %13386 }
 0xce7   :  { %19110 = vpow2.f32 %v13491_v30  ;;  %v13441_v14 = vsub.f32 %v23589_v8, %v13387_v5 }
 0xce8   :  { %13527 = vadd.xlane.f32.xlu1 %v13526_v25  ;;  %13536 = vadd.xlane.f32.xlu0 %v13535_v55  ;;  %v13556_v25 = vsel %vm2779_vm3, %v23749_v26, 0.0  ;;  %19112 = vpow2.f32 %v13485_v48 }
 0xcea   :  { %v13390_v45 = vpop.xlane.xlu1 %13389 }
 0xceb   :  { %v13442_v53 = vsub.f32 %v23595_v54, %v13390_v45  ;;  %v23752_v54 = vpop.eup %19100 }
 0xcec   :  { %13533 = vadd.xlane.f32.xlu1 %v13532_v1  ;;  %13542 = vadd.xlane.f32.xlu0 %v13541_v33  ;;  %v23759_v55 = vpop.eup %19102  ;;  %v13493_v1 = vmul.f32 1.442695, %v13441_v14 }
 0xced   :  { %v13495_v56 = vmul.f32 1.442695, %v13442_v53  ;;  %v23762_v63 = vpop.eup %19104  ;;  %v13562_v29 = vsel %vm2779_vm3, %v23759_v55, 0.0 }
 0xcee   :  { %v13393_v17 = vpop.xlane.xlu0 %13392  ;;  %v23768_v45 = vpop.eup %19106  ;;  %v13553_v30 = vsel %vm2779_vm3, %v23762_v63, 0.0 }
 0xcef   :  { %19114 = vpow2.f32 %v13495_v56  ;;  %v13443_v33 = vsub.f32 %v23601_v41, %v13393_v17  ;;  %v23771_v28 = vpop.eup %19108  ;;  %v13568_v53 = vsel %vm2779_vm3, %v23768_v45, 0.0 }
 0xcf0   :  { %13539 = vadd.xlane.f32.xlu1 %v13538_v9  ;;  %13551 = vadd.xlane.f32.xlu0 %v13550_v43  ;;  %19116 = vpow2.f32 %v13489_v50 }
 0xcf1   :  { %v23778_v9 = vpop.eup %19110  ;;  %v13497_v41 = vmul.f32 1.442695, %v13443_v33 }
 0xcf2   :  { %v13396_v22 = vpop.xlane.xlu1 %13395  ;;  %v23781_v10 = vpop.eup %19112 }
 0xcf3   :  { %v13444_v27 = vsub.f32 %v23609_v21, %v13396_v22  ;;  %v13547_v21 = vsel %vm2779_vm3, %v23752_v54, 0.0  ;;  %v13574_v22 = vsel %vm2779_vm3, %v23778_v9, 0.0  ;;  %v13565_v14 = vsel %vm2779_vm3, %v23781_v10, 0.0 }
 0xcf4   :  { %13545 = vadd.xlane.f32.xlu1 %v13544_v18  ;;  %13557 = vadd.xlane.f32.xlu0 %v13556_v25 }
 0xcf5   :  { %v13499_v47 = vmul.f32 1.442695, %v13444_v27 }
 0xcf6   :  { %v13399_v34 = vpop.xlane.xlu0 %13398 }
 0xcf7   :  { %19118 = vpow2.f32 %v13499_v47  ;;  %v13445_v48 = vsub.f32 %v23615_v20, %v13399_v34 }
 0xcf8   :  { %13548 = vadd.xlane.f32.xlu1 %v13547_v21  ;;  %13563 = vadd.xlane.f32.xlu0 %v13562_v29  ;;  %19120 = vpow2.f32 %v13493_v1 }
 0xcf9   :  { %v23787_v5 = vpop.eup %19114  ;;  %v13501_v27 = vmul.f32 1.442695, %v13445_v48 }
 0xcfa   :  { %v13402_v8 = vpop.xlane.xlu1 %13401  ;;  %v23790_v20 = vpop.eup %19116  ;;  %v13580_v47 = vsel %vm2779_vm3, %v23787_v5, 0.0 }
 0xcfb   :  { %v13446_v3 = vsub.f32 %v23621_v37, %v13402_v8  ;;  %v13559_v37 = vsel %vm2779_vm3, %v23771_v28, 0.0 }
 0xcfc   :  { %13554 = vadd.xlane.f32.xlu1 %v13553_v30  ;;  %13569 = vadd.xlane.f32.xlu0 %v13568_v53 }
 0xcfd   :  { %v13503_v43 = vmul.f32 1.442695, %v13446_v3 }
 0xcfe   :  { %v13405_v56 = vpop.xlane.xlu0 %13404 }
 0xcff   :  { %19122 = vpow2.f32 %v13503_v43  ;;  %v13447_v18 = vsub.f32 %v23629_v62, %v13405_v56  ;;  %v13571_v62 = vsel %vm2779_vm3, %v23790_v20, 0.0 }
 0xd00   :  { %13560 = vadd.xlane.f32.xlu1 %v13559_v37  ;;  %13575 = vadd.xlane.f32.xlu0 %v13574_v22  ;;  %19124 = vpow2.f32 %v13497_v41  ;;  %v25229_v22 = vld [vmem:[#allocation88_spill] sm:$0xff] }
 0xd01   :  { %v23797_v17 = vpop.eup %19118  ;;  %19126 = vpow2.f32 %v13501_v27  ;;  %v13505_v29 = vmul.f32 1.442695, %v13447_v18  ;;  %v25230_v27 = vld [vmem:[#allocation87_spill] sm:$0xff] }
 0xd02   :  { %v13408_v25 = vpop.xlane.xlu1 %13407  ;;  %v23803_v1 = vpop.eup %19120 }
 0xd03   :  { %v13448_v50 = vsub.f32 %v23635_v12, %v13408_v25  ;;  %v13586_v12 = vsel %vm2779_vm3, %v23797_v17, 0.0  ;;  %v13577_v8 = vsel %vm2779_vm3, %v23803_v1, 0.0 }
 0xd04   :  { %13566 = vadd.xlane.f32.xlu1 %v13565_v14  ;;  %13581 = vadd.xlane.f32.xlu0 %v13580_v47 }
 0xd05   :  { %v13507_v21 = vmul.f32 1.442695, %v13448_v50 }
 0xd06   :  { %v13411_v18 = vpop.xlane.xlu0 %13410 }
 0xd07   :  { %19128 = vpow2.f32 %v13507_v21 }
 0xd08   :  { %13572 = vadd.xlane.f32.xlu1 %v13571_v62  ;;  %13587 = vadd.xlane.f32.xlu0 %v13586_v12  ;;  %19130 = vpow2.f32 %v13505_v29  ;;  %v13449_v12 = vsub.f32 %v23641_v11, %v13411_v18  ;;  %v13811_v11 = vsel %vm3167_vm2, %v23587_v59, 0  ;;  %v13859_v59 = vsel %vm3167_vm2, %v23593_v32, 0 }
 0xd09   :  { %v23805_v33 = vpop.eup %19122  ;;  %v13907_v32 = vsel %vm3167_vm2, %v23597_v0, 0 }
 0xd0a   :  { %v13592_v34 = vsel %vm2779_vm3, %v23805_v33, 0.0  ;;  %v23811_v3 = vpop.eup %19124  ;;  %v13414_v25 = vpop.xlane.xlu1 %13413 }
 0xd0b   :  { %v13583_v30 = vsel %vm2779_vm3, %v23811_v3, 0.0  ;;  %v23815_v53 = vpop.eup %19126  ;;  %v13450_v14 = vsub.f32 %v23649_v4, %v13414_v25 }
 0xd0c   :  { %13578 = vadd.xlane.f32.xlu1 %v13577_v8  ;;  %13593 = vadd.xlane.f32.xlu0 %v13592_v34  ;;  %v13589_v48 = vsel %vm2779_vm3, %v23815_v53, 0.0 }
 0xd0d   :  { %v13511_v29 = vmul.f32 1.442695, %v13450_v14 }
 0xd0e   :  { %v13417_v47 = vpop.xlane.xlu1 %13416 }
 0xd10   :  { %13584 = vadd.xlane.f32.xlu1 %v13583_v30  ;;  %v13509_v30 = vmul.f32 1.442695, %v13449_v12 }
 0xd11   :  { %v23817_v43 = vpop.eup %19128 }
 0xd12   :  { %v13598_v41 = vsel %vm2779_vm3, %v23817_v43, 0.0  ;;  %v23823_v56 = vpop.eup %19130  ;;  %v13420_v50 = vpop.xlane.xlu0 %13419 }
 0xd13   :  { %13599 = vadd.xlane.f32.xlu0 %v13598_v41  ;;  %v13595_v37 = vsel %vm2779_vm3, %v23823_v56, 0.0  ;;  %v13452_v62 = vsub.f32 %v23661_v46, %v13420_v50  ;;  %v13451_v41 = vsub.f32 %v23655_v35, %v13417_v47 }
 0xd14   :  { %13590 = vadd.xlane.f32.xlu1 %v13589_v48 }
 0xd15   :  { %v13515_v34 = vmul.f32 1.442695, %v13452_v62  ;;  %v13513_v4 = vmul.f32 1.442695, %v13451_v41  ;;  %v25234_v41 = vld [vmem:[#allocation140_spill] sm:$0xff] }
 0xd18   :  { %13596 = vadd.xlane.f32.xlu1 %v13595_v37 }
 0xd29   :  { %15053 = vrot.lane.b32.xlu0 %v25229_v22, %s19359_s8  ;;  %15101 = vrot.lane.b32.xlu1 %v25230_v27, %s19359_s8 }
 0xd34   :  { %v13519_v21 = vpop.xlane.xlu0 %13518 }
 0xd35   :  { %19132 = vrcp.f32 %v13519_v21 }
 0xd38   :  { %v13522_v8 = vpop.xlane.xlu1 %13521 }
 0xd39   :  { %19134 = vrcp.f32 %v13522_v8  ;;  %v25231_v8 = vld [vmem:[#allocation25_spill] sm:$0xff] }
 0xd3a   :  { %19136 = vpow2.f32 %v13511_v29 }
 0xd3c   :  { %v13525_v48 = vpop.xlane.xlu0 %13524  ;;  %v23876_v0 = vpop.permute.xlu1 %14909 }
 0xd3d   :  { %19138 = vrcp.f32 %v13525_v48  ;;  %v25235_v48 = vld [vmem:[#allocation28_spill] sm:$0xff] }
 0xd3e   :  { %19140 = vpow2.f32 %v13515_v34  ;;  %v25232_v34 = vld [vmem:[#allocation22_spill] sm:$0xff] }
 0xd3f   :  { %v19133_v37 = vpop.eup %19132  ;;  %19142 = vpow2.f32 %v13509_v30  ;;  %v25233_v30 = vpack.c.bf16 %v25231_v8, %v25232_v34  ;;  %v25256_v8 = vld [vmem:[#allocation26_spill] sm:$0xff] }
 0xd40   :  { %v13645_v22 = vmul.f32 %v19133_v37, %v23682_v13  ;;  %19144 = vpow2.f32 %v13513_v4  ;;  %v25236_v37 = vpack.c.bf16 %v25234_v41, %v25235_v48  ;;  %v25237_v4 = vpack.c.bf16 %v23305_v6, %v23298_v57 }
 0xd42   :  { %v13677_v27 = vpack.c.bf16 %v13645_v22, %v13645_v22  ;;  %v23896_v22 = vpop.permute.xlu0 %14861 }
 0xd43   :  { %v19135_v25 = vpop.eup %19134 }
 0xd44   :  { %v23836_v46 = vpop.eup %19136  ;;  %v13646_v18 = vmul.f32 %v19135_v25, %v23686_v7  ;;  %18318 = vmatmul.mubr.msk.bf16.vlgmr.msra.gmra.mrb[220].mxu0 %vm2779_vm3, %v13677_v27  ;;  %v25239_v27 = vld [vmem:[#allocation142_spill] sm:$0xff]  ;;  %v25240_v25 = vld [vmem:[#allocation136_spill] sm:$0xff] }
 0xd45   :  { %18328 = vmatpush3.bf16.msra.mxu0 %v13811_v11  ;;  %18329 = vmatprep.mubr.msk.bf16.mxu0 %vm19357_vm0, %v24762_v44  ;;  %v13604_v50 = vsel %vm2779_vm3, %v23836_v46, 0.0  ;;  %v25241_v11 = vpack.c.bf16 %v25239_v27, %v25240_v25  ;;  %v25261_v25 = vld [vmem:[#allocation151_spill] sm:$0xff] }
 0xd46   :  { %v13678_v35 = vpack.c.bf16 %v13646_v18, %v13646_v18  ;;  %18339 = vmatprep.subr.bf16.mxu0 %v24762_v44  ;;  %v25242_v18 = vld [vmem:[#allocation143_spill] sm:$0xff] }
 0xd47   :  { %v19139_v13 = vpop.eup %19138 }
 0xd48   :  { %v23847_v14 = vpop.eup %19140  ;;  %v13647_v7 = vmul.f32 %v19139_v13, %v23690_v49  ;;  %13605 = vadd.xlane.f32.xlu0 %v13604_v50  ;;  %18324 = vmatmul.mubr.msk.bf16.vlgmr.msra.gmra.mrb[4].mxu1 %vm2779_vm3, %v13678_v35  ;;  %v25243_v35 = vld [vmem:[#allocation137_spill] sm:$0xff] }
 0xd49   :  { %v23853_v47 = vpop.eup %19142  ;;  %18334 = vmatpush3.bf16.msra.mxu1 %v13859_v59  ;;  %18335 = vmatprep.mubr.msk.bf16.mxu1 %vm19357_vm0, %v24762_v44  ;;  %v13610_v29 = vsel %vm2779_vm3, %v23847_v14, 0.0  ;;  %v25244_v13 = vpack.c.bf16 %v25242_v18, %v25243_v35 }
 0xd4a   :  { %v13679_v21 = vpack.c.bf16 %v13647_v7, %v13647_v7  ;;  %18345 = vmatprep.subr.bf16.mxu1 %v24762_v44  ;;  %v13601_v49 = vsel %vm2779_vm3, %v23853_v47, 0.0  ;;  %v23865_v62 = vpop.eup %19144  ;;  %v25247_v7 = vld [vmem:[#allocation145_spill] sm:$0xff] }
 0xd4b   :  { %v13607_v12 = vsel %vm2779_vm3, %v23865_v62, 0.0 }
 0xd4c   :  { %13611 = vadd.xlane.f32.xlu0 %v13610_v29  ;;  %18330 = vmatmul.mubr.msk.bf16.vlgmr.msra.gmra.mrb[224].mxu0 %vm2779_vm3, %v13679_v21  ;;  %v25248_v21 = vld [vmem:[#allocation138_spill] sm:$0xff] }
 0xd4d   :  { %18340 = vmatpush3.bf16.msra.mxu0 %v13907_v32  ;;  %13602 = vadd.xlane.f32.xlu1 %v13601_v49  ;;  %v25249_v29 = vpack.c.bf16 %v25247_v7, %v25248_v21  ;;  %v25250_v32 = vld [vmem:[#allocation147_spill] sm:$0xff] }
 0xd4e   :  { %18341 = vmatprep.mubr.msk.bf16.mxu0 %vm19357_vm0, %v24762_v44  ;;  %18351 = vmatprep.subr.bf16.mxu0 %v24762_v44  ;;  %v25251_v49 = vld [vmem:[#allocation139_spill] sm:$0xff] }
 0xd51   :  { %13608 = vadd.xlane.f32.xlu1 %v13607_v12  ;;  %v25252_v12 = vpack.c.bf16 %v25250_v32, %v25251_v49  ;;  %v25268_v32 = vld [vmem:[#allocation34_spill] sm:$0xff] }
 0xd52   :  { %v25269_v49 = vld [vmem:[#allocation30_spill] sm:$0xff] }
 0xd62   :  { %15149 = vrot.lane.b32.xlu0 %v21115_v61, %s19359_s8  ;;  %15197 = vrot.lane.b32.xlu1 %v21135_v31, %s19359_s8  ;;  %v25238_v61 = vpack.c.bf16 %v23321_v15, %v23314_v24  ;;  %v23894_v31 = vpop.permute.xlu1 %14957  ;;  %v25245_v24 = vpack.c.bf16 %v23394_v52, %v23330_v51  ;;  %v25246_v15 = vpack.c.bf16 %v23410_v60, %v23403_v16  ;;  %v25253_v52 = vld [vmem:[#allocation31_spill] sm:$0xff]  ;;  %v25255_v60 = vld [vmem:[#allocation32_spill] sm:$0xff] }
 0xd63   :  { %v25254_v16 = vpack.c.bf16 %v23426_v38, %v25253_v52  ;;  %v25257_v34 = vpack.c.bf16 %v25255_v60, %v25256_v8  ;;  %v25262_v38 = vld [vmem:[#allocation144_spill] sm:$0xff]  ;;  %v25273_v60 = vld [vmem:[#allocation146_spill] sm:$0xff] }
 0xd66   :  { %15277 = vrot.lane.b32.xlu0 %v25233_v30, %s19359_s8  ;;  %15279 = vrot.lane.b32.xlu1 %v25236_v37, %s19359_s8  ;;  %v23906_v57 = vpop.permute.xlu1 %15005 }
 0xd6a   :  { %15325 = vrot.lane.b32.xlu0 %v25237_v4, %s19348_s1  ;;  %15327 = vrot.lane.b32.xlu1 %v25238_v61, %s19348_s1  ;;  %v25258_v4 = vld [vmem:[#allocation149_spill] sm:$0xff] }
 0xd6b   :  { %v25259_v61 = vld [vmem:[#allocation141_spill] sm:$0xff] }
 0xd6c   :  { %v25260_v27 = vpack.c.bf16 %v25258_v4, %v25259_v61  ;;  %v25278_v61 = vld [vmem:[#allocation45_spill] sm:$0xff] }
 0xd6e   :  { %15281 = vrot.lane.b32.xlu0 %v25241_v11, %s19359_s8  ;;  %15283 = vrot.lane.b32.xlu1 %v25244_v13, %s19359_s8  ;;  %v25263_v11 = vpack.c.bf16 %v25261_v25, %v25262_v38 }
 0xd71   :  { %v13531_v6 = vpop.xlane.xlu0 %13530 }
 0xd72   :  { %15329 = vrot.lane.b32.xlu0 %v25245_v24, %s19348_s1  ;;  %19146 = vrcp.f32 %v13531_v6  ;;  %15331 = vrot.lane.b32.xlu1 %v25246_v15, %s19348_s1  ;;  %v25264_v6 = vld [vmem:[#allocation172_spill] sm:$0xff] }
 0xd73   :  { %v14003_v24 = vsel %vm3167_vm2, %v25264_v6, 0 }
 0xd75   :  { %v13528_v50 = vpop.xlane.xlu1 %13527  ;;  %v13537_v59 = vpop.xlane.xlu0 %13536 }
 0xd76   :  { %19148 = vrcp.f32 %v13528_v50  ;;  %15285 = vrot.lane.b32.xlu0 %v25249_v29, %s19359_s8  ;;  %15287 = vrot.lane.b32.xlu1 %v25252_v12, %s19359_s8  ;;  %v25265_v50 = vld [vmem:[#allocation35_spill] sm:$0xff]  ;;  %v25270_v12 = vpack.c.bf16 %v25268_v32, %v25269_v49 }
 0xd77   :  { %19150 = vrcp.f32 %v13537_v59  ;;  %v25266_v59 = vld [vmem:[#allocation29_spill] sm:$0xff] }
 0xd78   :  { %v25267_v7 = vpack.c.bf16 %v25265_v50, %v25266_v59 }
 0xd79   :  { %v13534_v51 = vpop.xlane.xlu1 %13533  ;;  %v13543_v30 = vpop.xlane.xlu0 %13542 }
 0xd7a   :  { %19152 = vrcp.f32 %v13534_v51  ;;  %15333 = vrot.lane.b32.xlu0 %v25254_v16, %s19348_s1  ;;  %15335 = vrot.lane.b32.xlu1 %v25257_v34, %s19348_s1  ;;  %v25271_v51 = vld [vmem:[#allocation42_spill] sm:$0xff] }
 0xd7b   :  { %19154 = vrcp.f32 %v13543_v30  ;;  %v13955_v52 = vsel %vm3167_vm2, %v25271_v51, 0 }
 0xd7c   :  { %v19147_v41 = vpop.eup %19146 }
 0xd7d   :  { %v13649_v48 = vmul.f32 %v19147_v41, %v23711_v40  ;;  %v13540_v37 = vpop.xlane.xlu1 %13539  ;;  %v25275_v41 = vld [vmem:[#allocation153_spill] sm:$0xff] }
 0xd7e   :  { %15289 = vrot.lane.b32.xlu0 %v25260_v27, %s19359_s8  ;;  %15291 = vrot.lane.b32.xlu1 %v25263_v11, %s19359_s8  ;;  %19156 = vrcp.f32 %v13540_v37  ;;  %v14099_v27 = vsel %vm3167_vm2, %v25278_v61, 0 }
 0xd7f   :  { %v13681_v18 = vpack.c.bf16 %v13649_v48, %v13649_v48  ;;  %v25276_v48 = vld [vmem:[#allocation148_spill] sm:$0xff] }
 0xd80   :  { %v19149_v35 = vpop.eup %19148  ;;  %v25277_v37 = vpack.c.bf16 %v25275_v41, %v25276_v48  ;;  %v25284_v48 = vld [vmem:[#allocation49_spill] sm:$0xff] }
 0xd81   :  { %v19151_v13 = vpop.eup %19150  ;;  %v13648_v40 = vmul.f32 %v19149_v35, %v23715_v58  ;;  %v13546_v15 = vpop.xlane.xlu1 %13545  ;;  %18342 = vmatmul.mubr.msk.bf16.vlgmr.msra.gmra.mrb[228].mxu0 %vm2779_vm3, %v13681_v18  ;;  %v25279_v18 = vld [vmem:[#allocation21_spill] sm:$0xff] }
 0xd82   :  { %15337 = vrot.lane.b32.xlu0 %v25267_v7, %s19348_s1  ;;  %18352 = vmatpush3.bf16.msra.mxu0 %v14003_v24  ;;  %v13651_v29 = vmul.f32 %v19151_v13, %v23719_v39  ;;  %v25272_v39 = vld [vmem:[#allocation152_spill] sm:$0xff]  ;;  %v14051_v35 = vsel %vm3167_vm2, %v25279_v18, 0  ;;  %v13552_v24 = vpop.xlane.xlu0 %13551 }
 0xd83   :  { %v13680_v21 = vpack.c.bf16 %v13648_v40, %v13648_v40  ;;  %15339 = vrot.lane.b32.xlu1 %v25270_v12, %s19348_s1  ;;  %18353 = vmatprep.mubr.msk.bf16.mxu0 %vm19357_vm0, %v24762_v44  ;;  %v25274_v8 = vpack.c.bf16 %v25272_v39, %v25273_v60  ;;  %v25280_v40 = vld [vmem:[#allocation41_spill] sm:$0xff]  ;;  %v25283_v60 = vld [vmem:[#allocation46_spill] sm:$0xff] }
 0xd84   :  { %v19153_v58 = vpop.eup %19152  ;;  %18363 = vmatprep.subr.bf16.mxu0 %v24762_v44  ;;  %v13683_v34 = vpack.c.bf16 %v13651_v29, %v13651_v29 }
 0xd85   :  { %18336 = vmatmul.mubr.msk.bf16.vlgmr.msra.gmra.mrb[8].mxu1 %vm2779_vm3, %v13680_v21  ;;  %v13549_v16 = vpop.xlane.xlu1 %13548  ;;  %v13650_v30 = vmul.f32 %v19153_v58, %v23723_v23  ;;  %v19155_v4 = vpop.eup %19154  ;;  %v25281_v21 = vld [vmem:[#allocation169_spill] sm:$0xff]  ;;  %v25282_v58 = vld [vmem:[#allocation174_spill] sm:$0xff] }
 0xd86   :  { %18346 = vmatpush3.bf16.msra.mxu1 %v13955_v52  ;;  %19158 = vrcp.f32 %v13549_v16  ;;  %15293 = vrot.lane.b32.xlu0 %v25274_v8, %s19359_s8  ;;  %v13653_v25 = vmul.f32 %v19155_v4, %v23729_v2  ;;  %v14147_v29 = vsel %vm3167_vm2, %v25281_v21, 0  ;;  %v13558_v49 = vpop.xlane.xlu0 %13557  ;;  %v14291_v51 = vsel %vm3167_vm2, %v25282_v58, 0 }
 0xd87   :  { %15295 = vrot.lane.b32.xlu1 %v25277_v37, %s19359_s8  ;;  %18347 = vmatprep.mubr.msk.bf16.mxu1 %vm19357_vm0, %v24762_v44  ;;  %19160 = vrcp.f32 %v13546_v15  ;;  %v13682_v23 = vpack.c.bf16 %v13650_v30, %v13650_v30  ;;  %v14195_v15 = vsel %vm3167_vm2, %v25280_v40, 0  ;;  %v14243_v8 = vsel %vm3167_vm2, %v25283_v60, 0  ;;  %v25287_v40 = vld [vmem:[#allocation171_spill] sm:$0xff] }
 0xd88   :  { %18357 = vmatprep.subr.bf16.mxu1 %v24762_v44  ;;  %v19157_v11 = vpop.eup %19156  ;;  %v13685_v13 = vpack.c.bf16 %v13653_v25, %v13653_v25  ;;  %v14387_v37 = vsel %vm3167_vm2, %v25284_v48, 0 }
 0xd89   :  { %18354 = vmatmul.mubr.msk.bf16.vlgmr.msra.gmra.mrb[232].mxu0 %vm2779_vm3, %v13683_v34  ;;  %v13555_v38 = vpop.xlane.xlu1 %13554  ;;  %v13652_v6 = vmul.f32 %v19157_v11, %v23733_v42 }
 0xd8a   :  { %18364 = vmatpush3.bf16.msra.mxu0 %v14099_v27  ;;  %18365 = vmatprep.mubr.msk.bf16.mxu0 %vm19357_vm0, %v24762_v44  ;;  %19162 = vrcp.f32 %v13555_v38  ;;  %v13564_v30 = vpop.xlane.xlu0 %13563 }
 0xd8b   :  { %18375 = vmatprep.subr.bf16.mxu0 %v24762_v44  ;;  %19164 = vrcp.f32 %v13552_v24  ;;  %v13684_v50 = vpack.c.bf16 %v13652_v6, %v13652_v6 }
 0xd8d   :  { %18348 = vmatmul.mubr.msk.bf16.vlgmr.msra.gmra.mrb[12].mxu1 %vm2779_vm3, %v13682_v23  ;;  %v13561_v7 = vpop.xlane.xlu1 %13560  ;;  %v25285_v23 = vld [vmem:[#allocation43_spill] sm:$0xff] }
 0xd8e   :  { %18358 = vmatpush3.bf16.msra.mxu1 %v14051_v35  ;;  %18359 = vmatprep.mubr.msk.bf16.mxu1 %vm19357_vm0, %v24762_v44  ;;  %19166 = vrcp.f32 %v13561_v7  ;;  %v14339_v25 = vsel %vm3167_vm2, %v25285_v23, 0  ;;  %v13570_v11 = vpop.xlane.xlu0 %13569  ;;  %v25286_v35 = vld [vmem:[#allocation44_spill] sm:$0xff]  ;;  %v25293_v23 = vld [vmem:[#allocation173_spill] sm:$0xff] }
 0xd8f   :  { %18369 = vmatprep.subr.bf16.mxu1 %v24762_v44  ;;  %19168 = vrcp.f32 %v13558_v49 }
 0xd90   :  { %v19159_v2 = vpop.eup %19158 }
 0xd91   :  { %18366 = vmatmul.mubr.msk.bf16.vlgmr.msra.gmra.mrb[236].mxu0 %vm2779_vm3, %v13685_v13  ;;  %v13655_v59 = vmul.f32 %v19159_v2, %v23752_v54  ;;  %v19161_v42 = vpop.eup %19160  ;;  %v13567_v39 = vpop.xlane.xlu1 %13566  ;;  %v14483_v13 = vsel %vm3167_vm2, %v25286_v35, 0 }
 0xd92   :  { %18376 = vmatpush3.bf16.msra.mxu0 %v14195_v15  ;;  %18377 = vmatprep.mubr.msk.bf16.mxu0 %vm19357_vm0, %v24762_v44  ;;  %v13654_v32 = vmul.f32 %v19161_v42, %v23743_v19  ;;  %19170 = vrcp.f32 %v13567_v39  ;;  %v14435_v15 = vsel %vm3167_vm2, %v25287_v40, 0  ;;  %v25288_v42 = vld [vmem:[#allocation176_spill] sm:$0xff] }
 0xd93   :  { %18387 = vmatprep.subr.bf16.mxu0 %v24762_v44  ;;  %v13687_v12 = vpack.c.bf16 %v13655_v59, %v13655_v59  ;;  %19172 = vrcp.f32 %v13564_v30  ;;  %v13576_v59 = vpop.xlane.xlu0 %13575  ;;  %v14579_v21 = vsel %vm3167_vm2, %v25288_v42, 0 }
 0xd94   :  { %v19163_v54 = vpop.eup %19162  ;;  %v13686_v52 = vpack.c.bf16 %v13654_v32, %v13654_v32 }
 0xd95   :  { %18360 = vmatmul.mubr.msk.bf16.vlgmr.msra.gmra.mrb[16].mxu1 %vm2779_vm3, %v13684_v50  ;;  %v13657_v16 = vmul.f32 %v19163_v54, %v23762_v63  ;;  %v19165_v19 = vpop.eup %19164  ;;  %v13573_v27 = vpop.xlane.xlu1 %13572 }
 0xd96   :  { %18370 = vmatpush3.bf16.msra.mxu1 %v14147_v29  ;;  %18371 = vmatprep.mubr.msk.bf16.mxu1 %vm19357_vm0, %v24762_v44  ;;  %v13656_v34 = vmul.f32 %v19165_v19, %v23739_v36  ;;  %19174 = vrcp.f32 %v13573_v27 }
 0xd97   :  { %18381 = vmatprep.subr.bf16.mxu1 %v24762_v44  ;;  %v13689_v41 = vpack.c.bf16 %v13657_v16, %v13657_v16  ;;  %19176 = vrcp.f32 %v13570_v11  ;;  %v25290_v16 = vld [vmem:[#allocation53_spill] sm:$0xff] }
 0xd98   :  { %v19167_v63 = vpop.eup %19166  ;;  %v13688_v4 = vpack.c.bf16 %v13656_v34, %v13656_v34  ;;  %v14675_v39 = vsel %vm3167_vm2, %v25290_v16, 0  ;;  %v25291_v34 = vld [vmem:[#allocation47_spill] sm:$0xff] }
 0xd99   :  { %18378 = vmatmul.mubr.msk.bf16.vlgmr.msra.gmra.mrb[240].mxu0 %vm2779_vm3, %v13687_v12  ;;  %v13659_v61 = vmul.f32 %v19167_v63, %v23771_v28  ;;  %v19169_v36 = vpop.eup %19168  ;;  %v13579_v2 = vpop.xlane.xlu1 %13578  ;;  %v25289_v12 = vld [vmem:[#allocation50_spill] sm:$0xff]  ;;  %v14627_v30 = vsel %vm3167_vm2, %v25291_v34, 0 }
 0xd9a   :  { %18388 = vmatpush3.bf16.msra.mxu0 %v14291_v51  ;;  %18389 = vmatprep.mubr.msk.bf16.mxu0 %vm19357_vm0, %v24762_v44  ;;  %v13658_v38 = vmul.f32 %v19169_v36, %v23749_v26  ;;  %19178 = vrcp.f32 %v13579_v2  ;;  %v14531_v54 = vsel %vm3167_vm2, %v25289_v12, 0  ;;  %v13582_v51 = vpop.xlane.xlu0 %13581 }
 0xd9b   :  { %18399 = vmatprep.subr.bf16.mxu0 %v24762_v44  ;;  %v13691_v18 = vpack.c.bf16 %v13659_v61, %v13659_v61  ;;  %19180 = vrcp.f32 %v13576_v59 }
 0xd9c   :  { %v19171_v28 = vpop.eup %19170  ;;  %v13690_v6 = vpack.c.bf16 %v13658_v38, %v13658_v38 }
 0xd9d   :  { %18372 = vmatmul.mubr.msk.bf16.vlgmr.msra.gmra.mrb[20].mxu1 %vm2779_vm3, %v13686_v52  ;;  %v13661_v24 = vmul.f32 %v19171_v28, %v23781_v10  ;;  %v19173_v26 = vpop.eup %19172  ;;  %v13585_v49 = vpop.xlane.xlu1 %13584  ;;  %v14867_v28 = vsel %vm3167_vm2, %v23896_v22, 0 }
 0xd9e   :  { %18382 = vmatpush3.bf16.msra.mxu1 %v14243_v8  ;;  %18383 = vmatprep.mubr.msk.bf16.mxu1 %vm19357_vm0, %v24762_v44  ;;  %v13660_v50 = vmul.f32 %v19173_v26, %v23759_v55  ;;  %19182 = vrcp.f32 %v13585_v49  ;;  %v13588_v63 = vpop.xlane.xlu0 %13587 }
 0xd9f   :  { %18393 = vmatprep.subr.bf16.mxu1 %v24762_v44  ;;  %v13693_v7 = vpack.c.bf16 %v13661_v24, %v13661_v24  ;;  %19184 = vrcp.f32 %v13582_v51  ;;  %v25294_v24 = vld [vmem:[#allocation54_spill] sm:$0xff] }
 0xda0   :  { %v19175_v10 = vpop.eup %19174  ;;  %v13692_v29 = vpack.c.bf16 %v13660_v50, %v13660_v50  ;;  %v14819_v2 = vsel %vm3167_vm2, %v25294_v24, 0  ;;  %v25302_v24 = vld [vmem:[#allocation116_spill] sm:$0xff] }
 0xda1   :  { %18390 = vmatmul.mubr.msk.bf16.vlgmr.msra.gmra.mrb[244].mxu0 %vm2779_vm3, %v13689_v41  ;;  %v13663_v32 = vmul.f32 %v19175_v10, %v23790_v20  ;;  %v19177_v55 = vpop.eup %19176  ;;  %v13591_v8 = vpop.xlane.xlu1 %13590 }
 0xda2   :  { %18400 = vmatpush3.bf16.msra.mxu0 %v14387_v37  ;;  %18401 = vmatprep.mubr.msk.bf16.mxu0 %vm19357_vm0, %v24762_v44  ;;  %v13662_v58 = vmul.f32 %v19177_v55, %v23768_v45  ;;  %19186 = vrcp.f32 %v13591_v8  ;;  %v25292_v37 = vld [vmem:[#allocation48_spill] sm:$0xff]  ;;  %v13594_v11 = vpop.xlane.xlu0 %13593 }
 0xda3   :  { %18411 = vmatprep.subr.bf16.mxu0 %v24762_v44  ;;  %v13695_v52 = vpack.c.bf16 %v13663_v32, %v13663_v32  ;;  %19188 = vrcp.f32 %v13588_v63  ;;  %v25296_v63 = vld [vmem:[#allocation93_spill] sm:$0xff] }
 0xda4   :  { %v19179_v20 = vpop.eup %19178  ;;  %v13694_v19 = vpack.c.bf16 %v13662_v58, %v13662_v58 }
 0xda5   :  { %18384 = vmatmul.mubr.msk.bf16.vlgmr.msra.gmra.mrb[24].mxu1 %vm2779_vm3, %v13688_v4  ;;  %v13665_v60 = vmul.f32 %v19179_v20, %v23803_v1  ;;  %v19181_v45 = vpop.eup %19180  ;;  %v14771_v4 = vsel %vm3167_vm2, %v25292_v37, 0  ;;  %v13597_v36 = vpop.xlane.xlu1 %13596 }
 0xda6   :  { %18394 = vmatpush3.bf16.msra.mxu1 %v14339_v25  ;;  %18395 = vmatprep.mubr.msk.bf16.mxu1 %vm19357_vm0, %v24762_v44  ;;  %v13664_v41 = vmul.f32 %v19181_v45, %v23778_v9  ;;  %v14723_v25 = vsel %vm3167_vm2, %v25293_v23, 0  ;;  %19190 = vrcp.f32 %v13597_v36 }
 0xda7   :  { %18405 = vmatprep.subr.bf16.mxu1 %v24762_v44  ;;  %v13697_v48 = vpack.c.bf16 %v13665_v60, %v13665_v60  ;;  %19192 = vrcp.f32 %v13594_v11  ;;  %v25299_v11 = vld [vmem:[#allocation112_spill] sm:$0xff] }
 0xda8   :  { %v19183_v1 = vpop.eup %19182  ;;  %v13696_v61 = vpack.c.bf16 %v13664_v41, %v13664_v41  ;;  %v25295_v41 = vld [vmem:[#allocation109_spill] sm:$0xff] }
 0xda9   :  { %18402 = vmatmul.mubr.msk.bf16.vlgmr.msra.gmra.mrb[248].mxu0 %vm2779_vm3, %v13691_v18  ;;  %v13667_v27 = vmul.f32 %v19183_v1, %v23811_v3  ;;  %v19185_v9 = vpop.eup %19184 }
 0xdaa   :  { %18412 = vmatpush3.bf16.msra.mxu0 %v14483_v13  ;;  %18413 = vmatprep.mubr.msk.bf16.mxu0 %vm19357_vm0, %v24762_v44  ;;  %v13666_v38 = vmul.f32 %v19185_v9, %v23787_v5  ;;  %v13600_v13 = vpop.xlane.xlu0 %13599 }
 0xdab   :  { %18423 = vmatprep.subr.bf16.mxu0 %v24762_v44  ;;  %v13699_v18 = vpack.c.bf16 %v13667_v27, %v13667_v27  ;;  %19194 = vrcp.f32 %v13600_v13 }
 0xdac   :  { %v19187_v3 = vpop.eup %19186  ;;  %v13698_v35 = vpack.c.bf16 %v13666_v38, %v13666_v38 }
 0xdad   :  { %18396 = vmatmul.mubr.msk.bf16.vlgmr.msra.gmra.mrb[28].mxu1 %vm2779_vm3, %v13690_v6  ;;  %v13669_v6 = vmul.f32 %v19187_v3, %v23815_v53  ;;  %v19189_v5 = vpop.eup %19188  ;;  %v14963_v53 = vsel %vm3167_vm2, %v23894_v31, 0  ;;  %v15102_v31 = vpop.permute.xlu1 %15101 }
 0xdae   :  { %18406 = vmatpush3.bf16.msra.mxu1 %v14435_v15  ;;  %18407 = vmatprep.mubr.msk.bf16.mxu1 %vm19357_vm0, %v24762_v44  ;;  %v13668_v22 = vmul.f32 %v19189_v5, %v23797_v17  ;;  %v15054_v15 = vpop.permute.xlu0 %15053  ;;  %v15107_v16 = vsel %vm3167_vm2, %v15102_v31, 0  ;;  %v25301_v5 = vld [vmem:[#allocation117_spill] sm:$0xff] }
 0xdaf   :  { %18417 = vmatprep.subr.bf16.mxu1 %v24762_v44  ;;  %v13701_v26 = vpack.c.bf16 %v13669_v6, %v13669_v6 }
 0xdb0   :  { %v19191_v40 = vpop.eup %19190  ;;  %v13700_v50 = vpack.c.bf16 %v13668_v22, %v13668_v22 }
 0xdb1   :  { %18414 = vmatmul.mubr.msk.bf16.vlgmr.msra.gmra.mrb[252].mxu0 %vm2779_vm3, %v13693_v7  ;;  %v13671_v59 = vmul.f32 %v19191_v40, %v23823_v56  ;;  %v19193_v17 = vpop.eup %19192  ;;  %v14915_v7 = vsel %vm3167_vm2, %v23876_v0, 0  ;;  %v15059_v56 = vsel %vm3167_vm2, %v15054_v15, 0 }
 0xdb2   :  { %18424 = vmatpush3.bf16.msra.mxu0 %v14579_v21  ;;  %18425 = vmatprep.mubr.msk.bf16.mxu0 %vm19357_vm0, %v24762_v44  ;;  %v13670_v42 = vmul.f32 %v19193_v17, %v23805_v33  ;;  %v15011_v33 = vsel %vm3167_vm2, %v23906_v57, 0  ;;  %v25304_v17 = vld [vmem:[#allocation123_spill] sm:$0xff] }
 0xdb3   :  { %18435 = vmatprep.subr.bf16.mxu0 %v24762_v44  ;;  %v13703_v21 = vpack.c.bf16 %v13671_v59, %v13671_v59 }
 0xdb4   :  { %v13702_v32 = vpack.c.bf16 %v13670_v42, %v13670_v42 }
 0xdb5   :  { %18408 = vmatmul.mubr.msk.bf16.vlgmr.msra.gmra.mrb[32].mxu1 %vm2779_vm3, %v13692_v29  ;;  %v19195_v49 = vpop.eup %19194 }
 0xdb6   :  { %18418 = vmatpush3.bf16.msra.mxu1 %v14531_v54  ;;  %18419 = vmatprep.mubr.msk.bf16.mxu1 %vm19357_vm0, %v24762_v44  ;;  %v13672_v54 = vmul.f32 %v19195_v49, %v23817_v43 }
 0xdb7   :  { %18429 = vmatprep.subr.bf16.mxu1 %v24762_v44 }
 0xdb9   :  { %18426 = vmatmul.mubr.msk.bf16.vlgmr.msra.gmra.mrb[0].mxu0 %vm2779_vm3, %v13695_v52  ;;  %v13704_v52 = vpack.c.bf16 %v13672_v54, %v13672_v54 }
 0xdba   :  { %18436 = vmatpush3.bf16.msra.mxu0 %v14675_v39  ;;  %18437 = vmatprep.mubr.msk.bf16.mxu0 %vm19357_vm0, %v24762_v44 }
 0xdbb   :  { %18447 = vmatprep.subr.bf16.mxu0 %v24762_v44 }
 0xdbd   :  { %18420 = vmatmul.mubr.msk.bf16.vlgmr.msra.gmra.mrb[36].mxu1 %vm2779_vm3, %v13694_v19 }
 0xdbe   :  { %18430 = vmatpush3.bf16.msra.mxu1 %v14627_v30  ;;  %18431 = vmatprep.mubr.msk.bf16.mxu1 %vm19357_vm0, %v24762_v44 }
 0xdbf   :  { %18441 = vmatprep.subr.bf16.mxu1 %v24762_v44 }
 0xdc1   :  { %18438 = vmatmul.mubr.msk.bf16.vlgmr.msra.gmra.mrb[4].mxu0 %vm2779_vm3, %v13697_v48  ;;  %v25297_v48 = vpack.c.bf16 %v25295_v41, %v25296_v63  ;;  %v18626_v41 = vld [vmem:[#allocation8 + $0x30] sm:$0xff]   ;;  %v18627_v63 = vld [vmem:[#allocation8 + $0x38] sm:$0xff]  }
 0xdc2   :  { %18448 = vmatpush3.bf16.msra.mxu0 %v14771_v4  ;;  %18449 = vmatprep.mubr.msk.bf16.mxu0 %vm19357_vm0, %v24762_v44 }
 0xdc3   :  { %18459 = vmatprep.subr.bf16.mxu0 %v24762_v44 }
 0xdc5   :  { %18432 = vmatmul.mubr.msk.bf16.vlgmr.msra.gmra.mrb[40].mxu1 %vm2779_vm3, %v13696_v61 }
 0xdc6   :  { %18442 = vmatpush3.bf16.msra.mxu1 %v14723_v25  ;;  %18443 = vmatprep.mubr.msk.bf16.mxu1 %vm19357_vm0, %v24762_v44 }
 0xdc7   :  { %18453 = vmatprep.subr.bf16.mxu1 %v24762_v44 }
 0xdc9   :  { %18450 = vmatmul.mubr.msk.bf16.vlgmr.msra.gmra.mrb[8].mxu0 %vm2779_vm3, %v13699_v18 }
 0xdca   :  { %18460 = vmatpush3.bf16.msra.mxu0 %v14867_v28  ;;  %18461 = vmatprep.mubr.msk.bf16.mxu0 %vm19357_vm0, %v24762_v44 }
 0xdcb   :  { %18471 = vmatprep.subr.bf16.mxu0 %v24762_v44 }
 0xdcd   :  { %18444 = vmatmul.mubr.msk.bf16.vlgmr.msra.gmra.mrb[44].mxu1 %vm2779_vm3, %v13698_v35 }
 0xdce   :  { %18454 = vmatpush3.bf16.msra.mxu1 %v14819_v2  ;;  %18455 = vmatprep.mubr.msk.bf16.mxu1 %vm19357_vm0, %v24762_v44  ;;  %v25303_v2 = vpack.c.bf16 %v25301_v5, %v25302_v24 }
 0xdcf   :  { %18465 = vmatprep.subr.bf16.mxu1 %v24762_v44 }
 0xdd1   :  { %18462 = vmatmul.mubr.msk.bf16.vlgmr.msra.gmra.mrb[12].mxu0 %vm2779_vm3, %v13701_v26 }
 0xdd2   :  { %18472 = vmatpush3.bf16.msra.mxu0 %v14963_v53  ;;  %18473 = vmatprep.mubr.msk.bf16.mxu0 %vm19357_vm0, %v24762_v44 }
 0xdd3   :  { %18483 = vmatprep.subr.bf16.mxu0 %v24762_v44 }
 0xdd5   :  { %v13606_v10 = vpop.xlane.xlu0 %13605  ;;  %18456 = vmatmul.mubr.msk.bf16.vlgmr.msra.gmra.mrb[48].mxu1 %vm2779_vm3, %v13700_v50 }
 0xdd6   :  { %18466 = vmatpush3.bf16.msra.mxu1 %v14915_v7  ;;  %18467 = vmatprep.mubr.msk.bf16.mxu1 %vm19357_vm0, %v24762_v44  ;;  %19196 = vrcp.f32 %v13606_v10  ;;  %v25305_v7 = vld [vmem:[#allocation122_spill] sm:$0xff] }
 0xdd7   :  { %18477 = vmatprep.subr.bf16.mxu1 %v24762_v44  ;;  %v25306_v10 = vpack.c.bf16 %v25304_v17, %v25305_v7  ;;  %v25313_v7 = vld [vmem:[#allocation154_spill] sm:$0xff] }
 0xdd9   :  { %v13612_v29 = vpop.xlane.xlu0 %13611  ;;  %18474 = vmatmul.mubr.msk.bf16.vlgmr.msra.gmra.mrb[16].mxu0 %vm2779_vm3, %v13703_v21 }
 0xdda   :  { %18484 = vmatpush3.bf16.msra.mxu0 %v15059_v56  ;;  %v13603_v0 = vpop.xlane.xlu1 %13602  ;;  %18485 = vmatprep.mubr.msk.bf16.mxu0 %vm19357_vm0, %v24762_v44 }
 0xddb   :  { %19198 = vrcp.f32 %v13603_v0  ;;  %18495 = vmatprep.subr.bf16.mxu0 %v24762_v44 }
 0xddd   :  { %v15150_v55 = vpop.permute.xlu0 %15149  ;;  %18468 = vmatmul.mubr.msk.bf16.vlgmr.msra.gmra.mrb[52].mxu1 %vm2779_vm3, %v13702_v32 }
 0xdde   :  { %18478 = vmatpush3.bf16.msra.mxu1 %v15011_v33  ;;  %v13609_v12 = vpop.xlane.xlu1 %13608  ;;  %18479 = vmatprep.mubr.msk.bf16.mxu1 %vm19357_vm0, %v24762_v44  ;;  %v15155_v30 = vsel %vm3167_vm2, %v15150_v55, 0 }
 0xddf   :  { %19200 = vrcp.f32 %v13609_v12  ;;  %18489 = vmatprep.subr.bf16.mxu1 %v24762_v44 }
 0xde0   :  { %19202 = vrcp.f32 %v13612_v29  ;;  %v19197_v20 = vpop.eup %19196 }
 0xde1   :  { %v24124_v58 = vpop.permute.xlu0 %15277  ;;  %v13674_v60 = vmul.f32 %v19197_v20, %v23836_v46  ;;  %v25308_v20 = vld [vmem:[#allocation33_spill] sm:$0xff] }
 0xde2   :  { %v15198_v51 = vpop.permute.xlu1 %15197 }
 0xde3   :  { %v13706_v37 = vpack.c.bf16 %v13674_v60, %v13674_v60  ;;  %v15203_v61 = vsel %vm3167_vm2, %v15198_v51, 0  ;;  %v18621_v60 = vld [vmem:[#allocation8 + $0x8] sm:$0xff]  }
 0xde5   :  { %v19199_v57 = vpop.eup %19198  ;;  %v24127_v39 = vpop.permute.xlu0 %15325  ;;  %18480 = vmatmul.mubr.msk.bf16.vlgmr.msra.gmra.mrb[56].mxu1 %vm2779_vm3, %v13704_v52  ;;  %v25307_v52 = vld [vmem:[#allocation37_spill] sm:$0xff] }
 0xde6   :  { %v13673_v19 = vmul.f32 %v19199_v57, %v23853_v47  ;;  %18490 = vmatpush3.bf16.msra.mxu1 %v15107_v16  ;;  %v24131_v43 = vpop.permute.xlu1 %15279  ;;  %18491 = vmatprep.mubr.msk.bf16.mxu1 %vm19357_vm0, %v24762_v44  ;;  %v25309_v57 = vpack.c.bf16 %v25307_v52, %v25308_v20 }
 0xde7   :  { %18501 = vmatprep.subr.bf16.mxu1 %v24762_v44 }
 0xde8   :  { %v13705_v8 = vpack.c.bf16 %v13673_v19, %v13673_v19  ;;  %v18620_v19 = vld [vmem:[#allocation8] sm:$0xff]  }
 0xde9   :  { %v19201_v45 = vpop.eup %19200  ;;  %v15282_v34 = vpop.permute.xlu0 %15281 }
 0xdea   :  { %v15413_v47 = vsel %vm1306_vm1, %v25297_v48, %v15282_v34  ;;  %18486 = vmatmul.mubr.msk.bf16.vlgmr.msra.gmra.mrb[20].mxu0 %vm2779_vm3, %v13705_v8  ;;  %v24143_v1 = vpop.permute.xlu1 %15327  ;;  %v19203_v46 = vpop.eup %19202  ;;  %v13675_v4 = vmul.f32 %v19201_v45, %v23865_v62  ;;  %v25298_v62 = vld [vmem:[#allocation113_spill] sm:$0xff]  ;;  %v18623_v45 = vld [vmem:[#allocation8 + $0x18] sm:$0xff]   ;;  %v18624_v34 = vld [vmem:[#allocation8 + $0x20] sm:$0xff]  }
 0xdeb   :  { %18496 = vmatpush3.bf16.msra.mxu0 %v15155_v30  ;;  %18497 = vmatprep.mubr.msk.bf16.mxu0 %vm19357_vm0, %v24762_v44  ;;  %v13676_v23 = vmul.f32 %v19203_v46, %v23847_v14  ;;  %v25300_v18 = vpack.c.bf16 %v25298_v62, %v25299_v11  ;;  %v18622_v8 = vld [vmem:[#allocation8 + $0x10] sm:$0xff]   ;;  %v18625_v30 = vld [vmem:[#allocation8 + $0x28] sm:$0xff]  }
 0xdec   :  { %v13707_v25 = vpack.c.bf16 %v13675_v4, %v13675_v4  ;;  %18507 = vmatprep.subr.bf16.mxu0 %v18620_v19 }
 0xded   :  { %v15330_v27 = vpop.permute.xlu0 %15329  ;;  %18492 = vmatmul.mubr.msk.bf16.vlgmr.msra.gmra.mrb[60].mxu1 %vm2779_vm3, %v13706_v37  ;;  %v13708_v35 = vpack.c.bf16 %v13676_v23, %v13676_v23 }
 0xdee   :  { %v24151_v36 = vsel %vm15453_vm4, %v15413_v47, %v15330_v27  ;;  %18502 = vmatpush3.bf16.msra.mxu1 %v15203_v61  ;;  %v24153_v9 = vpop.permute.xlu1 %15283  ;;  %18503 = vmatprep.mubr.msk.bf16.mxu1 %vm19357_vm0, %v24762_v44 }
 0xdf1   :  { %v15286_v38 = vpop.permute.xlu0 %15285 }
 0xdf2   :  { %v15419_v3 = vsel %vm1306_vm1, %v25300_v18, %v15286_v38  ;;  %18498 = vmatmul.mubr.msk.bf16.vlgmr.msra.gmra.mrb[24].mxu0 %vm2779_vm3, %v13707_v25  ;;  %v24163_v28 = vpop.permute.xlu1 %15331  ;;  %v25310_v18 = vld [vmem:[#allocation16_spill] sm:$0xff] }
 0xdf3   :  { %18508 = vmatpush3.bf16.msra.mxu0 %v18620_v19 }
 0xdf4   :  { %18509 = vmatprep.subr.bf16.mxu0 %v18621_v60 }
 0xdf5   :  { %v15334_v13 = vpop.permute.xlu0 %15333  ;;  %18504 = vmatmul.mubr.msk.bf16.vlgmr.msra.gmra.mrb[64].mxu1 %vm2779_vm3, %v13708_v35 }
 0xdf6   :  { %v24167_v6 = vsel %vm15453_vm4, %v15419_v3, %v15334_v13  ;;  %v24169_v44 = vpop.permute.xlu1 %15287  ;;  %v25311_v3 = vld [vmem:[#allocation165_spill] sm:$0xff] }
 0xdf7   :  { %18510 = vmatpush3.bf16.msra.mxu0 %v18621_v60  ;;  %v25312_v35 = vpack.c.bf16 %v25310_v18, %v25311_v3 }
 0xdf8   :  { %18511 = vmatprep.subr.bf16.mxu0 %v18622_v8 }
 0xdf9   :  { %v15290_v14 = vpop.permute.xlu0 %15289 }
 0xdfa   :  { %v15425_v22 = vsel %vm1306_vm1, %v25303_v2, %v15290_v14  ;;  %v24175_v26 = vpop.permute.xlu1 %15335 }
 0xdfb   :  { %18512 = vmatpush3.bf16.msra.mxu0 %v18622_v8 }
 0xdfc   :  { %18513 = vmatprep.subr.bf16.mxu0 %v18623_v45 }
 0xdfd   :  { %v15338_v40 = vpop.permute.xlu0 %15337 }
 0xdfe   :  { %v24178_v53 = vsel %vm15453_vm4, %v15425_v22, %v15338_v40  ;;  %v24180_v15 = vpop.permute.xlu1 %15291 }
 0xdff   :  { %18514 = vmatpush3.bf16.msra.mxu0 %v18623_v45 }
 0xe00   :  { %18515 = vmatprep.subr.bf16.mxu0 %v18624_v34 }
 0xe02   :  { %v24182_v50 = vpop.permute.xlu1 %15339 }
 0xe03   :  { %18516 = vmatpush3.bf16.msra.mxu0 %v18624_v34 }
 0xe04   :  { %18517 = vmatprep.subr.bf16.mxu0 %v18625_v30 }
 0xe06   :  { %v15296_v59 = vpop.permute.xlu1 %15295 }
 0xe07   :  { %v24188_v31 = vsel %vm1306_vm1, %v25306_v10, %v15296_v59  ;;  %18518 = vmatpush3.bf16.msra.mxu0 %v18625_v30  ;;  %v25314_v10 = vld [vmem:[#allocation150_spill] sm:$0xff] }
 0xe08   :  { %18519 = vmatprep.subr.bf16.mxu0 %v18626_v41 }
 0xe0b   :  { %18520 = vmatpush3.bf16.msra.mxu0 %v18626_v41  ;;  %v25319_v41 = vld [vmem:[#allocation168_spill] sm:$0xff] }
 0xe0c   :  { %18521 = vmatprep.subr.bf16.mxu0 %v18627_v63 }
 0xe0f   :  { %18522 = vmatpush3.bf16.msra.mxu0 %v18627_v63  ;;  %v25320_v63 = vld [vmem:[#allocation36_spill] sm:$0xff] }
 0xe17   :  { %v13751_v42 = vpop.f32.mrb[220].mxu0 }
 0xe18   :  { %v18319_v21 = vpop.f32.mrb[221].mxu0 }
 0xe19   :  { %v13754_v56 = vpop.f32.mrb[222].mxu0 }
 0xe1a   :  { %v18320_v29 = vpop.f32.mrb[223].mxu0 }
 0xe1b   :  { %v13799_v0 = vpop.f32.mrb[4].mxu1 }
 0xe1c   :  { %v15245_v32 = vpack.c.bf16 %v13799_v0, %v13751_v42  ;;  %v18325_v49 = vpop.f32.mrb[5].mxu1  ;;  %v25315_v42 = vpack.c.bf16 %v25313_v7, %v25314_v10 }
 0xe1d   :  { %v13802_v33 = vpop.f32.mrb[6].mxu1 }
 0xe1e   :  { %v18326_v55 = vpop.f32.mrb[7].mxu1  ;;  %15373 = vrot.lane.b32.xlu0 %v15245_v32, %s19358_s4 }
 0xe1f   :  { %v13847_v12 = vpop.f32.mrb[224].mxu0 }
 0xe20   :  { %v18331_v54 = vpop.f32.mrb[225].mxu0 }
 0xe21   :  { %v13850_v51 = vpop.f32.mrb[226].mxu0  ;;  %v25316_v54 = vld [vmem:[#allocation156_spill] sm:$0xff] }
 0xe22   :  { %15341 = vrot.lane.b32.xlu0 %v25309_v57, %s19348_s1  ;;  %v18332_v16 = vpop.f32.mrb[227].mxu0  ;;  %v25317_v51 = vld [vmem:[#allocation155_spill] sm:$0xff] }
 0xe23   :  { %v25318_v52 = vpack.c.bf16 %v25316_v54, %v25317_v51  ;;  %v25329_v54 = vld [vmem:[#allocation92_spill] sm:$0xff] }
 0xe54   :  { %v13943_v48 = vpop.f32.mrb[228].mxu0 }
 0xe55   :  { %v18343_v47 = vpop.f32.mrb[229].mxu0 }
 0xe56   :  { %v13946_v37 = vpop.f32.mrb[230].mxu0 }
 0xe57   :  { %v18344_v46 = vpop.f32.mrb[231].mxu0 }
 0xe58   :  { %v13895_v4 = vpop.f32.mrb[8].mxu1 }
 0xe59   :  { %v15246_v61 = vpack.c.bf16 %v13895_v4, %v13847_v12  ;;  %v18337_v27 = vpop.f32.mrb[9].mxu1 }
 0xe5a   :  { %v13898_v23 = vpop.f32.mrb[10].mxu1 }
 0xe5b   :  { %v18338_v25 = vpop.f32.mrb[11].mxu1  ;;  %15375 = vrot.lane.b32.xlu1 %v15246_v61, %s19358_s4 }
 0xe5c   :  { %v14039_v38 = vpop.f32.mrb[232].mxu0 }
 0xe5d   :  { %v18355_v62 = vpop.f32.mrb[233].mxu0 }
 0xe5e   :  { %v14042_v11 = vpop.f32.mrb[234].mxu0  ;;  %v25322_v62 = vld [vmem:[#allocation39_spill] sm:$0xff] }
 0xe5f   :  { %15343 = vrot.lane.b32.xlu1 %v25312_v35, %s19348_s1  ;;  %v18356_v13 = vpop.f32.mrb[235].mxu0  ;;  %v25323_v11 = vld [vmem:[#allocation17_spill] sm:$0xff] }
 0xe60   :  { %v13991_v14 = vpop.f32.mrb[12].mxu1  ;;  %v25324_v18 = vpack.c.bf16 %v25322_v62, %v25323_v11 }
 0xe61   :  { %v15247_v5 = vpack.c.bf16 %v13991_v14, %v13943_v48  ;;  %v18349_v24 = vpop.f32.mrb[13].mxu1  ;;  %v25321_v48 = vpack.c.bf16 %v25319_v41, %v25320_v63 }
 0xe62   :  { %v13994_v2 = vpop.f32.mrb[14].mxu1 }
 0xe63   :  { %v18350_v22 = vpop.f32.mrb[15].mxu1  ;;  %15377 = vrot.lane.b32.xlu0 %v15247_v5, %s19358_s4 }
 0xe64   :  { %v14135_v40 = vpop.f32.mrb[236].mxu0 }
 0xe65   :  { %v18367_v59 = vpop.f32.mrb[237].mxu0 }
 0xe66   :  { %v14138_v17 = vpop.f32.mrb[238].mxu0  ;;  %v25325_v59 = vld [vmem:[#allocation158_spill] sm:$0xff] }
 0xe67   :  { %15297 = vrot.lane.b32.xlu0 %v25315_v42, %s19359_s8  ;;  %v18368_v21 = vpop.f32.mrb[239].mxu0  ;;  %v25326_v17 = vld [vmem:[#allocation157_spill] sm:$0xff] }
 0xe68   :  { %v14087_v56 = vpop.f32.mrb[16].mxu1  ;;  %v25327_v7 = vpack.c.bf16 %v25325_v59, %v25326_v17 }
 0xe69   :  { %v15248_v29 = vpack.c.bf16 %v14087_v56, %v14039_v38  ;;  %v18361_v0 = vpop.f32.mrb[17].mxu1 }
 0xe6a   :  { %v14090_v32 = vpop.f32.mrb[18].mxu1 }
 0xe6b   :  { %v18362_v49 = vpop.f32.mrb[19].mxu1  ;;  %15379 = vrot.lane.b32.xlu1 %v15248_v29, %s19358_s4  ;;  %v24226_v32 = vpop.permute.xlu0 %15293 }
 0xe6c   :  { %v14231_v33 = vpop.f32.mrb[240].mxu0 }
 0xe6d   :  { %v18379_v55 = vpop.f32.mrb[241].mxu0 }
 0xe6e   :  { %v14234_v12 = vpop.f32.mrb[242].mxu0 }
 0xe6f   :  { %15299 = vrot.lane.b32.xlu1 %v25318_v52, %s19359_s8  ;;  %v18380_v20 = vpop.f32.mrb[243].mxu0  ;;  %v25328_v12 = vld [vmem:[#allocation89_spill] sm:$0xff] }
 0xe70   :  { %v14183_v57 = vpop.f32.mrb[20].mxu1  ;;  %v25330_v51 = vpack.c.bf16 %v25328_v12, %v25329_v54  ;;  %v25331_v20 = vld [vmem:[#allocation160_spill] sm:$0xff] }
 0xe71   :  { %v15249_v16 = vpack.c.bf16 %v14183_v57, %v14135_v40  ;;  %v18373_v19 = vpop.f32.mrb[21].mxu1  ;;  %v25332_v57 = vld [vmem:[#allocation159_spill] sm:$0xff] }
 0xe72   :  { %v14186_v60 = vpop.f32.mrb[22].mxu1  ;;  %v15407_v52 = vsel %vm1306_vm1, %v25330_v51, %v24124_v58 }
 0xe73   :  { %v18374_v8 = vpop.f32.mrb[23].mxu1  ;;  %15381 = vrot.lane.b32.xlu0 %v15249_v16, %s19358_s4  ;;  %v25333_v16 = vpack.c.bf16 %v25331_v20, %v25332_v57  ;;  %v15455_v60 = vsel %vm15453_vm4, %v15407_v52, %v24127_v39  ;;  %v25343_v20 = vld [vmem:[#allocation164_spill] sm:$0xff]  ;;  %v25344_v57 = vld [vmem:[#allocation163_spill] sm:$0xff] }
 0xe74   :  { %v14327_v45 = vpop.f32.mrb[244].mxu0 }
 0xe75   :  { %v18391_v34 = vpop.f32.mrb[245].mxu0 }
 0xe76   :  { %v14330_v30 = vpop.f32.mrb[246].mxu0 }
 0xe77   :  { %15345 = vrot.lane.b32.xlu0 %v25321_v48, %s19348_s1  ;;  %v18392_v47 = vpop.f32.mrb[247].mxu0 }
 0xe78   :  { %v14279_v37 = vpop.f32.mrb[24].mxu1 }
 0xe79   :  { %v15250_v46 = vpack.c.bf16 %v14279_v37, %v14231_v33  ;;  %v18385_v4 = vpop.f32.mrb[25].mxu1 }
 0xe7a   :  { %v14282_v61 = vpop.f32.mrb[26].mxu1  ;;  %v25335_v4 = vld [vmem:[#allocation166_spill] sm:$0xff] }
 0xe7b   :  { %v18386_v27 = vpop.f32.mrb[27].mxu1  ;;  %15383 = vrot.lane.b32.xlu1 %v15250_v46, %s19358_s4  ;;  %v25334_v46 = vld [vmem:[#allocation18_spill] sm:$0xff] }
 0xe7c   :  { %v14423_v23 = vpop.f32.mrb[248].mxu0  ;;  %v25336_v61 = vpack.c.bf16 %v25334_v46, %v25335_v4 }
 0xe7d   :  { %v18403_v25 = vpop.f32.mrb[249].mxu0 }
 0xe7e   :  { %v14426_v38 = vpop.f32.mrb[250].mxu0 }
 0xe7f   :  { %15347 = vrot.lane.b32.xlu1 %v25324_v18, %s19348_s1  ;;  %v18404_v3 = vpop.f32.mrb[251].mxu0 }
 0xe80   :  { %v14375_v35 = vpop.f32.mrb[28].mxu1 }
 0xe81   :  { %v15251_v13 = vpack.c.bf16 %v14375_v35, %v14327_v45  ;;  %v18397_v14 = vpop.f32.mrb[29].mxu1  ;;  %v25337_v35 = vld [vmem:[#allocation170_spill] sm:$0xff] }
 0xe82   :  { %v14378_v5 = vpop.f32.mrb[30].mxu1 }
 0xe83   :  { %v18398_v24 = vpop.f32.mrb[31].mxu1  ;;  %15385 = vrot.lane.b32.xlu0 %v15251_v13, %s19358_s4  ;;  %v25338_v13 = vld [vmem:[#allocation38_spill] sm:$0xff] }
 0xe84   :  { %v14519_v2 = vpop.f32.mrb[252].mxu0  ;;  %v25339_v14 = vpack.c.bf16 %v25337_v35, %v25338_v13 }
 0xe85   :  { %v18415_v22 = vpop.f32.mrb[253].mxu0 }
 0xe86   :  { %v14522_v40 = vpop.f32.mrb[254].mxu0 }
 0xe87   :  { %15301 = vrot.lane.b32.xlu0 %v25327_v7, %s19359_s8  ;;  %v18416_v10 = vpop.f32.mrb[255].mxu0 }
 0xe88   :  { %v14471_v42 = vpop.f32.mrb[32].mxu1 }
 0xe89   :  { %v15252_v21 = vpack.c.bf16 %v14471_v42, %v14423_v23  ;;  %v18409_v56 = vpop.f32.mrb[33].mxu1  ;;  %v25340_v42 = vld [vmem:[#allocation162_spill] sm:$0xff] }
 0xe8a   :  { %v14474_v29 = vpop.f32.mrb[34].mxu1 }
 0xe8b   :  { %v18410_v0 = vpop.f32.mrb[35].mxu1  ;;  %15387 = vrot.lane.b32.xlu1 %v15252_v21, %s19358_s4  ;;  %v25341_v21 = vld [vmem:[#allocation161_spill] sm:$0xff] }
 0xe8c   :  { %v14615_v49 = vpop.f32.mrb[0].mxu0  ;;  %v25342_v56 = vpack.c.bf16 %v25340_v42, %v25341_v21  ;;  %v25353_v42 = vld [vmem:[#allocation94_spill] sm:$0xff] }
 0xe8d   :  { %v18427_v33 = vpop.f32.mrb[1].mxu0 }
 0xe8e   :  { %v14618_v55 = vpop.f32.mrb[2].mxu0 }
 0xe8f   :  { %15303 = vrot.lane.b32.xlu1 %v25333_v16, %s19359_s8  ;;  %v18428_v19 = vpop.f32.mrb[3].mxu0  ;;  %v25345_v16 = vpack.c.bf16 %v25343_v20, %v25344_v57 }
 0xe90   :  { %v14567_v8 = vpop.f32.mrb[36].mxu1  ;;  %v15374_v45 = vpop.permute.xlu0 %15373 }
 0xe91   :  { %v15253_v34 = vpack.c.bf16 %v14567_v8, %v14519_v2  ;;  %v18421_v30 = vpop.f32.mrb[37].mxu1  ;;  %v15488_v41 = vsel %vm15486_vm5, %v15455_v60, %v15374_v45 }
 0xe92   :  { %v14570_v63 = vpop.f32.mrb[38].mxu1  ;;  %18523 = vmatprep.mubr.bf16.mxu0 %v15488_v41  ;;  %v25346_v41 = vld [vmem:[#allocation40_spill] sm:$0xff] }
 0xe93   :  { %v18422_v48 = vpop.f32.mrb[39].mxu1  ;;  %15389 = vrot.lane.b32.xlu0 %v15253_v34, %s19358_s4  ;;  %v25347_v63 = vld [vmem:[#allocation19_spill] sm:$0xff] }
 0xe94   :  { %v14711_v58 = vpop.f32.mrb[4].mxu0  ;;  %v25348_v48 = vpack.c.bf16 %v25346_v41, %v25347_v63 }
 0xe95   :  { %v18439_v47 = vpop.f32.mrb[5].mxu0 }
 0xe96   :  { %v14714_v37 = vpop.f32.mrb[6].mxu0 }
 0xe97   :  { %15349 = vrot.lane.b32.xlu0 %v25336_v61, %s19348_s1  ;;  %v18440_v39 = vpop.f32.mrb[7].mxu0 }
 0xe98   :  { %v14663_v27 = vpop.f32.mrb[40].mxu1 }
 0xe99   :  { %v15254_v23 = vpack.c.bf16 %v14663_v27, %v14615_v49  ;;  %v18433_v25 = vpop.f32.mrb[41].mxu1  ;;  %v25349_v27 = vld [vmem:[#allocation20_spill] sm:$0xff] }
 0xe9a   :  { %v14666_v38 = vpop.f32.mrb[42].mxu1 }
 0xe9b   :  { %v18434_v62 = vpop.f32.mrb[43].mxu1  ;;  %15391 = vrot.lane.b32.xlu1 %v15254_v23, %s19358_s4  ;;  %v25350_v23 = vld [vmem:[#allocation167_spill] sm:$0xff] }
 0xe9c   :  { %v14807_v11 = vpop.f32.mrb[8].mxu0  ;;  %v25351_v25 = vpack.c.bf16 %v25349_v27, %v25350_v23  ;;  %v25364_v23 = vld [vmem:[#allocation121_spill] sm:$0xff] }
 0xe9d   :  { %v18451_v18 = vpop.f32.mrb[9].mxu0 }
 0xe9e   :  { %v14810_v3 = vpop.f32.mrb[10].mxu0 }
 0xe9f   :  { %15351 = vrot.lane.b32.xlu1 %v25339_v14, %s19348_s1  ;;  %v18452_v5 = vpop.f32.mrb[11].mxu0 }
 0xea0   :  { %v14759_v24 = vpop.f32.mrb[44].mxu1 }
 0xea1   :  { %v15255_v2 = vpack.c.bf16 %v14759_v24, %v14711_v58  ;;  %v18445_v22 = vpop.f32.mrb[45].mxu1 }
 0xea2   :  { %v14762_v40 = vpop.f32.mrb[46].mxu1 }
 0xea3   :  { %v18446_v59 = vpop.f32.mrb[47].mxu1  ;;  %15393 = vrot.lane.b32.xlu0 %v15255_v2, %s19358_s4 }
 0xea4   :  { %v14903_v17 = vpop.f32.mrb[12].mxu0 }
 0xea5   :  { %v18463_v7 = vpop.f32.mrb[13].mxu0 }
 0xea6   :  { %v14906_v10 = vpop.f32.mrb[14].mxu0 }
 0xea7   :  { %15305 = vrot.lane.b32.xlu0 %v25342_v56, %s19359_s8  ;;  %v18464_v29 = vpop.f32.mrb[15].mxu0  ;;  %v25352_v10 = vld [vmem:[#allocation91_spill] sm:$0xff] }
 0xea8   :  { %v14855_v0 = vpop.f32.mrb[48].mxu1  ;;  %v25354_v21 = vpack.c.bf16 %v25352_v10, %v25353_v42 }
 0xea9   :  { %v15256_v49 = vpack.c.bf16 %v14855_v0, %v14807_v11  ;;  %v18457_v33 = vpop.f32.mrb[49].mxu1 }
 0xeaa   :  { %v14858_v55 = vpop.f32.mrb[50].mxu1  ;;  %v15410_v56 = vsel %vm1306_vm1, %v25354_v21, %v24131_v43  ;;  %v15342_v33 = vpop.permute.xlu0 %15341 }
 0xeab   :  { %v18458_v12 = vpop.f32.mrb[51].mxu1  ;;  %15395 = vrot.lane.b32.xlu1 %v15256_v49, %s19358_s4  ;;  %v15457_v29 = vsel %vm15453_vm4, %v15410_v56, %v24143_v1 }
 0xeac   :  { %v14999_v54 = vpop.f32.mrb[16].mxu0 }
 0xead   :  { %v18475_v51 = vpop.f32.mrb[17].mxu0 }
 0xeae   :  { %v15002_v52 = vpop.f32.mrb[18].mxu0  ;;  %v25355_v51 = vld [vmem:[#allocation111_spill] sm:$0xff] }
 0xeaf   :  { %15307 = vrot.lane.b32.xlu1 %v25345_v16, %s19359_s8  ;;  %v18476_v19 = vpop.f32.mrb[19].mxu0  ;;  %v25356_v52 = vld [vmem:[#allocation110_spill] sm:$0xff] }
 0xeb0   :  { %v14951_v60 = vpop.f32.mrb[52].mxu1  ;;  %v25357_v20 = vpack.c.bf16 %v25355_v51, %v25356_v52 }
 0xeb1   :  { %v15257_v8 = vpack.c.bf16 %v14951_v60, %v14903_v17  ;;  %v18469_v45 = vpop.f32.mrb[53].mxu1 }
 0xeb2   :  { %v14954_v34 = vpop.f32.mrb[54].mxu1  ;;  %v15416_v43 = vsel %vm1306_vm1, %v25357_v20, %v24153_v9  ;;  %v25358_v45 = vld [vmem:[#allocation115_spill] sm:$0xff] }
 0xeb3   :  { %v18470_v30 = vpop.f32.mrb[55].mxu1  ;;  %15397 = vrot.lane.b32.xlu0 %v15257_v8, %s19358_s4  ;;  %v15461_v1 = vsel %vm15453_vm4, %v15416_v43, %v24163_v28  ;;  %v25359_v34 = vld [vmem:[#allocation114_spill] sm:$0xff]  ;;  %v25376_v20 = vld [vmem:[#allocation131_spill] sm:$0xff]  ;;  %v25377_v43 = vld [vmem:[#allocation129_spill] sm:$0xff] }
 0xeb4   :  { %v25360_v30 = vpack.c.bf16 %v25358_v45, %v25359_v34  ;;  %v25380_v45 = vld [vmem:[#allocation132_spill] sm:$0xff] }
 0xeb6   :  { %v15422_v9 = vsel %vm1306_vm1, %v25360_v30, %v24169_v44 }
 0xeb7   :  { %15353 = vrot.lane.b32.xlu0 %v25348_v48, %s19348_s1  ;;  %v15465_v28 = vsel %vm15453_vm4, %v15422_v9, %v24175_v26 }
 0xeb8   :  { %v15047_v58 = vpop.f32.mrb[56].mxu1 }
 0xeb9   :  { %v15258_v47 = vpack.c.bf16 %v15047_v58, %v14999_v54  ;;  %v18481_v37 = vpop.f32.mrb[57].mxu1 }
 0xeba   :  { %v15050_v46 = vpop.f32.mrb[58].mxu1  ;;  %v25361_v37 = vld [vmem:[#allocation119_spill] sm:$0xff] }
 0xebb   :  { %v18482_v4 = vpop.f32.mrb[59].mxu1  ;;  %15399 = vrot.lane.b32.xlu1 %v15258_v47, %s19358_s4  ;;  %v25362_v46 = vld [vmem:[#allocation118_spill] sm:$0xff] }
 0xebc   :  { %v25363_v4 = vpack.c.bf16 %v25361_v37, %v25362_v46 }
 0xebd   :  { %v15095_v61 = vpop.f32.mrb[20].mxu0 }
 0xebe   :  { %v18487_v39 = vpop.f32.mrb[21].mxu0  ;;  %v15428_v44 = vsel %vm1306_vm1, %v25363_v4, %v24180_v15 }
 0xebf   :  { %15355 = vrot.lane.b32.xlu1 %v25351_v25, %s19348_s1  ;;  %v15098_v38 = vpop.f32.mrb[22].mxu0  ;;  %v15469_v26 = vsel %vm15453_vm4, %v15428_v44, %v24182_v50  ;;  %v25365_v25 = vld [vmem:[#allocation120_spill] sm:$0xff]  ;;  %v24356_v44 = vld [vmem:[#allocation10] ss:$0 sm:$0xff]  ;;  %s19360_s1 = smov [#allocation11]  }
 0xec0   :  { %v18488_v62 = vpop.f32.mrb[23].mxu0  ;;  %v15143_v11 = vpop.f32.mrb[60].mxu1  ;;  %s15868_s9 = sshll.u32 %s19360_s1, 4  ;;  %s15869_s9 = int_to_ptr.vmem [resolvable:$true] %s15868_s9 }
 0xec1   :  { %v15259_v18 = vpack.c.bf16 %v15143_v11, %v15095_v61  ;;  %v18493_v3 = vpop.f32.mrb[61].mxu1  ;;  %s19314_s10 = scalar_lea.vmem %s15869_s9, 4096  ;;  %p19319_p13 = scmp.lt.s32.totalorder %s15869_s9, %s15869_s9 }
 0xec2   :  { %v15146_v35 = vpop.f32.mrb[62].mxu1  ;;  %p19315_p12 = scmp.ne.s32.totalorder %s15869_s9, %s19314_s10  ;;  %p19320_p0 = scmp.lt.s32.totalorder %s19314_s10, %s19314_s10 }
 0xec3   :  { %v18494_v13 = vpop.f32.mrb[63].mxu1  ;;  %15401 = vrot.lane.b32.xlu0 %v15259_v18, %s19358_s4 }
 0xec4   :  { %p19321_p1 = por %p19320_p0, %p19319_p13 }
 0xec5   :  { %v15191_v14 = vpop.f32.mrb[24].mxu0 }
 0xec6   :  { %v18499_v5 = vpop.f32.mrb[25].mxu0  ;;  %p19322_p2 = pnand %p19321_p1, %p19315_p12 }
 0xec7   :  { %v15194_v24 = vpop.f32.mrb[26].mxu0  ;;  %v25368_v5 = vld [vmem:[#allocation124_spill] sm:$0xff] }
 0xec8   :  { %v18500_v2 = vpop.f32.mrb[27].mxu0  ;;  %v15239_v22 = vpop.f32.mrb[64].mxu1 }
 0xec9   :  { %v15260_v40 = vpack.c.bf16 %v15239_v22, %v15191_v14  ;;  %v18505_v59 = vpop.f32.mrb[65].mxu1  ;;  %v25367_v14 = vld [vmem:[#allocation125_spill] sm:$0xff] }
 0xeca   :  { %v15242_v17 = vpop.f32.mrb[66].mxu1  ;;  %v25369_v24 = vpack.c.bf16 %v25367_v14, %v25368_v5  ;;  %v15773_v5 = vld [vmem:[#allocation2 + $0x30] sm:$0xff] }
 0xecb   :  { %v18506_v7 = vpop.f32.mrb[67].mxu1  ;;  %15403 = vrot.lane.b32.xlu1 %v15260_v40, %s19358_s4  ;;  %v25370_v17 = vld [vmem:[#allocation127_spill] sm:$0xff] }
 0xecc   :  { %v25371_v7 = vld [vmem:[#allocation126_spill] sm:$0xff] }
 0xecd   :  { %v15376_v0 = vpop.permute.xlu1 %15375 }
 0xece   :  { %v15491_v49 = vsel %vm15486_vm5, %v15457_v29, %v15376_v0  ;;  %v25373_v0 = vld [vmem:[#allocation130_spill] sm:$0xff] }
 0xecf   :  { %18524 = vmatmul.mubr.bf16.vlgmr.msra.gmra.mrb[28].mxu0 %v15491_v49  ;;  %v25374_v49 = vld [vmem:[#allocation128_spill] sm:$0xff] }
 0xed1   :  { %v15344_v54 = vpop.permute.xlu1 %15343 }
 0xed2   :  { %v15473_v50 = vsel %vm15453_vm4, %v24188_v31, %v15344_v54  ;;  %v25372_v31 = vpack.c.bf16 %v25370_v17, %v25371_v7 }
 0xed5   :  { %v15378_v55 = vpop.permute.xlu0 %15377 }
 0xed6   :  { %v15494_v12 = vsel %vm15486_vm5, %v24151_v36, %v15378_v55 }
 0xed7   :  { %18527 = vmatprep.mubr.bf16.mxu0 %v15494_v12 }
 0xed9   :  { %v15298_v19 = vpop.permute.xlu0 %15297 }
 0xedd   :  { %v15380_v57 = vpop.permute.xlu1 %15379 }
 0xede   :  { %v15497_v16 = vsel %vm15486_vm5, %v15461_v1, %v15380_v57  ;;  %v25378_v1 = vpack.c.bf16 %v25376_v20, %v25377_v43 }
 0xedf   :  { %18528 = vmatmul.mubr.bf16.gmra.mrb[32].mxu0 %v15497_v16 }
 0xee1   :  { %v15300_v8 = vpop.permute.xlu1 %15299 }
 0xee2   :  { %v15440_v10 = vsel %vm1306_vm1, %v25372_v31, %v15300_v8  ;;  %v25379_v8 = vld [vmem:[#allocation133_spill] sm:$0xff] }
 0xee3   :  { %v25381_v34 = vpack.c.bf16 %v25379_v8, %v25380_v45  ;;  %v15781_v45 = vld [vmem:[#allocation2 + $0x70] sm:$0xff] }
 0xee5   :  { %v15382_v60 = vpop.permute.xlu0 %15381 }
 0xee6   :  { %v15500_v36 = vsel %vm15486_vm5, %v24167_v6, %v15382_v60 }
 0xee7   :  { %18531 = vmatprep.mubr.bf16.mxu0 %v15500_v36 }
 0xee9   :  { %v15346_v48 = vpop.permute.xlu0 %15345 }
 0xeed   :  { %v15384_v41 = vpop.permute.xlu1 %15383 }
 0xeee   :  { %v15503_v63 = vsel %vm15486_vm5, %v15465_v28, %v15384_v41 }
 0xeef   :  { %18532 = vmatmul.mubr.bf16.gmra.mrb[36].mxu0 %v15503_v63 }
 0xef1   :  { %v15348_v47 = vpop.permute.xlu1 %15347 }
 0xef2   :  { %v15477_v42 = vsel %vm15453_vm4, %v15440_v10, %v15348_v47  ;;  %v15772_v10 = vld [vmem:[#allocation2 + $0x28] sm:$0xff] }
 0xef5   :  { %v15386_v58 = vpop.permute.xlu0 %15385 }
 0xef6   :  { %v15506_v6 = vsel %vm15486_vm5, %v24178_v53, %v15386_v58  ;;  %v25366_v53 = vpack.c.bf16 %v25364_v23, %v25365_v25  ;;  %v25383_v58 = vld [vmem:[#allocation134_spill] sm:$0xff]  ;;  %v15767_v23 = vld [vmem:[#allocation2] sm:$0xff] }
 0xef7   :  { %18535 = vmatprep.mubr.bf16.mxu0 %v15506_v6 }
 0xef8   :  { %v15431_v38 = vsel %vm1306_vm1, %v25366_v53, %v24226_v32  ;;  %v15437_v32 = vsel %vm1306_vm1, %v25369_v24, %v15298_v19 }
 0xef9   :  { %v15302_v27 = vpop.permute.xlu0 %15301  ;;  %v15471_v62 = vsel %vm15453_vm4, %v15431_v38, %v15342_v33  ;;  %v15475_v2 = vsel %vm15453_vm4, %v15437_v32, %v15346_v48  ;;  %v25375_v33 = vpack.c.bf16 %v25373_v0, %v25374_v49  ;;  %v25382_v48 = vld [vmem:[#allocation135_spill] sm:$0xff]  ;;  %v15777_v49 = vld [vmem:[#allocation2 + $0x50] sm:$0xff] }
 0xefa   :  { %v25384_v6 = vpack.c.bf16 %v25382_v48, %v25383_v58  ;;  %v15770_v38 = vld [vmem:[#allocation2 + $0x18] sm:$0xff] }
 0xefb   :  { %v15443_v55 = vsel %vm1306_vm1, %v25375_v33, %v15302_v27 }
 0xefd   :  { %v15388_v61 = vpop.permute.xlu1 %15387 }
 0xefe   :  { %v15509_v39 = vsel %vm15486_vm5, %v15469_v26, %v15388_v61  ;;  %v15769_v61 = vld [vmem:[#allocation2 + $0x10] sm:$0xff] }
 0xeff   :  { %18536 = vmatmul.mubr.bf16.gmra.mrb[40].mxu0 %v15509_v39 }
 0xf01   :  { %v15304_v15 = vpop.permute.xlu1 %15303 }
 0xf02   :  { %v15446_v57 = vsel %vm1306_vm1, %v25378_v1, %v15304_v15  ;;  %v15768_v15 = vld [vmem:[#allocation2 + $0x8] sm:$0xff] }
 0xf05   :  { %v15390_v11 = vpop.permute.xlu0 %15389 }
 0xf06   :  { %v15512_v18 = vsel %vm15486_vm5, %v15471_v62, %v15390_v11 }
 0xf07   :  { %18539 = vmatprep.mubr.bf16.mxu0 %v15512_v18 }
 0xf09   :  { %v15350_v13 = vpop.permute.xlu0 %15349 }
 0xf0a   :  { %v15479_v12 = vsel %vm15453_vm4, %v15443_v55, %v15350_v13 }
 0xf0d   :  { %v15392_v3 = vpop.permute.xlu1 %15391 }
 0xf0e   :  { %v15515_v35 = vsel %vm15486_vm5, %v15473_v50, %v15392_v3 }
 0xf0f   :  { %18540 = vmatmul.mubr.bf16.gmra.mrb[44].mxu0 %v15515_v35 }
 0xf11   :  { %v15352_v59 = vpop.permute.xlu1 %15351 }
 0xf12   :  { %v15481_v16 = vsel %vm15453_vm4, %v15446_v57, %v15352_v59  ;;  %v15774_v59 = vld [vmem:[#allocation2 + $0x38] sm:$0xff]  ;;  %v15776_v57 = vld [vmem:[#allocation2 + $0x48] sm:$0xff] }
 0xf15   :  { %v15394_v22 = vpop.permute.xlu0 %15393 }
 0xf16   :  { %v15518_v40 = vsel %vm15486_vm5, %v15475_v2, %v15394_v22  ;;  %v15771_v2 = vld [vmem:[#allocation2 + $0x20] sm:$0xff] }
 0xf17   :  { %18543 = vmatprep.mubr.bf16.mxu0 %v15518_v40 }
 0xf19   :  { %v15306_v29 = vpop.permute.xlu0 %15305 }
 0xf1a   :  { %v15449_v30 = vsel %vm1306_vm1, %v25381_v34, %v15306_v29 }
 0xf1d   :  { %v15396_v21 = vpop.permute.xlu1 %15395 }
 0xf1e   :  { %v15521_v56 = vsel %vm15486_vm5, %v15477_v42, %v15396_v21 }
 0xf1f   :  { %18544 = vmatmul.mubr.bf16.gmra.mrb[48].mxu0 %v15521_v56 }
 0xf21   :  { %v15308_v52 = vpop.permute.xlu1 %15307 }
 0xf22   :  { %v15452_v47 = vsel %vm1306_vm1, %v25384_v6, %v15308_v52  ;;  %v15778_v52 = vld [vmem:[#allocation2 + $0x58] sm:$0xff] }
 0xf25   :  { %v15398_v54 = vpop.permute.xlu0 %15397 }
 0xf26   :  { %v15524_v51 = vsel %vm15486_vm5, %v15479_v12, %v15398_v54  ;;  %v15775_v12 = vld [vmem:[#allocation2 + $0x40] sm:$0xff] }
 0xf27   :  { %18547 = vmatprep.mubr.bf16.mxu0 %v15524_v51 }
 0xf29   :  { %v15354_v36 = vpop.permute.xlu0 %15353 }
 0xf2a   :  { %v15483_v9 = vsel %vm15453_vm4, %v15449_v30, %v15354_v36 }
 0xf2d   :  { %v15400_v19 = vpop.permute.xlu1 %15399 }
 0xf2e   :  { %v15527_v60 = vsel %vm15486_vm5, %v15481_v16, %v15400_v19 }
 0xf2f   :  { %18548 = vmatmul.mubr.bf16.gmra.mrb[52].mxu0 %v15527_v60 }
 0xf31   :  { %v15356_v63 = vpop.permute.xlu1 %15355 }
 0xf32   :  { %v15485_v37 = vsel %vm15453_vm4, %v15452_v47, %v15356_v63  ;;  %v15782_v63 = vld [vmem:[#allocation2 + $0x78] sm:$0xff]  ;;  %v15780_v47 = vld [vmem:[#allocation2 + $0x68] sm:$0xff] }
 0xf35   :  { %v15402_v28 = vpop.permute.xlu0 %15401 }
 0xf36   :  { %v15530_v41 = vsel %vm15486_vm5, %v15483_v9, %v15402_v28  ;;  %v15779_v9 = vld [vmem:[#allocation2 + $0x60] sm:$0xff] }
 0xf37   :  { %18551 = vmatprep.mubr.bf16.mxu0 %v15530_v41 }
 0xf3d   :  { %v15404_v46 = vpop.permute.xlu1 %15403 }
 0xf3e   :  { %v15533_v4 = vsel %vm15486_vm5, %v15485_v37, %v15404_v46 }
 0xf3f   :  { %18552 = vmatmul.mubr.bf16.gmra.mrb[56].mxu0 %v15533_v4 }
 0xfa2   :  { %v18525_v26 = vpop.f32.mrb[28].mxu0 }
 0xfa3   :  { %v15649_v39 = vadd.f32 %v18525_v26, %v24356_v44  ;;  %v15640_v27 = vpop.f32.mrb[29].mxu0 }
 0xfa4   :  { %v15641_v25 = vadd.f32 %v24356_v44, %v15640_v27  ;;  %v18526_v53 = vpop.f32.mrb[30].mxu0 }
 0xfa5   :  { %v15801_v62 = vadd.f32 %v15769_v61, %v15649_v39  ;;  %v15652_v11 = vadd.f32 %v18526_v53, %v24356_v44  ;;  %v15643_v18 = vpop.f32.mrb[31].mxu0  ;;  %v15785_v39 = vld [vmem:[#allocation2 + $0x90] sm:$0xff] }
 0xfa6   :  { %v15799_v50 = vadd.f32 %v15767_v23, %v15641_v25  ;;  %v15644_v3 = vadd.f32 %v24356_v44, %v15643_v18  ;;  %v15783_v25 = vld [vmem:[#allocation2 + $0x80] sm:$0xff] }
 0xfa7   :  { %15833 = vst [vmem:[#allocation11 + $0x10] sm:$0xff] %v15801_v62  ;;  %v15802_v35 = vadd.f32 %v15770_v38, %v15652_v11  ;;  %v15786_v62 = vld [vmem:[#allocation2 + $0x98] sm:$0xff] }
 0xfa8   :  { %15831 = vst [vmem:[#allocation11] sm:$0xff] %v15799_v50  ;;  %v15800_v13 = vadd.f32 %v15768_v15, %v15644_v3  ;;  %v15784_v50 = vld [vmem:[#allocation2 + $0x88] sm:$0xff] }
 0xfa9   :  { %15834 = vst [vmem:[#allocation11 + $0x18] sm:$0xff] %v15802_v35 }
 0xfaa   :  { %15832 = vst [vmem:[#allocation11 + $0x8] sm:$0xff] %v15800_v13 }
 0xfb2   :  { %v18529_v14 = vpop.f32.mrb[32].mxu0 }
 0xfb3   :  { %v15665_v24 = vadd.f32 %v18529_v14, %v24356_v44  ;;  %v15656_v32 = vpop.f32.mrb[33].mxu0 }
 0xfb4   :  { %v15657_v22 = vadd.f32 %v24356_v44, %v15656_v32  ;;  %v18530_v40 = vpop.f32.mrb[34].mxu0 }
 0xfb5   :  { %v15805_v17 = vadd.f32 %v15773_v5, %v15665_v24  ;;  %v15668_v7 = vadd.f32 %v18530_v40, %v24356_v44  ;;  %v15659_v31 = vpop.f32.mrb[35].mxu0  ;;  %v15789_v24 = vld [vmem:[#allocation2 + $0xb0] sm:$0xff] }
 0xfb6   :  { %v15803_v42 = vadd.f32 %v15771_v2, %v15657_v22  ;;  %v15660_v21 = vadd.f32 %v24356_v44, %v15659_v31  ;;  %v15787_v22 = vld [vmem:[#allocation2 + $0xa0] sm:$0xff] }
 0xfb7   :  { %15837 = vst [vmem:[#allocation11 + $0x30] sm:$0xff] %v15805_v17  ;;  %v15806_v56 = vadd.f32 %v15774_v59, %v15668_v7  ;;  %v15790_v17 = vld [vmem:[#allocation2 + $0xb8] sm:$0xff] }
 0xfb8   :  { %15835 = vst [vmem:[#allocation11 + $0x20] sm:$0xff] %v15803_v42  ;;  %v15804_v29 = vadd.f32 %v15772_v10, %v15660_v21  ;;  %v15788_v42 = vld [vmem:[#allocation2 + $0xa8] sm:$0xff] }
 0xfb9   :  { %15838 = vst [vmem:[#allocation11 + $0x38] sm:$0xff] %v15806_v56 }
 0xfba   :  { %15836 = vst [vmem:[#allocation11 + $0x28] sm:$0xff] %v15804_v29 }
 0xfc2   :  { %v18533_v0 = vpop.f32.mrb[36].mxu0 }
 0xfc3   :  { %v15681_v33 = vadd.f32 %v18533_v0, %v24356_v44  ;;  %v15672_v55 = vpop.f32.mrb[37].mxu0 }
 0xfc4   :  { %v15673_v54 = vadd.f32 %v24356_v44, %v15672_v55  ;;  %v18534_v51 = vpop.f32.mrb[38].mxu0 }
 0xfc5   :  { %v15809_v20 = vadd.f32 %v15777_v49, %v15681_v33  ;;  %v15684_v43 = vadd.f32 %v18534_v51, %v24356_v44  ;;  %v15675_v1 = vpop.f32.mrb[39].mxu0  ;;  %v15793_v33 = vld [vmem:[#allocation2 + $0xd0] sm:$0xff] }
 0xfc6   :  { %v15807_v16 = vadd.f32 %v15775_v12, %v15673_v54  ;;  %v15676_v19 = vadd.f32 %v24356_v44, %v15675_v1  ;;  %v15791_v54 = vld [vmem:[#allocation2 + $0xc0] sm:$0xff] }
 0xfc7   :  { %15841 = vst [vmem:[#allocation11 + $0x50] sm:$0xff] %v15809_v20  ;;  %v15810_v60 = vadd.f32 %v15778_v52, %v15684_v43  ;;  %v15794_v20 = vld [vmem:[#allocation2 + $0xd8] sm:$0xff] }
 0xfc8   :  { %15839 = vst [vmem:[#allocation11 + $0x40] sm:$0xff] %v15807_v16  ;;  %v15808_v36 = vadd.f32 %v15776_v57, %v15676_v19  ;;  %v15792_v16 = vld [vmem:[#allocation2 + $0xc8] sm:$0xff] }
 0xfc9   :  { %15842 = vst [vmem:[#allocation11 + $0x58] sm:$0xff] %v15810_v60 }
 0xfca   :  { %15840 = vst [vmem:[#allocation11 + $0x48] sm:$0xff] %v15808_v36 }
 0xfd2   :  { %v18537_v8 = vpop.f32.mrb[40].mxu0 }
 0xfd3   :  { %v15697_v34 = vadd.f32 %v18537_v8, %v24356_v44  ;;  %v15688_v30 = vpop.f32.mrb[41].mxu0 }
 0xfd4   :  { %v15689_v28 = vadd.f32 %v24356_v44, %v15688_v30  ;;  %v18538_v41 = vpop.f32.mrb[42].mxu0 }
 0xfd5   :  { %v15813_v48 = vadd.f32 %v15781_v45, %v15697_v34  ;;  %v15700_v58 = vadd.f32 %v18538_v41, %v24356_v44  ;;  %v15691_v6 = vpop.f32.mrb[43].mxu0  ;;  %v15797_v34 = vld [vmem:[#allocation2 + $0xf0] sm:$0xff] }
 0xfd6   :  { %v15811_v37 = vadd.f32 %v15779_v9, %v15689_v28  ;;  %v15692_v46 = vadd.f32 %v24356_v44, %v15691_v6  ;;  %v15795_v28 = vld [vmem:[#allocation2 + $0xe0] sm:$0xff] }
 0xfd7   :  { %15845 = vst [vmem:[#allocation11 + $0x70] sm:$0xff] %v15813_v48  ;;  %v15814_v4 = vadd.f32 %v15782_v63, %v15700_v58  ;;  %v15798_v48 = vld [vmem:[#allocation2 + $0xf8] sm:$0xff] }
 0xfd8   :  { %15843 = vst [vmem:[#allocation11 + $0x60] sm:$0xff] %v15811_v37  ;;  %v15812_v26 = vadd.f32 %v15780_v47, %v15692_v46  ;;  %v15796_v37 = vld [vmem:[#allocation2 + $0xe8] sm:$0xff] }
 0xfd9   :  { %15846 = vst [vmem:[#allocation11 + $0x78] sm:$0xff] %v15814_v4 }
 0xfda   :  { %15844 = vst [vmem:[#allocation11 + $0x68] sm:$0xff] %v15812_v26 }
 0xfe2   :  { %v18541_v61 = vpop.f32.mrb[44].mxu0 }
 0xfe3   :  { %v15713_v27 = vadd.f32 %v18541_v61, %v24356_v44  ;;  %v15704_v23 = vpop.f32.mrb[45].mxu0 }
 0xfe4   :  { %v15705_v53 = vadd.f32 %v24356_v44, %v15704_v23  ;;  %v18542_v38 = vpop.f32.mrb[46].mxu0 }
 0xfe5   :  { %v15817_v11 = vadd.f32 %v15785_v39, %v15713_v27  ;;  %v15716_v18 = vadd.f32 %v18542_v38, %v24356_v44  ;;  %v15707_v15 = vpop.f32.mrb[47].mxu0 }
 0xfe6   :  { %v15815_v3 = vadd.f32 %v15783_v25, %v15705_v53  ;;  %v15708_v35 = vadd.f32 %v24356_v44, %v15707_v15 }
 0xfe7   :  { %15849 = vst [vmem:[#allocation11 + $0x90] sm:$0xff] %v15817_v11  ;;  %v15818_v13 = vadd.f32 %v15786_v62, %v15716_v18 }
 0xfe8   :  { %15847 = vst [vmem:[#allocation11 + $0x80] sm:$0xff] %v15815_v3  ;;  %v15816_v14 = vadd.f32 %v15784_v50, %v15708_v35 }
 0xfe9   :  { %15850 = vst [vmem:[#allocation11 + $0x98] sm:$0xff] %v15818_v13 }
 0xfea   :  { %15848 = vst [vmem:[#allocation11 + $0x88] sm:$0xff] %v15816_v14 }
 0xff2   :  { %v18545_v5 = vpop.f32.mrb[48].mxu0 }
 0xff3   :  { %v15729_v32 = vadd.f32 %v18545_v5, %v24356_v44  ;;  %v15720_v2 = vpop.f32.mrb[49].mxu0 }
 0xff4   :  { %v15721_v40 = vadd.f32 %v24356_v44, %v15720_v2  ;;  %v18546_v59 = vpop.f32.mrb[50].mxu0 }
 0xff5   :  { %v15821_v7 = vadd.f32 %v15789_v24, %v15729_v32  ;;  %v15732_v31 = vadd.f32 %v18546_v59, %v24356_v44  ;;  %v15723_v10 = vpop.f32.mrb[51].mxu0 }
 0xff6   :  { %v15819_v21 = vadd.f32 %v15787_v22, %v15721_v40  ;;  %v15724_v56 = vadd.f32 %v24356_v44, %v15723_v10 }
 0xff7   :  { %15853 = vst [vmem:[#allocation11 + $0xb0] sm:$0xff] %v15821_v7  ;;  %v15822_v29 = vadd.f32 %v15790_v17, %v15732_v31 }
 0xff8   :  { %15851 = vst [vmem:[#allocation11 + $0xa0] sm:$0xff] %v15819_v21  ;;  %v15820_v0 = vadd.f32 %v15788_v42, %v15724_v56 }
 0xff9   :  { %15854 = vst [vmem:[#allocation11 + $0xb8] sm:$0xff] %v15822_v29 }
 0xffa   :  { %15852 = vst [vmem:[#allocation11 + $0xa8] sm:$0xff] %v15820_v0 }
0x1002   :  { %v18549_v49 = vpop.f32.mrb[52].mxu0 }
0x1003   :  { %v15745_v55 = vadd.f32 %v18549_v49, %v24356_v44  ;;  %v15736_v12 = vpop.f32.mrb[53].mxu0 }
0x1004   :  { %v15737_v51 = vadd.f32 %v24356_v44, %v15736_v12  ;;  %v18550_v52 = vpop.f32.mrb[54].mxu0 }
0x1005   :  { %v15825_v43 = vadd.f32 %v15793_v33, %v15745_v55  ;;  %v15748_v1 = vadd.f32 %v18550_v52, %v24356_v44  ;;  %v15739_v57 = vpop.f32.mrb[55].mxu0 }
0x1006   :  { %v15823_v19 = vadd.f32 %v15791_v54, %v15737_v51  ;;  %v15740_v60 = vadd.f32 %v24356_v44, %v15739_v57 }
0x1007   :  { %15857 = vst [vmem:[#allocation11 + $0xd0] sm:$0xff] %v15825_v43  ;;  %v15826_v36 = vadd.f32 %v15794_v20, %v15748_v1 }
0x1008   :  { %15855 = vst [vmem:[#allocation11 + $0xc0] sm:$0xff] %v15823_v19  ;;  %v15824_v8 = vadd.f32 %v15792_v16, %v15740_v60 }
0x1009   :  { %15858 = vst [vmem:[#allocation11 + $0xd8] sm:$0xff] %v15826_v36 }
0x100a   :  { %15856 = vst [vmem:[#allocation11 + $0xc8] sm:$0xff] %v15824_v8 }
0x1012   :  { %v18553_v45 = vpop.f32.mrb[56].mxu0 }
0x1013   :  { %v15761_v30 = vadd.f32 %v18553_v45, %v24356_v44  ;;  %v15752_v9 = vpop.f32.mrb[57].mxu0 }
0x1014   :  { %v15753_v41 = vadd.f32 %v24356_v44, %v15752_v9  ;;  %v18554_v63 = vpop.f32.mrb[58].mxu0 }
0x1015   :  { %v15829_v58 = vadd.f32 %v15797_v34, %v15761_v30  ;;  %v15764_v6 = vadd.f32 %v18554_v63, %v24356_v44  ;;  %v15755_v47 = vpop.f32.mrb[59].mxu0 }
0x1016   :  { %v15827_v46 = vadd.f32 %v15795_v28, %v15753_v41  ;;  %v15756_v4 = vadd.f32 %v24356_v44, %v15755_v47 }
0x1017   :  { %15861 = vst [vmem:[#allocation11 + $0xf0] sm:$0xff] %v15829_v58  ;;  %v15830_v26 = vadd.f32 %v15798_v48, %v15764_v6 }
0x1018   :  { %15859 = vst [vmem:[#allocation11 + $0xe0] sm:$0xff] %v15827_v46  ;;  %v15828_v61 = vadd.f32 %v15796_v37, %v15756_v4 }
0x1019   :  { %15862 = vst [vmem:[#allocation11 + $0xf8] sm:$0xff] %v15830_v26 }
0x101a   :  { %15860 = vst [vmem:[#allocation11 + $0xe8] sm:$0xff] %v15828_v61 }
0x101b   :  { %19325 = shalt.err (!%p19322_p2)
}
0x101c   :  { %s19326_s13 = scalar_lea.hbm %s24410_s5, 4096 }
0x101d   :  { %p19327_p3 = scmp.ne.s32.totalorder %s24410_s5, %s19326_s13  ;;  %p19330_p4 = scmp.lt.u32.totalorder %s19326_s13, %s24410_s5 }
0x101f   :  { %p19332_p5 = pnand %p19330_p4, %p19327_p3 }
0x1021   :  { %19335 = shalt.err (!%p19332_p5)
}
0x1022   :  { %15874 = dma.vmem_to_hbm [thread:$0]  %s15869_s9, 4096, %s24410_s5, [#allocation4], %s19351_s3, %s19351_s3, %s19352_s30  }
0x1023   :  { %19342 = dma.done.wait [#allocation4], 4096  }
0x1024   :  { %19343 = vsyncadd [#allocation4], 4294963200 }
0x1025   :  { %15878 = vsyncpa [#allocation3], 1 }
0x1026   :  { %15879 = vsyncpa [#allocation6], 1 }
0x1027   :  { %15880 = vsyncpa [#allocation9], 1 }
0x1028   :  { %15881 = vsyncpa [#allocation4], 1 }

</bundles_post_ra>
